<compile_context>
chip_gen: v7x
topology: tpu7x:2x2x1
jax: 0.10.0
libtpu: 0.0.40
codegen_flags: <defaults>
</compile_context>

<pallas_src>
import functools

import jax
import jax.numpy as jnp
from jax import lax
from jax.experimental import pallas as pl
from jax.experimental.pallas import tpu as pltpu

_VMEM_LIMIT = 32 * 1024 * 1024


def _batch_tile(batch):
    for t in (8, 4, 2, 1):
        if batch % t == 0:
            return t
    return 1


# ----------------------------------------------------------------------------
# Shared in-kernel epilogue: 2x2 max-pool + bias + ReLU + per-channel scale.
# ----------------------------------------------------------------------------
def _pool_bias_relu_scale(acc_ref, b_ref, s_ref, o_ref, *, tb, h, w, c):
    """acc_ref holds conv outputs as (tb*h*w, c) rows in (b, y, x) order."""
    n = tb * h * w
    ho, wo = h // 2, w // 2
    # Pool along W: adjacent row pairs (x even / x odd) via strided VMEM reads.
    even = acc_ref[pl.ds(0, n // 2, stride=2), :]
    odd = acc_ref[pl.ds(1, n // 2, stride=2), :]
    wp = jnp.maximum(even, odd)                        # (tb*h*wo, c)
    # Pool along H: partner rows are wo apart -> pure leading-dim slab max.
    wp = wp.reshape(tb * ho, 2, wo, c)
    hp = jnp.maximum(wp[:, 0], wp[:, 1])               # (tb*ho, wo, c)
    y = jnp.maximum(hp + b_ref[...], 0.0) * s_ref[...]
    o_ref[...] = y.reshape(tb, ho, wo, c).astype(o_ref.dtype)


# ----------------------------------------------------------------------------
# conv1: im2col matmul + fused pool/ReLU (single K step, batch-tiled grid)
# ----------------------------------------------------------------------------
def _matmul_pool_kernel(x_ref, w_ref, b_ref, s_ref, o_ref, acc_ref,
                        *, tb, h, w, c):
    # Single K step: write the matmul straight into the f32 scratch (kept only
    # so the pooling epilogue can do strided reads from it).
    acc_ref[...] = jnp.dot(x_ref[...], w_ref[...],
                           preferred_element_type=jnp.float32)
    _pool_bias_relu_scale(acc_ref, b_ref, s_ref, o_ref, tb=tb, h=h, w=w, c=c)


def conv1_matmul_pool(cols, w_mat, b, s, *, batch, tb):
    """cols: (batch*32*32, 32) bf16 im2col.  Returns (batch,16,16,128) bf16."""
    h = ws = 32
    k = cols.shape[1]
    c = w_mat.shape[1]
    m_blk = tb * h * ws
    kern = functools.partial(_matmul_pool_kernel, tb=tb, h=h, w=ws, c=c)
    return pl.pallas_call(
        kern,
        out_shape=jax.ShapeDtypeStruct((batch, h // 2, ws // 2, c),
                                       jnp.bfloat16),
        grid_spec=pltpu.PrefetchScalarGridSpec(
            num_scalar_prefetch=0,
            grid=(batch // tb,),
            in_specs=[
                pl.BlockSpec((m_blk, k), lambda i: (i, 0)),
                pl.BlockSpec((k, c), lambda i: (0, 0)),
                pl.BlockSpec((1, c), lambda i: (0, 0)),
                pl.BlockSpec((1, c), lambda i: (0, 0)),
            ],
            out_specs=pl.BlockSpec((tb, h // 2, ws // 2, c),
                                   lambda i: (i, 0, 0, 0)),
            scratch_shapes=[pltpu.VMEM((m_blk, c), jnp.float32)],
        ),
        compiler_params=pltpu.CompilerParams(
            dimension_semantics=("parallel",),
            vmem_limit_bytes=_VMEM_LIMIT),
    )(cols, w_mat, b, s)


# ----------------------------------------------------------------------------
# conv2: fused 9-tap conv (no HBM im2col) + pool/ReLU/HAT-mask, batch-tiled
# ----------------------------------------------------------------------------
def _conv3x3_pool_kernel(x_ref, w_ref, b_ref, s_ref, o_ref, acc_ref,
                         *, tb, h, w, cin, cout):
    # x_ref: (tb, h+2, w+2, cin) padded NHWC activation tile (bf16).
    # w_ref: (9, cin, cout) bf16 taps.  Accumulate 9 shifted matmuls in f32.
    for t in range(9):
        dy, dx = t // 3, t % 3
        xs = x_ref[:, dy:dy + h, dx:dx + w, :].reshape(tb * h * w, cin)
        contrib = jnp.dot(xs, w_ref[t], preferred_element_type=jnp.float32)
        if t == 0:
            acc_ref[...] = contrib
        else:
            acc_ref[...] += contrib
    _pool_bias_relu_scale(acc_ref, b_ref, s_ref, o_ref,
                          tb=tb, h=h, w=w, c=cout)


def conv2_fused_pool(x_pad, w_taps, b, s, *, batch, tb):
    """x_pad: (batch, 18, 18, 128) bf16.  Returns (batch, 8, 8, 128) bf16."""
    h = w = 16
    cin = x_pad.shape[-1]
    cout = w_taps.shape[-1]
    kern = functools.partial(_conv3x3_pool_kernel, tb=tb, h=h, w=w,
                             cin=cin, cout=cout)
    return pl.pallas_call(
        kern,
        out_shape=jax.ShapeDtypeStruct((batch, h // 2, w // 2, cout),
                                       jnp.bfloat16),
        grid_spec=pltpu.PrefetchScalarGridSpec(
            num_scalar_prefetch=0,
            grid=(batch // tb,),
            in_specs=[
                pl.BlockSpec((tb, h + 2, w + 2, cin), lambda i: (i, 0, 0, 0)),
                pl.BlockSpec((9, cin, cout), lambda i: (0, 0, 0)),
                pl.BlockSpec((1, cout), lambda i: (0, 0)),
                pl.BlockSpec((1, cout), lambda i: (0, 0)),
            ],
            out_specs=pl.BlockSpec((tb, h // 2, w // 2, cout),
                                   lambda i: (i, 0, 0, 0)),
            scratch_shapes=[pltpu.VMEM((tb * h * w, cout), jnp.float32)],
        ),
        compiler_params=pltpu.CompilerParams(
            dimension_semantics=("parallel",),
            vmem_limit_bytes=_VMEM_LIMIT),
    )(x_pad, w_taps, b, s)


# ----------------------------------------------------------------------------
# fc1 (+ReLU) and fc2 fused in one kernel; K-tiled weight streaming for fc1.
# ----------------------------------------------------------------------------
def _fc_fused_kernel(x_ref, w1_ref, b1_ref, w2_ref, b2_ref, o_ref, acc_ref):
    k = pl.program_id(0)

    @pl.when(k == 0)
    def _():
        acc_ref[...] = jnp.zeros_like(acc_ref)

    acc_ref[...] += jnp.dot(x_ref[...], w1_ref[...],
                            preferred_element_type=jnp.float32)

    @pl.when(k == pl.num_programs(0) - 1)
    def _():
        hidden = jnp.maximum(acc_ref[...] + b1_ref[...], 0.0)
        logits = jnp.dot(hidden.astype(w2_ref.dtype), w2_ref[...],
                         preferred_element_type=jnp.float32) + b2_ref[...]
        o_ref[...] = logits.astype(o_ref.dtype)


def fc_fused(x, w1, b1, w2, b2, *, tk=2048):
    m, k_total = x.shape
    n1 = w1.shape[1]
    n2 = w2.shape[1]
    tk = min(tk, k_total)
    while k_total % tk:
        tk //= 2
    return pl.pallas_call(
        _fc_fused_kernel,
        out_shape=jax.ShapeDtypeStruct((m, n2), jnp.float32),
        grid_spec=pltpu.PrefetchScalarGridSpec(
            num_scalar_prefetch=0,
            grid=(k_total // tk,),
            in_specs=[
                pl.BlockSpec((m, tk), lambda j: (0, j)),
                pl.BlockSpec((tk, n1), lambda j: (j, 0)),
                pl.BlockSpec((1, n1), lambda j: (0, 0)),
                pl.BlockSpec((n1, n2), lambda j: (0, 0)),
                pl.BlockSpec((1, n2), lambda j: (0, 0)),
            ],
            out_specs=pl.BlockSpec((m, n2), lambda j: (0, 0)),
            scratch_shapes=[pltpu.VMEM((m, n1), jnp.float32)],
        ),
        compiler_params=pltpu.CompilerParams(
            dimension_semantics=("arbitrary",),
            vmem_limit_bytes=_VMEM_LIMIT),
    )(x, w1, b1, w2, b2)


# ----------------------------------------------------------------------------
# Parameters (torch layout) + one-time conversion to the kernel layout.
# ----------------------------------------------------------------------------
def init_params(num_tasks, key):
    """Parameters in the PyTorch HAT_CNN layout (float32)."""
    ks = jax.random.split(key, 8)
    s = 0.05
    return {
        "conv1_w": s * jax.random.normal(ks[0], (64, 3, 3, 3), jnp.float32),
        "conv1_b": s * jax.random.normal(ks[1], (64,), jnp.float32),
        "conv2_w": s * jax.random.normal(ks[2], (128, 64, 3, 3), jnp.float32),
        "conv2_b": s * jax.random.normal(ks[3], (128,), jnp.float32),
        "fc1_w": s * jax.random.normal(ks[4], (256, 128 * 8 * 8), jnp.float32),
        "fc1_b": s * jax.random.normal(ks[5], (256,), jnp.float32),
        "fc2_w": s * jax.random.normal(ks[6], (10, 256), jnp.float32),
        "fc2_b": s * jax.random.normal(ks[7], (10,), jnp.float32),
        "masks": jnp.ones((num_tasks, 128), jnp.float32),   # HAT embeddings
    }


def prepare_params(p):
    """One-time conversion: transpose / permute / zero-pad / cast to bf16."""
    # conv1: (64,3,3,3) -> im2col weight (27,64); pad K 27->32, Cout 64->128.
    w1 = jnp.transpose(p["conv1_w"], (2, 3, 1, 0)).reshape(27, 64)
    w1 = jnp.pad(w1, ((0, 5), (0, 64)))
    b1 = jnp.pad(p["conv1_b"], (0, 64)).reshape(1, 128)
    # conv2: (128,64,3,3) -> (9, Cin, Cout); pad Cin 64->128 with zeros.
    w2 = jnp.transpose(p["conv2_w"], (2, 3, 1, 0)).reshape(9, 64, 128)
    w2 = jnp.pad(w2, ((0, 0), (0, 64), (0, 0)))
    b2 = p["conv2_b"].reshape(1, 128)
    # fc1: permute the 8192 inputs from torch (c,h,w) order to NHWC (h,w,c)
    # flatten order and store as (K, N) -- no transpose in the forward pass.
    fc1 = p["fc1_w"].reshape(256, 128, 8, 8)
    fc1 = jnp.transpose(fc1, (2, 3, 1, 0)).reshape(8 * 8 * 128, 256)
    fc2 = jnp.transpose(p["fc2_w"], (1, 0))                # (256, 10)
    return {
        "conv1_w": w1.astype(jnp.bfloat16),
        "conv1_b": b1.astype(jnp.float32),
        "conv1_s": jnp.ones((1, 128), jnp.float32),
        "conv2_w": w2.astype(jnp.bfloat16),
        "conv2_b": b2.astype(jnp.float32),
        "fc1_w": fc1.astype(jnp.bfloat16),
        "fc1_b": p["fc1_b"].reshape(1, 256).astype(jnp.float32),
        "fc2_w": fc2.astype(jnp.bfloat16),
        "fc2_b": p["fc2_b"].reshape(1, 10).astype(jnp.float32),
        "masks": p["masks"].astype(jnp.float32),
    }


# ----------------------------------------------------------------------------
# Full forward pass (matches HAT_CNN.forward(x, task_id), x: (B,3,32,32) f32).
# ----------------------------------------------------------------------------
def hat_cnn_forward(params, x_nchw, task_id):
    batch = x_nchw.shape[0]
    tb = _batch_tile(batch)

    # NCHW -> NHWC, bf16 for the MXU.
    x = jnp.transpose(x_nchw, (0, 2, 3, 1)).astype(jnp.bfloat16)

    # conv1 im2col (cheap: only 3 input channels); column order (dy, dx, cin)
    # matches the weight layout; K zero-padded 27 -> 32.
    xp = jnp.pad(x, ((0, 0), (1, 1), (1, 1), (0, 0)))
    cols = jnp.concatenate(
        [xp[:, dy:dy + 32, dx:dx + 32, :]
         for dy in range(3) for dx in range(3)],
        axis=-1).reshape(batch * 32 * 32, 27)
    cols = jnp.pad(cols, ((0, 0), (0, 5)))

    # conv1 -> fused maxpool/ReLU: (B,16,16,128) bf16 (top 64 channels are 0).
    y1 = conv1_matmul_pool(cols, params["conv1_w"], params["conv1_b"],
                           params["conv1_s"], batch=batch, tb=tb)

    # conv2 (fused in-VMEM taps) -> maxpool/ReLU -> HAT sigmoid mask.
    # TODO(synk): the spatial halo pad + HAT sigmoid/gather stay as tiny XLA
    # glue ops; fusing them into the conv kernels saves <1% HBM traffic.
    y1p = jnp.pad(y1, ((0, 0), (1, 1), (1, 1), (0, 0)))
    mask = jax.nn.sigmoid(params["masks"][task_id]).reshape(1, 128)
    y2 = conv2_fused_pool(y1p, params["conv2_w"], params["conv2_b"],
                          mask.astype(jnp.float32), batch=batch, tb=tb)

    # Flatten in NHWC order (fc1 weight rows were permuted to match) + fc1/fc2.
    feat = y2.reshape(batch, 8 * 8 * 128)
    return fc_fused(feat, params["fc1_w"], params["fc1_b"],
                    params["fc2_w"], params["fc2_b"])


# ----------------------------------------------------------------------------
# Pure-JAX float32 reference (exact PyTorch op order) for validation.
# ----------------------------------------------------------------------------
def reference_forward(p, x_nchw, task_id):
    def pool2(t):
        b, c, h, w = t.shape
        return t.reshape(b, c, h // 2, 2, w // 2, 2).max(axis=(3, 5))

    dn = ("NCHW", "OIHW", "NCHW")
    mask = jax.nn.sigmoid(p["masks"][task_id])
    y = lax.conv_general_dilated(x_nchw, p["conv1_w"], (1, 1), "SAME",
                                 dimension_numbers=dn)
    y = jax.nn.relu(pool2(y + p["conv1_b"][None, :, None, None]))
    y = lax.conv_general_dilated(y, p["conv2_w"], (1, 1), "SAME",
                                 dimension_numbers=dn)
    y = jax.nn.relu(pool2(y + p["conv2_b"][None, :, None, None]))
    y = y * mask[None, :, None, None]
    feat = y.reshape(y.shape[0], -1)                       # torch (c,h,w) order
    hidden = jax.nn.relu(feat @ p["fc1_w"].T + p["fc1_b"])
    return hidden @ p["fc2_w"].T + p["fc2_b"]


# ----------------------------------------------------------------------------
if __name__ == "__main__":
    num_tasks = 3
    key = jax.random.PRNGKey(0)
    k_param, k_x = jax.random.split(key)

    torch_layout_params = init_params(num_tasks, k_param)
    params = prepare_params(torch_layout_params)

    # fc1 = Linear(128*8*8, 256) forces 32x32 inputs (two 2x2 pools: 32->16->8).
    x = jax.random.normal(k_x, (2, 3, 32, 32), jnp.float32)   # NCHW like torch

    fwd = jax.jit(hat_cnn_forward)
    logits = fwd(params, x, jnp.int32(1))
    jax.block_until_ready(logits)
    assert logits.shape == (2, 10) and logits.dtype == jnp.float32

    # Validate against the float32 XLA reference (bf16 MXU tolerance).
    ref = reference_forward(torch_layout_params, x, 1)
    err = float(jnp.max(jnp.abs(logits - ref)))
    assert err < 1e-1, f"max abs err vs reference: {err}"

    print("KERNEL_OK")
</pallas_src>

<mosaic_0001>
module attributes {stable_mosaic.version = 11 : i64} {
  func.func @_matmul_pool_kernel(%arg0: i32, %arg1: memref<2048x32xbf16, #tpu.memory_space<vmem>>, %arg2: memref<32x128xbf16, #tpu.memory_space<vmem>>, %arg3: memref<1x128xf32, #tpu.memory_space<vmem>>, %arg4: memref<1x128xf32, #tpu.memory_space<vmem>>, %arg5: memref<2x16x16x128xbf16, #tpu.memory_space<vmem>>, %arg6: memref<2048x128xf32, #tpu.memory_space<vmem>>) attributes {dimension_semantics = [#tpu.dimension_semantics<parallel>], iteration_bounds = array<i64: 1>, scalar_prefetch = 0 : i64, scratch_operands = 1 : i64, tpu.core_type = #tpu.core_type<tc>, window_params = [{transform_indices = @transform_0, window_bounds = array<i64: 2048, 32>}, {pipeline_mode = #tpu.pipeline_mode<synchronous>, transform_indices = @transform_1, window_bounds = array<i64: 32, 128>}, {pipeline_mode = #tpu.pipeline_mode<synchronous>, transform_indices = @transform_2, window_bounds = array<i64: 1, 128>}, {pipeline_mode = #tpu.pipeline_mode<synchronous>, transform_indices = @transform_3, window_bounds = array<i64: 1, 128>}, {transform_indices = @transform_4, window_bounds = array<i64: 2, 16, 16, 128>}]} {
    %c0 = arith.constant 0 : index
    %c0_0 = arith.constant 0 : index
    %0 = vector.load %arg1[%c0, %c0_0] : memref<2048x32xbf16, #tpu.memory_space<vmem>>, vector<2048x32xbf16>
    %c0_1 = arith.constant 0 : index
    %c0_2 = arith.constant 0 : index
    %1 = vector.load %arg2[%c0_1, %c0_2] : memref<32x128xbf16, #tpu.memory_space<vmem>>, vector<32x128xbf16>
    %cst = arith.constant dense<0.000000e+00> : vector<2048x128xf32>
    %2 = tpu.matmul %0, %1, %cst {dimension_numbers = #tpu.dot_dimension_numbers<[1], [0], [0], [1], [0, 0, 1, 1], [], []>} : vector<2048x32xbf16>, vector<32x128xbf16>, vector<2048x128xf32> -> vector<2048x128xf32>
    %c0_3 = arith.constant 0 : index
    %c0_4 = arith.constant 0 : index
    %3 = vector.load %arg6[%c0_3, %c0_4] : memref<2048x128xf32, #tpu.memory_space<vmem>>, vector<2048x128xf32>
    tpu.vector_store %arg6[%c0_3, %c0_4], %2 {strides = array<i32>} : memref<2048x128xf32, #tpu.memory_space<vmem>>, vector<2048x128xf32>,
    %c0_5 = arith.constant 0 : index
    %c0_6 = arith.constant 0 : index
    %4 = tpu.strided_load %arg6[%c0_5, %c0_6] {strides = array<i32: 2, 1>} : memref<2048x128xf32, #tpu.memory_space<vmem>>, vector<1024x128xf32>
    %c1 = arith.constant 1 : index
    %c0_7 = arith.constant 0 : index
    %5 = tpu.strided_load %arg6[%c1, %c0_7] {strides = array<i32: 2, 1>} : memref<2048x128xf32, #tpu.memory_space<vmem>>, vector<1024x128xf32>
    %6 = arith.maximumf %4, %5 : vector<1024x128xf32>
    %7 = vector.shape_cast %6 : vector<1024x128xf32> to vector<32x2x16x128xf32>
    %8 = vector.extract_strided_slice %7 {offsets = [0, 0, 0, 0], sizes = [32, 1, 16, 128], strides = [1, 1, 1, 1]} : vector<32x2x16x128xf32> to vector<32x1x16x128xf32>
    %9 = vector.shape_cast %8 : vector<32x1x16x128xf32> to vector<32x16x128xf32>
    %10 = vector.extract_strided_slice %7 {offsets = [0, 1, 0, 0], sizes = [32, 1, 16, 128], strides = [1, 1, 1, 1]} : vector<32x2x16x128xf32> to vector<32x1x16x128xf32>
    %11 = vector.shape_cast %10 : vector<32x1x16x128xf32> to vector<32x16x128xf32>
    %12 = arith.maximumf %9, %11 : vector<32x16x128xf32>
    %c0_8 = arith.constant 0 : index
    %c0_9 = arith.constant 0 : index
    %13 = vector.load %arg3[%c0_8, %c0_9] : memref<1x128xf32, #tpu.memory_space<vmem>>, vector<1x128xf32>
    %14 = vector.shape_cast %13 : vector<1x128xf32> to vector<1x1x128xf32>
    %15 = vector.broadcast %14 : vector<1x1x128xf32> to vector<32x16x128xf32>
    %16 = arith.addf %12, %15 : vector<32x16x128xf32>
    %cst_10 = arith.constant 0.000000e+00 : f32
    %17 = vector.broadcast %cst_10 : f32 to vector<32x16x128xf32>
    %18 = arith.maximumf %16, %17 : vector<32x16x128xf32>
    %c0_11 = arith.constant 0 : index
    %c0_12 = arith.constant 0 : index
    %19 = vector.load %arg4[%c0_11, %c0_12] : memref<1x128xf32, #tpu.memory_space<vmem>>, vector<1x128xf32>
    %20 = vector.shape_cast %19 : vector<1x128xf32> to vector<1x1x128xf32>
    %21 = vector.broadcast %20 : vector<1x1x128xf32> to vector<32x16x128xf32>
    %22 = arith.mulf %18, %21 : vector<32x16x128xf32>
    %23 = vector.shape_cast %22 : vector<32x16x128xf32> to vector<2x16x16x128xf32>
    %24 = arith.truncf %23 : vector<2x16x16x128xf32> to vector<2x16x16x128xbf16>
    %c0_13 = arith.constant 0 : index
    %c0_14 = arith.constant 0 : index
    %c0_15 = arith.constant 0 : index
    %c0_16 = arith.constant 0 : index
    %25 = vector.load %arg5[%c0_13, %c0_14, %c0_15, %c0_16] : memref<2x16x16x128xbf16, #tpu.memory_space<vmem>>, vector<2x16x16x128xbf16>
    tpu.vector_store %arg5[%c0_13, %c0_14, %c0_15, %c0_16], %24 {strides = array<i32>} : memref<2x16x16x128xbf16, #tpu.memory_space<vmem>>, vector<2x16x16x128xbf16>,
    return
  }
  func.func @transform_0(%arg0: i32) -> (i32, i32) {
    %c0_i32 = arith.constant 0 : i32
    %c0_i32_0 = arith.constant 0 : i32
    return %arg0, %c0_i32 : i32, i32
  }
  func.func @transform_1(%arg0: i32) -> (i32, i32) {
    %c0_i32 = arith.constant 0 : i32
    %c0_i32_0 = arith.constant 0 : i32
    %c0_i32_1 = arith.constant 0 : i32
    return %c0_i32, %c0_i32_0 : i32, i32
  }
  func.func @transform_2(%arg0: i32) -> (i32, i32) {
    %c0_i32 = arith.constant 0 : i32
    %c0_i32_0 = arith.constant 0 : i32
    %c0_i32_1 = arith.constant 0 : i32
    return %c0_i32, %c0_i32_0 : i32, i32
  }
  func.func @transform_3(%arg0: i32) -> (i32, i32) {
    %c0_i32 = arith.constant 0 : i32
    %c0_i32_0 = arith.constant 0 : i32
    %c0_i32_1 = arith.constant 0 : i32
    return %c0_i32, %c0_i32_0 : i32, i32
  }
  func.func @transform_4(%arg0: i32) -> (i32, i32, i32, i32) {
    %c0_i32 = arith.constant 0 : i32
    %c0_i32_0 = arith.constant 0 : i32
    %c0_i32_1 = arith.constant 0 : i32
    %c0_i32_2 = arith.constant 0 : i32
    return %arg0, %c0_i32, %c0_i32_0, %c0_i32_1 : i32, i32, i32, i32
  }
}

module attributes {stable_mosaic.version = 11 : i64} {
  func.func @_conv3x3_pool_kernel(%arg0: i32, %arg1: memref<2x18x18x128xbf16, #tpu.memory_space<vmem>>, %arg2: memref<9x128x128xbf16, #tpu.memory_space<vmem>>, %arg3: memref<1x128xf32, #tpu.memory_space<vmem>>, %arg4: memref<1x128xf32, #tpu.memory_space<vmem>>, %arg5: memref<2x8x8x128xbf16, #tpu.memory_space<vmem>>, %arg6: memref<512x128xf32, #tpu.memory_space<vmem>>) attributes {dimension_semantics = [#tpu.dimension_semantics<parallel>], iteration_bounds = array<i64: 1>, scalar_prefetch = 0 : i64, scratch_operands = 1 : i64, tpu.core_type = #tpu.core_type<tc>, window_params = [{transform_indices = @transform_0, window_bounds = array<i64: 2, 18, 18, 128>}, {pipeline_mode = #tpu.pipeline_mode<synchronous>, transform_indices = @transform_1, window_bounds = array<i64: 9, 128, 128>}, {pipeline_mode = #tpu.pipeline_mode<synchronous>, transform_indices = @transform_2, window_bounds = array<i64: 1, 128>}, {pipeline_mode = #tpu.pipeline_mode<synchronous>, transform_indices = @transform_3, window_bounds = array<i64: 1, 128>}, {transform_indices = @transform_4, window_bounds = array<i64: 2, 8, 8, 128>}]} {
    %c0 = arith.constant 0 : index
    %c0_0 = arith.constant 0 : index
    %c0_1 = arith.constant 0 : index
    %c0_2 = arith.constant 0 : index
    %0 = vector.load %arg1[%c0, %c0_0, %c0_1, %c0_2] : memref<2x18x18x128xbf16, #tpu.memory_space<vmem>>, vector<2x16x16x128xbf16>
    %1 = vector.shape_cast %0 : vector<2x16x16x128xbf16> to vector<512x128xbf16>
    %c0_3 = arith.constant 0 : index
    %c0_4 = arith.constant 0 : index
    %c0_5 = arith.constant 0 : index
    %2 = vector.load %arg2[%c0_3, %c0_4, %c0_5] : memref<9x128x128xbf16, #tpu.memory_space<vmem>>, vector<1x128x128xbf16>
    %3 = vector.shape_cast %2 : vector<1x128x128xbf16> to vector<128x128xbf16>
    %cst = arith.constant dense<0.000000e+00> : vector<512x128xf32>
    %4 = tpu.matmul %1, %3, %cst {dimension_numbers = #tpu.dot_dimension_numbers<[1], [0], [0], [1], [0, 0, 1, 1], [], []>} : vector<512x128xbf16>, vector<128x128xbf16>, vector<512x128xf32> -> vector<512x128xf32>
    %c0_6 = arith.constant 0 : index
    %c0_7 = arith.constant 0 : index
    %5 = vector.load %arg6[%c0_6, %c0_7] : memref<512x128xf32, #tpu.memory_space<vmem>>, vector<512x128xf32>
    tpu.vector_store %arg6[%c0_6, %c0_7], %4 {strides = array<i32>} : memref<512x128xf32, #tpu.memory_space<vmem>>, vector<512x128xf32>,
    %c0_8 = arith.constant 0 : index
    %c0_9 = arith.constant 0 : index
    %c1 = arith.constant 1 : index
    %c0_10 = arith.constant 0 : index
    %6 = vector.load %arg1[%c0_8, %c0_9, %c1, %c0_10] : memref<2x18x18x128xbf16, #tpu.memory_space<vmem>>, vector<2x16x16x128xbf16>
    %7 = vector.shape_cast %6 : vector<2x16x16x128xbf16> to vector<512x128xbf16>
    %c1_11 = arith.constant 1 : index
    %c0_12 = arith.constant 0 : index
    %c0_13 = arith.constant 0 : index
    %8 = vector.load %arg2[%c1_11, %c0_12, %c0_13] : memref<9x128x128xbf16, #tpu.memory_space<vmem>>, vector<1x128x128xbf16>
    %9 = vector.shape_cast %8 : vector<1x128x128xbf16> to vector<128x128xbf16>
    %cst_14 = arith.constant dense<0.000000e+00> : vector<512x128xf32>
    %10 = tpu.matmul %7, %9, %cst_14 {dimension_numbers = #tpu.dot_dimension_numbers<[1], [0], [0], [1], [0, 0, 1, 1], [], []>} : vector<512x128xbf16>, vector<128x128xbf16>, vector<512x128xf32> -> vector<512x128xf32>
    %c0_15 = arith.constant 0 : index
    %c0_16 = arith.constant 0 : index
    %11 = vector.load %arg6[%c0_15, %c0_16] : memref<512x128xf32, #tpu.memory_space<vmem>>, vector<512x128xf32>
    %12 = arith.addf %11, %10 : vector<512x128xf32>
    %c0_17 = arith.constant 0 : index
    %c0_18 = arith.constant 0 : index
    %13 = vector.load %arg6[%c0_17, %c0_18] : memref<512x128xf32, #tpu.memory_space<vmem>>, vector<512x128xf32>
    tpu.vector_store %arg6[%c0_17, %c0_18], %12 {strides = array<i32>} : memref<512x128xf32, #tpu.memory_space<vmem>>, vector<512x128xf32>,
    %c0_19 = arith.constant 0 : index
    %c0_20 = arith.constant 0 : index
    %c2 = arith.constant 2 : index
    %c0_21 = arith.constant 0 : index
    %14 = vector.load %arg1[%c0_19, %c0_20, %c2, %c0_21] : memref<2x18x18x128xbf16, #tpu.memory_space<vmem>>, vector<2x16x16x128xbf16>
    %15 = vector.shape_cast %14 : vector<2x16x16x128xbf16> to vector<512x128xbf16>
    %c2_22 = arith.constant 2 : index
    %c0_23 = arith.constant 0 : index
    %c0_24 = arith.constant 0 : index
    %16 = vector.load %arg2[%c2_22, %c0_23, %c0_24] : memref<9x128x128xbf16, #tpu.memory_space<vmem>>, vector<1x128x128xbf16>
    %17 = vector.shape_cast %16 : vector<1x128x128xbf16> to vector<128x128xbf16>
    %cst_25 = arith.constant dense<0.000000e+00> : vector<512x128xf32>
    %18 = tpu.matmul %15, %17, %cst_25 {dimension_numbers = #tpu.dot_dimension_numbers<[1], [0], [0], [1], [0, 0, 1, 1], [], []>} : vector<512x128xbf16>, vector<128x128xbf16>, vector<512x128xf32> -> vector<512x128xf32>
    %c0_26 = arith.constant 0 : index
    %c0_27 = arith.constant 0 : index
    %19 = vector.load %arg6[%c0_26, %c0_27] : memref<512x128xf32, #tpu.memory_space<vmem>>, vector<512x128xf32>
    %20 = arith.addf %19, %18 : vector<512x128xf32>
    %c0_28 = arith.constant 0 : index
    %c0_29 = arith.constant 0 : index
    %21 = vector.load %arg6[%c0_28, %c0_29] : memref<512x128xf32, #tpu.memory_space<vmem>>, vector<512x128xf32>
    tpu.vector_store %arg6[%c0_28, %c0_29], %20 {strides = array<i32>} : memref<512x128xf32, #tpu.memory_space<vmem>>, vector<512x128xf32>,
    %c0_30 = arith.constant 0 : index
    %c1_31 = arith.constant 1 : index
    %c0_32 = arith.constant 0 : index
    %c0_33 = arith.constant 0 : index
    %22 = vector.load %arg1[%c0_30, %c1_31, %c0_32, %c0_33] : memref<2x18x18x128xbf16, #tpu.memory_space<vmem>>, vector<2x16x16x128xbf16>
    %23 = vector.shape_cast %22 : vector<2x16x16x128xbf16> to vector<512x128xbf16>
    %c3 = arith.constant 3 : index
    %c0_34 = arith.constant 0 : index
    %c0_35 = arith.constant 0 : index
    %24 = vector.load %arg2[%c3, %c0_34, %c0_35] : memref<9x128x128xbf16, #tpu.memory_space<vmem>>, vector<1x128x128xbf16>
    %25 = vector.shape_cast %24 : vector<1x128x128xbf16> to vector<128x128xbf16>
    %cst_36 = arith.constant dense<0.000000e+00> : vector<512x128xf32>
    %26 = tpu.matmul %23, %25, %cst_36 {dimension_numbers = #tpu.dot_dimension_numbers<[1], [0], [0], [1], [0, 0, 1, 1], [], []>} : vector<512x128xbf16>, vector<128x128xbf16>, vector<512x128xf32> -> vector<512x128xf32>
    %c0_37 = arith.constant 0 : index
    %c0_38 = arith.constant 0 : index
    %27 = vector.load %arg6[%c0_37, %c0_38] : memref<512x128xf32, #tpu.memory_space<vmem>>, vector<512x128xf32>
    %28 = arith.addf %27, %26 : vector<512x128xf32>
    %c0_39 = arith.constant 0 : index
    %c0_40 = arith.constant 0 : index
    %29 = vector.load %arg6[%c0_39, %c0_40] : memref<512x128xf32, #tpu.memory_space<vmem>>, vector<512x128xf32>
    tpu.vector_store %arg6[%c0_39, %c0_40], %28 {strides = array<i32>} : memref<512x128xf32, #tpu.memory_space<vmem>>, vector<512x128xf32>,
    %c0_41 = arith.constant 0 : index
    %c1_42 = arith.constant 1 : index
    %c1_43 = arith.constant 1 : index
    %c0_44 = arith.constant 0 : index
    %30 = vector.load %arg1[%c0_41, %c1_42, %c1_43, %c0_44] : memref<2x18x18x128xbf16, #tpu.memory_space<vmem>>, vector<2x16x16x128xbf16>
    %31 = vector.shape_cast %30 : vector<2x16x16x128xbf16> to vector<512x128xbf16>
    %c4 = arith.constant 4 : index
    %c0_45 = arith.constant 0 : index
    %c0_46 = arith.constant 0 : index
    %32 = vector.load %arg2[%c4, %c0_45, %c0_46] : memref<9x128x128xbf16, #tpu.memory_space<vmem>>, vector<1x128x128xbf16>
    %33 = vector.shape_cast %32 : vector<1x128x128xbf16> to vector<128x128xbf16>
    %cst_47 = arith.constant dense<0.000000e+00> : vector<512x128xf32>
    %34 = tpu.matmul %31, %33, %cst_47 {dimension_numbers = #tpu.dot_dimension_numbers<[1], [0], [0], [1], [0, 0, 1, 1], [], []>} : vector<512x128xbf16>, vector<128x128xbf16>, vector<512x128xf32> -> vector<512x128xf32>
    %c0_48 = arith.constant 0 : index
    %c0_49 = arith.constant 0 : index
    %35 = vector.load %arg6[%c0_48, %c0_49] : memref<512x128xf32, #tpu.memory_space<vmem>>, vector<512x128xf32>
    %36 = arith.addf %35, %34 : vector<512x128xf32>
    %c0_50 = arith.constant 0 : index
    %c0_51 = arith.constant 0 : index
    %37 = vector.load %arg6[%c0_50, %c0_51] : memref<512x128xf32, #tpu.memory_space<vmem>>, vector<512x128xf32>
    tpu.vector_store %arg6[%c0_50, %c0_51], %36 {strides = array<i32>} : memref<512x128xf32, #tpu.memory_space<vmem>>, vector<512x128xf32>,
    %c0_52 = arith.constant 0 : index
    %c1_53 = arith.constant 1 : index
    %c2_54 = arith.constant 2 : index
    %c0_55 = arith.constant 0 : index
    %38 = vector.load %arg1[%c0_52, %c1_53, %c2_54, %c0_55] : memref<2x18x18x128xbf16, #tpu.memory_space<vmem>>, vector<2x16x16x128xbf16>
    %39 = vector.shape_cast %38 : vector<2x16x16x128xbf16> to vector<512x128xbf16>
    %c5 = arith.constant 5 : index
    %c0_56 = arith.constant 0 : index
    %c0_57 = arith.constant 0 : index
    %40 = vector.load %arg2[%c5, %c0_56, %c0_57] : memref<9x128x128xbf16, #tpu.memory_space<vmem>>, vector<1x128x128xbf16>
    %41 = vector.shape_cast %40 : vector<1x128x128xbf16> to vector<128x128xbf16>
    %cst_58 = arith.constant dense<0.000000e+00> : vector<512x128xf32>
    %42 = tpu.matmul %39, %41, %cst_58 {dimension_numbers = #tpu.dot_dimension_numbers<[1], [0], [0], [1], [0, 0, 1, 1], [], []>} : vector<512x128xbf16>, vector<128x128xbf16>, vector<512x128xf32> -> vector<512x128xf32>
    %c0_59 = arith.constant 0 : index
    %c0_60 = arith.constant 0 : index
    %43 = vector.load %arg6[%c0_59, %c0_60] : memref<512x128xf32, #tpu.memory_space<vmem>>, vector<512x128xf32>
    %44 = arith.addf %43, %42 : vector<512x128xf32>
    %c0_61 = arith.constant 0 : index
    %c0_62 = arith.constant 0 : index
    %45 = vector.load %arg6[%c0_61, %c0_62] : memref<512x128xf32, #tpu.memory_space<vmem>>, vector<512x128xf32>
    tpu.vector_store %arg6[%c0_61, %c0_62], %44 {strides = array<i32>} : memref<512x128xf32, #tpu.memory_space<vmem>>, vector<512x128xf32>,
    %c0_63 = arith.constant 0 : index
    %c2_64 = arith.constant 2 : index
    %c0_65 = arith.constant 0 : index
    %c0_66 = arith.constant 0 : index
    %46 = vector.load %arg1[%c0_63, %c2_64, %c0_65, %c0_66] : memref<2x18x18x128xbf16, #tpu.memory_space<vmem>>, vector<2x16x16x128xbf16>
    %47 = vector.shape_cast %46 : vector<2x16x16x128xbf16> to vector<512x128xbf16>
    %c6 = arith.constant 6 : index
    %c0_67 = arith.constant 0 : index
    %c0_68 = arith.constant 0 : index
    %48 = vector.load %arg2[%c6, %c0_67, %c0_68] : memref<9x128x128xbf16, #tpu.memory_space<vmem>>, vector<1x128x128xbf16>
    %49 = vector.shape_cast %48 : vector<1x128x128xbf16> to vector<128x128xbf16>
    %cst_69 = arith.constant dense<0.000000e+00> : vector<512x128xf32>
    %50 = tpu.matmul %47, %49, %cst_69 {dimension_numbers = #tpu.dot_dimension_numbers<[1], [0], [0], [1], [0, 0, 1, 1], [], []>} : vector<512x128xbf16>, vector<128x128xbf16>, vector<512x128xf32> -> vector<512x128xf32>
    %c0_70 = arith.constant 0 : index
    %c0_71 = arith.constant 0 : index
    %51 = vector.load %arg6[%c0_70, %c0_71] : memref<512x128xf32, #tpu.memory_space<vmem>>, vector<512x128xf32>
    %52 = arith.addf %51, %50 : vector<512x128xf32>
    %c0_72 = arith.constant 0 : index
    %c0_73 = arith.constant 0 : index
    %53 = vector.load %arg6[%c0_72, %c0_73] : memref<512x128xf32, #tpu.memory_space<vmem>>, vector<512x128xf32>
    tpu.vector_store %arg6[%c0_72, %c0_73], %52 {strides = array<i32>} : memref<512x128xf32, #tpu.memory_space<vmem>>, vector<512x128xf32>,
    %c0_74 = arith.constant 0 : index
    %c2_75 = arith.constant 2 : index
    %c1_76 = arith.constant 1 : index
    %c0_77 = arith.constant 0 : index
    %54 = vector.load %arg1[%c0_74, %c2_75, %c1_76, %c0_77] : memref<2x18x18x128xbf16, #tpu.memory_space<vmem>>, vector<2x16x16x128xbf16>
    %55 = vector.shape_cast %54 : vector<2x16x16x128xbf16> to vector<512x128xbf16>
    %c7 = arith.constant 7 : index
    %c0_78 = arith.constant 0 : index
    %c0_79 = arith.constant 0 : index
    %56 = vector.load %arg2[%c7, %c0_78, %c0_79] : memref<9x128x128xbf16, #tpu.memory_space<vmem>>, vector<1x128x128xbf16>
    %57 = vector.shape_cast %56 : vector<1x128x128xbf16> to vector<128x128xbf16>
    %cst_80 = arith.constant dense<0.000000e+00> : vector<512x128xf32>
    %58 = tpu.matmul %55, %57, %cst_80 {dimension_numbers = #tpu.dot_dimension_numbers<[1], [0], [0], [1], [0, 0, 1, 1], [], []>} : vector<512x128xbf16>, vector<128x128xbf16>, vector<512x128xf32> -> vector<512x128xf32>
    %c0_81 = arith.constant 0 : index
    %c0_82 = arith.constant 0 : index
    %59 = vector.load %arg6[%c0_81, %c0_82] : memref<512x128xf32, #tpu.memory_space<vmem>>, vector<512x128xf32>
    %60 = arith.addf %59, %58 : vector<512x128xf32>
    %c0_83 = arith.constant 0 : index
    %c0_84 = arith.constant 0 : index
    %61 = vector.load %arg6[%c0_83, %c0_84] : memref<512x128xf32, #tpu.memory_space<vmem>>, vector<512x128xf32>
    tpu.vector_store %arg6[%c0_83, %c0_84], %60 {strides = array<i32>} : memref<512x128xf32, #tpu.memory_space<vmem>>, vector<512x128xf32>,
    %c0_85 = arith.constant 0 : index
    %c2_86 = arith.constant 2 : index
    %c2_87 = arith.constant 2 : index
    %c0_88 = arith.constant 0 : index
    %62 = vector.load %arg1[%c0_85, %c2_86, %c2_87, %c0_88] : memref<2x18x18x128xbf16, #tpu.memory_space<vmem>>, vector<2x16x16x128xbf16>
    %63 = vector.shape_cast %62 : vector<2x16x16x128xbf16> to vector<512x128xbf16>
    %c8 = arith.constant 8 : index
    %c0_89 = arith.constant 0 : index
    %c0_90 = arith.constant 0 : index
    %64 = vector.load %arg2[%c8, %c0_89, %c0_90] : memref<9x128x128xbf16, #tpu.memory_space<vmem>>, vector<1x128x128xbf16>
    %65 = vector.shape_cast %64 : vector<1x128x128xbf16> to vector<128x128xbf16>
    %cst_91 = arith.constant dense<0.000000e+00> : vector<512x128xf32>
    %66 = tpu.matmul %63, %65, %cst_91 {dimension_numbers = #tpu.dot_dimension_numbers<[1], [0], [0], [1], [0, 0, 1, 1], [], []>} : vector<512x128xbf16>, vector<128x128xbf16>, vector<512x128xf32> -> vector<512x128xf32>
    %c0_92 = arith.constant 0 : index
    %c0_93 = arith.constant 0 : index
    %67 = vector.load %arg6[%c0_92, %c0_93] : memref<512x128xf32, #tpu.memory_space<vmem>>, vector<512x128xf32>
    %68 = arith.addf %67, %66 : vector<512x128xf32>
    %c0_94 = arith.constant 0 : index
    %c0_95 = arith.constant 0 : index
    %69 = vector.load %arg6[%c0_94, %c0_95] : memref<512x128xf32, #tpu.memory_space<vmem>>, vector<512x128xf32>
    tpu.vector_store %arg6[%c0_94, %c0_95], %68 {strides = array<i32>} : memref<512x128xf32, #tpu.memory_space<vmem>>, vector<512x128xf32>,
    %c0_96 = arith.constant 0 : index
    %c0_97 = arith.constant 0 : index
    %70 = tpu.strided_load %arg6[%c0_96, %c0_97] {strides = array<i32: 2, 1>} : memref<512x128xf32, #tpu.memory_space<vmem>>, vector<256x128xf32>
    %c1_98 = arith.constant 1 : index
    %c0_99 = arith.constant 0 : index
    %71 = tpu.strided_load %arg6[%c1_98, %c0_99] {strides = array<i32: 2, 1>} : memref<512x128xf32, #tpu.memory_space<vmem>>, vector<256x128xf32>
    %72 = arith.maximumf %70, %71 : vector<256x128xf32>
    %73 = vector.shape_cast %72 : vector<256x128xf32> to vector<16x2x8x128xf32>
    %74 = vector.extract_strided_slice %73 {offsets = [0, 0, 0, 0], sizes = [16, 1, 8, 128], strides = [1, 1, 1, 1]} : vector<16x2x8x128xf32> to vector<16x1x8x128xf32>
    %75 = vector.shape_cast %74 : vector<16x1x8x128xf32> to vector<16x8x128xf32>
    %76 = vector.extract_strided_slice %73 {offsets = [0, 1, 0, 0], sizes = [16, 1, 8, 128], strides = [1, 1, 1, 1]} : vector<16x2x8x128xf32> to vector<16x1x8x128xf32>
    %77 = vector.shape_cast %76 : vector<16x1x8x128xf32> to vector<16x8x128xf32>
    %78 = arith.maximumf %75, %77 : vector<16x8x128xf32>
    %c0_100 = arith.constant 0 : index
    %c0_101 = arith.constant 0 : index
    %79 = vector.load %arg3[%c0_100, %c0_101] : memref<1x128xf32, #tpu.memory_space<vmem>>, vector<1x128xf32>
    %80 = vector.shape_cast %79 : vector<1x128xf32> to vector<1x1x128xf32>
    %81 = vector.broadcast %80 : vector<1x1x128xf32> to vector<16x8x128xf32>
    %82 = arith.addf %78, %81 : vector<16x8x128xf32>
    %cst_102 = arith.constant 0.000000e+00 : f32
    %83 = vector.broadcast %cst_102 : f32 to vector<16x8x128xf32>
    %84 = arith.maximumf %82, %83 : vector<16x8x128xf32>
    %c0_103 = arith.constant 0 : index
    %c0_104 = arith.constant 0 : index
    %85 = vector.load %arg4[%c0_103, %c0_104] : memref<1x128xf32, #tpu.memory_space<vmem>>, vector<1x128xf32>
    %86 = vector.shape_cast %85 : vector<1x128xf32> to vector<1x1x128xf32>
    %87 = vector.broadcast %86 : vector<1x1x128xf32> to vector<16x8x128xf32>
    %88 = arith.mulf %84, %87 : vector<16x8x128xf32>
    %89 = vector.shape_cast %88 : vector<16x8x128xf32> to vector<2x8x8x128xf32>
    %90 = arith.truncf %89 : vector<2x8x8x128xf32> to vector<2x8x8x128xbf16>
    %c0_105 = arith.constant 0 : index
    %c0_106 = arith.constant 0 : index
    %c0_107 = arith.constant 0 : index
    %c0_108 = arith.constant 0 : index
    %91 = vector.load %arg5[%c0_105, %c0_106, %c0_107, %c0_108] : memref<2x8x8x128xbf16, #tpu.memory_space<vmem>>, vector<2x8x8x128xbf16>
    tpu.vector_store %arg5[%c0_105, %c0_106, %c0_107, %c0_108], %90 {strides = array<i32>} : memref<2x8x8x128xbf16, #tpu.memory_space<vmem>>, vector<2x8x8x128xbf16>,
    return
  }
  func.func @transform_0(%arg0: i32) -> (i32, i32, i32, i32) {
    %c0_i32 = arith.constant 0 : i32
    %c0_i32_0 = arith.constant 0 : i32
    %c0_i32_1 = arith.constant 0 : i32
    %c0_i32_2 = arith.constant 0 : i32
    return %arg0, %c0_i32, %c0_i32_0, %c0_i32_1 : i32, i32, i32, i32
  }
  func.func @transform_1(%arg0: i32) -> (i32, i32, i32) {
    %c0_i32 = arith.constant 0 : i32
    %c0_i32_0 = arith.constant 0 : i32
    %c0_i32_1 = arith.constant 0 : i32
    %c0_i32_2 = arith.constant 0 : i32
    return %c0_i32, %c0_i32_0, %c0_i32_1 : i32, i32, i32
  }
  func.func @transform_2(%arg0: i32) -> (i32, i32) {
    %c0_i32 = arith.constant 0 : i32
    %c0_i32_0 = arith.constant 0 : i32
    %c0_i32_1 = arith.constant 0 : i32
    return %c0_i32, %c0_i32_0 : i32, i32
  }
  func.func @transform_3(%arg0: i32) -> (i32, i32) {
    %c0_i32 = arith.constant 0 : i32
    %c0_i32_0 = arith.constant 0 : i32
    %c0_i32_1 = arith.constant 0 : i32
    return %c0_i32, %c0_i32_0 : i32, i32
  }
  func.func @transform_4(%arg0: i32) -> (i32, i32, i32, i32) {
    %c0_i32 = arith.constant 0 : i32
    %c0_i32_0 = arith.constant 0 : i32
    %c0_i32_1 = arith.constant 0 : i32
    %c0_i32_2 = arith.constant 0 : i32
    return %arg0, %c0_i32, %c0_i32_0, %c0_i32_1 : i32, i32, i32, i32
  }
}

module attributes {stable_mosaic.version = 11 : i64} {
  func.func @_fc_fused_kernel(%arg0: i32, %arg1: memref<2x2048xbf16, #tpu.memory_space<vmem>>, %arg2: memref<2048x256xbf16, #tpu.memory_space<vmem>>, %arg3: memref<1x256xf32, #tpu.memory_space<vmem>>, %arg4: memref<256x10xbf16, #tpu.memory_space<vmem>>, %arg5: memref<1x10xf32, #tpu.memory_space<vmem>>, %arg6: memref<2x10xf32, #tpu.memory_space<vmem>>, %arg7: memref<2x256xf32, #tpu.memory_space<vmem>>) attributes {dimension_semantics = [#tpu.dimension_semantics<arbitrary>], iteration_bounds = array<i64: 4>, scalar_prefetch = 0 : i64, scratch_operands = 1 : i64, tpu.core_type = #tpu.core_type<tc>, window_params = [{transform_indices = @transform_0, window_bounds = array<i64: 2, 2048>}, {transform_indices = @transform_1, window_bounds = array<i64: 2048, 256>}, {pipeline_mode = #tpu.pipeline_mode<synchronous>, transform_indices = @transform_2, window_bounds = array<i64: 1, 256>}, {pipeline_mode = #tpu.pipeline_mode<synchronous>, transform_indices = @transform_3, window_bounds = array<i64: 256, 10>}, {pipeline_mode = #tpu.pipeline_mode<synchronous>, transform_indices = @transform_4, window_bounds = array<i64: 1, 10>}, {pipeline_mode = #tpu.pipeline_mode<synchronous>, transform_indices = @transform_5, window_bounds = array<i64: 2, 10>}]} {
    %c0_i32 = arith.constant 0 : i32
    %0 = arith.cmpi eq, %arg0, %c0_i32 : i32
    %1 = arith.extui %0 : i1 to i32
    %c0_i32_0 = arith.constant 0 : i32
    %2 = arith.cmpi ne, %1, %c0_i32_0 : i32
    scf.if %2 {
      %cst_9 = arith.constant 0.000000e+00 : f32
      %12 = vector.broadcast %cst_9 : f32 to vector<2x256xf32>
      %c0_10 = arith.constant 0 : index
      %c0_11 = arith.constant 0 : index
      %13 = vector.load %arg7[%c0_10, %c0_11] : memref<2x256xf32, #tpu.memory_space<vmem>>, vector<2x256xf32>
      tpu.vector_store %arg7[%c0_10, %c0_11], %12 {strides = array<i32>} : memref<2x256xf32, #tpu.memory_space<vmem>>, vector<2x256xf32>,
    } else {
    }
    %c0 = arith.constant 0 : index
    %c0_1 = arith.constant 0 : index
    %3 = vector.load %arg7[%c0, %c0_1] : memref<2x256xf32, #tpu.memory_space<vmem>>, vector<2x256xf32>
    %c0_2 = arith.constant 0 : index
    %c0_3 = arith.constant 0 : index
    %4 = vector.load %arg1[%c0_2, %c0_3] : memref<2x2048xbf16, #tpu.memory_space<vmem>>, vector<2x2048xbf16>
    %c0_4 = arith.constant 0 : index
    %c0_5 = arith.constant 0 : index
    %5 = vector.load %arg2[%c0_4, %c0_5] : memref<2048x256xbf16, #tpu.memory_space<vmem>>, vector<2048x256xbf16>
    %cst = arith.constant dense<0.000000e+00> : vector<2x256xf32>
    %6 = tpu.matmul %4, %5, %cst {dimension_numbers = #tpu.dot_dimension_numbers<[1], [0], [0], [1], [0, 0, 1, 1], [], []>} : vector<2x2048xbf16>, vector<2048x256xbf16>, vector<2x256xf32> -> vector<2x256xf32>
    %7 = arith.addf %3, %6 : vector<2x256xf32>
    %c0_6 = arith.constant 0 : index
    %c0_7 = arith.constant 0 : index
    %8 = vector.load %arg7[%c0_6, %c0_7] : memref<2x256xf32, #tpu.memory_space<vmem>>, vector<2x256xf32>
    tpu.vector_store %arg7[%c0_6, %c0_7], %7 {strides = array<i32>} : memref<2x256xf32, #tpu.memory_space<vmem>>, vector<2x256xf32>,
    %c3_i32 = arith.constant 3 : i32
    %9 = arith.cmpi eq, %arg0, %c3_i32 : i32
    %10 = arith.extui %9 : i1 to i32
    %c0_i32_8 = arith.constant 0 : i32
    %11 = arith.cmpi ne, %10, %c0_i32_8 : i32
    scf.if %11 {
      %c0_9 = arith.constant 0 : index
      %c0_10 = arith.constant 0 : index
      %12 = vector.load %arg7[%c0_9, %c0_10] : memref<2x256xf32, #tpu.memory_space<vmem>>, vector<2x256xf32>
      %c0_11 = arith.constant 0 : index
      %c0_12 = arith.constant 0 : index
      %13 = vector.load %arg3[%c0_11, %c0_12] : memref<1x256xf32, #tpu.memory_space<vmem>>, vector<1x256xf32>
      %14 = vector.broadcast %13 : vector<1x256xf32> to vector<2x256xf32>
      %15 = arith.addf %12, %14 : vector<2x256xf32>
      %cst_13 = arith.constant 0.000000e+00 : f32
      %16 = vector.broadcast %cst_13 : f32 to vector<2x256xf32>
      %17 = arith.maximumf %15, %16 : vector<2x256xf32>
      %18 = arith.truncf %17 : vector<2x256xf32> to vector<2x256xbf16>
      %c0_14 = arith.constant 0 : index
      %c0_15 = arith.constant 0 : index
      %19 = vector.load %arg4[%c0_14, %c0_15] : memref<256x10xbf16, #tpu.memory_space<vmem>>, vector<256x10xbf16>
      %cst_16 = arith.constant dense<0.000000e+00> : vector<2x10xf32>
      %20 = tpu.matmul %18, %19, %cst_16 {dimension_numbers = #tpu.dot_dimension_numbers<[1], [0], [0], [1], [0, 0, 1, 1], [], []>} : vector<2x256xbf16>, vector<256x10xbf16>, vector<2x10xf32> -> vector<2x10xf32>
      %c0_17 = arith.constant 0 : index
      %c0_18 = arith.constant 0 : index
      %21 = vector.load %arg5[%c0_17, %c0_18] : memref<1x10xf32, #tpu.memory_space<vmem>>, vector<1x10xf32>
      %22 = vector.broadcast %21 : vector<1x10xf32> to vector<2x10xf32>
      %23 = arith.addf %20, %22 : vector<2x10xf32>
      %c0_19 = arith.constant 0 : index
      %c0_20 = arith.constant 0 : index
      %24 = vector.load %arg6[%c0_19, %c0_20] : memref<2x10xf32, #tpu.memory_space<vmem>>, vector<2x10xf32>
      tpu.vector_store %arg6[%c0_19, %c0_20], %23 {strides = array<i32>} : memref<2x10xf32, #tpu.memory_space<vmem>>, vector<2x10xf32>,
    } else {
    }
    return
  }
  func.func @transform_0(%arg0: i32) -> (i32, i32) {
    %c0_i32 = arith.constant 0 : i32
    %c0_i32_0 = arith.constant 0 : i32
    return %c0_i32, %arg0 : i32, i32
  }
  func.func @transform_1(%arg0: i32) -> (i32, i32) {
    %c0_i32 = arith.constant 0 : i32
    %c0_i32_0 = arith.constant 0 : i32
    return %arg0, %c0_i32 : i32, i32
  }
  func.func @transform_2(%arg0: i32) -> (i32, i32) {
    %c0_i32 = arith.constant 0 : i32
    %c0_i32_0 = arith.constant 0 : i32
    %c0_i32_1 = arith.constant 0 : i32
    return %c0_i32, %c0_i32_0 : i32, i32
  }
  func.func @transform_3(%arg0: i32) -> (i32, i32) {
    %c0_i32 = arith.constant 0 : i32
    %c0_i32_0 = arith.constant 0 : i32
    %c0_i32_1 = arith.constant 0 : i32
    return %c0_i32, %c0_i32_0 : i32, i32
  }
  func.func @transform_4(%arg0: i32) -> (i32, i32) {
    %c0_i32 = arith.constant 0 : i32
    %c0_i32_0 = arith.constant 0 : i32
    %c0_i32_1 = arith.constant 0 : i32
    return %c0_i32, %c0_i32_0 : i32, i32
  }
  func.func @transform_5(%arg0: i32) -> (i32, i32) {
    %c0_i32 = arith.constant 0 : i32
    %c0_i32_0 = arith.constant 0 : i32
    %c0_i32_1 = arith.constant 0 : i32
    return %c0_i32, %c0_i32_0 : i32, i32
  }
}

</mosaic_0001>

<bundles_post_ra>
// kernel: hat_cnn_forward.5
= control target key start
LH: loop header
LB: loop body
LE: loop exit
PB: predicated region body
PF: predicated region fallthrough
CT: control target
= control target key end

     0   :  { %10 = vsyncpa [#allocation4], 0  ;;  %s3336_s18 = smov 0   ;;  %s3753_s0 = inlined_call_operand.vmem [shape: bf16[2,8192], index: 0, kind: input, shape index: {}]   ;;  %s3754_s1 = inlined_call_operand.vmem [shape: bf16[8192,256], index: 1, kind: input, shape index: {}]   ;;  %s3755_s2 = inlined_call_operand.vmem [shape: f32[1,256], index: 2, kind: input, shape index: {}]   ;;  %s3756_s3 = inlined_call_operand.vmem [shape: bf16[256,10], index: 3, kind: input, shape index: {}]   ;;  %s3757_s4 = inlined_call_operand.vmem [shape: f32[1,10], index: 4, kind: input, shape index: {}]   ;;  %s3758_s5 = inlined_call_operand.hbm [shape: f32[2,10], index: 5, kind: output, shape index: {}]  }
   0x1 LB: > { %s3342_s19 = sadd.s32 4294967295, %s3300_s18   ;;  %p2511_p0 = scmp.ge.s32.totalorder %s3300_s18, 1  ;;  %s3300_s18 = sphi %s3336_s18, %s16_s18  }
   0x2   : > { %p195_p1 = scmp.lt.s32.totalorder %s3300_s18, 5 }
   0x4   : > { %p196_p2 = pnand %p2511_p0, %p195_p1 }
   0x5   : > { %s2512_s20 = sshll.u32 (!%p196_p2), %s3342_s19, 4  ;;  %s2513_s21 = sshll.u32 (!%p196_p2), %s3342_s19, 8 }
   0x6   : > { %199 = sbr.rel (%p196_p2) target bundleno = 763 (0x2fb), region = 40  ;;  %p224_p3 = scmp.lt.s32.totalorder (!%p196_p2), %s2512_s20, 63 }
   0x7   : > { %p229_p4 = scmp.lt.s32.totalorder (!%p196_p2), %s2513_s21, 1023  ;;  %p2516_p5 = scmp.ne.s32.totalorder (!%p196_p2), %s3342_s19, 0 }
   0xd   : > { %s3760_s20 = smov (!%p224_p3, %s2512_s20), 63  ;;  %s3762_s21 = smov (!%p229_p4, %s2513_s21), 1023 }
   0xe   : > { %s3351_s24 = scalar_lea.vmem %s3753_s0, %s3760_s20  ;;  %s2795_s25 = sshll.u32 %s3762_s21, 3  ;;  %v3302_v0 = vmov (!%p2516_p5), 0.0  }
   0xf   : > { %s3356_s28 = scalar_lea.vmem %s3754_s1, %s2795_s25  ;;  %239 = sbr.rel (%p2516_p5) target bundleno = 22 (0x16), region = 44  ;;  %240 = vst [vmem:[#allocation2] sm:$0xf] (!%p2516_p5), %v3302_v0 }
  0x16 PF: > { %v2862_v1 = vld [vmem:[%s3356_s28 + $0x4] ss:$8 sps:$4 sm:$0xff]   ;;  %v2866_v3 = vld [vmem:[%s3356_s28] ss:$8 sps:$4 sm:$0xff]   ;;  %v2868_v5 = vld [vmem:[%s3356_s28 + $0x14] ss:$8 sps:$4 sm:$0xff]   ;;  %v506_v39 = vlaneseq }
  0x17   : > { %v2864_v2 = vld [vmem:[%s3356_s28 + $0x404] ss:$8 sps:$4 sm:$0xff]   ;;  %1896 = vmatprep.subr.bf16.mxu1 %v2862_v1  ;;  %v2867_v4 = vld [vmem:[%s3356_s28 + $0x400] ss:$8 sps:$4 sm:$0xff]   ;;  %v2870_v6 = vld [vmem:[%s3356_s28 + $0x414] ss:$8 sps:$4 sm:$0xff]  }
  0x18   : > { %2060 = vmatprep.subr.bf16.mxu0 %v2864_v2  ;;  %1897 = vmatpush1.bf16.msra.mxu1 %v2866_v3  ;;  %v2872_v7 = vld [vmem:[%s3356_s28 + $0x10] ss:$8 sps:$4 sm:$0xff]   ;;  %v2874_v9 = vld [vmem:[%s3356_s28 + $0x24] ss:$8 sps:$4 sm:$0xff]   ;;  %v2878_v11 = vld [vmem:[%s3356_s28 + $0x20] ss:$8 sps:$4 sm:$0xff]  }
  0x19   : > { %2061 = vmatpush1.bf16.msra.mxu0 %v2867_v4  ;;  %1898 = vmatprep.subr.bf16.mxu1 %v2868_v5  ;;  %v2873_v8 = vld [vmem:[%s3356_s28 + $0x410] ss:$8 sps:$4 sm:$0xff]   ;;  %v2876_v10 = vld [vmem:[%s3356_s28 + $0x424] ss:$8 sps:$4 sm:$0xff]   ;;  %v2879_v12 = vld [vmem:[%s3356_s28 + $0x420] ss:$8 sps:$4 sm:$0xff]  }
  0x1a   : > { %2062 = vmatprep.subr.bf16.mxu0 %v2870_v6  ;;  %v2880_v13 = vld [vmem:[%s3356_s28 + $0x34] ss:$8 sps:$4 sm:$0xff]   ;;  %v2884_v15 = vld [vmem:[%s3356_s28 + $0x30] ss:$8 sps:$4 sm:$0xff]   ;;  %v2886_v17 = vld [vmem:[%s3356_s28 + $0x44] ss:$8 sps:$4 sm:$0xff]  }
  0x1b   : > { %v2882_v14 = vld [vmem:[%s3356_s28 + $0x434] ss:$8 sps:$4 sm:$0xff]   ;;  %v2885_v16 = vld [vmem:[%s3356_s28 + $0x430] ss:$8 sps:$4 sm:$0xff]   ;;  %v2888_v18 = vld [vmem:[%s3356_s28 + $0x444] ss:$8 sps:$4 sm:$0xff]  }
  0x1c   : > { %1899 = vmatpush1.bf16.msra.mxu1 %v2872_v7  ;;  %v2890_v19 = vld [vmem:[%s3356_s28 + $0x40] ss:$8 sps:$4 sm:$0xff]   ;;  %v2892_v21 = vld [vmem:[%s3356_s28 + $0x54] ss:$8 sps:$4 sm:$0xff]   ;;  %v2896_v23 = vld [vmem:[%s3356_s28 + $0x50] ss:$8 sps:$4 sm:$0xff]  }
  0x1d   : > { %2063 = vmatpush1.bf16.msra.mxu0 %v2873_v8  ;;  %1900 = vmatprep.subr.bf16.mxu1 %v2874_v9  ;;  %v2891_v20 = vld [vmem:[%s3356_s28 + $0x440] ss:$8 sps:$4 sm:$0xff]   ;;  %v2894_v22 = vld [vmem:[%s3356_s28 + $0x454] ss:$8 sps:$4 sm:$0xff]   ;;  %v2897_v24 = vld [vmem:[%s3356_s28 + $0x450] ss:$8 sps:$4 sm:$0xff]  }
  0x1e   : > { %2064 = vmatprep.subr.bf16.mxu0 %v2876_v10  ;;  %v2898_v25 = vld [vmem:[%s3356_s28 + $0x64] ss:$8 sps:$4 sm:$0xff]   ;;  %v2902_v27 = vld [vmem:[%s3356_s28 + $0x60] ss:$8 sps:$4 sm:$0xff]   ;;  %v2904_v29 = vld [vmem:[%s3356_s28 + $0x74] ss:$8 sps:$4 sm:$0xff]  }
  0x1f   : > { %v2900_v26 = vld [vmem:[%s3356_s28 + $0x464] ss:$8 sps:$4 sm:$0xff]   ;;  %v2903_v28 = vld [vmem:[%s3356_s28 + $0x460] ss:$8 sps:$4 sm:$0xff]   ;;  %v2906_v30 = vld [vmem:[%s3356_s28 + $0x474] ss:$8 sps:$4 sm:$0xff]  }
  0x20   : > { %1901 = vmatpush1.bf16.msra.mxu1 %v2878_v11  ;;  %v2908_v31 = vld [vmem:[%s3356_s28 + $0x70] ss:$8 sps:$4 sm:$0xff]   ;;  %v2910_v33 = vld [vmem:[%s3356_s28 + $0x84] ss:$8 sps:$4 sm:$0xff]   ;;  %v2914_v35 = vld [vmem:[%s3356_s28 + $0x80] ss:$8 sps:$4 sm:$0xff]  }
  0x21   : > { %2065 = vmatpush1.bf16.msra.mxu0 %v2879_v12  ;;  %1902 = vmatprep.subr.bf16.mxu1 %v2880_v13  ;;  %v2909_v32 = vld [vmem:[%s3356_s28 + $0x470] ss:$8 sps:$4 sm:$0xff]   ;;  %v2912_v34 = vld [vmem:[%s3356_s28 + $0x484] ss:$8 sps:$4 sm:$0xff]   ;;  %v2915_v36 = vld [vmem:[%s3356_s28 + $0x480] ss:$8 sps:$4 sm:$0xff]  }
  0x22   : > { %2066 = vmatprep.subr.bf16.mxu0 %v2882_v14  ;;  %v3303_v37 = vmov 1966171168   ;;  %v2916_v40 = vld [vmem:[%s3356_s28 + $0x94] ss:$8 sps:$4 sm:$0xff]   ;;  %v2920_v42 = vld [vmem:[%s3356_s28 + $0x90] ss:$8 sps:$4 sm:$0xff]  }
  0x23   : > { %v504_v38 = vunpack.c.l.s4 %v3303_v37  ;;  %v2918_v41 = vld [vmem:[%s3356_s28 + $0x494] ss:$8 sps:$4 sm:$0xff]   ;;  %v3398_v44 = vshrl.u32 %v506_v39, 7  ;;  %v2921_v45 = vld [vmem:[%s3356_s28 + $0x490] ss:$8 sps:$4 sm:$0xff]   ;;  %v242_v53 = vld [vmem:[%s3351_s24] sm:$0xff] }
  0x24   : > { %1903 = vmatpush1.bf16.msra.mxu1 %v2884_v15  ;;  %v2922_v46 = vld [vmem:[%s3356_s28 + $0xa4] ss:$8 sps:$4 sm:$0xff]   ;;  %v2926_v48 = vld [vmem:[%s3356_s28 + $0xa0] ss:$8 sps:$4 sm:$0xff]   ;;  %v2928_v51 = vld [vmem:[%s3356_s28 + $0xb4] ss:$8 sps:$4 sm:$0xff]   ;;  %v502_v13 = vcombine.high %v242_v53, %v242_v53 }
  0x25   : > { %2067 = vmatpush1.bf16.msra.mxu0 %v2885_v16  ;;  %1904 = vmatprep.subr.bf16.mxu1 %v2886_v17  ;;  %v505_v43 = vunpack.c.0.s8 %v504_v38  ;;  %v2924_v47 = vld [vmem:[%s3356_s28 + $0x4a4] ss:$8 sps:$4 sm:$0xff]   ;;  %v2927_v49 = vld [vmem:[%s3356_s28 + $0x4a0] ss:$8 sps:$4 sm:$0xff]   ;;  %v2930_v52 = vld [vmem:[%s3356_s28 + $0x4b4] ss:$8 sps:$4 sm:$0xff]  }
  0x26   : > { %2068 = vmatprep.subr.bf16.mxu0 %v2888_v18  ;;  %v2932_v54 = vld [vmem:[%s3356_s28 + $0xb0] ss:$8 sps:$4 sm:$0xff]   ;;  %v243_v57 = vld [vmem:[%s3351_s24 + $0x8] sm:$0xff]  ;;  %v2940_v2 = vld [vmem:[%s3356_s28 + $0xd4] ss:$8 sps:$4 sm:$0xff]   ;;  %p2773_p6 = scmp.ne.s32.totalorder %s3342_s19, 3 }
  0x27   : > { %v3406_v50 = vsub.s32 %v505_v43, %v3398_v44  ;;  %v2933_v56 = vld [vmem:[%s3356_s28 + $0x4b0] ss:$8 sps:$4 sm:$0xff]   ;;  %v2934_v58 = vld [vmem:[%s3356_s28 + $0xc4] ss:$8 sps:$4 sm:$0xff]   ;;  %v2938_v0 = vld [vmem:[%s3356_s28 + $0xc0] ss:$8 sps:$4 sm:$0xff]   ;;  %v551_v14 = vcombine.high %v243_v57, %v243_v57 }
  0x28   : > { %1905 = vmatpush1.bf16.msra.mxu1 %v2890_v19  ;;  %v2936_v59 = vld [vmem:[%s3356_s28 + $0x4c4] ss:$8 sps:$4 sm:$0xff]   ;;  %v2939_v1 = vld [vmem:[%s3356_s28 + $0x4c0] ss:$8 sps:$4 sm:$0xff]   ;;  %v2942_v3 = vld [vmem:[%s3356_s28 + $0x4d4] ss:$8 sps:$4 sm:$0xff]  }
  0x29   : > { %2069 = vmatpush1.bf16.msra.mxu0 %v2891_v20  ;;  %1906 = vmatprep.subr.bf16.mxu1 %v2892_v21  ;;  %v509_v55 = vrot.slane %v242_v53, %v3406_v50  ;;  %v558_v61 = vrot.slane %v243_v57, %v3406_v50  ;;  %v2944_v5 = vld [vmem:[%s3356_s28 + $0xd0] ss:$8 sps:$4 sm:$0xff]   ;;  %v2946_v7 = vld [vmem:[%s3356_s28 + $0xe4] ss:$8 sps:$4 sm:$0xff]   ;;  %v2950_v9 = vld [vmem:[%s3356_s28 + $0xe0] ss:$8 sps:$4 sm:$0xff]   ;;  %v516_v19 = vrot.slane %v502_v13, %v3406_v50 }
  0x2a   : > { %2070 = vmatprep.subr.bf16.mxu0 %v2894_v22  ;;  %v2945_v6 = vld [vmem:[%s3356_s28 + $0x4d0] ss:$8 sps:$4 sm:$0xff]   ;;  %v2948_v8 = vld [vmem:[%s3356_s28 + $0x4e4] ss:$8 sps:$4 sm:$0xff]   ;;  %v2951_v10 = vld [vmem:[%s3356_s28 + $0x4e0] ss:$8 sps:$4 sm:$0xff]   ;;  %v565_v20 = vrot.slane %v551_v14, %v3406_v50 }
  0x2b   : > { %v517_v60 = vcombine.high %v509_v55, %v509_v55  ;;  %v566_v63 = vcombine.high %v558_v61, %v558_v61  ;;  %v2952_v11 = vld [vmem:[%s3356_s28 + $0xf4] ss:$8 sps:$4 sm:$0xff]   ;;  %v2956_v15 = vld [vmem:[%s3356_s28 + $0xf0] ss:$8 sps:$4 sm:$0xff]   ;;  %v2961_v17 = vld [vmem:[%s3356_s28 + $0x104] ss:$8 sps:$4 sm:$0xff]   ;;  %v3442_v21 = vrot.slane %v509_v55, %v3406_v50  ;;  %v3445_v22 = vrot.slane %v558_v61, %v3406_v50 }
  0x2c   : > { %1907 = vmatpush1.bf16.msra.mxu1 %v2896_v23  ;;  %v2954_v12 = vld [vmem:[%s3356_s28 + $0x4f4] ss:$8 sps:$4 sm:$0xff]   ;;  %v2957_v16 = vld [vmem:[%s3356_s28 + $0x4f0] ss:$8 sps:$4 sm:$0xff]   ;;  %v2965_v18 = vld [vmem:[%s3356_s28 + $0x504] ss:$8 sps:$4 sm:$0xff]   ;;  %v518_v23 = vcombine.high %v516_v19, %v516_v19 }
  0x2d   : > { %2071 = vmatpush1.bf16.msra.mxu0 %v2897_v24  ;;  %1908 = vmatprep.subr.bf16.mxu1 %v2898_v25  ;;  %v3419_v62 = vrot.slane %v517_v60, %v3406_v50  ;;  %v588_v4 = vrot.slane %v566_v63, %v3406_v50  ;;  %v567_v24 = vcombine.high %v565_v20, %v565_v20  ;;  %v2959_v25 = vld [vmem:[%s3356_s28 + $0x100] ss:$8 sps:$4 sm:$0xff]   ;;  %v2974_v37 = vld [vmem:[%s3356_s28 + $0x124] ss:$8 sps:$4 sm:$0xff]   ;;  %v2978_v43 = vld [vmem:[%s3356_s28 + $0x130] ss:$8 sps:$4 sm:$0xff]  }
  0x2e   : > { %2072 = vmatprep.subr.bf16.mxu0 %v2900_v26  ;;  %v2963_v26 = vld [vmem:[%s3356_s28 + $0x500] ss:$8 sps:$4 sm:$0xff]   ;;  %v2977_v38 = vld [vmem:[%s3356_s28 + $0x524] ss:$8 sps:$4 sm:$0xff]   ;;  %v2993_v53 = vld [vmem:[%s3356_s28 + $0x550] ss:$8 sps:$4 sm:$0xff]  }
  0x2f   : > { %1928 = vmatprep.mubr.bf16.mxu1 %v3419_v62  ;;  %2092 = vmatprep.mubr.bf16.mxu0 %v588_v4  ;;  %v2972_v39 = vld [vmem:[%s3356_s28 + $0x120] ss:$8 sps:$4 sm:$0xff]   ;;  %v3001_v55 = vld [vmem:[%s3356_s28 + $0x564] ss:$8 sps:$4 sm:$0xff]   ;;  %v3002_v60 = vld [vmem:[%s3356_s28 + $0x170] ss:$8 sps:$4 sm:$0xff]  }
  0x30   : > { %1909 = vmatpush1.bf16.msra.mxu1 %v2902_v27  ;;  %v2968_v27 = vld [vmem:[%s3356_s28 + $0x114] ss:$8 sps:$4 sm:$0xff]   ;;  %v2999_v57 = vld [vmem:[%s3356_s28 + $0x560] ss:$8 sps:$4 sm:$0xff]   ;;  %v3005_v61 = vld [vmem:[%s3356_s28 + $0x570] ss:$8 sps:$4 sm:$0xff]  }
  0x31   : > { %2073 = vmatpush1.bf16.msra.mxu0 %v2903_v28  ;;  %1910 = vmatprep.subr.bf16.mxu1 %v2904_v29  ;;  %v2971_v28 = vld [vmem:[%s3356_s28 + $0x514] ss:$8 sps:$4 sm:$0xff]   ;;  %v3452_v29 = vrot.slane %v518_v23, %v3406_v50  ;;  %v3013_v63 = vld [vmem:[%s3356_s28 + $0x584] ss:$8 sps:$4 sm:$0xff]   ;;  %v3029_v13 = vld [vmem:[%s3356_s28 + $0x5b0] ss:$8 sps:$4 sm:$0xff]  }
  0x32   : > { %2074 = vmatprep.subr.bf16.mxu0 %v2906_v30  ;;  %v3455_v30 = vrot.slane %v567_v24, %v3406_v50  ;;  %v3034_v14 = vld [vmem:[%s3356_s28 + $0x1c4] ss:$8 sps:$4 sm:$0xff]   ;;  %v3041_v23 = vld [vmem:[%s3356_s28 + $0x5d0] ss:$8 sps:$4 sm:$0xff]   ;;  %vm2451_vm0 = vcmask (!%p2773_p6), 74752  }
  0x33   : > { %v3046_v24 = vld [vmem:[%s3356_s28 + $0x1e4] ss:$8 sps:$4 sm:$0xff]  }
  0x34   : > { %1911 = vmatpush1.bf16.msra.mxu1 %v2908_v31  ;;  %v3458_v31 = vrot.slane %v516_v19, %v3406_v50  ;;  %v3043_v19 = vld [vmem:[%s3356_s28 + $0x5d4] ss:$8 sps:$4 sm:$0xff]  }
  0x35   : > { %2075 = vmatpush1.bf16.msra.mxu0 %v2909_v32  ;;  %1912 = vmatprep.subr.bf16.mxu1 %v2910_v33  ;;  %v549_v32 = vcombine.high %v3419_v62, %v3419_v62  ;;  %v598_v33 = vcombine.high %v588_v4, %v588_v4  ;;  %v3010_v62 = vld [vmem:[%s3356_s28 + $0x184] ss:$8 sps:$4 sm:$0xff]   ;;  %v3014_v4 = vld [vmem:[%s3356_s28 + $0x190] ss:$8 sps:$4 sm:$0xff]  }
  0x36   : > { %2076 = vmatprep.subr.bf16.mxu0 %v2912_v34  ;;  %v3463_v34 = vrot.slane %v565_v20, %v3406_v50  ;;  %v2992_v50 = vld [vmem:[%s3356_s28 + $0x154] ss:$8 sps:$4 sm:$0xff]   ;;  %v3038_v20 = vld [vmem:[%s3356_s28 + $0x1d0] ss:$8 sps:$4 sm:$0xff]  }
  0x38   : > { %1913 = vmatpush1.bf16.msra.mxu1 %v2914_v35  ;;  %v2966_v35 = vld [vmem:[%s3356_s28 + $0x110] ss:$8 sps:$4 sm:$0xff]  }
  0x39   : > { %2077 = vmatpush1.bf16.msra.mxu0 %v2915_v36  ;;  %1914 = vmatprep.subr.bf16.mxu1 %v2916_v40  ;;  %v2969_v36 = vld [vmem:[%s3356_s28 + $0x510] ss:$8 sps:$4 sm:$0xff]   ;;  %v2975_v40 = vld [vmem:[%s3356_s28 + $0x520] ss:$8 sps:$4 sm:$0xff]  }
  0x3a   : > { %2078 = vmatprep.subr.bf16.mxu0 %v2918_v41  ;;  %v2980_v41 = vld [vmem:[%s3356_s28 + $0x134] ss:$8 sps:$4 sm:$0xff]  }
  0x3c   : > { %1915 = vmatpush1.bf16.msra.mxu1 %v2920_v42  ;;  %v2983_v42 = vld [vmem:[%s3356_s28 + $0x534] ss:$8 sps:$4 sm:$0xff]  }
  0x3d   : > { %2079 = vmatpush1.bf16.msra.mxu0 %v2921_v45  ;;  %1916 = vmatprep.subr.bf16.mxu1 %v2922_v46  ;;  %v2981_v45 = vld [vmem:[%s3356_s28 + $0x530] ss:$8 sps:$4 sm:$0xff]   ;;  %v2986_v46 = vld [vmem:[%s3356_s28 + $0x144] ss:$8 sps:$4 sm:$0xff]  }
  0x3e   : > { %2080 = vmatprep.subr.bf16.mxu0 %v2924_v47  ;;  %v2989_v47 = vld [vmem:[%s3356_s28 + $0x544] ss:$8 sps:$4 sm:$0xff]  }
  0x40   : > { %1917 = vmatpush1.bf16.msra.mxu1 %v2926_v48  ;;  %v2984_v48 = vld [vmem:[%s3356_s28 + $0x140] ss:$8 sps:$4 sm:$0xff]  }
  0x41   : > { %2081 = vmatpush1.bf16.msra.mxu0 %v2927_v49  ;;  %1918 = vmatprep.subr.bf16.mxu1 %v2928_v51  ;;  %v2987_v49 = vld [vmem:[%s3356_s28 + $0x540] ss:$8 sps:$4 sm:$0xff]   ;;  %v2995_v51 = vld [vmem:[%s3356_s28 + $0x554] ss:$8 sps:$4 sm:$0xff]  }
  0x42   : > { %2082 = vmatprep.subr.bf16.mxu0 %v2930_v52  ;;  %v2990_v52 = vld [vmem:[%s3356_s28 + $0x150] ss:$8 sps:$4 sm:$0xff]  }
  0x44   : > { %1919 = vmatpush1.bf16.msra.mxu1 %v2932_v54  ;;  %v2998_v54 = vld [vmem:[%s3356_s28 + $0x164] ss:$8 sps:$4 sm:$0xff]  }
  0x45   : > { %2083 = vmatpush1.bf16.msra.mxu0 %v2933_v56  ;;  %1920 = vmatprep.subr.bf16.mxu1 %v2934_v58  ;;  %v2996_v56 = vld [vmem:[%s3356_s28 + $0x160] ss:$8 sps:$4 sm:$0xff]   ;;  %v3004_v58 = vld [vmem:[%s3356_s28 + $0x174] ss:$8 sps:$4 sm:$0xff]  }
  0x46   : > { %2084 = vmatprep.subr.bf16.mxu0 %v2936_v59  ;;  %v3007_v59 = vld [vmem:[%s3356_s28 + $0x574] ss:$8 sps:$4 sm:$0xff]  }
  0x48   : > { %1921 = vmatpush1.bf16.msra.mxu1 %v2938_v0  ;;  %v3008_v0 = vld [vmem:[%s3356_s28 + $0x180] ss:$8 sps:$4 sm:$0xff]  }
  0x49   : > { %2085 = vmatpush1.bf16.msra.mxu0 %v2939_v1  ;;  %1922 = vmatprep.subr.bf16.mxu1 %v2940_v2  ;;  %v3011_v1 = vld [vmem:[%s3356_s28 + $0x580] ss:$8 sps:$4 sm:$0xff]   ;;  %v3016_v2 = vld [vmem:[%s3356_s28 + $0x194] ss:$8 sps:$4 sm:$0xff]  }
  0x4a   : > { %2086 = vmatprep.subr.bf16.mxu0 %v2942_v3  ;;  %v3019_v3 = vld [vmem:[%s3356_s28 + $0x594] ss:$8 sps:$4 sm:$0xff]  }
  0x4c   : > { %1923 = vmatpush1.bf16.msra.mxu1 %v2944_v5  ;;  %v3017_v5 = vld [vmem:[%s3356_s28 + $0x590] ss:$8 sps:$4 sm:$0xff]  }
  0x4d   : > { %2087 = vmatpush1.bf16.msra.mxu0 %v2945_v6  ;;  %1924 = vmatprep.subr.bf16.mxu1 %v2946_v7  ;;  %v3022_v6 = vld [vmem:[%s3356_s28 + $0x1a4] ss:$8 sps:$4 sm:$0xff]  }
  0x4e   : > { %2088 = vmatprep.subr.bf16.mxu0 %v2948_v8  ;;  %v3025_v7 = vld [vmem:[%s3356_s28 + $0x5a4] ss:$8 sps:$4 sm:$0xff]   ;;  %v3020_v8 = vld [vmem:[%s3356_s28 + $0x1a0] ss:$8 sps:$4 sm:$0xff]  }
  0x50   : > { %1925 = vmatpush1.bf16.msra.mxu1 %v2950_v9  ;;  %v3023_v9 = vld [vmem:[%s3356_s28 + $0x5a0] ss:$8 sps:$4 sm:$0xff]  }
  0x51   : > { %2089 = vmatpush1.bf16.msra.mxu0 %v2951_v10  ;;  %1926 = vmatprep.subr.bf16.mxu1 %v2952_v11  ;;  %v3028_v10 = vld [vmem:[%s3356_s28 + $0x1b4] ss:$8 sps:$4 sm:$0xff]  }
  0x52   : > { %2090 = vmatprep.subr.bf16.mxu0 %v2954_v12  ;;  %v3031_v11 = vld [vmem:[%s3356_s28 + $0x5b4] ss:$8 sps:$4 sm:$0xff]   ;;  %v3026_v12 = vld [vmem:[%s3356_s28 + $0x1b0] ss:$8 sps:$4 sm:$0xff]  }
  0x54   : > { %1927 = vmatpush1.bf16.msra.mxu1 %v2956_v15  ;;  %v3037_v15 = vld [vmem:[%s3356_s28 + $0x5c4] ss:$8 sps:$4 sm:$0xff]  }
  0x55   : > { %2091 = vmatpush1.bf16.msra.mxu0 %v2957_v16  ;;  %1937 = vmatprep.subr.bf16.mxu1 %v2961_v17  ;;  %v3032_v16 = vld [vmem:[%s3356_s28 + $0x1c0] ss:$8 sps:$4 sm:$0xff]  }
  0x56   : > { %2101 = vmatprep.subr.bf16.mxu0 %v2965_v18  ;;  %v3035_v17 = vld [vmem:[%s3356_s28 + $0x5c0] ss:$8 sps:$4 sm:$0xff]   ;;  %v3040_v18 = vld [vmem:[%s3356_s28 + $0x1d4] ss:$8 sps:$4 sm:$0xff]  }
  0x57   : > { %1929 = vmatmul.mubr.bf16.vlgmr.msra.gmra.mrb[0].mxu1 %v3442_v21 }
  0x58   : > { %2093 = vmatmul.mubr.bf16.vlgmr.msra.gmra.mrb[0].mxu0 %v3445_v22  ;;  %1938 = vmatpush1.bf16.msra.mxu1 %v2959_v25  ;;  %v3049_v25 = vld [vmem:[%s3356_s28 + $0x5e4] ss:$8 sps:$4 sm:$0xff]  }
  0x59   : > { %2102 = vmatpush1.bf16.msra.mxu0 %v2963_v26  ;;  %1939 = vmatprep.subr.bf16.mxu1 %v2968_v27  ;;  %v3044_v26 = vld [vmem:[%s3356_s28 + $0x1e0] ss:$8 sps:$4 sm:$0xff]  }
  0x5a   : > { %2103 = vmatprep.subr.bf16.mxu0 %v2971_v28  ;;  %1969 = vmatprep.mubr.bf16.mxu1 %v549_v32  ;;  %v3047_v27 = vld [vmem:[%s3356_s28 + $0x5e0] ss:$8 sps:$4 sm:$0xff]   ;;  %v3052_v28 = vld [vmem:[%s3356_s28 + $0x1f4] ss:$8 sps:$4 sm:$0xff]  }
  0x5b   : > { %2133 = vmatprep.mubr.bf16.mxu0 %v598_v33  ;;  %v3055_v32 = vld [vmem:[%s3356_s28 + $0x5f4] ss:$8 sps:$4 sm:$0xff]   ;;  %v3050_v33 = vld [vmem:[%s3356_s28 + $0x1f0] ss:$8 sps:$4 sm:$0xff]  }
  0x5c   : > { %1940 = vmatpush1.bf16.msra.mxu1 %v2966_v35  ;;  %v3053_v35 = vld [vmem:[%s3356_s28 + $0x5f0] ss:$8 sps:$4 sm:$0xff]  }
  0x5d   : > { %2104 = vmatpush1.bf16.msra.mxu0 %v2969_v36  ;;  %1941 = vmatprep.subr.bf16.mxu1 %v2974_v37  ;;  %v3058_v36 = vld [vmem:[%s3356_s28 + $0x204] ss:$8 sps:$4 sm:$0xff]  }
  0x5e   : > { %2105 = vmatprep.subr.bf16.mxu0 %v2977_v38  ;;  %v3061_v37 = vld [vmem:[%s3356_s28 + $0x604] ss:$8 sps:$4 sm:$0xff]   ;;  %v547_v38 = vcombine.high %v3442_v21, %v3442_v21  ;;  %v3062_v21 = vld [vmem:[%s3356_s28 + $0x210] ss:$8 sps:$4 sm:$0xff]  }
  0x60   : > { %1942 = vmatpush1.bf16.msra.mxu1 %v2972_v39  ;;  %v596_v39 = vcombine.high %v3445_v22, %v3445_v22  ;;  %v3065_v22 = vld [vmem:[%s3356_s28 + $0x610] ss:$8 sps:$4 sm:$0xff]  }
  0x61   : > { %2106 = vmatpush1.bf16.msra.mxu0 %v2975_v40  ;;  %1943 = vmatprep.subr.bf16.mxu1 %v2980_v41  ;;  %v3056_v40 = vld [vmem:[%s3356_s28 + $0x200] ss:$8 sps:$4 sm:$0xff]  }
  0x62   : > { %2107 = vmatprep.subr.bf16.mxu0 %v2983_v42  ;;  %v3059_v41 = vld [vmem:[%s3356_s28 + $0x600] ss:$8 sps:$4 sm:$0xff]   ;;  %v3064_v42 = vld [vmem:[%s3356_s28 + $0x214] ss:$8 sps:$4 sm:$0xff]  }
  0x64   : > { %1944 = vmatpush1.bf16.msra.mxu1 %v2978_v43  ;;  %v3067_v43 = vld [vmem:[%s3356_s28 + $0x614] ss:$8 sps:$4 sm:$0xff]  }
  0x65   : > { %2108 = vmatpush1.bf16.msra.mxu0 %v2981_v45  ;;  %1945 = vmatprep.subr.bf16.mxu1 %v2986_v46  ;;  %v3070_v45 = vld [vmem:[%s3356_s28 + $0x224] ss:$8 sps:$4 sm:$0xff]  }
  0x66   : > { %2109 = vmatprep.subr.bf16.mxu0 %v2989_v47  ;;  %v3073_v46 = vld [vmem:[%s3356_s28 + $0x624] ss:$8 sps:$4 sm:$0xff]   ;;  %v3068_v47 = vld [vmem:[%s3356_s28 + $0x220] ss:$8 sps:$4 sm:$0xff]  }
  0x68   : > { %1946 = vmatpush1.bf16.msra.mxu1 %v2984_v48  ;;  %v3071_v48 = vld [vmem:[%s3356_s28 + $0x620] ss:$8 sps:$4 sm:$0xff]  }
  0x69   : > { %2110 = vmatpush1.bf16.msra.mxu0 %v2987_v49  ;;  %1947 = vmatprep.subr.bf16.mxu1 %v2992_v50  ;;  %v3076_v49 = vld [vmem:[%s3356_s28 + $0x234] ss:$8 sps:$4 sm:$0xff]  }
  0x6a   : > { %2111 = vmatprep.subr.bf16.mxu0 %v2995_v51  ;;  %v3079_v50 = vld [vmem:[%s3356_s28 + $0x634] ss:$8 sps:$4 sm:$0xff]   ;;  %v3074_v51 = vld [vmem:[%s3356_s28 + $0x230] ss:$8 sps:$4 sm:$0xff]  }
  0x6c   : > { %1948 = vmatpush1.bf16.msra.mxu1 %v2990_v52  ;;  %v3077_v52 = vld [vmem:[%s3356_s28 + $0x630] ss:$8 sps:$4 sm:$0xff]  }
  0x6d   : > { %2112 = vmatpush1.bf16.msra.mxu0 %v2993_v53  ;;  %1949 = vmatprep.subr.bf16.mxu1 %v2998_v54  ;;  %v3082_v53 = vld [vmem:[%s3356_s28 + $0x244] ss:$8 sps:$4 sm:$0xff]  }
  0x6e   : > { %2113 = vmatprep.subr.bf16.mxu0 %v3001_v55  ;;  %v3085_v54 = vld [vmem:[%s3356_s28 + $0x644] ss:$8 sps:$4 sm:$0xff]   ;;  %v3080_v55 = vld [vmem:[%s3356_s28 + $0x240] ss:$8 sps:$4 sm:$0xff]  }
  0x70   : > { %1950 = vmatpush1.bf16.msra.mxu1 %v2996_v56  ;;  %v3083_v56 = vld [vmem:[%s3356_s28 + $0x640] ss:$8 sps:$4 sm:$0xff]  }
  0x71   : > { %2114 = vmatpush1.bf16.msra.mxu0 %v2999_v57  ;;  %1951 = vmatprep.subr.bf16.mxu1 %v3004_v58  ;;  %v3088_v57 = vld [vmem:[%s3356_s28 + $0x254] ss:$8 sps:$4 sm:$0xff]  }
  0x72   : > { %2115 = vmatprep.subr.bf16.mxu0 %v3007_v59  ;;  %v3091_v58 = vld [vmem:[%s3356_s28 + $0x654] ss:$8 sps:$4 sm:$0xff]   ;;  %v3086_v59 = vld [vmem:[%s3356_s28 + $0x250] ss:$8 sps:$4 sm:$0xff]  }
  0x74   : > { %1952 = vmatpush1.bf16.msra.mxu1 %v3002_v60  ;;  %v3089_v60 = vld [vmem:[%s3356_s28 + $0x650] ss:$8 sps:$4 sm:$0xff]  }
  0x75   : > { %2116 = vmatpush1.bf16.msra.mxu0 %v3005_v61  ;;  %1953 = vmatprep.subr.bf16.mxu1 %v3010_v62  ;;  %v3094_v61 = vld [vmem:[%s3356_s28 + $0x264] ss:$8 sps:$4 sm:$0xff]  }
  0x76   : > { %2117 = vmatprep.subr.bf16.mxu0 %v3013_v63  ;;  %v3097_v62 = vld [vmem:[%s3356_s28 + $0x664] ss:$8 sps:$4 sm:$0xff]   ;;  %v3092_v63 = vld [vmem:[%s3356_s28 + $0x260] ss:$8 sps:$4 sm:$0xff]  }
  0x78   : > { %1954 = vmatpush1.bf16.msra.mxu1 %v3008_v0  ;;  %v3095_v0 = vld [vmem:[%s3356_s28 + $0x660] ss:$8 sps:$4 sm:$0xff]  }
  0x79   : > { %2118 = vmatpush1.bf16.msra.mxu0 %v3011_v1  ;;  %1955 = vmatprep.subr.bf16.mxu1 %v3016_v2  ;;  %v3100_v1 = vld [vmem:[%s3356_s28 + $0x274] ss:$8 sps:$4 sm:$0xff]  }
  0x7a   : > { %2119 = vmatprep.subr.bf16.mxu0 %v3019_v3  ;;  %v3103_v2 = vld [vmem:[%s3356_s28 + $0x674] ss:$8 sps:$4 sm:$0xff]   ;;  %v3098_v3 = vld [vmem:[%s3356_s28 + $0x270] ss:$8 sps:$4 sm:$0xff]  }
  0x7c   : > { %1956 = vmatpush1.bf16.msra.mxu1 %v3014_v4  ;;  %v3101_v4 = vld [vmem:[%s3356_s28 + $0x670] ss:$8 sps:$4 sm:$0xff]  }
  0x7d   : > { %2120 = vmatpush1.bf16.msra.mxu0 %v3017_v5  ;;  %1957 = vmatprep.subr.bf16.mxu1 %v3022_v6  ;;  %v3106_v5 = vld [vmem:[%s3356_s28 + $0x284] ss:$8 sps:$4 sm:$0xff]  }
  0x7e   : > { %2121 = vmatprep.subr.bf16.mxu0 %v3025_v7  ;;  %v3109_v6 = vld [vmem:[%s3356_s28 + $0x684] ss:$8 sps:$4 sm:$0xff]   ;;  %v3104_v7 = vld [vmem:[%s3356_s28 + $0x280] ss:$8 sps:$4 sm:$0xff]  }
  0x80   : > { %1958 = vmatpush1.bf16.msra.mxu1 %v3020_v8  ;;  %v3107_v8 = vld [vmem:[%s3356_s28 + $0x680] ss:$8 sps:$4 sm:$0xff]  }
  0x81   : > { %2122 = vmatpush1.bf16.msra.mxu0 %v3023_v9  ;;  %1959 = vmatprep.subr.bf16.mxu1 %v3028_v10  ;;  %v3112_v9 = vld [vmem:[%s3356_s28 + $0x294] ss:$8 sps:$4 sm:$0xff]  }
  0x82   : > { %2123 = vmatprep.subr.bf16.mxu0 %v3031_v11  ;;  %v3115_v10 = vld [vmem:[%s3356_s28 + $0x694] ss:$8 sps:$4 sm:$0xff]   ;;  %v3110_v11 = vld [vmem:[%s3356_s28 + $0x290] ss:$8 sps:$4 sm:$0xff]  }
  0x84   : > { %1960 = vmatpush1.bf16.msra.mxu1 %v3026_v12  ;;  %v3113_v12 = vld [vmem:[%s3356_s28 + $0x690] ss:$8 sps:$4 sm:$0xff]  }
  0x85   : > { %2124 = vmatpush1.bf16.msra.mxu0 %v3029_v13  ;;  %1961 = vmatprep.subr.bf16.mxu1 %v3034_v14  ;;  %v3118_v13 = vld [vmem:[%s3356_s28 + $0x2a4] ss:$8 sps:$4 sm:$0xff]  }
  0x86   : > { %2125 = vmatprep.subr.bf16.mxu0 %v3037_v15  ;;  %v3121_v14 = vld [vmem:[%s3356_s28 + $0x6a4] ss:$8 sps:$4 sm:$0xff]   ;;  %v3116_v15 = vld [vmem:[%s3356_s28 + $0x2a0] ss:$8 sps:$4 sm:$0xff]  }
  0x88   : > { %1962 = vmatpush1.bf16.msra.mxu1 %v3032_v16  ;;  %v3119_v16 = vld [vmem:[%s3356_s28 + $0x6a0] ss:$8 sps:$4 sm:$0xff]  }
  0x89   : > { %2126 = vmatpush1.bf16.msra.mxu0 %v3035_v17  ;;  %1963 = vmatprep.subr.bf16.mxu1 %v3040_v18  ;;  %v3124_v17 = vld [vmem:[%s3356_s28 + $0x2b4] ss:$8 sps:$4 sm:$0xff]  }
  0x8a   : > { %2127 = vmatprep.subr.bf16.mxu0 %v3043_v19  ;;  %v3127_v18 = vld [vmem:[%s3356_s28 + $0x6b4] ss:$8 sps:$4 sm:$0xff]   ;;  %v3122_v19 = vld [vmem:[%s3356_s28 + $0x2b0] ss:$8 sps:$4 sm:$0xff]  }
  0x8c   : > { %1964 = vmatpush1.bf16.msra.mxu1 %v3038_v20  ;;  %v3125_v20 = vld [vmem:[%s3356_s28 + $0x6b0] ss:$8 sps:$4 sm:$0xff]  }
  0x8d   : > { %2128 = vmatpush1.bf16.msra.mxu0 %v3041_v23  ;;  %1965 = vmatprep.subr.bf16.mxu1 %v3046_v24  ;;  %v3130_v23 = vld [vmem:[%s3356_s28 + $0x2c4] ss:$8 sps:$4 sm:$0xff]  }
  0x8e   : > { %2129 = vmatprep.subr.bf16.mxu0 %v3049_v25  ;;  %v3133_v24 = vld [vmem:[%s3356_s28 + $0x6c4] ss:$8 sps:$4 sm:$0xff]   ;;  %v3128_v25 = vld [vmem:[%s3356_s28 + $0x2c0] ss:$8 sps:$4 sm:$0xff]  }
  0x90   : > { %1966 = vmatpush1.bf16.msra.mxu1 %v3044_v26  ;;  %v3131_v26 = vld [vmem:[%s3356_s28 + $0x6c0] ss:$8 sps:$4 sm:$0xff]  }
  0x91   : > { %2130 = vmatpush1.bf16.msra.mxu0 %v3047_v27  ;;  %1967 = vmatprep.subr.bf16.mxu1 %v3052_v28  ;;  %v3136_v27 = vld [vmem:[%s3356_s28 + $0x2d4] ss:$8 sps:$4 sm:$0xff]  }
  0x92   : > { %2131 = vmatprep.subr.bf16.mxu0 %v3055_v32  ;;  %v3139_v28 = vld [vmem:[%s3356_s28 + $0x6d4] ss:$8 sps:$4 sm:$0xff]   ;;  %v3134_v32 = vld [vmem:[%s3356_s28 + $0x2d0] ss:$8 sps:$4 sm:$0xff]  }
  0x94   : > { %1968 = vmatpush1.bf16.msra.mxu1 %v3050_v33  ;;  %v3137_v33 = vld [vmem:[%s3356_s28 + $0x6d0] ss:$8 sps:$4 sm:$0xff]  }
  0x95   : > { %2132 = vmatpush1.bf16.msra.mxu0 %v3053_v35  ;;  %1978 = vmatprep.subr.bf16.mxu1 %v3058_v36  ;;  %v3142_v35 = vld [vmem:[%s3356_s28 + $0x2e4] ss:$8 sps:$4 sm:$0xff]  }
  0x96   : > { %2142 = vmatprep.subr.bf16.mxu0 %v3061_v37  ;;  %v3145_v36 = vld [vmem:[%s3356_s28 + $0x6e4] ss:$8 sps:$4 sm:$0xff]   ;;  %v3140_v37 = vld [vmem:[%s3356_s28 + $0x2e0] ss:$8 sps:$4 sm:$0xff]  }
  0x97   : > { %1970 = vmatmul.mubr.bf16.vlgmr.msra.gmra.mrb[0].mxu1 %v547_v38  ;;  %v3143_v38 = vld [vmem:[%s3356_s28 + $0x6e0] ss:$8 sps:$4 sm:$0xff]  }
  0x98   : > { %2134 = vmatmul.mubr.bf16.vlgmr.msra.gmra.mrb[0].mxu0 %v596_v39  ;;  %1979 = vmatpush1.bf16.msra.mxu1 %v3056_v40  ;;  %v3148_v39 = vld [vmem:[%s3356_s28 + $0x2f4] ss:$8 sps:$4 sm:$0xff]  }
  0x99   : > { %2143 = vmatpush1.bf16.msra.mxu0 %v3059_v41  ;;  %1980 = vmatprep.subr.bf16.mxu1 %v3064_v42  ;;  %v3151_v40 = vld [vmem:[%s3356_s28 + $0x6f4] ss:$8 sps:$4 sm:$0xff]   ;;  %v3146_v41 = vld [vmem:[%s3356_s28 + $0x2f0] ss:$8 sps:$4 sm:$0xff]  }
  0x9a   : > { %2144 = vmatprep.subr.bf16.mxu0 %v3067_v43  ;;  %2010 = vmatprep.mubr.bf16.mxu1 %v3452_v29  ;;  %v3149_v42 = vld [vmem:[%s3356_s28 + $0x6f0] ss:$8 sps:$4 sm:$0xff]   ;;  %v3154_v43 = vld [vmem:[%s3356_s28 + $0x304] ss:$8 sps:$4 sm:$0xff]  }
  0x9b   : > { %2174 = vmatprep.mubr.bf16.mxu0 %v3455_v30 }
  0x9c   : > { %1981 = vmatpush1.bf16.msra.mxu1 %v3062_v21  ;;  %v3157_v21 = vld [vmem:[%s3356_s28 + $0x704] ss:$8 sps:$4 sm:$0xff]  }
  0x9d   : > { %2145 = vmatpush1.bf16.msra.mxu0 %v3065_v22  ;;  %1982 = vmatprep.subr.bf16.mxu1 %v3070_v45  ;;  %v3152_v22 = vld [vmem:[%s3356_s28 + $0x300] ss:$8 sps:$4 sm:$0xff]  }
  0x9e   : > { %2146 = vmatprep.subr.bf16.mxu0 %v3073_v46  ;;  %v3155_v45 = vld [vmem:[%s3356_s28 + $0x700] ss:$8 sps:$4 sm:$0xff]   ;;  %v3160_v46 = vld [vmem:[%s3356_s28 + $0x314] ss:$8 sps:$4 sm:$0xff]  }
  0xa0   : > { %1983 = vmatpush1.bf16.msra.mxu1 %v3068_v47  ;;  %v3163_v47 = vld [vmem:[%s3356_s28 + $0x714] ss:$8 sps:$4 sm:$0xff]  }
  0xa1   : > { %2147 = vmatpush1.bf16.msra.mxu0 %v3071_v48  ;;  %1984 = vmatprep.subr.bf16.mxu1 %v3076_v49  ;;  %v550_v48 = vcombine.high %v3452_v29, %v3452_v29  ;;  %v599_v49 = vcombine.high %v3455_v30, %v3455_v30  ;;  %v3166_v29 = vld [vmem:[%s3356_s28 + $0x324] ss:$8 sps:$4 sm:$0xff]   ;;  %v3164_v30 = vld [vmem:[%s3356_s28 + $0x320] ss:$8 sps:$4 sm:$0xff]  }
  0xa2   : > { %2148 = vmatprep.subr.bf16.mxu0 %v3079_v50  ;;  %v3158_v50 = vld [vmem:[%s3356_s28 + $0x310] ss:$8 sps:$4 sm:$0xff]  }
  0xa4   : > { %1985 = vmatpush1.bf16.msra.mxu1 %v3074_v51  ;;  %v3161_v51 = vld [vmem:[%s3356_s28 + $0x710] ss:$8 sps:$4 sm:$0xff]  }
  0xa5   : > { %2149 = vmatpush1.bf16.msra.mxu0 %v3077_v52  ;;  %1986 = vmatprep.subr.bf16.mxu1 %v3082_v53  ;;  %v3169_v52 = vld [vmem:[%s3356_s28 + $0x724] ss:$8 sps:$4 sm:$0xff]   ;;  %v3167_v53 = vld [vmem:[%s3356_s28 + $0x720] ss:$8 sps:$4 sm:$0xff]  }
  0xa6   : > { %2150 = vmatprep.subr.bf16.mxu0 %v3085_v54  ;;  %v3172_v54 = vld [vmem:[%s3356_s28 + $0x334] ss:$8 sps:$4 sm:$0xff]  }
  0xa8   : > { %1987 = vmatpush1.bf16.msra.mxu1 %v3080_v55  ;;  %v3175_v55 = vld [vmem:[%s3356_s28 + $0x734] ss:$8 sps:$4 sm:$0xff]  }
  0xa9   : > { %2151 = vmatpush1.bf16.msra.mxu0 %v3083_v56  ;;  %1988 = vmatprep.subr.bf16.mxu1 %v3088_v57  ;;  %v3170_v56 = vld [vmem:[%s3356_s28 + $0x330] ss:$8 sps:$4 sm:$0xff]  }
  0xaa   : > { %2152 = vmatprep.subr.bf16.mxu0 %v3091_v58  ;;  %v3173_v57 = vld [vmem:[%s3356_s28 + $0x730] ss:$8 sps:$4 sm:$0xff]   ;;  %v3178_v58 = vld [vmem:[%s3356_s28 + $0x344] ss:$8 sps:$4 sm:$0xff]  }
  0xac   : > { %1989 = vmatpush1.bf16.msra.mxu1 %v3086_v59  ;;  %v3181_v59 = vld [vmem:[%s3356_s28 + $0x744] ss:$8 sps:$4 sm:$0xff]  }
  0xad   : > { %2153 = vmatpush1.bf16.msra.mxu0 %v3089_v60  ;;  %1990 = vmatprep.subr.bf16.mxu1 %v3094_v61  ;;  %v3176_v60 = vld [vmem:[%s3356_s28 + $0x340] ss:$8 sps:$4 sm:$0xff]  }
  0xae   : > { %2154 = vmatprep.subr.bf16.mxu0 %v3097_v62  ;;  %v3179_v61 = vld [vmem:[%s3356_s28 + $0x740] ss:$8 sps:$4 sm:$0xff]   ;;  %v3184_v62 = vld [vmem:[%s3356_s28 + $0x354] ss:$8 sps:$4 sm:$0xff]  }
  0xb0   : > { %1991 = vmatpush1.bf16.msra.mxu1 %v3092_v63  ;;  %v3187_v63 = vld [vmem:[%s3356_s28 + $0x754] ss:$8 sps:$4 sm:$0xff]  }
  0xb1   : > { %2155 = vmatpush1.bf16.msra.mxu0 %v3095_v0  ;;  %1992 = vmatprep.subr.bf16.mxu1 %v3100_v1  ;;  %v3182_v0 = vld [vmem:[%s3356_s28 + $0x350] ss:$8 sps:$4 sm:$0xff]  }
  0xb2   : > { %2156 = vmatprep.subr.bf16.mxu0 %v3103_v2  ;;  %v3185_v1 = vld [vmem:[%s3356_s28 + $0x750] ss:$8 sps:$4 sm:$0xff]   ;;  %v3190_v2 = vld [vmem:[%s3356_s28 + $0x364] ss:$8 sps:$4 sm:$0xff]  }
  0xb4   : > { %1993 = vmatpush1.bf16.msra.mxu1 %v3098_v3  ;;  %v3193_v3 = vld [vmem:[%s3356_s28 + $0x764] ss:$8 sps:$4 sm:$0xff]  }
  0xb5   : > { %2157 = vmatpush1.bf16.msra.mxu0 %v3101_v4  ;;  %1994 = vmatprep.subr.bf16.mxu1 %v3106_v5  ;;  %v3188_v4 = vld [vmem:[%s3356_s28 + $0x360] ss:$8 sps:$4 sm:$0xff]  }
  0xb6   : > { %2158 = vmatprep.subr.bf16.mxu0 %v3109_v6  ;;  %v3191_v5 = vld [vmem:[%s3356_s28 + $0x760] ss:$8 sps:$4 sm:$0xff]   ;;  %v3196_v6 = vld [vmem:[%s3356_s28 + $0x374] ss:$8 sps:$4 sm:$0xff]  }
  0xb8   : > { %1995 = vmatpush1.bf16.msra.mxu1 %v3104_v7  ;;  %v3199_v7 = vld [vmem:[%s3356_s28 + $0x774] ss:$8 sps:$4 sm:$0xff]  }
  0xb9   : > { %2159 = vmatpush1.bf16.msra.mxu0 %v3107_v8  ;;  %1996 = vmatprep.subr.bf16.mxu1 %v3112_v9  ;;  %v3194_v8 = vld [vmem:[%s3356_s28 + $0x370] ss:$8 sps:$4 sm:$0xff]  }
  0xba   : > { %2160 = vmatprep.subr.bf16.mxu0 %v3115_v10  ;;  %v3197_v9 = vld [vmem:[%s3356_s28 + $0x770] ss:$8 sps:$4 sm:$0xff]   ;;  %v3202_v10 = vld [vmem:[%s3356_s28 + $0x384] ss:$8 sps:$4 sm:$0xff]  }
  0xbc   : > { %1997 = vmatpush1.bf16.msra.mxu1 %v3110_v11  ;;  %v3205_v11 = vld [vmem:[%s3356_s28 + $0x784] ss:$8 sps:$4 sm:$0xff]  }
  0xbd   : > { %2161 = vmatpush1.bf16.msra.mxu0 %v3113_v12  ;;  %1998 = vmatprep.subr.bf16.mxu1 %v3118_v13  ;;  %v3200_v12 = vld [vmem:[%s3356_s28 + $0x380] ss:$8 sps:$4 sm:$0xff]  }
  0xbe   : > { %2162 = vmatprep.subr.bf16.mxu0 %v3121_v14  ;;  %v3203_v13 = vld [vmem:[%s3356_s28 + $0x780] ss:$8 sps:$4 sm:$0xff]   ;;  %v3208_v14 = vld [vmem:[%s3356_s28 + $0x394] ss:$8 sps:$4 sm:$0xff]  }
  0xc0   : > { %1999 = vmatpush1.bf16.msra.mxu1 %v3116_v15  ;;  %v3211_v15 = vld [vmem:[%s3356_s28 + $0x794] ss:$8 sps:$4 sm:$0xff]  }
  0xc1   : > { %2163 = vmatpush1.bf16.msra.mxu0 %v3119_v16  ;;  %2000 = vmatprep.subr.bf16.mxu1 %v3124_v17  ;;  %v3206_v16 = vld [vmem:[%s3356_s28 + $0x390] ss:$8 sps:$4 sm:$0xff]  }
  0xc2   : > { %2164 = vmatprep.subr.bf16.mxu0 %v3127_v18  ;;  %v3209_v17 = vld [vmem:[%s3356_s28 + $0x790] ss:$8 sps:$4 sm:$0xff]   ;;  %v3214_v18 = vld [vmem:[%s3356_s28 + $0x3a4] ss:$8 sps:$4 sm:$0xff]  }
  0xc4   : > { %2001 = vmatpush1.bf16.msra.mxu1 %v3122_v19  ;;  %v3217_v19 = vld [vmem:[%s3356_s28 + $0x7a4] ss:$8 sps:$4 sm:$0xff]  }
  0xc5   : > { %2165 = vmatpush1.bf16.msra.mxu0 %v3125_v20  ;;  %2002 = vmatprep.subr.bf16.mxu1 %v3130_v23  ;;  %v3212_v20 = vld [vmem:[%s3356_s28 + $0x3a0] ss:$8 sps:$4 sm:$0xff]  }
  0xc6   : > { %2166 = vmatprep.subr.bf16.mxu0 %v3133_v24  ;;  %v3215_v23 = vld [vmem:[%s3356_s28 + $0x7a0] ss:$8 sps:$4 sm:$0xff]   ;;  %v3220_v24 = vld [vmem:[%s3356_s28 + $0x3b4] ss:$8 sps:$4 sm:$0xff]  }
  0xc8   : > { %2003 = vmatpush1.bf16.msra.mxu1 %v3128_v25  ;;  %v3223_v25 = vld [vmem:[%s3356_s28 + $0x7b4] ss:$8 sps:$4 sm:$0xff]  }
  0xc9   : > { %2167 = vmatpush1.bf16.msra.mxu0 %v3131_v26  ;;  %2004 = vmatprep.subr.bf16.mxu1 %v3136_v27  ;;  %v3218_v26 = vld [vmem:[%s3356_s28 + $0x3b0] ss:$8 sps:$4 sm:$0xff]  }
  0xca   : > { %2168 = vmatprep.subr.bf16.mxu0 %v3139_v28  ;;  %v3221_v27 = vld [vmem:[%s3356_s28 + $0x7b0] ss:$8 sps:$4 sm:$0xff]   ;;  %v3226_v28 = vld [vmem:[%s3356_s28 + $0x3c4] ss:$8 sps:$4 sm:$0xff]  }
  0xcc   : > { %2005 = vmatpush1.bf16.msra.mxu1 %v3134_v32  ;;  %v3229_v32 = vld [vmem:[%s3356_s28 + $0x7c4] ss:$8 sps:$4 sm:$0xff]  }
  0xcd   : > { %2169 = vmatpush1.bf16.msra.mxu0 %v3137_v33  ;;  %2006 = vmatprep.subr.bf16.mxu1 %v3142_v35  ;;  %v3224_v33 = vld [vmem:[%s3356_s28 + $0x3c0] ss:$8 sps:$4 sm:$0xff]  }
  0xce   : > { %2170 = vmatprep.subr.bf16.mxu0 %v3145_v36  ;;  %v3227_v35 = vld [vmem:[%s3356_s28 + $0x7c0] ss:$8 sps:$4 sm:$0xff]   ;;  %v3232_v36 = vld [vmem:[%s3356_s28 + $0x3d4] ss:$8 sps:$4 sm:$0xff]  }
  0xd0   : > { %2007 = vmatpush1.bf16.msra.mxu1 %v3140_v37  ;;  %v3235_v37 = vld [vmem:[%s3356_s28 + $0x7d4] ss:$8 sps:$4 sm:$0xff]  }
  0xd1   : > { %2171 = vmatpush1.bf16.msra.mxu0 %v3143_v38  ;;  %2008 = vmatprep.subr.bf16.mxu1 %v3148_v39  ;;  %v3230_v38 = vld [vmem:[%s3356_s28 + $0x3d0] ss:$8 sps:$4 sm:$0xff]  }
  0xd2   : > { %2172 = vmatprep.subr.bf16.mxu0 %v3151_v40  ;;  %v3233_v39 = vld [vmem:[%s3356_s28 + $0x7d0] ss:$8 sps:$4 sm:$0xff]   ;;  %v3238_v40 = vld [vmem:[%s3356_s28 + $0x3e4] ss:$8 sps:$4 sm:$0xff]  }
  0xd4   : > { %2009 = vmatpush1.bf16.msra.mxu1 %v3146_v41  ;;  %v3241_v41 = vld [vmem:[%s3356_s28 + $0x7e4] ss:$8 sps:$4 sm:$0xff]  }
  0xd5   : > { %2173 = vmatpush1.bf16.msra.mxu0 %v3149_v42  ;;  %2019 = vmatprep.subr.bf16.mxu1 %v3154_v43  ;;  %v3236_v42 = vld [vmem:[%s3356_s28 + $0x3e0] ss:$8 sps:$4 sm:$0xff]  }
  0xd6   : > { %2183 = vmatprep.subr.bf16.mxu0 %v3157_v21  ;;  %v3239_v43 = vld [vmem:[%s3356_s28 + $0x7e0] ss:$8 sps:$4 sm:$0xff]   ;;  %v3244_v21 = vld [vmem:[%s3356_s28 + $0x3f4] ss:$8 sps:$4 sm:$0xff]  }
  0xd7   : > { %2011 = vmatmul.mubr.bf16.vlgmr.msra.gmra.mrb[0].mxu1 %v3458_v31 }
  0xd8   : > { %2175 = vmatmul.mubr.bf16.vlgmr.msra.gmra.mrb[0].mxu0 %v3463_v34  ;;  %2020 = vmatpush1.bf16.msra.mxu1 %v3152_v22  ;;  %v3247_v22 = vld [vmem:[%s3356_s28 + $0x7f4] ss:$8 sps:$4 sm:$0xff]  }
  0xd9   : > { %2184 = vmatpush1.bf16.msra.mxu0 %v3155_v45  ;;  %2021 = vmatprep.subr.bf16.mxu1 %v3160_v46  ;;  %v3242_v45 = vld [vmem:[%s3356_s28 + $0x3f0] ss:$8 sps:$4 sm:$0xff]  }
  0xda   : > { %2185 = vmatprep.subr.bf16.mxu0 %v3163_v47  ;;  %2051 = vmatprep.mubr.bf16.mxu1 %v550_v48  ;;  %v3245_v46 = vld [vmem:[%s3356_s28 + $0x7f0] ss:$8 sps:$4 sm:$0xff]   ;;  %v548_v47 = vcombine.high %v3458_v31, %v3458_v31  ;;  %v597_v48 = vcombine.high %v3463_v34, %v3463_v34 }
  0xdb   : > { %2215 = vmatprep.mubr.bf16.mxu0 %v599_v49  ;;  %v3304_v49 = vmov 1983009808  }
  0xdc   : > { %2022 = vmatpush1.bf16.msra.mxu1 %v3158_v50  ;;  %v2228_v50 = vunpack.c.l.s4 %v3304_v49 }
  0xdd   : > { %2186 = vmatpush1.bf16.msra.mxu0 %v3161_v51  ;;  %2023 = vmatprep.subr.bf16.mxu1 %v3166_v29 }
  0xde   : > { %2187 = vmatprep.subr.bf16.mxu0 %v3169_v52  ;;  %v2229_v51 = vunpack.c.0.s8 %v2228_v50 }
  0xe0   : > { %2024 = vmatpush1.bf16.msra.mxu1 %v3164_v30 }
  0xe1   : > { %2188 = vmatpush1.bf16.msra.mxu0 %v3167_v53  ;;  %2025 = vmatprep.subr.bf16.mxu1 %v3172_v54 }
  0xe2   : > { %2189 = vmatprep.subr.bf16.mxu0 %v3175_v55 }
  0xe4   : > { %2026 = vmatpush1.bf16.msra.mxu1 %v3170_v56  ;;  %v2232_v56 = vsub.s32 %v2229_v51, %v3398_v44 }
  0xe5   : > { %2190 = vmatpush1.bf16.msra.mxu0 %v3173_v57  ;;  %2027 = vmatprep.subr.bf16.mxu1 %v3178_v58 }
  0xe6   : > { %2191 = vmatprep.subr.bf16.mxu0 %v3181_v59 }
  0xe8   : > { %2028 = vmatpush1.bf16.msra.mxu1 %v3176_v60  ;;  %v241_v60 = vld [vmem:[#allocation2] sm:$0xf] }
  0xe9   : > { %2192 = vmatpush1.bf16.msra.mxu0 %v3179_v61  ;;  %2029 = vmatprep.subr.bf16.mxu1 %v3184_v62 }
  0xea   : > { %2193 = vmatprep.subr.bf16.mxu0 %v3187_v63  ;;  %v3248_v63 = vld [vmem:[%s3756_s3 + $0x40] sm:$0xff] (!%p2773_p6)  }
  0xec   : > { %2030 = vmatpush1.bf16.msra.mxu1 %v3182_v0  ;;  %v3249_v0 = vld [vmem:[%s3756_s3] sm:$0xff] (!%p2773_p6)  }
  0xed   : > { %2194 = vmatpush1.bf16.msra.mxu0 %v3185_v1  ;;  %2031 = vmatprep.subr.bf16.mxu1 %v3190_v2  ;;  %v3250_v1 = vld [vmem:[%s3756_s3 + $0x48] sm:$0xff] (!%p2773_p6)  }
  0xee   : > { %2195 = vmatprep.subr.bf16.mxu0 %v3193_v3  ;;  %v3251_v2 = vld [vmem:[%s3756_s3 + $0x8] sm:$0xff] (!%p2773_p6)   ;;  %v3252_v3 = vld [vmem:[%s3756_s3 + $0x50] sm:$0xff] (!%p2773_p6)  }
  0xf0   : > { %2032 = vmatpush1.bf16.msra.mxu1 %v3188_v4  ;;  %v3253_v4 = vld [vmem:[%s3756_s3 + $0x10] sm:$0xff] (!%p2773_p6)  }
  0xf1   : > { %2196 = vmatpush1.bf16.msra.mxu0 %v3191_v5  ;;  %2033 = vmatprep.subr.bf16.mxu1 %v3196_v6  ;;  %v3254_v5 = vld [vmem:[%s3756_s3 + $0x58] sm:$0xff] (!%p2773_p6)  }
  0xf2   : > { %2197 = vmatprep.subr.bf16.mxu0 %v3199_v7  ;;  %v3255_v6 = vld [vmem:[%s3756_s3 + $0x18] sm:$0xff] (!%p2773_p6)   ;;  %v3256_v7 = vld [vmem:[%s3756_s3 + $0x60] sm:$0xff] (!%p2773_p6)  }
  0xf4   : > { %2034 = vmatpush1.bf16.msra.mxu1 %v3194_v8  ;;  %v2246_v8 = vsub.s32 (!%p2773_p6), 0, %v3398_v44 }
  0xf5   : > { %2198 = vmatpush1.bf16.msra.mxu0 %v3197_v9  ;;  %2035 = vmatprep.subr.bf16.mxu1 %v3202_v10  ;;  %v2250_v9 = vsub.s32 (!%p2773_p6), 1, %v3398_v44  ;;  %v3257_v10 = vld [vmem:[%s3756_s3 + $0x20] sm:$0xff] (!%p2773_p6)   ;;  %v3259_v44 = vld [vmem:[%s3756_s3 + $0x28] sm:$0xff] (!%p2773_p6)  }
  0xf6   : > { %2199 = vmatprep.subr.bf16.mxu0 %v3205_v11  ;;  %v3258_v11 = vld [vmem:[%s3756_s3 + $0x68] sm:$0xff] (!%p2773_p6)  }
  0xf8   : > { %2036 = vmatpush1.bf16.msra.mxu1 %v3200_v12  ;;  %v2242_v12 = vld [vmem:[%s3755_s2] sm:$0x3] (!%p2773_p6) }
  0xf9   : > { %2200 = vmatpush1.bf16.msra.mxu0 %v3203_v13  ;;  %2037 = vmatprep.subr.bf16.mxu1 %v3208_v14  ;;  %v2247_v13 = vrot.slane (!%p2773_p6), %v2242_v12, %v2246_v8  ;;  %v2251_v14 = vrot.slane (!%p2773_p6), %v2242_v12, %v2250_v9 }
  0xfa   : > { %2201 = vmatprep.subr.bf16.mxu0 %v3211_v15 }
  0xfb   : > { %v2252_v15 = vcombine.low (!%p2773_p6), %v2247_v13, %v2251_v14 }
  0xfc   : > { %2038 = vmatpush1.bf16.msra.mxu1 %v3206_v16  ;;  %v3260_v16 = vld [vmem:[%s3756_s3 + $0x70] sm:$0xff] (!%p2773_p6)  }
  0xfd   : > { %2202 = vmatpush1.bf16.msra.mxu0 %v3209_v17  ;;  %2039 = vmatprep.subr.bf16.mxu1 %v3214_v18  ;;  %v2259_v18 = vrot.slane (!%p2773_p6), %v2252_v15, %v2232_v56 }
  0xfe   : > { %2203 = vmatprep.subr.bf16.mxu0 %v3217_v19  ;;  %v3261_v19 = vld [vmem:[%s3756_s3 + $0x30] sm:$0xff] (!%p2773_p6)  }
 0x100   : > { %2040 = vmatpush1.bf16.msra.mxu1 %v3212_v20 }
 0x101   : > { %2204 = vmatpush1.bf16.msra.mxu0 %v3215_v23  ;;  %2041 = vmatprep.subr.bf16.mxu1 %v3220_v24  ;;  %v3262_v23 = vld [vmem:[%s3756_s3 + $0x78] sm:$0xff] (!%p2773_p6)  }
 0x102   : > { %2205 = vmatprep.subr.bf16.mxu0 %v3223_v25  ;;  %v3263_v25 = vld [vmem:[%s3756_s3 + $0x38] sm:$0xff] (!%p2773_p6)  }
 0x104   : > { %2042 = vmatpush1.bf16.msra.mxu1 %v3218_v26 }
 0x105   : > { %2206 = vmatpush1.bf16.msra.mxu0 %v3221_v27  ;;  %2043 = vmatprep.subr.bf16.mxu1 %v3226_v28 }
 0x106   : > { %2207 = vmatprep.subr.bf16.mxu0 %v3229_v32 }
 0x108   : > { %2044 = vmatpush1.bf16.msra.mxu1 %v3224_v33 }
 0x109   : > { %2208 = vmatpush1.bf16.msra.mxu0 %v3227_v35  ;;  %2045 = vmatprep.subr.bf16.mxu1 %v3232_v36  ;;  %v2774_v35 = vld [vmem:[%s3757_s4] ss:$0 sm:$0xff] (!%p2773_p6) }
 0x10a   : > { %2209 = vmatprep.subr.bf16.mxu0 %v3235_v37 }
 0x10c   : > { %2046 = vmatpush1.bf16.msra.mxu1 %v3230_v38 }
 0x10d   : > { %2210 = vmatpush1.bf16.msra.mxu0 %v3233_v39  ;;  %2047 = vmatprep.subr.bf16.mxu1 %v3238_v40 }
 0x10e   : > { %2211 = vmatprep.subr.bf16.mxu0 %v3241_v41 }
 0x110   : > { %2048 = vmatpush1.bf16.msra.mxu1 %v3236_v42 }
 0x111   : > { %2212 = vmatpush1.bf16.msra.mxu0 %v3239_v43  ;;  %2049 = vmatprep.subr.bf16.mxu1 %v3244_v21 }
 0x112   : > { %2213 = vmatprep.subr.bf16.mxu0 %v3247_v22 }
 0x114   : > { %2050 = vmatpush1.bf16.msra.mxu1 %v3242_v45 }
 0x115   : > { %2214 = vmatpush1.bf16.msra.mxu0 %v3245_v46 }
 0x116   : > { %2796 = vmatprep.subr.bf16.mxu0 (!%p2773_p6), %v3248_v63 }
 0x117   : > { %2052 = vmatmul.mubr.bf16.vlgmr.msra.gmra.mrb[0].mxu1 %v548_v47 }
 0x118   : > { %2216 = vmatmul.mubr.bf16.vlgmr.msra.gmra.mrb[0].mxu0 %v597_v48 }
 0x119   : > { %2797 = vmatpush3.bf16.msra.mxu0 (!%p2773_p6), %v3249_v0 }
 0x11a   : > { %2798 = vmatprep.subr.bf16.mxu0 (!%p2773_p6), %v3250_v1 }
 0x11d   : > { %2799 = vmatpush3.bf16.msra.mxu0 (!%p2773_p6), %v3251_v2 }
 0x11e   : > { %2800 = vmatprep.subr.bf16.mxu0 (!%p2773_p6), %v3252_v3 }
 0x121   : > { %2801 = vmatpush3.bf16.msra.mxu0 (!%p2773_p6), %v3253_v4 }
 0x122   : > { %2802 = vmatprep.subr.bf16.mxu0 (!%p2773_p6), %v3254_v5 }
 0x125   : > { %2803 = vmatpush3.bf16.msra.mxu0 (!%p2773_p6), %v3255_v6 }
 0x126   : > { %2804 = vmatprep.subr.bf16.mxu0 (!%p2773_p6), %v3256_v7 }
 0x129   : > { %2805 = vmatpush3.bf16.msra.mxu0 (!%p2773_p6), %v3257_v10 }
 0x12a   : > { %2806 = vmatprep.subr.bf16.mxu0 (!%p2773_p6), %v3258_v11 }
 0x12d   : > { %2807 = vmatpush3.bf16.msra.mxu0 (!%p2773_p6), %v3259_v44 }
 0x12e   : > { %2808 = vmatprep.subr.bf16.mxu0 (!%p2773_p6), %v3260_v16 }
 0x131   : > { %2809 = vmatpush3.bf16.msra.mxu0 (!%p2773_p6), %v3261_v19 }
 0x132   : > { %2810 = vmatprep.subr.bf16.mxu0 (!%p2773_p6), %v3262_v23 }
 0x135   : > { %2811 = vmatpush3.bf16.msra.mxu0 (!%p2773_p6), %v3263_v25 }
 0x1ea   : > { %v2053_v29 = vpop.f32.mrb[0].mxu1 }
 0x1eb   : > { %v2217_v52 = vpop.f32.mrb[0].mxu0  ;;  %v2055_v53 = vpop.f32.mrb[1].mxu1 }
 0x1ec   : > { %v2818_v30 = vadd.f32 %v2217_v52, %v2053_v29  ;;  %v2219_v54 = vpop.f32.mrb[1].mxu0  ;;  %v2057_v57 = vpop.f32.mrb[2].mxu1 }
 0x1ed   : > { %v2819_v55 = vadd.f32 %v2219_v54, %v2055_v53  ;;  %v2221_v31 = vpop.f32.mrb[2].mxu0  ;;  %v2058_v58 = vpop.f32.mrb[3].mxu1 }
 0x1ee   : > { %v2222_v59 = vpop.f32.mrb[3].mxu0 }
 0x1ef   : > { %v2226_v34 = vcombine.low %v2818_v30, %v2819_v55  ;;  %2240 = sbr.rel (%p2773_p6) target bundleno = 738 (0x2e2), region = 48 }
 0x1f1   : > { %v2233_v61 = vrot.slane %v2226_v34, %v2232_v56 }
 0x1f3   : > { %v2235_v62 = vadd.f32 %v2233_v61, %v241_v60 }
 0x1f5   : > { %2236 = vst [vmem:[#allocation2] sm:$0xf] %v2235_v62 }
 0x1fc   : > { %v2241_v17 = vld [vmem:[#allocation2] sm:$0xf] }
 0x1fd   : > { %v2261_v20 = vadd.f32 %v2259_v18, %v2241_v17 }
 0x1ff   : > { %v2262_v24 = vmax.f32 %v2261_v20, 0.0 }
 0x201   : > { %v2270_v26 = vrot.slane %v2262_v24, %v2232_v56 }
 0x203   : > { %v2271_v27 = vcombine.high %v2270_v26, %v2270_v26  ;;  %v2274_v28 = vpack.c.bf16 %v2270_v26, %v2270_v26 }
 0x205   : > { %v2275_v32 = vpack.c.bf16 %v2271_v27, %v2271_v27 }
 0x207   : > { %2443 = vmatprep.mubr.bf16.mxu0 %v2275_v32 }
 0x208   : > { %2444 = vmatmul.mubr.bf16.vlgmr.msra.gmra.mrb[0].mxu0 %v2274_v28 }
 0x2db   : > { %v2812_v33 = vpop.f32.mrb[0].mxu0 }
 0x2dc   : > { %v2813_v36 = vpop.f32.mrb[1].mxu0 }
 0x2dd   : > { %v2814_v37 = vadd.f32 %v2813_v36, %v2812_v33  ;;  %v2815_v38 = vpop.f32.mrb[2].mxu0 }
 0x2de   : > { %v2816_v39 = vpop.f32.mrb[3].mxu0 }
 0x2df   : > { %v2446_v40 = vadd.f32 %v2814_v37, %v2774_v35 }
 0x2e1   : > { %2452 = vst.msk [vmem:[#allocation3] sm:$0x3] %vm2451_vm0, %v2446_v40 }
 0x2e2 PF: > { %p2848_p7 = scmp.eq.s32.totalorder %s3342_s19, 3  ;;  %s3305_s17 = smov [#allocation3]  }
 0x2e3   : > { %s2460_s20 = sshll.u32 %s3305_s17, 4  ;;  %s2461_s20 = int_to_ptr.vmem [resolvable:$true] %s2460_s20 }
 0x2e4   : > { %s3264_s21 = scalar_lea.vmem %s2461_s20, 32  ;;  %p3271_p11 = scmp.lt.s32.totalorder %s2461_s20, %s2461_s20 }
 0x2e5   : > { %p3265_p8 = scmp.ne.s32.totalorder %s2461_s20, %s3264_s21  ;;  %p3272_p12 = scmp.lt.s32.totalorder %s3264_s21, %s3264_s21 }
 0x2e7   : > { %p3266_p9 = pnand %p3265_p8, %p2848_p7  ;;  %p3273_p13 = por %p3272_p12, %p3271_p11 }
 0x2e9   : > { %p3267_p10 = pneg %p3266_p9 }
 0x2eb   : > { %p3274_p0 = pnand %p3273_p13, %p3267_p10 }
 0x2ed   : > { %3277 = shalt.err (!%p3274_p0)
}
 0x2ee   : > { %s3278_s24 = scalar_lea.hbm %s3758_s5, 32 }
 0x2ef   : > { %p3279_p1 = scmp.ne.s32.totalorder %s3758_s5, %s3278_s24  ;;  %p3284_p4 = scmp.lt.u32.totalorder %s3278_s24, %s3758_s5 }
 0x2f1   : > { %p3280_p2 = pnand %p3279_p1, %p2848_p7 }
 0x2f3   : > { %p3281_p3 = pneg %p3280_p2 }
 0x2f5   : > { %p3286_p5 = pnand %p3284_p4, %p3281_p3 }
 0x2f7   : > { %3289 = shalt.err (!%p3286_p5)
}
 0x2f8   : > { %2845 = dma.vmem_to_hbm [thread:$0]  (%p2848_p7), %s2461_s20, 32, %s3758_s5, [#allocation4]  }
 0x2f9   : > { %3295 = dma.done.wait (%p2848_p7), [#allocation4], 32  }
 0x2fa   : > { %3297 = vsyncadd (%p2848_p7), [#allocation4], 4294967264 }
 0x2fb PF: > { %s16_s18 = sadd.s32 1, %s3300_s18  }
 0x2fc   : > { %p13_p6 = scmp.ge.s32.totalorder %s16_s18, 6  }
 0x2fe   :  { %15 = sbr.rel (!%p13_p6) target bundleno = 1 (0x1), region = 78 }
 0x305   :  { %2473 = vsyncpa [#allocation4], 1 }
 0x306   :  { %2475 = vsyncpa [#allocation4 + $0x1], 1 }

// kernel: hat_cnn_forward.3
= control target key start
LH: loop header
LB: loop body
LE: loop exit
PB: predicated region body
PF: predicated region fallthrough
CT: control target
= control target key end

     0   :  { %9 = vsyncpa [#allocation4], 0  ;;  %s5893_s0 = inlined_call_operand.vmem [shape: bf16[2048,32], index: 0, kind: input, shape index: {}]   ;;  %s5894_s1 = inlined_call_operand.hbm [shape: bf16[32,128], index: 1, kind: input, shape index: {}]   ;;  %s5895_s2 = inlined_call_operand.hbm [shape: f32[1,128], index: 2, kind: input, shape index: {}]   ;;  %s5896_s3 = inlined_call_operand.hbm [shape: f32[1,128], index: 3, kind: input, shape index: {}]   ;;  %s5897_s4 = inlined_call_operand.vmem [shape: bf16[2,16,16,128], index: 4, kind: output, shape index: {}]  }
   0x1   :  { %10 = vsyncpa [#allocation6], 0  ;;  %s5082_s15 = smov [#allocation5]   ;;  %s5083_s17 = smov [#allocation3]  }
   0x2   :  { %s31_s16 = sshll.u32 %s5082_s15, 4  ;;  %s18_s18 = sshll.u32 %s5083_s17, 4  ;;  %s32_s16 = int_to_ptr.vmem [resolvable:$true] %s31_s16  ;;  %s5112_s18 = int_to_ptr.vmem [resolvable:$true] %s18_s18 }
   0x3   :  { %s5012_s21 = scalar_lea.hbm %s5895_s2, 16 }
   0x4   :  { %p5013_p0 = scmp.ne.s32.totalorder %s5895_s2, %s5012_s21  ;;  %p5016_p1 = scmp.lt.u32.totalorder %s5012_s21, %s5895_s2 }
   0x6   :  { %p5018_p2 = pnand %p5016_p1, %p5013_p0 }
   0x8   :  { %5021 = shalt.err (!%p5018_p2)
}
   0x9   :  { %s5022_s26 = scalar_lea.vmem %s32_s16, 16  ;;  %s5026_s27 = scalar_lea.vmem %s32_s16, 32 }
   0xa   :  { %p5023_p3 = scmp.ne.s32.totalorder %s32_s16, %s5022_s26  ;;  %p5027_p4 = scmp.lt.s32.totalorder %s32_s16, %s32_s16 }
   0xb   :  { %p5028_p5 = scmp.lt.s32.totalorder %s5026_s27, %s5022_s26 }
   0xd   :  { %p5029_p6 = por %p5028_p5, %p5027_p4 }
   0xf   :  { %p5030_p7 = pnand %p5029_p6, %p5023_p3 }
  0x11   :  { %5033 = shalt.err (!%p5030_p7)
}
  0x12   :  { %34 = dma.hbm_to_vmem [thread:$0]  %s5895_s2, 16, %s32_s16, [#allocation6]  }
  0x13   :  { %s5034_s6 = scalar_lea.hbm %s5894_s1, 256 }
  0x14   :  { %p5035_p8 = scmp.ne.s32.totalorder %s5894_s1, %s5034_s6  ;;  %p5038_p9 = scmp.lt.u32.totalorder %s5034_s6, %s5894_s1 }
  0x16   :  { %p5040_p10 = pnand %p5038_p9, %p5035_p8 }
  0x18   :  { %5043 = shalt.err (!%p5040_p10)
}
  0x19   :  { %s5044_s11 = scalar_lea.vmem %s5112_s18, 256  ;;  %p5049_p12 = scmp.lt.s32.totalorder %s5112_s18, %s5112_s18 }
  0x1a   :  { %p5045_p11 = scmp.ne.s32.totalorder %s5112_s18, %s5044_s11  ;;  %p5050_p13 = scmp.lt.s32.totalorder %s5044_s11, %s5044_s11 }
  0x1c   :  { %p5051_p0 = por %p5050_p13, %p5049_p12 }
  0x1e   :  { %p5052_p1 = pnand %p5051_p0, %p5045_p11 }
  0x20   :  { %5055 = shalt.err (!%p5052_p1)
}
  0x21   :  { %s5084_s2 = smov 64   ;;  %s5085_s12 = smov 4  }
  0x22   :  { %24 = dma.hbm_to_vmem [thread:$0]  %s5894_s1, 256, %s5112_s18, [#allocation4], %s5084_s2, %s5084_s2, %s5085_s12  }
  0x23   :  { %s5086_s15 = smov [#allocation7]   ;;  %s5056_s20 = scalar_lea.hbm %s5896_s3, 16 }
  0x24   :  { %s41_s16 = sshll.u32 %s5086_s15, 4  ;;  %p5057_p2 = scmp.ne.s32.totalorder %s5896_s3, %s5056_s20  ;;  %s42_s16 = int_to_ptr.vmem [resolvable:$true] %s41_s16 }
  0x25   :  { %p5060_p3 = scmp.lt.u32.totalorder %s5056_s20, %s5896_s3 }
  0x27   :  { %p5062_p4 = pnand %p5060_p3, %p5057_p2 }
  0x29   :  { %5065 = shalt.err (!%p5062_p4)
}
  0x2a   :  { %s5066_s25 = scalar_lea.vmem %s42_s16, 16  ;;  %s5070_s1 = scalar_lea.vmem %s42_s16, 32 }
  0x2b   :  { %p5067_p5 = scmp.ne.s32.totalorder %s42_s16, %s5066_s25  ;;  %p5071_p6 = scmp.lt.s32.totalorder %s42_s16, %s42_s16 }
  0x2c   :  { %p5072_p7 = scmp.lt.s32.totalorder %s5070_s1, %s5066_s25 }
  0x2e   :  { %p5073_p8 = por %p5072_p7, %p5071_p6 }
  0x30   :  { %p5074_p9 = pnand %p5073_p8, %p5067_p5 }
  0x32   :  { %5077 = shalt.err (!%p5074_p9)
}
  0x33   :  { %44 = dma.hbm_to_vmem [thread:$0]  %s5896_s3, 16, %s42_s16, [#allocation6]  }
  0x34   :  { %5078 = dma.done.wait [#allocation4], 256  }
  0x35   :  { %5079 = vsyncadd [#allocation4], 4294967040 }
  0x36   :  { %5080 = dma.done.wait [#allocation6], 32  }
  0x37   :  { %5081 = vsyncadd [#allocation6], 4294967264  ;;  %v4878_v0 = vld [vmem:[#allocation3] sm:$0xff]   ;;  %v4879_v1 = vld [vmem:[#allocation3 + $0x8] sm:$0xff]   ;;  %vm967_vm0 = vcmask 261120  }
  0x38   :  { %4609 = vmatprep.subr.bf16.mxu0 %v4878_v0  ;;  %4869 = vmatprep.subr.bf16.mxu1 %v4878_v0  ;;  %v4880_v2 = vld [vmem:[%s5893_s0] sm:$0xff]   ;;  %v4882_v4 = vld [vmem:[%s5893_s0 + $0x8] sm:$0xff]   ;;  %v4884_v6 = vld [vmem:[%s5893_s0 + $0x10] sm:$0xff]  }
  0x39   :  { %4610 = vmatpush3.bf16.msra.mxu0 %v4878_v0  ;;  %4871 = vmatpush3.bf16.msra.mxu1 %v4878_v0  ;;  %v4881_v3 = vld [vmem:[%s5893_s0 + $0x200] sm:$0xff]   ;;  %v4883_v5 = vld [vmem:[%s5893_s0 + $0x208] sm:$0xff]   ;;  %v4885_v7 = vld [vmem:[%s5893_s0 + $0x210] sm:$0xff]  }
  0x3a   :  { %4611 = vmatprep.subr.bf16.mxu0 %v4879_v1  ;;  %4870 = vmatprep.subr.bf16.mxu1 %v4879_v1  ;;  %v4886_v8 = vld [vmem:[%s5893_s0 + $0x18] sm:$0xff]   ;;  %v4888_v10 = vld [vmem:[%s5893_s0 + $0x20] sm:$0xff]   ;;  %v4890_v12 = vld [vmem:[%s5893_s0 + $0x28] sm:$0xff]  }
  0x3b   :  { %4613 = vmatprep.mubr.msk.bf16.mxu0 %vm967_vm0, %v4880_v2  ;;  %4741 = vmatprep.mubr.msk.bf16.mxu1 %vm967_vm0, %v4881_v3  ;;  %v4887_v9 = vld [vmem:[%s5893_s0 + $0x218] sm:$0xff]   ;;  %v4889_v11 = vld [vmem:[%s5893_s0 + $0x220] sm:$0xff]   ;;  %v4891_v13 = vld [vmem:[%s5893_s0 + $0x228] sm:$0xff]  }
  0x3c   :  { %v4892_v14 = vld [vmem:[%s5893_s0 + $0x30] sm:$0xff]   ;;  %v4894_v16 = vld [vmem:[%s5893_s0 + $0x38] sm:$0xff]   ;;  %v4896_v18 = vld [vmem:[%s5893_s0 + $0x40] sm:$0xff]  }
  0x3d   :  { %4612 = vmatpush3.bf16.msra.mxu0 %v4879_v1  ;;  %4872 = vmatpush3.bf16.msra.mxu1 %v4879_v1  ;;  %v4893_v15 = vld [vmem:[%s5893_s0 + $0x230] sm:$0xff]   ;;  %v4895_v17 = vld [vmem:[%s5893_s0 + $0x238] sm:$0xff]   ;;  %v4897_v19 = vld [vmem:[%s5893_s0 + $0x240] sm:$0xff]  }
  0x3e   :  { %v4898_v20 = vld [vmem:[%s5893_s0 + $0x48] sm:$0xff]   ;;  %v4900_v22 = vld [vmem:[%s5893_s0 + $0x50] sm:$0xff]   ;;  %v4902_v24 = vld [vmem:[%s5893_s0 + $0x58] sm:$0xff]  }
  0x3f   :  { %v4899_v21 = vld [vmem:[%s5893_s0 + $0x248] sm:$0xff]   ;;  %v4901_v23 = vld [vmem:[%s5893_s0 + $0x250] sm:$0xff]   ;;  %v4903_v25 = vld [vmem:[%s5893_s0 + $0x258] sm:$0xff]  }
  0x40   :  { %4614 = vmatmul.mubr.msk.bf16.vlgmr.msra.gmra.mrb[0].mxu0 %vm967_vm0, %v4882_v4  ;;  %4742 = vmatmul.mubr.msk.bf16.vlgmr.msra.gmra.mrb[0].mxu1 %vm967_vm0, %v4883_v5  ;;  %v4904_v26 = vld [vmem:[%s5893_s0 + $0x60] sm:$0xff]   ;;  %v4906_v28 = vld [vmem:[%s5893_s0 + $0x68] sm:$0xff]   ;;  %v4908_v30 = vld [vmem:[%s5893_s0 + $0x70] sm:$0xff]  }
  0x41   :  { %4617 = vmatprep.mubr.msk.bf16.mxu0 %vm967_vm0, %v4884_v6  ;;  %4745 = vmatprep.mubr.msk.bf16.mxu1 %vm967_vm0, %v4885_v7  ;;  %v4905_v27 = vld [vmem:[%s5893_s0 + $0x260] sm:$0xff]   ;;  %v4907_v29 = vld [vmem:[%s5893_s0 + $0x268] sm:$0xff]   ;;  %v4909_v31 = vld [vmem:[%s5893_s0 + $0x270] sm:$0xff]  }
  0x42   :  { %v4910_v32 = vld [vmem:[%s5893_s0 + $0x78] sm:$0xff]   ;;  %v4912_v34 = vld [vmem:[%s5893_s0 + $0x80] sm:$0xff]   ;;  %v4914_v36 = vld [vmem:[%s5893_s0 + $0x88] sm:$0xff]  }
  0x43   :  { %v4911_v33 = vld [vmem:[%s5893_s0 + $0x278] sm:$0xff]   ;;  %v4913_v35 = vld [vmem:[%s5893_s0 + $0x280] sm:$0xff]   ;;  %v4915_v37 = vld [vmem:[%s5893_s0 + $0x288] sm:$0xff]  }
  0x44   :  { %v4916_v38 = vld [vmem:[%s5893_s0 + $0x90] sm:$0xff]   ;;  %v4918_v40 = vld [vmem:[%s5893_s0 + $0x98] sm:$0xff]   ;;  %v4920_v42 = vld [vmem:[%s5893_s0 + $0xa0] sm:$0xff]  }
  0x45   :  { %v4917_v39 = vld [vmem:[%s5893_s0 + $0x290] sm:$0xff]   ;;  %v4919_v41 = vld [vmem:[%s5893_s0 + $0x298] sm:$0xff]   ;;  %v4921_v43 = vld [vmem:[%s5893_s0 + $0x2a0] sm:$0xff]  }
  0x46   :  { %v4922_v44 = vld [vmem:[%s5893_s0 + $0xa8] sm:$0xff]   ;;  %v4924_v46 = vld [vmem:[%s5893_s0 + $0xb0] sm:$0xff]   ;;  %v4926_v48 = vld [vmem:[%s5893_s0 + $0xb8] sm:$0xff]  }
  0x47   :  { %v4923_v45 = vld [vmem:[%s5893_s0 + $0x2a8] sm:$0xff]   ;;  %v4925_v47 = vld [vmem:[%s5893_s0 + $0x2b0] sm:$0xff]   ;;  %v4927_v49 = vld [vmem:[%s5893_s0 + $0x2b8] sm:$0xff]  }
  0x48   :  { %4618 = vmatmul.mubr.msk.bf16.gmra.mrb[4].mxu0 %vm967_vm0, %v4886_v8  ;;  %4746 = vmatmul.mubr.msk.bf16.gmra.mrb[4].mxu1 %vm967_vm0, %v4887_v9  ;;  %v4928_v50 = vld [vmem:[%s5893_s0 + $0xc0] sm:$0xff]   ;;  %v4930_v52 = vld [vmem:[%s5893_s0 + $0xc8] sm:$0xff]   ;;  %v4932_v54 = vld [vmem:[%s5893_s0 + $0xd0] sm:$0xff]  }
  0x49   :  { %4621 = vmatprep.mubr.msk.bf16.mxu0 %vm967_vm0, %v4888_v10  ;;  %4749 = vmatprep.mubr.msk.bf16.mxu1 %vm967_vm0, %v4889_v11  ;;  %v4929_v51 = vld [vmem:[%s5893_s0 + $0x2c0] sm:$0xff]   ;;  %v4931_v53 = vld [vmem:[%s5893_s0 + $0x2c8] sm:$0xff]   ;;  %v4933_v55 = vld [vmem:[%s5893_s0 + $0x2d0] sm:$0xff]  }
  0x4a   :  { %v4934_v56 = vld [vmem:[%s5893_s0 + $0xd8] sm:$0xff]   ;;  %v4936_v58 = vld [vmem:[%s5893_s0 + $0xe0] sm:$0xff]   ;;  %v4938_v60 = vld [vmem:[%s5893_s0 + $0xe8] sm:$0xff]  }
  0x4b   :  { %v4935_v57 = vld [vmem:[%s5893_s0 + $0x2d8] sm:$0xff]   ;;  %v4937_v59 = vld [vmem:[%s5893_s0 + $0x2e0] sm:$0xff]   ;;  %v4939_v61 = vld [vmem:[%s5893_s0 + $0x2e8] sm:$0xff]  }
  0x4c   :  { %v4940_v62 = vld [vmem:[%s5893_s0 + $0xf0] sm:$0xff]   ;;  %v4942_v0 = vld [vmem:[%s5893_s0 + $0xf8] sm:$0xff]   ;;  %v4944_v2 = vld [vmem:[%s5893_s0 + $0x100] sm:$0xff]  }
  0x4d   :  { %v4941_v63 = vld [vmem:[%s5893_s0 + $0x2f0] sm:$0xff]   ;;  %v4943_v1 = vld [vmem:[%s5893_s0 + $0x2f8] sm:$0xff]   ;;  %v4945_v3 = vld [vmem:[%s5893_s0 + $0x300] sm:$0xff]  }
  0x4e   :  { %v4946_v4 = vld [vmem:[%s5893_s0 + $0x108] sm:$0xff]   ;;  %v4948_v6 = vld [vmem:[%s5893_s0 + $0x110] sm:$0xff]   ;;  %v4950_v8 = vld [vmem:[%s5893_s0 + $0x118] sm:$0xff]  }
  0x4f   :  { %v4947_v5 = vld [vmem:[%s5893_s0 + $0x308] sm:$0xff]   ;;  %v4949_v7 = vld [vmem:[%s5893_s0 + $0x310] sm:$0xff]   ;;  %v4951_v9 = vld [vmem:[%s5893_s0 + $0x318] sm:$0xff]  }
  0x50   :  { %4622 = vmatmul.mubr.msk.bf16.gmra.mrb[8].mxu0 %vm967_vm0, %v4890_v12  ;;  %4750 = vmatmul.mubr.msk.bf16.gmra.mrb[8].mxu1 %vm967_vm0, %v4891_v13  ;;  %v4952_v10 = vld [vmem:[%s5893_s0 + $0x120] sm:$0xff]   ;;  %v4954_v12 = vld [vmem:[%s5893_s0 + $0x128] sm:$0xff]  }
  0x51   :  { %4625 = vmatprep.mubr.msk.bf16.mxu0 %vm967_vm0, %v4892_v14  ;;  %4753 = vmatprep.mubr.msk.bf16.mxu1 %vm967_vm0, %v4893_v15  ;;  %v4953_v11 = vld [vmem:[%s5893_s0 + $0x320] sm:$0xff]   ;;  %v4955_v13 = vld [vmem:[%s5893_s0 + $0x328] sm:$0xff]   ;;  %v4956_v14 = vld [vmem:[%s5893_s0 + $0x130] sm:$0xff]  }
  0x52   :  { %v4957_v15 = vld [vmem:[%s5893_s0 + $0x330] sm:$0xff]  }
  0x58   :  { %4626 = vmatmul.mubr.msk.bf16.gmra.mrb[12].mxu0 %vm967_vm0, %v4894_v16  ;;  %4754 = vmatmul.mubr.msk.bf16.gmra.mrb[12].mxu1 %vm967_vm0, %v4895_v17  ;;  %v4958_v16 = vld [vmem:[%s5893_s0 + $0x138] sm:$0xff]  }
  0x59   :  { %4629 = vmatprep.mubr.msk.bf16.mxu0 %vm967_vm0, %v4896_v18  ;;  %4757 = vmatprep.mubr.msk.bf16.mxu1 %vm967_vm0, %v4897_v19  ;;  %v4959_v17 = vld [vmem:[%s5893_s0 + $0x338] sm:$0xff]   ;;  %v4960_v18 = vld [vmem:[%s5893_s0 + $0x140] sm:$0xff]  }
  0x5a   :  { %v4961_v19 = vld [vmem:[%s5893_s0 + $0x340] sm:$0xff]  }
  0x60   :  { %4630 = vmatmul.mubr.msk.bf16.gmra.mrb[16].mxu0 %vm967_vm0, %v4898_v20  ;;  %4758 = vmatmul.mubr.msk.bf16.gmra.mrb[16].mxu1 %vm967_vm0, %v4899_v21  ;;  %v4962_v20 = vld [vmem:[%s5893_s0 + $0x148] sm:$0xff]  }
  0x61   :  { %4633 = vmatprep.mubr.msk.bf16.mxu0 %vm967_vm0, %v4900_v22  ;;  %4761 = vmatprep.mubr.msk.bf16.mxu1 %vm967_vm0, %v4901_v23  ;;  %v4963_v21 = vld [vmem:[%s5893_s0 + $0x348] sm:$0xff]   ;;  %v4964_v22 = vld [vmem:[%s5893_s0 + $0x150] sm:$0xff]  }
  0x62   :  { %v4965_v23 = vld [vmem:[%s5893_s0 + $0x350] sm:$0xff]  }
  0x68   :  { %4634 = vmatmul.mubr.msk.bf16.gmra.mrb[20].mxu0 %vm967_vm0, %v4902_v24  ;;  %4762 = vmatmul.mubr.msk.bf16.gmra.mrb[20].mxu1 %vm967_vm0, %v4903_v25  ;;  %v4966_v24 = vld [vmem:[%s5893_s0 + $0x158] sm:$0xff]  }
  0x69   :  { %4637 = vmatprep.mubr.msk.bf16.mxu0 %vm967_vm0, %v4904_v26  ;;  %4765 = vmatprep.mubr.msk.bf16.mxu1 %vm967_vm0, %v4905_v27  ;;  %v4967_v25 = vld [vmem:[%s5893_s0 + $0x358] sm:$0xff]   ;;  %v4968_v26 = vld [vmem:[%s5893_s0 + $0x160] sm:$0xff]  }
  0x6a   :  { %v4969_v27 = vld [vmem:[%s5893_s0 + $0x360] sm:$0xff]  }
  0x70   :  { %4638 = vmatmul.mubr.msk.bf16.gmra.mrb[24].mxu0 %vm967_vm0, %v4906_v28  ;;  %4766 = vmatmul.mubr.msk.bf16.gmra.mrb[24].mxu1 %vm967_vm0, %v4907_v29  ;;  %v4970_v28 = vld [vmem:[%s5893_s0 + $0x168] sm:$0xff]  }
  0x71   :  { %4641 = vmatprep.mubr.msk.bf16.mxu0 %vm967_vm0, %v4908_v30  ;;  %4769 = vmatprep.mubr.msk.bf16.mxu1 %vm967_vm0, %v4909_v31  ;;  %v4971_v29 = vld [vmem:[%s5893_s0 + $0x368] sm:$0xff]   ;;  %v4972_v30 = vld [vmem:[%s5893_s0 + $0x170] sm:$0xff]  }
  0x72   :  { %v4973_v31 = vld [vmem:[%s5893_s0 + $0x370] sm:$0xff]  }
  0x78   :  { %4642 = vmatmul.mubr.msk.bf16.gmra.mrb[28].mxu0 %vm967_vm0, %v4910_v32  ;;  %4770 = vmatmul.mubr.msk.bf16.gmra.mrb[28].mxu1 %vm967_vm0, %v4911_v33  ;;  %v4974_v32 = vld [vmem:[%s5893_s0 + $0x178] sm:$0xff]  }
  0x79   :  { %4645 = vmatprep.mubr.msk.bf16.mxu0 %vm967_vm0, %v4912_v34  ;;  %4773 = vmatprep.mubr.msk.bf16.mxu1 %vm967_vm0, %v4913_v35  ;;  %v4975_v33 = vld [vmem:[%s5893_s0 + $0x378] sm:$0xff]   ;;  %v4976_v34 = vld [vmem:[%s5893_s0 + $0x180] sm:$0xff]  }
  0x7a   :  { %v4977_v35 = vld [vmem:[%s5893_s0 + $0x380] sm:$0xff]  }
  0x80   :  { %4646 = vmatmul.mubr.msk.bf16.gmra.mrb[32].mxu0 %vm967_vm0, %v4914_v36  ;;  %4774 = vmatmul.mubr.msk.bf16.gmra.mrb[32].mxu1 %vm967_vm0, %v4915_v37  ;;  %v4978_v36 = vld [vmem:[%s5893_s0 + $0x188] sm:$0xff]  }
  0x81   :  { %4649 = vmatprep.mubr.msk.bf16.mxu0 %vm967_vm0, %v4916_v38  ;;  %4777 = vmatprep.mubr.msk.bf16.mxu1 %vm967_vm0, %v4917_v39  ;;  %v4979_v37 = vld [vmem:[%s5893_s0 + $0x388] sm:$0xff]   ;;  %v4980_v38 = vld [vmem:[%s5893_s0 + $0x190] sm:$0xff]  }
  0x82   :  { %v4981_v39 = vld [vmem:[%s5893_s0 + $0x390] sm:$0xff]  }
  0x88   :  { %4650 = vmatmul.mubr.msk.bf16.gmra.mrb[36].mxu0 %vm967_vm0, %v4918_v40  ;;  %4778 = vmatmul.mubr.msk.bf16.gmra.mrb[36].mxu1 %vm967_vm0, %v4919_v41  ;;  %v4982_v40 = vld [vmem:[%s5893_s0 + $0x198] sm:$0xff]  }
  0x89   :  { %4653 = vmatprep.mubr.msk.bf16.mxu0 %vm967_vm0, %v4920_v42  ;;  %4781 = vmatprep.mubr.msk.bf16.mxu1 %vm967_vm0, %v4921_v43  ;;  %v4983_v41 = vld [vmem:[%s5893_s0 + $0x398] sm:$0xff]   ;;  %v4984_v42 = vld [vmem:[%s5893_s0 + $0x1a0] sm:$0xff]  }
  0x8a   :  { %v4985_v43 = vld [vmem:[%s5893_s0 + $0x3a0] sm:$0xff]  }
  0x90   :  { %4654 = vmatmul.mubr.msk.bf16.gmra.mrb[40].mxu0 %vm967_vm0, %v4922_v44  ;;  %4782 = vmatmul.mubr.msk.bf16.gmra.mrb[40].mxu1 %vm967_vm0, %v4923_v45  ;;  %v4986_v44 = vld [vmem:[%s5893_s0 + $0x1a8] sm:$0xff]  }
  0x91   :  { %4657 = vmatprep.mubr.msk.bf16.mxu0 %vm967_vm0, %v4924_v46  ;;  %4785 = vmatprep.mubr.msk.bf16.mxu1 %vm967_vm0, %v4925_v47  ;;  %v4987_v45 = vld [vmem:[%s5893_s0 + $0x3a8] sm:$0xff]   ;;  %v4988_v46 = vld [vmem:[%s5893_s0 + $0x1b0] sm:$0xff]  }
  0x92   :  { %v4989_v47 = vld [vmem:[%s5893_s0 + $0x3b0] sm:$0xff]  }
  0x98   :  { %4658 = vmatmul.mubr.msk.bf16.gmra.mrb[44].mxu0 %vm967_vm0, %v4926_v48  ;;  %4786 = vmatmul.mubr.msk.bf16.gmra.mrb[44].mxu1 %vm967_vm0, %v4927_v49 }
  0x99   :  { %4661 = vmatprep.mubr.msk.bf16.mxu0 %vm967_vm0, %v4928_v50  ;;  %4789 = vmatprep.mubr.msk.bf16.mxu1 %vm967_vm0, %v4929_v51 }
  0xa0   :  { %4662 = vmatmul.mubr.msk.bf16.gmra.mrb[48].mxu0 %vm967_vm0, %v4930_v52  ;;  %4790 = vmatmul.mubr.msk.bf16.gmra.mrb[48].mxu1 %vm967_vm0, %v4931_v53  ;;  %v4990_v52 = vld [vmem:[%s5893_s0 + $0x1b8] sm:$0xff]  }
  0xa1   :  { %4665 = vmatprep.mubr.msk.bf16.mxu0 %vm967_vm0, %v4932_v54  ;;  %4793 = vmatprep.mubr.msk.bf16.mxu1 %vm967_vm0, %v4933_v55  ;;  %v4991_v53 = vld [vmem:[%s5893_s0 + $0x3b8] sm:$0xff]  }
  0xa8   :  { %4666 = vmatmul.mubr.msk.bf16.gmra.mrb[52].mxu0 %vm967_vm0, %v4934_v56  ;;  %4794 = vmatmul.mubr.msk.bf16.gmra.mrb[52].mxu1 %vm967_vm0, %v4935_v57  ;;  %v4992_v56 = vld [vmem:[%s5893_s0 + $0x1c0] sm:$0xff]  }
  0xa9   :  { %4669 = vmatprep.mubr.msk.bf16.mxu0 %vm967_vm0, %v4936_v58  ;;  %4797 = vmatprep.mubr.msk.bf16.mxu1 %vm967_vm0, %v4937_v59  ;;  %v4993_v57 = vld [vmem:[%s5893_s0 + $0x3c0] sm:$0xff]  }
  0xb0   :  { %4670 = vmatmul.mubr.msk.bf16.gmra.mrb[56].mxu0 %vm967_vm0, %v4938_v60  ;;  %4798 = vmatmul.mubr.msk.bf16.gmra.mrb[56].mxu1 %vm967_vm0, %v4939_v61 }
  0xb1   :  { %4673 = vmatprep.mubr.msk.bf16.mxu0 %vm967_vm0, %v4940_v62  ;;  %4801 = vmatprep.mubr.msk.bf16.mxu1 %vm967_vm0, %v4941_v63 }
  0xb8   :  { %4674 = vmatmul.mubr.msk.bf16.gmra.mrb[60].mxu0 %vm967_vm0, %v4942_v0  ;;  %4802 = vmatmul.mubr.msk.bf16.gmra.mrb[60].mxu1 %vm967_vm0, %v4943_v1  ;;  %v4994_v0 = vld [vmem:[%s5893_s0 + $0x1c8] sm:$0xff]  }
  0xb9   :  { %4677 = vmatprep.mubr.msk.bf16.mxu0 %vm967_vm0, %v4944_v2  ;;  %4805 = vmatprep.mubr.msk.bf16.mxu1 %vm967_vm0, %v4945_v3  ;;  %v4995_v1 = vld [vmem:[%s5893_s0 + $0x3c8] sm:$0xff]   ;;  %v4996_v2 = vld [vmem:[%s5893_s0 + $0x1d0] sm:$0xff]  }
  0xba   :  { %v4997_v3 = vld [vmem:[%s5893_s0 + $0x3d0] sm:$0xff]  }
  0xc0   :  { %4678 = vmatmul.mubr.msk.bf16.gmra.mrb[64].mxu0 %vm967_vm0, %v4946_v4  ;;  %4806 = vmatmul.mubr.msk.bf16.gmra.mrb[64].mxu1 %vm967_vm0, %v4947_v5 }
  0xc1   :  { %4681 = vmatprep.mubr.msk.bf16.mxu0 %vm967_vm0, %v4948_v6  ;;  %4809 = vmatprep.mubr.msk.bf16.mxu1 %vm967_vm0, %v4949_v7 }
  0xc8   :  { %4682 = vmatmul.mubr.msk.bf16.gmra.mrb[68].mxu0 %vm967_vm0, %v4950_v8  ;;  %4810 = vmatmul.mubr.msk.bf16.gmra.mrb[68].mxu1 %vm967_vm0, %v4951_v9  ;;  %v4998_v8 = vld [vmem:[%s5893_s0 + $0x1d8] sm:$0xff]  }
  0xc9   :  { %4685 = vmatprep.mubr.msk.bf16.mxu0 %vm967_vm0, %v4952_v10  ;;  %4813 = vmatprep.mubr.msk.bf16.mxu1 %vm967_vm0, %v4953_v11  ;;  %v4999_v9 = vld [vmem:[%s5893_s0 + $0x3d8] sm:$0xff]  }
  0xd0   :  { %4686 = vmatmul.mubr.msk.bf16.gmra.mrb[72].mxu0 %vm967_vm0, %v4954_v12  ;;  %4814 = vmatmul.mubr.msk.bf16.gmra.mrb[72].mxu1 %vm967_vm0, %v4955_v13 }
  0xd1   :  { %4689 = vmatprep.mubr.msk.bf16.mxu0 %vm967_vm0, %v4956_v14  ;;  %4817 = vmatprep.mubr.msk.bf16.mxu1 %vm967_vm0, %v4957_v15  ;;  %v5000_v14 = vld [vmem:[%s5893_s0 + $0x1e0] sm:$0xff]  }
  0xd2   :  { %v5001_v15 = vld [vmem:[%s5893_s0 + $0x3e0] sm:$0xff]  }
  0xd8   :  { %4690 = vmatmul.mubr.msk.bf16.gmra.mrb[76].mxu0 %vm967_vm0, %v4958_v16  ;;  %4818 = vmatmul.mubr.msk.bf16.gmra.mrb[76].mxu1 %vm967_vm0, %v4959_v17 }
  0xd9   :  { %4693 = vmatprep.mubr.msk.bf16.mxu0 %vm967_vm0, %v4960_v18  ;;  %4821 = vmatprep.mubr.msk.bf16.mxu1 %vm967_vm0, %v4961_v19 }
  0xe0   :  { %4694 = vmatmul.mubr.msk.bf16.gmra.mrb[80].mxu0 %vm967_vm0, %v4962_v20  ;;  %4822 = vmatmul.mubr.msk.bf16.gmra.mrb[80].mxu1 %vm967_vm0, %v4963_v21 }
  0xe1   :  { %4697 = vmatprep.mubr.msk.bf16.mxu0 %vm967_vm0, %v4964_v22  ;;  %4825 = vmatprep.mubr.msk.bf16.mxu1 %vm967_vm0, %v4965_v23 }
  0xe8   :  { %4698 = vmatmul.mubr.msk.bf16.gmra.mrb[84].mxu0 %vm967_vm0, %v4966_v24  ;;  %4826 = vmatmul.mubr.msk.bf16.gmra.mrb[84].mxu1 %vm967_vm0, %v4967_v25 }
  0xe9   :  { %4701 = vmatprep.mubr.msk.bf16.mxu0 %vm967_vm0, %v4968_v26  ;;  %4829 = vmatprep.mubr.msk.bf16.mxu1 %vm967_vm0, %v4969_v27 }
  0xf0   :  { %4702 = vmatmul.mubr.msk.bf16.gmra.mrb[88].mxu0 %vm967_vm0, %v4970_v28  ;;  %4830 = vmatmul.mubr.msk.bf16.gmra.mrb[88].mxu1 %vm967_vm0, %v4971_v29 }
  0xf1   :  { %4705 = vmatprep.mubr.msk.bf16.mxu0 %vm967_vm0, %v4972_v30  ;;  %4833 = vmatprep.mubr.msk.bf16.mxu1 %vm967_vm0, %v4973_v31 }
  0xf8   :  { %4706 = vmatmul.mubr.msk.bf16.gmra.mrb[92].mxu0 %vm967_vm0, %v4974_v32  ;;  %4834 = vmatmul.mubr.msk.bf16.gmra.mrb[92].mxu1 %vm967_vm0, %v4975_v33 }
  0xf9   :  { %4709 = vmatprep.mubr.msk.bf16.mxu0 %vm967_vm0, %v4976_v34  ;;  %4837 = vmatprep.mubr.msk.bf16.mxu1 %vm967_vm0, %v4977_v35 }
 0x100   :  { %4710 = vmatmul.mubr.msk.bf16.gmra.mrb[96].mxu0 %vm967_vm0, %v4978_v36  ;;  %4838 = vmatmul.mubr.msk.bf16.gmra.mrb[96].mxu1 %vm967_vm0, %v4979_v37 }
 0x101   :  { %4713 = vmatprep.mubr.msk.bf16.mxu0 %vm967_vm0, %v4980_v38  ;;  %4841 = vmatprep.mubr.msk.bf16.mxu1 %vm967_vm0, %v4981_v39  ;;  %v5641_v38 = vld [vmem:[#allocation5] ss:$0 sm:$0xff] }
 0x108   :  { %4714 = vmatmul.mubr.msk.bf16.gmra.mrb[100].mxu0 %vm967_vm0, %v4982_v40  ;;  %4842 = vmatmul.mubr.msk.bf16.gmra.mrb[100].mxu1 %vm967_vm0, %v4983_v41 }
 0x109   :  { %4717 = vmatprep.mubr.msk.bf16.mxu0 %vm967_vm0, %v4984_v42  ;;  %4845 = vmatprep.mubr.msk.bf16.mxu1 %vm967_vm0, %v4985_v43 }
 0x110   :  { %4718 = vmatmul.mubr.msk.bf16.gmra.mrb[104].mxu0 %vm967_vm0, %v4986_v44  ;;  %4846 = vmatmul.mubr.msk.bf16.gmra.mrb[104].mxu1 %vm967_vm0, %v4987_v45 }
 0x111   :  { %4721 = vmatprep.mubr.msk.bf16.mxu0 %vm967_vm0, %v4988_v46  ;;  %4849 = vmatprep.mubr.msk.bf16.mxu1 %vm967_vm0, %v4989_v47 }
 0x113   :  { %v4615_v48 = vpop.f32.mrb[0].mxu0  ;;  %v4743_v49 = vpop.f32.mrb[0].mxu1 }
 0x114   :  { %2411 = vst [vmem:[#allocation2 + $0x10] sm:$0xff] %v4615_v48  ;;  %2539 = vst [vmem:[#allocation2 + $0x410] sm:$0xff] %v4743_v49  ;;  %v1386_v50 = vpop.f32.mrb[1].mxu0  ;;  %v1898_v51 = vpop.f32.mrb[1].mxu1 }
 0x115   :  { %2409 = vst [vmem:[#allocation2] sm:$0xff] %v1386_v50  ;;  %2537 = vst [vmem:[#allocation2 + $0x400] sm:$0xff] %v1898_v51  ;;  %v4616_v54 = vpop.f32.mrb[2].mxu0  ;;  %v4744_v55 = vpop.f32.mrb[2].mxu1 }
 0x116   :  { %2412 = vst [vmem:[#allocation2 + $0x18] sm:$0xff] %v4616_v54  ;;  %2540 = vst [vmem:[#allocation2 + $0x418] sm:$0xff] %v4744_v55  ;;  %v1389_v58 = vpop.f32.mrb[3].mxu0  ;;  %v1901_v59 = vpop.f32.mrb[3].mxu1  ;;  %v5002_v54 = vld [vmem:[%s5893_s0 + $0x1e8] sm:$0xff]  }
 0x117   :  { %2410 = vst [vmem:[#allocation2 + $0x8] sm:$0xff] %v1389_v58  ;;  %2538 = vst [vmem:[#allocation2 + $0x408] sm:$0xff] %v1901_v59  ;;  %v5003_v55 = vld [vmem:[%s5893_s0 + $0x3e8] sm:$0xff]   ;;  %v5004_v59 = vld [vmem:[%s5893_s0 + $0x1f0] sm:$0xff]  }
 0x118   :  { %4722 = vmatmul.mubr.msk.bf16.gmra.mrb[108].mxu0 %vm967_vm0, %v4990_v52  ;;  %4850 = vmatmul.mubr.msk.bf16.gmra.mrb[108].mxu1 %vm967_vm0, %v4991_v53 }
 0x119   :  { %4725 = vmatprep.mubr.msk.bf16.mxu0 %vm967_vm0, %v4992_v56  ;;  %4853 = vmatprep.mubr.msk.bf16.mxu1 %vm967_vm0, %v4993_v57  ;;  %v5652_v56 = vld [vmem:[#allocation7] ss:$0 sm:$0xff] }
 0x11b   :  { %v4619_v60 = vpop.f32.mrb[4].mxu0  ;;  %v4747_v61 = vpop.f32.mrb[4].mxu1 }
 0x11c   :  { %2415 = vst [vmem:[#allocation2 + $0x30] sm:$0xff] %v4619_v60  ;;  %2543 = vst [vmem:[#allocation2 + $0x430] sm:$0xff] %v4747_v61  ;;  %v1402_v62 = vpop.f32.mrb[5].mxu0  ;;  %v1914_v63 = vpop.f32.mrb[5].mxu1  ;;  %v5005_v60 = vld [vmem:[%s5893_s0 + $0x3f0] sm:$0xff]  }
 0x11d   :  { %2413 = vst [vmem:[#allocation2 + $0x20] sm:$0xff] %v1402_v62  ;;  %2541 = vst [vmem:[#allocation2 + $0x420] sm:$0xff] %v1914_v63  ;;  %v4620_v4 = vpop.f32.mrb[6].mxu0  ;;  %v4748_v5 = vpop.f32.mrb[6].mxu1  ;;  %v2667_v10 = vld [vmem:[#allocation2 + $0x10] ss:$2 sm:$0xff] }
 0x11e   :  { %2416 = vst [vmem:[#allocation2 + $0x38] sm:$0xff] %v4620_v4  ;;  %2544 = vst [vmem:[#allocation2 + $0x438] sm:$0xff] %v4748_v5  ;;  %v1405_v6 = vpop.f32.mrb[7].mxu0  ;;  %v1917_v7 = vpop.f32.mrb[7].mxu1  ;;  %v2923_v11 = vld [vmem:[#allocation2 + $0x11] ss:$2 sm:$0xff] }
 0x11f   :  { %2414 = vst [vmem:[#allocation2 + $0x28] sm:$0xff] %v1405_v6  ;;  %2542 = vst [vmem:[#allocation2 + $0x428] sm:$0xff] %v1917_v7  ;;  %v2795_v16 = vld [vmem:[#allocation2 + $0x410] ss:$2 sm:$0xff]  ;;  %v3051_v17 = vld [vmem:[#allocation2 + $0x411] ss:$2 sm:$0xff]  ;;  %v3177_v31 = vmax.f32 %v2667_v10, %v2923_v11 }
 0x120   :  { %4726 = vmatmul.mubr.msk.bf16.gmra.mrb[112].mxu0 %vm967_vm0, %v4994_v0  ;;  %4854 = vmatmul.mubr.msk.bf16.gmra.mrb[112].mxu1 %vm967_vm0, %v4995_v1  ;;  %v2665_v20 = vld [vmem:[#allocation2] ss:$2 sm:$0xff]  ;;  %v2921_v21 = vld [vmem:[#allocation2 + $0x1] ss:$2 sm:$0xff]  ;;  %v3241_v32 = vmax.f32 %v2795_v16, %v3051_v17 }
 0x121   :  { %4729 = vmatprep.mubr.msk.bf16.mxu0 %vm967_vm0, %v4996_v2  ;;  %4857 = vmatprep.mubr.msk.bf16.mxu1 %vm967_vm0, %v4997_v3  ;;  %v2793_v24 = vld [vmem:[#allocation2 + $0x400] ss:$2 sm:$0xff]  ;;  %v3049_v25 = vld [vmem:[#allocation2 + $0x401] ss:$2 sm:$0xff]  ;;  %v3176_v37 = vmax.f32 %v2665_v20, %v2921_v21 }
 0x122   :  { %v3240_v43 = vmax.f32 %v2793_v24, %v3049_v25 }
 0x123   :  { %v4623_v12 = vpop.f32.mrb[8].mxu0  ;;  %v4751_v13 = vpop.f32.mrb[8].mxu1 }
 0x124   :  { %2419 = vst [vmem:[#allocation2 + $0x50] sm:$0xff] %v4623_v12  ;;  %2547 = vst [vmem:[#allocation2 + $0x450] sm:$0xff] %v4751_v13  ;;  %v1418_v18 = vpop.f32.mrb[9].mxu0  ;;  %v1930_v19 = vpop.f32.mrb[9].mxu1 }
 0x125   :  { %2417 = vst [vmem:[#allocation2 + $0x40] sm:$0xff] %v1418_v18  ;;  %2545 = vst [vmem:[#allocation2 + $0x440] sm:$0xff] %v1930_v19  ;;  %v4624_v22 = vpop.f32.mrb[10].mxu0  ;;  %v4752_v23 = vpop.f32.mrb[10].mxu1  ;;  %v2671_v28 = vld [vmem:[#allocation2 + $0x30] ss:$2 sm:$0xff] }
 0x126   :  { %2420 = vst [vmem:[#allocation2 + $0x58] sm:$0xff] %v4624_v22  ;;  %2548 = vst [vmem:[#allocation2 + $0x458] sm:$0xff] %v4752_v23  ;;  %v1421_v26 = vpop.f32.mrb[11].mxu0  ;;  %v1933_v27 = vpop.f32.mrb[11].mxu1  ;;  %v2927_v29 = vld [vmem:[#allocation2 + $0x31] ss:$2 sm:$0xff] }
 0x127   :  { %v2799_v30 = vld [vmem:[#allocation2 + $0x430] ss:$2 sm:$0xff]  ;;  %2418 = vst [vmem:[#allocation2 + $0x48] sm:$0xff] %v1421_v26  ;;  %2546 = vst [vmem:[#allocation2 + $0x448] sm:$0xff] %v1933_v27  ;;  %v3179_v33 = vmax.f32 %v2671_v28, %v2927_v29  ;;  %v3055_v34 = vld [vmem:[#allocation2 + $0x431] ss:$2 sm:$0xff] }
 0x128   :  { %v2669_v35 = vld [vmem:[#allocation2 + $0x20] ss:$2 sm:$0xff]  ;;  %v2925_v36 = vld [vmem:[#allocation2 + $0x21] ss:$2 sm:$0xff]  ;;  %4730 = vmatmul.mubr.msk.bf16.gmra.mrb[116].mxu0 %vm967_vm0, %v4998_v8  ;;  %4858 = vmatmul.mubr.msk.bf16.gmra.mrb[116].mxu1 %vm967_vm0, %v4999_v9  ;;  %v3243_v39 = vmax.f32 %v2799_v30, %v3055_v34 }
 0x129   :  { %v3178_v40 = vmax.f32 %v2669_v35, %v2925_v36  ;;  %v2797_v41 = vld [vmem:[#allocation2 + $0x420] ss:$2 sm:$0xff]  ;;  %v3053_v42 = vld [vmem:[#allocation2 + $0x421] ss:$2 sm:$0xff]  ;;  %4733 = vmatprep.mubr.msk.bf16.mxu0 %vm967_vm0, %v5000_v14  ;;  %4861 = vmatprep.mubr.msk.bf16.mxu1 %vm967_vm0, %v5001_v15  ;;  %v3305_v44 = vmax.f32 %v3177_v31, %v3179_v33  ;;  %v5006_v14 = vld [vmem:[%s5893_s0 + $0x1f8] sm:$0xff]  }
 0x12a   :  { %v3242_v45 = vmax.f32 %v2797_v41, %v3053_v42  ;;  %v3337_v46 = vmax.f32 %v3241_v32, %v3243_v39  ;;  %v5007_v15 = vld [vmem:[%s5893_s0 + $0x3f8] sm:$0xff]  }
 0x12b   :  { %v3304_v47 = vmax.f32 %v3176_v37, %v3178_v40  ;;  %v4627_v48 = vpop.f32.mrb[12].mxu0  ;;  %v4755_v49 = vpop.f32.mrb[12].mxu1  ;;  %v3376_v50 = vadd.f32 %v5641_v38, %v3305_v44 }
 0x12c   :  { %v3336_v51 = vmax.f32 %v3240_v43, %v3242_v45  ;;  %2423 = vst [vmem:[#allocation2 + $0x70] sm:$0xff] %v4627_v48  ;;  %2551 = vst [vmem:[#allocation2 + $0x470] sm:$0xff] %v4755_v49  ;;  %v1434_v52 = vpop.f32.mrb[13].mxu0  ;;  %v1946_v53 = vpop.f32.mrb[13].mxu1  ;;  %v3408_v57 = vadd.f32 %v5641_v38, %v3337_v46 }
 0x12d   :  { %v3375_v58 = vadd.f32 %v5641_v38, %v3304_v47  ;;  %2421 = vst [vmem:[#allocation2 + $0x60] sm:$0xff] %v1434_v52  ;;  %2549 = vst [vmem:[#allocation2 + $0x460] sm:$0xff] %v1946_v53  ;;  %v3440_v61 = vmax.f32 %v3376_v50, 0.0  ;;  %v4628_v63 = vpop.f32.mrb[14].mxu0  ;;  %v4756_v4 = vpop.f32.mrb[14].mxu1 }
 0x12e   :  { %v3407_v62 = vadd.f32 %v5641_v38, %v3336_v51  ;;  %v3472_v0 = vmax.f32 %v3408_v57, 0.0  ;;  %2424 = vst [vmem:[#allocation2 + $0x78] sm:$0xff] %v4628_v63  ;;  %v1437_v5 = vpop.f32.mrb[15].mxu0  ;;  %2552 = vst [vmem:[#allocation2 + $0x478] sm:$0xff] %v4756_v4  ;;  %v1949_v8 = vpop.f32.mrb[15].mxu1 }
 0x12f   :  { %v3439_v1 = vmax.f32 %v3375_v58, 0.0  ;;  %v3511_v2 = vmul.f32 %v5652_v56, %v3440_v61  ;;  %2422 = vst [vmem:[#allocation2 + $0x68] sm:$0xff] %v1437_v5  ;;  %2550 = vst [vmem:[#allocation2 + $0x468] sm:$0xff] %v1949_v8  ;;  %v2675_v11 = vld [vmem:[#allocation2 + $0x50] ss:$2 sm:$0xff] }
 0x130   :  { %v3471_v3 = vmax.f32 %v3407_v62, 0.0  ;;  %4734 = vmatmul.mubr.msk.bf16.gmra.mrb[120].mxu0 %vm967_vm0, %v5002_v54  ;;  %4862 = vmatmul.mubr.msk.bf16.gmra.mrb[120].mxu1 %vm967_vm0, %v5003_v55  ;;  %v3543_v6 = vmul.f32 %v5652_v56, %v3472_v0  ;;  %v2931_v17 = vld [vmem:[#allocation2 + $0x51] ss:$2 sm:$0xff]  ;;  %v2803_v18 = vld [vmem:[#allocation2 + $0x450] ss:$2 sm:$0xff] }
 0x131   :  { %v3510_v7 = vmul.f32 %v5652_v56, %v3439_v1  ;;  %4737 = vmatprep.mubr.msk.bf16.mxu0 %vm967_vm0, %v5004_v59  ;;  %4865 = vmatprep.mubr.msk.bf16.mxu1 %vm967_vm0, %v5005_v60  ;;  %v3059_v21 = vld [vmem:[#allocation2 + $0x451] ss:$2 sm:$0xff]  ;;  %v2673_v22 = vld [vmem:[#allocation2 + $0x40] ss:$2 sm:$0xff]  ;;  %v3181_v29 = vmax.f32 %v2675_v11, %v2931_v17  ;;  %v2929_v30 = vld [vmem:[#allocation2 + $0x41] ss:$2 sm:$0xff] }
 0x132   :  { %v3542_v9 = vmul.f32 %v5652_v56, %v3471_v3  ;;  %v2801_v31 = vld [vmem:[#allocation2 + $0x440] ss:$2 sm:$0xff]  ;;  %v3057_v32 = vld [vmem:[#allocation2 + $0x441] ss:$2 sm:$0xff]  ;;  %v3245_v37 = vmax.f32 %v2803_v18, %v3059_v21  ;;  %v3180_v44 = vmax.f32 %v2673_v22, %v2929_v30 }
 0x133   :  { %v4291_v10 = vpack.c.bf16 %v3511_v2, %v3510_v7  ;;  %v4631_v12 = vpop.f32.mrb[16].mxu0  ;;  %v4759_v13 = vpop.f32.mrb[16].mxu1  ;;  %v3244_v45 = vmax.f32 %v2801_v31, %v3057_v32 }
 0x134   :  { %v4371_v16 = vpack.c.bf16 %v3543_v6, %v3542_v9  ;;  %2427 = vst [vmem:[#allocation2 + $0x90] sm:$0xff] %v4631_v12  ;;  %2555 = vst [vmem:[#allocation2 + $0x490] sm:$0xff] %v4759_v13  ;;  %v1450_v19 = vpop.f32.mrb[17].mxu0  ;;  %v1962_v20 = vpop.f32.mrb[17].mxu1 }
 0x135   :  { %4292 = vst [vmem:[%s5897_s4] sm:$0xff] %v4291_v10   ;;  %2425 = vst [vmem:[#allocation2 + $0x80] sm:$0xff] %v1450_v19  ;;  %v4632_v23 = vpop.f32.mrb[18].mxu0  ;;  %v4760_v24 = vpop.f32.mrb[18].mxu1  ;;  %v2679_v25 = vld [vmem:[#allocation2 + $0x70] ss:$2 sm:$0xff] }
 0x136   :  { %2553 = vst [vmem:[#allocation2 + $0x480] sm:$0xff] %v1962_v20  ;;  %4463 = vst [vmem:[%s5897_s4 + $0x80] sm:$0xff] %v4371_v16   ;;  %v2935_v26 = vld [vmem:[#allocation2 + $0x71] ss:$2 sm:$0xff]  ;;  %v1453_v27 = vpop.f32.mrb[19].mxu0  ;;  %v1965_v28 = vpop.f32.mrb[19].mxu1 }
 0x137   :  { %2428 = vst [vmem:[#allocation2 + $0x98] sm:$0xff] %v4632_v23  ;;  %2556 = vst [vmem:[#allocation2 + $0x498] sm:$0xff] %v4760_v24  ;;  %v3183_v33 = vmax.f32 %v2679_v25, %v2935_v26  ;;  %v2807_v34 = vld [vmem:[#allocation2 + $0x470] ss:$2 sm:$0xff]  ;;  %v3063_v35 = vld [vmem:[#allocation2 + $0x471] ss:$2 sm:$0xff] }
 0x138   :  { %2426 = vst [vmem:[#allocation2 + $0x88] sm:$0xff] %v1453_v27  ;;  %2554 = vst [vmem:[#allocation2 + $0x488] sm:$0xff] %v1965_v28  ;;  %v2677_v36 = vld [vmem:[#allocation2 + $0x60] ss:$2 sm:$0xff]  ;;  %4738 = vmatmul.mubr.msk.bf16.gmra.mrb[124].mxu0 %vm967_vm0, %v5006_v14  ;;  %4866 = vmatmul.mubr.msk.bf16.gmra.mrb[124].mxu1 %vm967_vm0, %v5007_v15  ;;  %v3247_v40 = vmax.f32 %v2807_v34, %v3063_v35  ;;  %v2933_v41 = vld [vmem:[#allocation2 + $0x61] ss:$2 sm:$0xff] }
 0x139   :  { %v3307_v39 = vmax.f32 %v3181_v29, %v3183_v33  ;;  %v2805_v42 = vld [vmem:[#allocation2 + $0x460] ss:$2 sm:$0xff]  ;;  %v3061_v43 = vld [vmem:[#allocation2 + $0x461] ss:$2 sm:$0xff]  ;;  %v3182_v46 = vmax.f32 %v2677_v36, %v2933_v41 }
 0x13a   :  { %v3246_v47 = vmax.f32 %v2805_v42, %v3061_v43  ;;  %v3339_v49 = vmax.f32 %v3245_v37, %v3247_v40 }
 0x13b   :  { %v3378_v48 = vadd.f32 %v5641_v38, %v3307_v39  ;;  %v4635_v50 = vpop.f32.mrb[20].mxu0  ;;  %v4763_v51 = vpop.f32.mrb[20].mxu1  ;;  %v3306_v52 = vmax.f32 %v3180_v44, %v3182_v46 }
 0x13c   :  { %v3338_v53 = vmax.f32 %v3244_v45, %v3246_v47  ;;  %2431 = vst [vmem:[#allocation2 + $0xb0] sm:$0xff] %v4635_v50  ;;  %2559 = vst [vmem:[#allocation2 + $0x4b0] sm:$0xff] %v4763_v51  ;;  %v1466_v54 = vpop.f32.mrb[21].mxu0  ;;  %v1978_v55 = vpop.f32.mrb[21].mxu1  ;;  %v3410_v58 = vadd.f32 %v5641_v38, %v3339_v49 }
 0x13d   :  { %v3442_v57 = vmax.f32 %v3378_v48, 0.0  ;;  %2429 = vst [vmem:[#allocation2 + $0xa0] sm:$0xff] %v1466_v54  ;;  %2557 = vst [vmem:[#allocation2 + $0x4a0] sm:$0xff] %v1978_v55  ;;  %v4636_v59 = vpop.f32.mrb[22].mxu0  ;;  %v3377_v60 = vadd.f32 %v5641_v38, %v3306_v52  ;;  %v4764_v63 = vpop.f32.mrb[22].mxu1 }
 0x13e   :  { %v3409_v61 = vadd.f32 %v5641_v38, %v3338_v53  ;;  %2432 = vst [vmem:[#allocation2 + $0xb8] sm:$0xff] %v4636_v59  ;;  %v3474_v62 = vmax.f32 %v3410_v58, 0.0  ;;  %2560 = vst [vmem:[#allocation2 + $0x4b8] sm:$0xff] %v4764_v63  ;;  %v1469_v3 = vpop.f32.mrb[23].mxu0  ;;  %v1981_v4 = vpop.f32.mrb[23].mxu1 }
 0x13f   :  { %v3513_v0 = vmul.f32 %v5652_v56, %v3442_v57  ;;  %v3441_v1 = vmax.f32 %v3377_v60, 0.0  ;;  %2430 = vst [vmem:[#allocation2 + $0xa8] sm:$0xff] %v1469_v3  ;;  %2558 = vst [vmem:[#allocation2 + $0x4a8] sm:$0xff] %v1981_v4  ;;  %v2683_v8 = vld [vmem:[#allocation2 + $0x90] ss:$2 sm:$0xff] }
 0x140   :  { %v3473_v2 = vmax.f32 %v3409_v61, 0.0  ;;  %v3545_v5 = vmul.f32 %v5652_v56, %v3474_v62  ;;  %v2939_v9 = vld [vmem:[#allocation2 + $0x91] ss:$2 sm:$0xff]  ;;  %v2811_v10 = vld [vmem:[#allocation2 + $0x490] ss:$2 sm:$0xff] }
 0x141   :  { %v3512_v6 = vmul.f32 %v5652_v56, %v3441_v1  ;;  %v3067_v15 = vld [vmem:[#allocation2 + $0x491] ss:$2 sm:$0xff]  ;;  %v2681_v16 = vld [vmem:[#allocation2 + $0x80] ss:$2 sm:$0xff]  ;;  %v3185_v23 = vmax.f32 %v2683_v8, %v2939_v9  ;;  %v2937_v24 = vld [vmem:[#allocation2 + $0x81] ss:$2 sm:$0xff] }
 0x142   :  { %v3544_v7 = vmul.f32 %v5652_v56, %v3473_v2  ;;  %v2809_v25 = vld [vmem:[#allocation2 + $0x480] ss:$2 sm:$0xff]  ;;  %v3065_v29 = vld [vmem:[#allocation2 + $0x481] ss:$2 sm:$0xff]  ;;  %v3249_v32 = vmax.f32 %v2811_v10, %v3067_v15  ;;  %v3184_v39 = vmax.f32 %v2681_v16, %v2937_v24 }
 0x143   :  { %v4639_v11 = vpop.f32.mrb[24].mxu0  ;;  %v4767_v12 = vpop.f32.mrb[24].mxu1  ;;  %v4296_v13 = vpack.c.bf16 %v3513_v0, %v3512_v6  ;;  %v3248_v42 = vmax.f32 %v2809_v25, %v3065_v29 }
 0x144   :  { %v4376_v14 = vpack.c.bf16 %v3545_v5, %v3544_v7  ;;  %2435 = vst [vmem:[#allocation2 + $0xd0] sm:$0xff] %v4639_v11  ;;  %2563 = vst [vmem:[#allocation2 + $0x4d0] sm:$0xff] %v4767_v12  ;;  %v1482_v17 = vpop.f32.mrb[25].mxu0  ;;  %v1994_v18 = vpop.f32.mrb[25].mxu1 }
 0x145   :  { %v2687_v19 = vld [vmem:[#allocation2 + $0xb0] ss:$2 sm:$0xff]  ;;  %v2943_v20 = vld [vmem:[#allocation2 + $0xb1] ss:$2 sm:$0xff]  ;;  %2433 = vst [vmem:[#allocation2 + $0xc0] sm:$0xff] %v1482_v17  ;;  %2561 = vst [vmem:[#allocation2 + $0x4c0] sm:$0xff] %v1994_v18 }
 0x146   :  { %v4640_v21 = vpop.f32.mrb[26].mxu0  ;;  %v4768_v22 = vpop.f32.mrb[26].mxu1  ;;  %4448 = vst [vmem:[%s5897_s4 + $0x8] sm:$0xff] %v4296_v13   ;;  %4464 = vst [vmem:[%s5897_s4 + $0x88] sm:$0xff] %v4376_v14   ;;  %v3187_v26 = vmax.f32 %v2687_v19, %v2943_v20  ;;  %v2815_v30 = vld [vmem:[#allocation2 + $0x4b0] ss:$2 sm:$0xff] }
 0x147   :  { %2436 = vst [vmem:[#allocation2 + $0xd8] sm:$0xff] %v4640_v21  ;;  %2564 = vst [vmem:[#allocation2 + $0x4d8] sm:$0xff] %v4768_v22  ;;  %v1485_v27 = vpop.f32.mrb[27].mxu0  ;;  %v1997_v28 = vpop.f32.mrb[27].mxu1  ;;  %v3071_v31 = vld [vmem:[#allocation2 + $0x4b1] ss:$2 sm:$0xff] }
 0x148   :  { %2434 = vst [vmem:[#allocation2 + $0xc8] sm:$0xff] %v1485_v27  ;;  %2562 = vst [vmem:[#allocation2 + $0x4c8] sm:$0xff] %v1997_v28  ;;  %v3309_v33 = vmax.f32 %v3185_v23, %v3187_v26  ;;  %v3251_v34 = vmax.f32 %v2815_v30, %v3071_v31  ;;  %v2685_v35 = vld [vmem:[#allocation2 + $0xa0] ss:$2 sm:$0xff]  ;;  %v2941_v36 = vld [vmem:[#allocation2 + $0xa1] ss:$2 sm:$0xff] }
 0x149   :  { %v2813_v37 = vld [vmem:[#allocation2 + $0x4a0] ss:$2 sm:$0xff]  ;;  %v3186_v40 = vmax.f32 %v2685_v35, %v2941_v36  ;;  %v3069_v41 = vld [vmem:[#allocation2 + $0x4a1] ss:$2 sm:$0xff] }
 0x14a   :  { %v3380_v43 = vadd.f32 %v5641_v38, %v3309_v33  ;;  %v3341_v44 = vmax.f32 %v3249_v32, %v3251_v34  ;;  %v3250_v45 = vmax.f32 %v2813_v37, %v3069_v41 }
 0x14b   :  { %v3308_v46 = vmax.f32 %v3184_v39, %v3186_v40  ;;  %v4643_v47 = vpop.f32.mrb[28].mxu0  ;;  %v4771_v48 = vpop.f32.mrb[28].mxu1 }
 0x14c   :  { %v3444_v49 = vmax.f32 %v3380_v43, 0.0  ;;  %v3412_v50 = vadd.f32 %v5641_v38, %v3341_v44  ;;  %v3340_v51 = vmax.f32 %v3248_v42, %v3250_v45  ;;  %2439 = vst [vmem:[#allocation2 + $0xf0] sm:$0xff] %v4643_v47  ;;  %2567 = vst [vmem:[#allocation2 + $0x4f0] sm:$0xff] %v4771_v48  ;;  %v1498_v52 = vpop.f32.mrb[29].mxu0  ;;  %v2010_v53 = vpop.f32.mrb[29].mxu1 }
 0x14d   :  { %v3379_v54 = vadd.f32 %v5641_v38, %v3308_v46  ;;  %2437 = vst [vmem:[#allocation2 + $0xe0] sm:$0xff] %v1498_v52  ;;  %2565 = vst [vmem:[#allocation2 + $0x4e0] sm:$0xff] %v2010_v53  ;;  %v4644_v58 = vpop.f32.mrb[30].mxu0  ;;  %v4772_v61 = vpop.f32.mrb[30].mxu1 }
 0x14e   :  { %v3476_v55 = vmax.f32 %v3412_v50, 0.0  ;;  %v3411_v57 = vadd.f32 %v5641_v38, %v3340_v51  ;;  %v3515_v59 = vmul.f32 %v5652_v56, %v3444_v49  ;;  %2440 = vst [vmem:[#allocation2 + $0xf8] sm:$0xff] %v4644_v58  ;;  %2568 = vst [vmem:[#allocation2 + $0x4f8] sm:$0xff] %v4772_v61  ;;  %v1501_v0 = vpop.f32.mrb[31].mxu0  ;;  %v2013_v1 = vpop.f32.mrb[31].mxu1 }
 0x14f   :  { %v3443_v60 = vmax.f32 %v3379_v54, 0.0  ;;  %2438 = vst [vmem:[#allocation2 + $0xe8] sm:$0xff] %v1501_v0  ;;  %2566 = vst [vmem:[#allocation2 + $0x4e8] sm:$0xff] %v2013_v1  ;;  %v2691_v4 = vld [vmem:[#allocation2 + $0xd0] ss:$2 sm:$0xff] }
 0x150   :  { %v3547_v62 = vmul.f32 %v5652_v56, %v3476_v55  ;;  %v3475_v63 = vmax.f32 %v3411_v57, 0.0  ;;  %v2947_v6 = vld [vmem:[#allocation2 + $0xd1] ss:$2 sm:$0xff]  ;;  %v2819_v7 = vld [vmem:[#allocation2 + $0x4d0] ss:$2 sm:$0xff] }
 0x151   :  { %v3514_v2 = vmul.f32 %v5652_v56, %v3443_v60  ;;  %v3075_v11 = vld [vmem:[#allocation2 + $0x4d1] ss:$2 sm:$0xff]  ;;  %v2689_v12 = vld [vmem:[#allocation2 + $0xc0] ss:$2 sm:$0xff]  ;;  %v2945_v15 = vld [vmem:[#allocation2 + $0xc1] ss:$2 sm:$0xff]  ;;  %v3189_v23 = vmax.f32 %v2691_v4, %v2947_v6 }
 0x152   :  { %v3546_v3 = vmul.f32 %v5652_v56, %v3475_v63  ;;  %v2817_v16 = vld [vmem:[#allocation2 + $0x4c0] ss:$2 sm:$0xff]  ;;  %v3073_v24 = vld [vmem:[#allocation2 + $0x4c1] ss:$2 sm:$0xff]  ;;  %v3253_v28 = vmax.f32 %v2819_v7, %v3075_v11  ;;  %v3188_v33 = vmax.f32 %v2689_v12, %v2945_v15 }
 0x153   :  { %v4301_v5 = vpack.c.bf16 %v3515_v59, %v3514_v2  ;;  %v4647_v8 = vpop.f32.mrb[32].mxu0  ;;  %v4775_v9 = vpop.f32.mrb[32].mxu1  ;;  %v3252_v37 = vmax.f32 %v2817_v16, %v3073_v24 }
 0x154   :  { %v4381_v10 = vpack.c.bf16 %v3547_v62, %v3546_v3  ;;  %2443 = vst [vmem:[#allocation2 + $0x110] sm:$0xff] %v4647_v8  ;;  %2571 = vst [vmem:[#allocation2 + $0x510] sm:$0xff] %v4775_v9  ;;  %v1514_v13 = vpop.f32.mrb[33].mxu0  ;;  %v2026_v14 = vpop.f32.mrb[33].mxu1 }
 0x155   :  { %4449 = vst [vmem:[%s5897_s4 + $0x10] sm:$0xff] %v4301_v5   ;;  %2441 = vst [vmem:[#allocation2 + $0x100] sm:$0xff] %v1514_v13  ;;  %v4648_v17 = vpop.f32.mrb[34].mxu0  ;;  %v4776_v18 = vpop.f32.mrb[34].mxu1  ;;  %v2695_v19 = vld [vmem:[#allocation2 + $0xf0] ss:$2 sm:$0xff] }
 0x156   :  { %2569 = vst [vmem:[#allocation2 + $0x500] sm:$0xff] %v2026_v14  ;;  %4465 = vst [vmem:[%s5897_s4 + $0x90] sm:$0xff] %v4381_v10   ;;  %v2951_v20 = vld [vmem:[#allocation2 + $0xf1] ss:$2 sm:$0xff]  ;;  %v1517_v21 = vpop.f32.mrb[35].mxu0  ;;  %v2029_v22 = vpop.f32.mrb[35].mxu1 }
 0x157   :  { %2444 = vst [vmem:[#allocation2 + $0x118] sm:$0xff] %v4648_v17  ;;  %2572 = vst [vmem:[#allocation2 + $0x518] sm:$0xff] %v4776_v18  ;;  %v3191_v25 = vmax.f32 %v2695_v19, %v2951_v20  ;;  %v2823_v26 = vld [vmem:[#allocation2 + $0x4f0] ss:$2 sm:$0xff]  ;;  %v3079_v27 = vld [vmem:[#allocation2 + $0x4f1] ss:$2 sm:$0xff] }
 0x158   :  { %2442 = vst [vmem:[#allocation2 + $0x108] sm:$0xff] %v1517_v21  ;;  %2570 = vst [vmem:[#allocation2 + $0x508] sm:$0xff] %v2029_v22  ;;  %v3255_v29 = vmax.f32 %v2823_v26, %v3079_v27  ;;  %v2693_v30 = vld [vmem:[#allocation2 + $0xe0] ss:$2 sm:$0xff]  ;;  %v2949_v31 = vld [vmem:[#allocation2 + $0xe1] ss:$2 sm:$0xff] }
 0x159   :  { %v2821_v32 = vld [vmem:[#allocation2 + $0x4e0] ss:$2 sm:$0xff]  ;;  %v3311_v34 = vmax.f32 %v3189_v23, %v3191_v25  ;;  %v3190_v35 = vmax.f32 %v2693_v30, %v2949_v31  ;;  %v3077_v36 = vld [vmem:[#allocation2 + $0x4e1] ss:$2 sm:$0xff] }
 0x15a   :  { %v3343_v39 = vmax.f32 %v3253_v28, %v3255_v29  ;;  %v3254_v40 = vmax.f32 %v2821_v32, %v3077_v36 }
 0x15b   :  { %v3382_v41 = vadd.f32 %v5641_v38, %v3311_v34  ;;  %v3310_v42 = vmax.f32 %v3188_v33, %v3190_v35  ;;  %v4651_v43 = vpop.f32.mrb[36].mxu0  ;;  %v4779_v44 = vpop.f32.mrb[36].mxu1 }
 0x15c   :  { %v3414_v45 = vadd.f32 %v5641_v38, %v3343_v39  ;;  %v3342_v46 = vmax.f32 %v3252_v37, %v3254_v40  ;;  %2447 = vst [vmem:[#allocation2 + $0x130] sm:$0xff] %v4651_v43  ;;  %2575 = vst [vmem:[#allocation2 + $0x530] sm:$0xff] %v4779_v44  ;;  %v1530_v47 = vpop.f32.mrb[37].mxu0  ;;  %v2042_v48 = vpop.f32.mrb[37].mxu1 }
 0x15d   :  { %v3446_v49 = vmax.f32 %v3382_v41, 0.0  ;;  %v3381_v50 = vadd.f32 %v5641_v38, %v3310_v42  ;;  %2445 = vst [vmem:[#allocation2 + $0x120] sm:$0xff] %v1530_v47  ;;  %2573 = vst [vmem:[#allocation2 + $0x520] sm:$0xff] %v2042_v48  ;;  %v4652_v51 = vpop.f32.mrb[38].mxu0  ;;  %v4780_v54 = vpop.f32.mrb[38].mxu1 }
 0x15e   :  { %v3478_v52 = vmax.f32 %v3414_v45, 0.0  ;;  %v3413_v53 = vadd.f32 %v5641_v38, %v3342_v46  ;;  %2448 = vst [vmem:[#allocation2 + $0x138] sm:$0xff] %v4652_v51  ;;  %2576 = vst [vmem:[#allocation2 + $0x538] sm:$0xff] %v4780_v54  ;;  %v1533_v58 = vpop.f32.mrb[39].mxu0  ;;  %v2045_v61 = vpop.f32.mrb[39].mxu1 }
 0x15f   :  { %v3517_v55 = vmul.f32 %v5652_v56, %v3446_v49  ;;  %v3445_v57 = vmax.f32 %v3381_v50, 0.0  ;;  %2446 = vst [vmem:[#allocation2 + $0x128] sm:$0xff] %v1533_v58  ;;  %v2699_v63 = vld [vmem:[#allocation2 + $0x110] ss:$2 sm:$0xff]  ;;  %2574 = vst [vmem:[#allocation2 + $0x528] sm:$0xff] %v2045_v61 }
 0x160   :  { %v3549_v59 = vmul.f32 %v5652_v56, %v3478_v52  ;;  %v3477_v60 = vmax.f32 %v3413_v53, 0.0  ;;  %v2955_v1 = vld [vmem:[#allocation2 + $0x111] ss:$2 sm:$0xff]  ;;  %v2827_v2 = vld [vmem:[#allocation2 + $0x510] ss:$2 sm:$0xff] }
 0x161   :  { %v3516_v62 = vmul.f32 %v5652_v56, %v3445_v57  ;;  %v3083_v3 = vld [vmem:[#allocation2 + $0x511] ss:$2 sm:$0xff]  ;;  %v2697_v5 = vld [vmem:[#allocation2 + $0x100] ss:$2 sm:$0xff]  ;;  %v2953_v6 = vld [vmem:[#allocation2 + $0x101] ss:$2 sm:$0xff]  ;;  %v3193_v18 = vmax.f32 %v2699_v63, %v2955_v1 }
 0x162   :  { %v3548_v0 = vmul.f32 %v5652_v56, %v3477_v60  ;;  %v2825_v10 = vld [vmem:[#allocation2 + $0x500] ss:$2 sm:$0xff]  ;;  %v3081_v11 = vld [vmem:[#allocation2 + $0x501] ss:$2 sm:$0xff]  ;;  %v3257_v24 = vmax.f32 %v2827_v2, %v3083_v3  ;;  %v3192_v28 = vmax.f32 %v2697_v5, %v2953_v6 }
 0x163   :  { %v4306_v4 = vpack.c.bf16 %v3517_v55, %v3516_v62  ;;  %v4655_v7 = vpop.f32.mrb[40].mxu0  ;;  %v4783_v8 = vpop.f32.mrb[40].mxu1  ;;  %v3256_v33 = vmax.f32 %v2825_v10, %v3081_v11 }
 0x164   :  { %v4386_v9 = vpack.c.bf16 %v3549_v59, %v3548_v0  ;;  %2451 = vst [vmem:[#allocation2 + $0x150] sm:$0xff] %v4655_v7  ;;  %2579 = vst [vmem:[#allocation2 + $0x550] sm:$0xff] %v4783_v8  ;;  %v1546_v12 = vpop.f32.mrb[41].mxu0  ;;  %v2058_v13 = vpop.f32.mrb[41].mxu1 }
 0x165   :  { %4450 = vst [vmem:[%s5897_s4 + $0x18] sm:$0xff] %v4306_v4   ;;  %v2703_v14 = vld [vmem:[#allocation2 + $0x130] ss:$2 sm:$0xff]  ;;  %v2959_v15 = vld [vmem:[#allocation2 + $0x131] ss:$2 sm:$0xff]  ;;  %2449 = vst [vmem:[#allocation2 + $0x140] sm:$0xff] %v1546_v12 }
 0x166   :  { %2577 = vst [vmem:[#allocation2 + $0x540] sm:$0xff] %v2058_v13  ;;  %v4656_v16 = vpop.f32.mrb[42].mxu0  ;;  %v4784_v17 = vpop.f32.mrb[42].mxu1  ;;  %4466 = vst [vmem:[%s5897_s4 + $0x98] sm:$0xff] %v4386_v9   ;;  %v3195_v19 = vmax.f32 %v2703_v14, %v2959_v15  ;;  %v2831_v20 = vld [vmem:[#allocation2 + $0x530] ss:$2 sm:$0xff] }
 0x167   :  { %v3087_v21 = vld [vmem:[#allocation2 + $0x531] ss:$2 sm:$0xff]  ;;  %2452 = vst [vmem:[#allocation2 + $0x158] sm:$0xff] %v4656_v16  ;;  %2580 = vst [vmem:[#allocation2 + $0x558] sm:$0xff] %v4784_v17  ;;  %v1549_v22 = vpop.f32.mrb[43].mxu0  ;;  %v2061_v23 = vpop.f32.mrb[43].mxu1 }
 0x168   :  { %v3259_v25 = vmax.f32 %v2831_v20, %v3087_v21  ;;  %v2701_v26 = vld [vmem:[#allocation2 + $0x120] ss:$2 sm:$0xff]  ;;  %v2957_v27 = vld [vmem:[#allocation2 + $0x121] ss:$2 sm:$0xff]  ;;  %2450 = vst [vmem:[#allocation2 + $0x148] sm:$0xff] %v1549_v22  ;;  %2578 = vst [vmem:[#allocation2 + $0x548] sm:$0xff] %v2061_v23  ;;  %v3313_v29 = vmax.f32 %v3193_v18, %v3195_v19 }
 0x169   :  { %v3194_v30 = vmax.f32 %v2701_v26, %v2957_v27  ;;  %v2829_v31 = vld [vmem:[#allocation2 + $0x520] ss:$2 sm:$0xff]  ;;  %v3085_v32 = vld [vmem:[#allocation2 + $0x521] ss:$2 sm:$0xff] }
 0x16a   :  { %v3345_v34 = vmax.f32 %v3257_v24, %v3259_v25  ;;  %v3258_v35 = vmax.f32 %v2829_v31, %v3085_v32  ;;  %v3384_v36 = vadd.f32 %v5641_v38, %v3313_v29 }
 0x16b   :  { %v3312_v37 = vmax.f32 %v3192_v28, %v3194_v30  ;;  %v4659_v41 = vpop.f32.mrb[44].mxu0  ;;  %v4787_v42 = vpop.f32.mrb[44].mxu1 }
 0x16c   :  { %v3416_v39 = vadd.f32 %v5641_v38, %v3345_v34  ;;  %v3344_v40 = vmax.f32 %v3256_v33, %v3258_v35  ;;  %v3448_v43 = vmax.f32 %v3384_v36, 0.0  ;;  %2455 = vst [vmem:[#allocation2 + $0x170] sm:$0xff] %v4659_v41  ;;  %2583 = vst [vmem:[#allocation2 + $0x570] sm:$0xff] %v4787_v42  ;;  %v1562_v45 = vpop.f32.mrb[45].mxu0  ;;  %v2074_v46 = vpop.f32.mrb[45].mxu1 }
 0x16d   :  { %v3383_v44 = vadd.f32 %v5641_v38, %v3312_v37  ;;  %2453 = vst [vmem:[#allocation2 + $0x160] sm:$0xff] %v1562_v45  ;;  %2581 = vst [vmem:[#allocation2 + $0x560] sm:$0xff] %v2074_v46  ;;  %v4660_v49 = vpop.f32.mrb[46].mxu0  ;;  %v4788_v52 = vpop.f32.mrb[46].mxu1 }
 0x16e   :  { %v3480_v47 = vmax.f32 %v3416_v39, 0.0  ;;  %v3415_v48 = vadd.f32 %v5641_v38, %v3344_v40  ;;  %v3519_v50 = vmul.f32 %v5652_v56, %v3448_v43  ;;  %2456 = vst [vmem:[#allocation2 + $0x178] sm:$0xff] %v4660_v49  ;;  %2584 = vst [vmem:[#allocation2 + $0x578] sm:$0xff] %v4788_v52  ;;  %v1565_v55 = vpop.f32.mrb[47].mxu0  ;;  %v2077_v58 = vpop.f32.mrb[47].mxu1 }
 0x16f   :  { %v3447_v51 = vmax.f32 %v3383_v44, 0.0  ;;  %2454 = vst [vmem:[#allocation2 + $0x168] sm:$0xff] %v1565_v55  ;;  %v2707_v60 = vld [vmem:[#allocation2 + $0x150] ss:$2 sm:$0xff]  ;;  %2582 = vst [vmem:[#allocation2 + $0x568] sm:$0xff] %v2077_v58 }
 0x170   :  { %v3551_v53 = vmul.f32 %v5652_v56, %v3480_v47  ;;  %v3479_v54 = vmax.f32 %v3415_v48, 0.0  ;;  %v2963_v62 = vld [vmem:[#allocation2 + $0x151] ss:$2 sm:$0xff]  ;;  %v2835_v63 = vld [vmem:[#allocation2 + $0x550] ss:$2 sm:$0xff] }
 0x171   :  { %v3518_v57 = vmul.f32 %v5652_v56, %v3447_v51  ;;  %v3091_v0 = vld [vmem:[#allocation2 + $0x551] ss:$2 sm:$0xff]  ;;  %v2705_v2 = vld [vmem:[#allocation2 + $0x140] ss:$2 sm:$0xff]  ;;  %v2961_v3 = vld [vmem:[#allocation2 + $0x141] ss:$2 sm:$0xff]  ;;  %v3197_v14 = vmax.f32 %v2707_v60, %v2963_v62 }
 0x172   :  { %v3550_v59 = vmul.f32 %v5652_v56, %v3479_v54  ;;  %v2833_v6 = vld [vmem:[#allocation2 + $0x540] ss:$2 sm:$0xff]  ;;  %v3089_v7 = vld [vmem:[#allocation2 + $0x541] ss:$2 sm:$0xff]  ;;  %v3261_v20 = vmax.f32 %v2835_v63, %v3091_v0  ;;  %v3196_v24 = vmax.f32 %v2705_v2, %v2961_v3 }
 0x173   :  { %v4311_v61 = vpack.c.bf16 %v3519_v50, %v3518_v57  ;;  %v4663_v4 = vpop.f32.mrb[48].mxu0  ;;  %v4791_v5 = vpop.f32.mrb[48].mxu1  ;;  %v3260_v29 = vmax.f32 %v2833_v6, %v3089_v7 }
 0x174   :  { %v4391_v1 = vpack.c.bf16 %v3551_v53, %v3550_v59  ;;  %2459 = vst [vmem:[#allocation2 + $0x190] sm:$0xff] %v4663_v4  ;;  %2587 = vst [vmem:[#allocation2 + $0x590] sm:$0xff] %v4791_v5  ;;  %v1578_v8 = vpop.f32.mrb[49].mxu0  ;;  %v2090_v9 = vpop.f32.mrb[49].mxu1 }
 0x175   :  { %4451 = vst [vmem:[%s5897_s4 + $0x20] sm:$0xff] %v4311_v61   ;;  %v2711_v10 = vld [vmem:[#allocation2 + $0x170] ss:$2 sm:$0xff]  ;;  %v2967_v11 = vld [vmem:[#allocation2 + $0x171] ss:$2 sm:$0xff]  ;;  %2457 = vst [vmem:[#allocation2 + $0x180] sm:$0xff] %v1578_v8 }
 0x176   :  { %4467 = vst [vmem:[%s5897_s4 + $0xa0] sm:$0xff] %v4391_v1   ;;  %2585 = vst [vmem:[#allocation2 + $0x580] sm:$0xff] %v2090_v9  ;;  %v4664_v12 = vpop.f32.mrb[50].mxu0  ;;  %v4792_v13 = vpop.f32.mrb[50].mxu1  ;;  %v3199_v15 = vmax.f32 %v2711_v10, %v2967_v11  ;;  %v2839_v16 = vld [vmem:[#allocation2 + $0x570] ss:$2 sm:$0xff] }
 0x177   :  { %v3095_v17 = vld [vmem:[#allocation2 + $0x571] ss:$2 sm:$0xff]  ;;  %2460 = vst [vmem:[#allocation2 + $0x198] sm:$0xff] %v4664_v12  ;;  %2588 = vst [vmem:[#allocation2 + $0x598] sm:$0xff] %v4792_v13  ;;  %v1581_v18 = vpop.f32.mrb[51].mxu0  ;;  %v2093_v19 = vpop.f32.mrb[51].mxu1 }
 0x178   :  { %v3263_v21 = vmax.f32 %v2839_v16, %v3095_v17  ;;  %v2709_v22 = vld [vmem:[#allocation2 + $0x160] ss:$2 sm:$0xff]  ;;  %v2965_v23 = vld [vmem:[#allocation2 + $0x161] ss:$2 sm:$0xff]  ;;  %2458 = vst [vmem:[#allocation2 + $0x188] sm:$0xff] %v1581_v18  ;;  %2586 = vst [vmem:[#allocation2 + $0x588] sm:$0xff] %v2093_v19  ;;  %v3315_v25 = vmax.f32 %v3197_v14, %v3199_v15 }
 0x179   :  { %v3198_v26 = vmax.f32 %v2709_v22, %v2965_v23  ;;  %v2837_v27 = vld [vmem:[#allocation2 + $0x560] ss:$2 sm:$0xff]  ;;  %v3093_v28 = vld [vmem:[#allocation2 + $0x561] ss:$2 sm:$0xff] }
 0x17a   :  { %v3347_v30 = vmax.f32 %v3261_v20, %v3263_v21  ;;  %v3262_v31 = vmax.f32 %v2837_v27, %v3093_v28  ;;  %v3386_v32 = vadd.f32 %v5641_v38, %v3315_v25 }
 0x17b   :  { %v3314_v33 = vmax.f32 %v3196_v24, %v3198_v26  ;;  %v4667_v36 = vpop.f32.mrb[52].mxu0  ;;  %v4795_v37 = vpop.f32.mrb[52].mxu1 }
 0x17c   :  { %v3418_v34 = vadd.f32 %v5641_v38, %v3347_v30  ;;  %v3346_v35 = vmax.f32 %v3260_v29, %v3262_v31  ;;  %v3450_v39 = vmax.f32 %v3386_v32, 0.0  ;;  %2463 = vst [vmem:[#allocation2 + $0x1b0] sm:$0xff] %v4667_v36  ;;  %2591 = vst [vmem:[#allocation2 + $0x5b0] sm:$0xff] %v4795_v37  ;;  %v1594_v41 = vpop.f32.mrb[53].mxu0  ;;  %v2106_v42 = vpop.f32.mrb[53].mxu1 }
 0x17d   :  { %v3385_v40 = vadd.f32 %v5641_v38, %v3314_v33  ;;  %2461 = vst [vmem:[#allocation2 + $0x1a0] sm:$0xff] %v1594_v41  ;;  %2589 = vst [vmem:[#allocation2 + $0x5a0] sm:$0xff] %v2106_v42  ;;  %v4668_v45 = vpop.f32.mrb[54].mxu0  ;;  %v4796_v48 = vpop.f32.mrb[54].mxu1 }
 0x17e   :  { %v3482_v43 = vmax.f32 %v3418_v34, 0.0  ;;  %v3417_v44 = vadd.f32 %v5641_v38, %v3346_v35  ;;  %v3521_v46 = vmul.f32 %v5652_v56, %v3450_v39  ;;  %2464 = vst [vmem:[#allocation2 + $0x1b8] sm:$0xff] %v4668_v45  ;;  %2592 = vst [vmem:[#allocation2 + $0x5b8] sm:$0xff] %v4796_v48  ;;  %v1597_v51 = vpop.f32.mrb[55].mxu0  ;;  %v2109_v53 = vpop.f32.mrb[55].mxu1 }
 0x17f   :  { %v3449_v47 = vmax.f32 %v3385_v40, 0.0  ;;  %2462 = vst [vmem:[#allocation2 + $0x1a8] sm:$0xff] %v1597_v51  ;;  %v2715_v55 = vld [vmem:[#allocation2 + $0x190] ss:$2 sm:$0xff]  ;;  %2590 = vst [vmem:[#allocation2 + $0x5a8] sm:$0xff] %v2109_v53 }
 0x180   :  { %v3553_v49 = vmul.f32 %v5652_v56, %v3482_v43  ;;  %v3481_v50 = vmax.f32 %v3417_v44, 0.0  ;;  %v2971_v58 = vld [vmem:[#allocation2 + $0x191] ss:$2 sm:$0xff]  ;;  %v2843_v59 = vld [vmem:[#allocation2 + $0x590] ss:$2 sm:$0xff] }
 0x181   :  { %v3520_v52 = vmul.f32 %v5652_v56, %v3449_v47  ;;  %v3099_v60 = vld [vmem:[#allocation2 + $0x591] ss:$2 sm:$0xff]  ;;  %v2713_v62 = vld [vmem:[#allocation2 + $0x180] ss:$2 sm:$0xff]  ;;  %v2969_v63 = vld [vmem:[#allocation2 + $0x181] ss:$2 sm:$0xff]  ;;  %v3201_v10 = vmax.f32 %v2715_v55, %v2971_v58 }
 0x182   :  { %v3552_v54 = vmul.f32 %v5652_v56, %v3481_v50  ;;  %v2841_v2 = vld [vmem:[#allocation2 + $0x580] ss:$2 sm:$0xff]  ;;  %v3097_v3 = vld [vmem:[#allocation2 + $0x581] ss:$2 sm:$0xff]  ;;  %v3265_v16 = vmax.f32 %v2843_v59, %v3099_v60  ;;  %v3200_v20 = vmax.f32 %v2713_v62, %v2969_v63 }
 0x183   :  { %v4316_v57 = vpack.c.bf16 %v3521_v46, %v3520_v52  ;;  %v4671_v0 = vpop.f32.mrb[56].mxu0  ;;  %v4799_v1 = vpop.f32.mrb[56].mxu1  ;;  %v3264_v25 = vmax.f32 %v2841_v2, %v3097_v3 }
 0x184   :  { %v4396_v61 = vpack.c.bf16 %v3553_v49, %v3552_v54  ;;  %2467 = vst [vmem:[#allocation2 + $0x1d0] sm:$0xff] %v4671_v0  ;;  %2595 = vst [vmem:[#allocation2 + $0x5d0] sm:$0xff] %v4799_v1  ;;  %v1610_v4 = vpop.f32.mrb[57].mxu0  ;;  %v2122_v5 = vpop.f32.mrb[57].mxu1 }
 0x185   :  { %4452 = vst [vmem:[%s5897_s4 + $0x28] sm:$0xff] %v4316_v57   ;;  %v2719_v6 = vld [vmem:[#allocation2 + $0x1b0] ss:$2 sm:$0xff]  ;;  %v2975_v7 = vld [vmem:[#allocation2 + $0x1b1] ss:$2 sm:$0xff]  ;;  %2465 = vst [vmem:[#allocation2 + $0x1c0] sm:$0xff] %v1610_v4 }
 0x186   :  { %4468 = vst [vmem:[%s5897_s4 + $0xa8] sm:$0xff] %v4396_v61   ;;  %2593 = vst [vmem:[#allocation2 + $0x5c0] sm:$0xff] %v2122_v5  ;;  %v4672_v8 = vpop.f32.mrb[58].mxu0  ;;  %v4800_v9 = vpop.f32.mrb[58].mxu1  ;;  %v3203_v11 = vmax.f32 %v2719_v6, %v2975_v7  ;;  %v2847_v12 = vld [vmem:[#allocation2 + $0x5b0] ss:$2 sm:$0xff] }
 0x187   :  { %v3103_v13 = vld [vmem:[#allocation2 + $0x5b1] ss:$2 sm:$0xff]  ;;  %2468 = vst [vmem:[#allocation2 + $0x1d8] sm:$0xff] %v4672_v8  ;;  %2596 = vst [vmem:[#allocation2 + $0x5d8] sm:$0xff] %v4800_v9  ;;  %v1613_v14 = vpop.f32.mrb[59].mxu0  ;;  %v2125_v15 = vpop.f32.mrb[59].mxu1 }
 0x188   :  { %v3267_v17 = vmax.f32 %v2847_v12, %v3103_v13  ;;  %v2717_v18 = vld [vmem:[#allocation2 + $0x1a0] ss:$2 sm:$0xff]  ;;  %v2973_v19 = vld [vmem:[#allocation2 + $0x1a1] ss:$2 sm:$0xff]  ;;  %2466 = vst [vmem:[#allocation2 + $0x1c8] sm:$0xff] %v1613_v14  ;;  %2594 = vst [vmem:[#allocation2 + $0x5c8] sm:$0xff] %v2125_v15  ;;  %v3317_v21 = vmax.f32 %v3201_v10, %v3203_v11 }
 0x189   :  { %v3202_v22 = vmax.f32 %v2717_v18, %v2973_v19  ;;  %v2845_v23 = vld [vmem:[#allocation2 + $0x5a0] ss:$2 sm:$0xff]  ;;  %v3101_v24 = vld [vmem:[#allocation2 + $0x5a1] ss:$2 sm:$0xff] }
 0x18a   :  { %v3349_v26 = vmax.f32 %v3265_v16, %v3267_v17  ;;  %v3266_v27 = vmax.f32 %v2845_v23, %v3101_v24  ;;  %v3388_v28 = vadd.f32 %v5641_v38, %v3317_v21 }
 0x18b   :  { %v3316_v29 = vmax.f32 %v3200_v20, %v3202_v22  ;;  %v4675_v32 = vpop.f32.mrb[60].mxu0  ;;  %v4803_v33 = vpop.f32.mrb[60].mxu1  ;;  %v5769_v22 = vld [vmem:[#allocation5] ss:$0 sm:$0xff] }
 0x18c   :  { %v3420_v30 = vadd.f32 %v5641_v38, %v3349_v26  ;;  %v3348_v31 = vmax.f32 %v3264_v25, %v3266_v27  ;;  %v3452_v34 = vmax.f32 %v3388_v28, 0.0  ;;  %2471 = vst [vmem:[#allocation2 + $0x1f0] sm:$0xff] %v4675_v32  ;;  %2599 = vst [vmem:[#allocation2 + $0x5f0] sm:$0xff] %v4803_v33  ;;  %v1626_v36 = vpop.f32.mrb[61].mxu0  ;;  %v2138_v37 = vpop.f32.mrb[61].mxu1 }
 0x18d   :  { %v3387_v35 = vadd.f32 %v5641_v38, %v3316_v29  ;;  %2469 = vst [vmem:[#allocation2 + $0x1e0] sm:$0xff] %v1626_v36  ;;  %2597 = vst [vmem:[#allocation2 + $0x5e0] sm:$0xff] %v2138_v37  ;;  %v4676_v41 = vpop.f32.mrb[62].mxu0  ;;  %v4804_v44 = vpop.f32.mrb[62].mxu1  ;;  %v5775_v36 = vld [vmem:[#allocation7] ss:$0 sm:$0xff] }
 0x18e   :  { %v3484_v39 = vmax.f32 %v3420_v30, 0.0  ;;  %v3419_v40 = vadd.f32 %v5641_v38, %v3348_v31  ;;  %v3523_v42 = vmul.f32 %v5652_v56, %v3452_v34  ;;  %2472 = vst [vmem:[#allocation2 + $0x1f8] sm:$0xff] %v4676_v41  ;;  %2600 = vst [vmem:[#allocation2 + $0x5f8] sm:$0xff] %v4804_v44  ;;  %v1629_v47 = vpop.f32.mrb[63].mxu0  ;;  %v2141_v49 = vpop.f32.mrb[63].mxu1 }
 0x18f   :  { %v3451_v43 = vmax.f32 %v3387_v35, 0.0  ;;  %2470 = vst [vmem:[#allocation2 + $0x1e8] sm:$0xff] %v1629_v47  ;;  %v2723_v38 = vld [vmem:[#allocation2 + $0x1d0] ss:$2 sm:$0xff]  ;;  %2598 = vst [vmem:[#allocation2 + $0x5e8] sm:$0xff] %v2141_v49 }
 0x190   :  { %v3555_v45 = vmul.f32 %v5652_v56, %v3484_v39  ;;  %v3483_v46 = vmax.f32 %v3419_v40, 0.0  ;;  %v2979_v52 = vld [vmem:[#allocation2 + $0x1d1] ss:$2 sm:$0xff]  ;;  %v2851_v53 = vld [vmem:[#allocation2 + $0x5d0] ss:$2 sm:$0xff] }
 0x191   :  { %v3522_v48 = vmul.f32 %v5652_v56, %v3451_v43  ;;  %v3107_v54 = vld [vmem:[#allocation2 + $0x5d1] ss:$2 sm:$0xff]  ;;  %v2721_v57 = vld [vmem:[#allocation2 + $0x1c0] ss:$2 sm:$0xff]  ;;  %v2977_v58 = vld [vmem:[#allocation2 + $0x1c1] ss:$2 sm:$0xff]  ;;  %v3205_v4 = vmax.f32 %v2723_v38, %v2979_v52 }
 0x192   :  { %v3554_v50 = vmul.f32 %v5652_v56, %v3483_v46  ;;  %v2849_v61 = vld [vmem:[#allocation2 + $0x5c0] ss:$2 sm:$0xff]  ;;  %v3105_v62 = vld [vmem:[#allocation2 + $0x5c1] ss:$2 sm:$0xff]  ;;  %v3269_v10 = vmax.f32 %v2851_v53, %v3107_v54  ;;  %v3204_v14 = vmax.f32 %v2721_v57, %v2977_v58 }
 0x193   :  { %v4321_v51 = vpack.c.bf16 %v3523_v42, %v3522_v48  ;;  %v4679_v59 = vpop.f32.mrb[64].mxu0  ;;  %v4807_v60 = vpop.f32.mrb[64].mxu1  ;;  %v3268_v19 = vmax.f32 %v2849_v61, %v3105_v62 }
 0x194   :  { %v4401_v55 = vpack.c.bf16 %v3555_v45, %v3554_v50  ;;  %2475 = vst [vmem:[#allocation2 + $0x210] sm:$0xff] %v4679_v59  ;;  %2603 = vst [vmem:[#allocation2 + $0x610] sm:$0xff] %v4807_v60  ;;  %v1642_v56 = vpop.f32.mrb[65].mxu0  ;;  %v2154_v63 = vpop.f32.mrb[65].mxu1 }
 0x195   :  { %4453 = vst [vmem:[%s5897_s4 + $0x30] sm:$0xff] %v4321_v51   ;;  %v2727_v0 = vld [vmem:[#allocation2 + $0x1f0] ss:$2 sm:$0xff]  ;;  %v2983_v1 = vld [vmem:[#allocation2 + $0x1f1] ss:$2 sm:$0xff]  ;;  %2473 = vst [vmem:[#allocation2 + $0x200] sm:$0xff] %v1642_v56 }
 0x196   :  { %4469 = vst [vmem:[%s5897_s4 + $0xb0] sm:$0xff] %v4401_v55   ;;  %2601 = vst [vmem:[#allocation2 + $0x600] sm:$0xff] %v2154_v63  ;;  %v4680_v2 = vpop.f32.mrb[66].mxu0  ;;  %v4808_v3 = vpop.f32.mrb[66].mxu1  ;;  %v3207_v5 = vmax.f32 %v2727_v0, %v2983_v1  ;;  %v2855_v6 = vld [vmem:[#allocation2 + $0x5f0] ss:$2 sm:$0xff] }
 0x197   :  { %v3111_v7 = vld [vmem:[#allocation2 + $0x5f1] ss:$2 sm:$0xff]  ;;  %2476 = vst [vmem:[#allocation2 + $0x218] sm:$0xff] %v4680_v2  ;;  %2604 = vst [vmem:[#allocation2 + $0x618] sm:$0xff] %v4808_v3  ;;  %v1645_v8 = vpop.f32.mrb[67].mxu0  ;;  %v2157_v9 = vpop.f32.mrb[67].mxu1 }
 0x198   :  { %v3271_v11 = vmax.f32 %v2855_v6, %v3111_v7  ;;  %v2725_v12 = vld [vmem:[#allocation2 + $0x1e0] ss:$2 sm:$0xff]  ;;  %v2981_v13 = vld [vmem:[#allocation2 + $0x1e1] ss:$2 sm:$0xff]  ;;  %2474 = vst [vmem:[#allocation2 + $0x208] sm:$0xff] %v1645_v8  ;;  %2602 = vst [vmem:[#allocation2 + $0x608] sm:$0xff] %v2157_v9  ;;  %v3319_v15 = vmax.f32 %v3205_v4, %v3207_v5 }
 0x199   :  { %v3206_v16 = vmax.f32 %v2725_v12, %v2981_v13  ;;  %v2853_v17 = vld [vmem:[#allocation2 + $0x5e0] ss:$2 sm:$0xff]  ;;  %v3109_v18 = vld [vmem:[#allocation2 + $0x5e1] ss:$2 sm:$0xff] }
 0x19a   :  { %v3351_v20 = vmax.f32 %v3269_v10, %v3271_v11  ;;  %v3270_v21 = vmax.f32 %v2853_v17, %v3109_v18  ;;  %v3390_v23 = vadd.f32 %v5769_v22, %v3319_v15 }
 0x19b   :  { %v3318_v24 = vmax.f32 %v3204_v14, %v3206_v16  ;;  %v4683_v27 = vpop.f32.mrb[68].mxu0  ;;  %v4811_v28 = vpop.f32.mrb[68].mxu1 }
 0x19c   :  { %v3422_v25 = vadd.f32 %v5769_v22, %v3351_v20  ;;  %v3350_v26 = vmax.f32 %v3268_v19, %v3270_v21  ;;  %v3454_v29 = vmax.f32 %v3390_v23, 0.0  ;;  %2479 = vst [vmem:[#allocation2 + $0x230] sm:$0xff] %v4683_v27  ;;  %2607 = vst [vmem:[#allocation2 + $0x630] sm:$0xff] %v4811_v28  ;;  %v1658_v31 = vpop.f32.mrb[69].mxu0  ;;  %v2170_v32 = vpop.f32.mrb[69].mxu1 }
 0x19d   :  { %v3389_v30 = vadd.f32 %v5769_v22, %v3318_v24  ;;  %2477 = vst [vmem:[#allocation2 + $0x220] sm:$0xff] %v1658_v31  ;;  %2605 = vst [vmem:[#allocation2 + $0x620] sm:$0xff] %v2170_v32  ;;  %v4684_v35 = vpop.f32.mrb[70].mxu0  ;;  %v4812_v40 = vpop.f32.mrb[70].mxu1 }
 0x19e   :  { %v3486_v33 = vmax.f32 %v3422_v25, 0.0  ;;  %v3421_v34 = vadd.f32 %v5769_v22, %v3350_v26  ;;  %v3525_v37 = vmul.f32 %v5775_v36, %v3454_v29  ;;  %2480 = vst [vmem:[#allocation2 + $0x238] sm:$0xff] %v4684_v35  ;;  %2608 = vst [vmem:[#allocation2 + $0x638] sm:$0xff] %v4812_v40  ;;  %v1661_v43 = vpop.f32.mrb[71].mxu0  ;;  %v2173_v45 = vpop.f32.mrb[71].mxu1 }
 0x19f   :  { %v3453_v39 = vmax.f32 %v3389_v30, 0.0  ;;  %2478 = vst [vmem:[#allocation2 + $0x228] sm:$0xff] %v1661_v43  ;;  %v2731_v47 = vld [vmem:[#allocation2 + $0x210] ss:$2 sm:$0xff]  ;;  %2606 = vst [vmem:[#allocation2 + $0x628] sm:$0xff] %v2173_v45 }
 0x1a0   :  { %v3557_v41 = vmul.f32 %v5775_v36, %v3486_v33  ;;  %v3485_v42 = vmax.f32 %v3421_v34, 0.0  ;;  %v2987_v49 = vld [vmem:[#allocation2 + $0x211] ss:$2 sm:$0xff]  ;;  %v2859_v50 = vld [vmem:[#allocation2 + $0x610] ss:$2 sm:$0xff] }
 0x1a1   :  { %v3524_v44 = vmul.f32 %v5775_v36, %v3453_v39  ;;  %v3115_v38 = vld [vmem:[#allocation2 + $0x611] ss:$2 sm:$0xff]  ;;  %v2729_v52 = vld [vmem:[#allocation2 + $0x200] ss:$2 sm:$0xff]  ;;  %v2985_v53 = vld [vmem:[#allocation2 + $0x201] ss:$2 sm:$0xff]  ;;  %v3209_v0 = vmax.f32 %v2731_v47, %v2987_v49 }
 0x1a2   :  { %v3556_v46 = vmul.f32 %v5775_v36, %v3485_v42  ;;  %v2857_v57 = vld [vmem:[#allocation2 + $0x600] ss:$2 sm:$0xff]  ;;  %v3113_v58 = vld [vmem:[#allocation2 + $0x601] ss:$2 sm:$0xff]  ;;  %v3273_v6 = vmax.f32 %v2859_v50, %v3115_v38  ;;  %v3208_v10 = vmax.f32 %v2729_v52, %v2985_v53 }
 0x1a3   :  { %v4326_v48 = vpack.c.bf16 %v3525_v37, %v3524_v44  ;;  %v4687_v54 = vpop.f32.mrb[72].mxu0  ;;  %v4815_v55 = vpop.f32.mrb[72].mxu1  ;;  %v3272_v15 = vmax.f32 %v2857_v57, %v3113_v58 }
 0x1a4   :  { %v4406_v51 = vpack.c.bf16 %v3557_v41, %v3556_v46  ;;  %2483 = vst [vmem:[#allocation2 + $0x250] sm:$0xff] %v4687_v54  ;;  %2611 = vst [vmem:[#allocation2 + $0x650] sm:$0xff] %v4815_v55  ;;  %v1674_v59 = vpop.f32.mrb[73].mxu0  ;;  %v2186_v60 = vpop.f32.mrb[73].mxu1 }
 0x1a5   :  { %4454 = vst [vmem:[%s5897_s4 + $0x38] sm:$0xff] %v4326_v48   ;;  %v2735_v61 = vld [vmem:[#allocation2 + $0x230] ss:$2 sm:$0xff]  ;;  %v2991_v62 = vld [vmem:[#allocation2 + $0x231] ss:$2 sm:$0xff]  ;;  %2481 = vst [vmem:[#allocation2 + $0x240] sm:$0xff] %v1674_v59 }
 0x1a6   :  { %4470 = vst [vmem:[%s5897_s4 + $0xb8] sm:$0xff] %v4406_v51   ;;  %2609 = vst [vmem:[#allocation2 + $0x640] sm:$0xff] %v2186_v60  ;;  %v4688_v56 = vpop.f32.mrb[74].mxu0  ;;  %v4816_v63 = vpop.f32.mrb[74].mxu1  ;;  %v3211_v1 = vmax.f32 %v2735_v61, %v2991_v62  ;;  %v2863_v2 = vld [vmem:[#allocation2 + $0x630] ss:$2 sm:$0xff] }
 0x1a7   :  { %v3119_v3 = vld [vmem:[#allocation2 + $0x631] ss:$2 sm:$0xff]  ;;  %2484 = vst [vmem:[#allocation2 + $0x258] sm:$0xff] %v4688_v56  ;;  %2612 = vst [vmem:[#allocation2 + $0x658] sm:$0xff] %v4816_v63  ;;  %v1677_v4 = vpop.f32.mrb[75].mxu0  ;;  %v2189_v5 = vpop.f32.mrb[75].mxu1 }
 0x1a8   :  { %v3275_v7 = vmax.f32 %v2863_v2, %v3119_v3  ;;  %v2733_v8 = vld [vmem:[#allocation2 + $0x220] ss:$2 sm:$0xff]  ;;  %v2989_v9 = vld [vmem:[#allocation2 + $0x221] ss:$2 sm:$0xff]  ;;  %2482 = vst [vmem:[#allocation2 + $0x248] sm:$0xff] %v1677_v4  ;;  %2610 = vst [vmem:[#allocation2 + $0x648] sm:$0xff] %v2189_v5  ;;  %v3321_v11 = vmax.f32 %v3209_v0, %v3211_v1 }
 0x1a9   :  { %v3210_v12 = vmax.f32 %v2733_v8, %v2989_v9  ;;  %v2861_v13 = vld [vmem:[#allocation2 + $0x620] ss:$2 sm:$0xff]  ;;  %v3117_v14 = vld [vmem:[#allocation2 + $0x621] ss:$2 sm:$0xff] }
 0x1aa   :  { %v3353_v16 = vmax.f32 %v3273_v6, %v3275_v7  ;;  %v3274_v17 = vmax.f32 %v2861_v13, %v3117_v14  ;;  %v3392_v18 = vadd.f32 %v5769_v22, %v3321_v11 }
 0x1ab   :  { %v3320_v19 = vmax.f32 %v3208_v10, %v3210_v12  ;;  %v4691_v23 = vpop.f32.mrb[76].mxu0  ;;  %v4819_v24 = vpop.f32.mrb[76].mxu1 }
 0x1ac   :  { %v3424_v20 = vadd.f32 %v5769_v22, %v3353_v16  ;;  %v3352_v21 = vmax.f32 %v3272_v15, %v3274_v17  ;;  %v3456_v25 = vmax.f32 %v3392_v18, 0.0  ;;  %2487 = vst [vmem:[#allocation2 + $0x270] sm:$0xff] %v4691_v23  ;;  %2615 = vst [vmem:[#allocation2 + $0x670] sm:$0xff] %v4819_v24  ;;  %v1690_v27 = vpop.f32.mrb[77].mxu0  ;;  %v2202_v28 = vpop.f32.mrb[77].mxu1 }
 0x1ad   :  { %v3391_v26 = vadd.f32 %v5769_v22, %v3320_v19  ;;  %2485 = vst [vmem:[#allocation2 + $0x260] sm:$0xff] %v1690_v27  ;;  %2613 = vst [vmem:[#allocation2 + $0x660] sm:$0xff] %v2202_v28  ;;  %v4692_v31 = vpop.f32.mrb[78].mxu0  ;;  %v4820_v34 = vpop.f32.mrb[78].mxu1 }
 0x1ae   :  { %v3488_v29 = vmax.f32 %v3424_v20, 0.0  ;;  %v3423_v30 = vadd.f32 %v5769_v22, %v3352_v21  ;;  %v3527_v32 = vmul.f32 %v5775_v36, %v3456_v25  ;;  %2488 = vst [vmem:[#allocation2 + $0x278] sm:$0xff] %v4692_v31  ;;  %2616 = vst [vmem:[#allocation2 + $0x678] sm:$0xff] %v4820_v34  ;;  %v1693_v39 = vpop.f32.mrb[79].mxu0  ;;  %v2205_v41 = vpop.f32.mrb[79].mxu1 }
 0x1af   :  { %v3455_v33 = vmax.f32 %v3391_v26, 0.0  ;;  %2486 = vst [vmem:[#allocation2 + $0x268] sm:$0xff] %v1693_v39  ;;  %v2739_v43 = vld [vmem:[#allocation2 + $0x250] ss:$2 sm:$0xff]  ;;  %2614 = vst [vmem:[#allocation2 + $0x668] sm:$0xff] %v2205_v41 }
 0x1b0   :  { %v3559_v35 = vmul.f32 %v5775_v36, %v3488_v29  ;;  %v3487_v37 = vmax.f32 %v3423_v30, 0.0  ;;  %v2995_v45 = vld [vmem:[#allocation2 + $0x251] ss:$2 sm:$0xff]  ;;  %v2867_v46 = vld [vmem:[#allocation2 + $0x650] ss:$2 sm:$0xff] }
 0x1b1   :  { %v3526_v40 = vmul.f32 %v5775_v36, %v3455_v33  ;;  %v3123_v47 = vld [vmem:[#allocation2 + $0x651] ss:$2 sm:$0xff]  ;;  %v2737_v49 = vld [vmem:[#allocation2 + $0x240] ss:$2 sm:$0xff]  ;;  %v2993_v50 = vld [vmem:[#allocation2 + $0x241] ss:$2 sm:$0xff]  ;;  %v3213_v61 = vmax.f32 %v2739_v43, %v2995_v45 }
 0x1b2   :  { %v3558_v42 = vmul.f32 %v5775_v36, %v3487_v37  ;;  %v2865_v52 = vld [vmem:[#allocation2 + $0x640] ss:$2 sm:$0xff]  ;;  %v3121_v53 = vld [vmem:[#allocation2 + $0x641] ss:$2 sm:$0xff]  ;;  %v3277_v2 = vmax.f32 %v2867_v46, %v3123_v47  ;;  %v3212_v6 = vmax.f32 %v2737_v49, %v2993_v50 }
 0x1b3   :  { %v4331_v44 = vpack.c.bf16 %v3527_v32, %v3526_v40  ;;  %v4695_v38 = vpop.f32.mrb[80].mxu0  ;;  %v4823_v51 = vpop.f32.mrb[80].mxu1  ;;  %v3276_v11 = vmax.f32 %v2865_v52, %v3121_v53 }
 0x1b4   :  { %v4411_v48 = vpack.c.bf16 %v3559_v35, %v3558_v42  ;;  %2491 = vst [vmem:[#allocation2 + $0x290] sm:$0xff] %v4695_v38  ;;  %2619 = vst [vmem:[#allocation2 + $0x690] sm:$0xff] %v4823_v51  ;;  %v1706_v54 = vpop.f32.mrb[81].mxu0  ;;  %v2218_v55 = vpop.f32.mrb[81].mxu1 }
 0x1b5   :  { %4455 = vst [vmem:[%s5897_s4 + $0x40] sm:$0xff] %v4331_v44   ;;  %v2743_v57 = vld [vmem:[#allocation2 + $0x270] ss:$2 sm:$0xff]  ;;  %v2999_v58 = vld [vmem:[#allocation2 + $0x271] ss:$2 sm:$0xff]  ;;  %2489 = vst [vmem:[#allocation2 + $0x280] sm:$0xff] %v1706_v54 }
 0x1b6   :  { %4471 = vst [vmem:[%s5897_s4 + $0xc0] sm:$0xff] %v4411_v48   ;;  %2617 = vst [vmem:[#allocation2 + $0x680] sm:$0xff] %v2218_v55  ;;  %v4696_v59 = vpop.f32.mrb[82].mxu0  ;;  %v4824_v60 = vpop.f32.mrb[82].mxu1  ;;  %v3215_v62 = vmax.f32 %v2743_v57, %v2999_v58  ;;  %v2871_v56 = vld [vmem:[#allocation2 + $0x670] ss:$2 sm:$0xff] }
 0x1b7   :  { %v3127_v63 = vld [vmem:[#allocation2 + $0x671] ss:$2 sm:$0xff]  ;;  %2492 = vst [vmem:[#allocation2 + $0x298] sm:$0xff] %v4696_v59  ;;  %2620 = vst [vmem:[#allocation2 + $0x698] sm:$0xff] %v4824_v60  ;;  %v1709_v0 = vpop.f32.mrb[83].mxu0  ;;  %v2221_v1 = vpop.f32.mrb[83].mxu1 }
 0x1b8   :  { %v3279_v3 = vmax.f32 %v2871_v56, %v3127_v63  ;;  %v2741_v4 = vld [vmem:[#allocation2 + $0x260] ss:$2 sm:$0xff]  ;;  %v2997_v5 = vld [vmem:[#allocation2 + $0x261] ss:$2 sm:$0xff]  ;;  %2490 = vst [vmem:[#allocation2 + $0x288] sm:$0xff] %v1709_v0  ;;  %2618 = vst [vmem:[#allocation2 + $0x688] sm:$0xff] %v2221_v1  ;;  %v3323_v7 = vmax.f32 %v3213_v61, %v3215_v62 }
 0x1b9   :  { %v3214_v8 = vmax.f32 %v2741_v4, %v2997_v5  ;;  %v2869_v9 = vld [vmem:[#allocation2 + $0x660] ss:$2 sm:$0xff]  ;;  %v3125_v10 = vld [vmem:[#allocation2 + $0x661] ss:$2 sm:$0xff] }
 0x1ba   :  { %v3355_v12 = vmax.f32 %v3277_v2, %v3279_v3  ;;  %v3278_v13 = vmax.f32 %v2869_v9, %v3125_v10  ;;  %v3394_v14 = vadd.f32 %v5769_v22, %v3323_v7 }
 0x1bb   :  { %v3322_v15 = vmax.f32 %v3212_v6, %v3214_v8  ;;  %v4699_v18 = vpop.f32.mrb[84].mxu0  ;;  %v4827_v19 = vpop.f32.mrb[84].mxu1 }
 0x1bc   :  { %v3426_v16 = vadd.f32 %v5769_v22, %v3355_v12  ;;  %v3354_v17 = vmax.f32 %v3276_v11, %v3278_v13  ;;  %v3458_v20 = vmax.f32 %v3394_v14, 0.0  ;;  %2495 = vst [vmem:[#allocation2 + $0x2b0] sm:$0xff] %v4699_v18  ;;  %2623 = vst [vmem:[#allocation2 + $0x6b0] sm:$0xff] %v4827_v19  ;;  %v1722_v23 = vpop.f32.mrb[85].mxu0  ;;  %v2234_v24 = vpop.f32.mrb[85].mxu1 }
 0x1bd   :  { %v3393_v21 = vadd.f32 %v5769_v22, %v3322_v15  ;;  %2493 = vst [vmem:[#allocation2 + $0x2a0] sm:$0xff] %v1722_v23  ;;  %2621 = vst [vmem:[#allocation2 + $0x6a0] sm:$0xff] %v2234_v24  ;;  %v4700_v27 = vpop.f32.mrb[86].mxu0  ;;  %v4828_v30 = vpop.f32.mrb[86].mxu1 }
 0x1be   :  { %v3490_v25 = vmax.f32 %v3426_v16, 0.0  ;;  %v3425_v26 = vadd.f32 %v5769_v22, %v3354_v17  ;;  %v3529_v28 = vmul.f32 %v5775_v36, %v3458_v20  ;;  %2496 = vst [vmem:[#allocation2 + $0x2b8] sm:$0xff] %v4700_v27  ;;  %2624 = vst [vmem:[#allocation2 + $0x6b8] sm:$0xff] %v4828_v30  ;;  %v1725_v33 = vpop.f32.mrb[87].mxu0  ;;  %v2237_v35 = vpop.f32.mrb[87].mxu1 }
 0x1bf   :  { %v3457_v29 = vmax.f32 %v3393_v21, 0.0  ;;  %2494 = vst [vmem:[#allocation2 + $0x2a8] sm:$0xff] %v1725_v33  ;;  %v2747_v39 = vld [vmem:[#allocation2 + $0x290] ss:$2 sm:$0xff]  ;;  %2622 = vst [vmem:[#allocation2 + $0x6a8] sm:$0xff] %v2237_v35 }
 0x1c0   :  { %v3561_v31 = vmul.f32 %v5775_v36, %v3490_v25  ;;  %v3489_v32 = vmax.f32 %v3425_v26, 0.0  ;;  %v3003_v41 = vld [vmem:[#allocation2 + $0x291] ss:$2 sm:$0xff]  ;;  %v2875_v42 = vld [vmem:[#allocation2 + $0x690] ss:$2 sm:$0xff] }
 0x1c1   :  { %v3528_v34 = vmul.f32 %v5775_v36, %v3457_v29  ;;  %v3131_v43 = vld [vmem:[#allocation2 + $0x691] ss:$2 sm:$0xff]  ;;  %v2745_v45 = vld [vmem:[#allocation2 + $0x280] ss:$2 sm:$0xff]  ;;  %v3001_v46 = vld [vmem:[#allocation2 + $0x281] ss:$2 sm:$0xff]  ;;  %v3217_v57 = vmax.f32 %v2747_v39, %v3003_v41 }
 0x1c2   :  { %v3560_v37 = vmul.f32 %v5775_v36, %v3489_v32  ;;  %v2873_v49 = vld [vmem:[#allocation2 + $0x680] ss:$2 sm:$0xff]  ;;  %v3129_v50 = vld [vmem:[#allocation2 + $0x681] ss:$2 sm:$0xff]  ;;  %v3281_v56 = vmax.f32 %v2875_v42, %v3131_v43  ;;  %v3216_v2 = vmax.f32 %v2745_v45, %v3001_v46 }
 0x1c3   :  { %v4336_v40 = vpack.c.bf16 %v3529_v28, %v3528_v34  ;;  %v4703_v47 = vpop.f32.mrb[88].mxu0  ;;  %v4831_v48 = vpop.f32.mrb[88].mxu1  ;;  %v3280_v7 = vmax.f32 %v2873_v49, %v3129_v50 }
 0x1c4   :  { %v4416_v44 = vpack.c.bf16 %v3561_v31, %v3560_v37  ;;  %2499 = vst [vmem:[#allocation2 + $0x2d0] sm:$0xff] %v4703_v47  ;;  %2627 = vst [vmem:[#allocation2 + $0x6d0] sm:$0xff] %v4831_v48  ;;  %v1738_v38 = vpop.f32.mrb[89].mxu0  ;;  %v2250_v51 = vpop.f32.mrb[89].mxu1 }
 0x1c5   :  { %4456 = vst [vmem:[%s5897_s4 + $0x48] sm:$0xff] %v4336_v40   ;;  %v2751_v52 = vld [vmem:[#allocation2 + $0x2b0] ss:$2 sm:$0xff]  ;;  %v3007_v53 = vld [vmem:[#allocation2 + $0x2b1] ss:$2 sm:$0xff]  ;;  %2497 = vst [vmem:[#allocation2 + $0x2c0] sm:$0xff] %v1738_v38 }
 0x1c6   :  { %4472 = vst [vmem:[%s5897_s4 + $0xc8] sm:$0xff] %v4416_v44   ;;  %2625 = vst [vmem:[#allocation2 + $0x6c0] sm:$0xff] %v2250_v51  ;;  %v4704_v54 = vpop.f32.mrb[90].mxu0  ;;  %v4832_v55 = vpop.f32.mrb[90].mxu1  ;;  %v3219_v58 = vmax.f32 %v2751_v52, %v3007_v53  ;;  %v2879_v59 = vld [vmem:[#allocation2 + $0x6b0] ss:$2 sm:$0xff] }
 0x1c7   :  { %v3135_v60 = vld [vmem:[#allocation2 + $0x6b1] ss:$2 sm:$0xff]  ;;  %2500 = vst [vmem:[#allocation2 + $0x2d8] sm:$0xff] %v4704_v54  ;;  %2628 = vst [vmem:[#allocation2 + $0x6d8] sm:$0xff] %v4832_v55  ;;  %v1741_v61 = vpop.f32.mrb[91].mxu0  ;;  %v2253_v62 = vpop.f32.mrb[91].mxu1 }
 0x1c8   :  { %v3283_v63 = vmax.f32 %v2879_v59, %v3135_v60  ;;  %v2749_v0 = vld [vmem:[#allocation2 + $0x2a0] ss:$2 sm:$0xff]  ;;  %v3005_v1 = vld [vmem:[#allocation2 + $0x2a1] ss:$2 sm:$0xff]  ;;  %2498 = vst [vmem:[#allocation2 + $0x2c8] sm:$0xff] %v1741_v61  ;;  %2626 = vst [vmem:[#allocation2 + $0x6c8] sm:$0xff] %v2253_v62  ;;  %v3325_v3 = vmax.f32 %v3217_v57, %v3219_v58 }
 0x1c9   :  { %v3218_v4 = vmax.f32 %v2749_v0, %v3005_v1  ;;  %v2877_v5 = vld [vmem:[#allocation2 + $0x6a0] ss:$2 sm:$0xff]  ;;  %v3133_v6 = vld [vmem:[#allocation2 + $0x6a1] ss:$2 sm:$0xff] }
 0x1ca   :  { %v3357_v8 = vmax.f32 %v3281_v56, %v3283_v63  ;;  %v3282_v9 = vmax.f32 %v2877_v5, %v3133_v6  ;;  %v3396_v10 = vadd.f32 %v5769_v22, %v3325_v3 }
 0x1cb   :  { %v3324_v11 = vmax.f32 %v3216_v2, %v3218_v4  ;;  %v4707_v14 = vpop.f32.mrb[92].mxu0  ;;  %v4835_v15 = vpop.f32.mrb[92].mxu1 }
 0x1cc   :  { %v3428_v12 = vadd.f32 %v5769_v22, %v3357_v8  ;;  %v3356_v13 = vmax.f32 %v3280_v7, %v3282_v9  ;;  %v3460_v16 = vmax.f32 %v3396_v10, 0.0  ;;  %2503 = vst [vmem:[#allocation2 + $0x2f0] sm:$0xff] %v4707_v14  ;;  %2631 = vst [vmem:[#allocation2 + $0x6f0] sm:$0xff] %v4835_v15  ;;  %v1754_v18 = vpop.f32.mrb[93].mxu0  ;;  %v2266_v19 = vpop.f32.mrb[93].mxu1 }
 0x1cd   :  { %v3395_v17 = vadd.f32 %v5769_v22, %v3324_v11  ;;  %2501 = vst [vmem:[#allocation2 + $0x2e0] sm:$0xff] %v1754_v18  ;;  %2629 = vst [vmem:[#allocation2 + $0x6e0] sm:$0xff] %v2266_v19  ;;  %v4708_v23 = vpop.f32.mrb[94].mxu0  ;;  %v4836_v26 = vpop.f32.mrb[94].mxu1 }
 0x1ce   :  { %v3492_v20 = vmax.f32 %v3428_v12, 0.0  ;;  %v3427_v21 = vadd.f32 %v5769_v22, %v3356_v13  ;;  %v3531_v24 = vmul.f32 %v5775_v36, %v3460_v16  ;;  %2504 = vst [vmem:[#allocation2 + $0x2f8] sm:$0xff] %v4708_v23  ;;  %2632 = vst [vmem:[#allocation2 + $0x6f8] sm:$0xff] %v4836_v26  ;;  %v1757_v29 = vpop.f32.mrb[95].mxu0  ;;  %v2269_v31 = vpop.f32.mrb[95].mxu1 }
 0x1cf   :  { %v3459_v25 = vmax.f32 %v3395_v17, 0.0  ;;  %2502 = vst [vmem:[#allocation2 + $0x2e8] sm:$0xff] %v1757_v29  ;;  %v2755_v33 = vld [vmem:[#allocation2 + $0x2d0] ss:$2 sm:$0xff]  ;;  %2630 = vst [vmem:[#allocation2 + $0x6e8] sm:$0xff] %v2269_v31 }
 0x1d0   :  { %v3563_v27 = vmul.f32 %v5775_v36, %v3492_v20  ;;  %v3491_v28 = vmax.f32 %v3427_v21, 0.0  ;;  %v3011_v35 = vld [vmem:[#allocation2 + $0x2d1] ss:$2 sm:$0xff]  ;;  %v2883_v37 = vld [vmem:[#allocation2 + $0x6d0] ss:$2 sm:$0xff] }
 0x1d1   :  { %v3530_v30 = vmul.f32 %v5775_v36, %v3459_v25  ;;  %v3139_v39 = vld [vmem:[#allocation2 + $0x6d1] ss:$2 sm:$0xff]  ;;  %v2753_v41 = vld [vmem:[#allocation2 + $0x2c0] ss:$2 sm:$0xff]  ;;  %v3009_v42 = vld [vmem:[#allocation2 + $0x2c1] ss:$2 sm:$0xff]  ;;  %v3221_v52 = vmax.f32 %v2755_v33, %v3011_v35 }
 0x1d2   :  { %v3562_v32 = vmul.f32 %v5775_v36, %v3491_v28  ;;  %v2881_v45 = vld [vmem:[#allocation2 + $0x6c0] ss:$2 sm:$0xff]  ;;  %v3137_v46 = vld [vmem:[#allocation2 + $0x6c1] ss:$2 sm:$0xff]  ;;  %v3285_v59 = vmax.f32 %v2883_v37, %v3139_v39  ;;  %v3220_v56 = vmax.f32 %v2753_v41, %v3009_v42 }
 0x1d3   :  { %v4341_v34 = vpack.c.bf16 %v3531_v24, %v3530_v30  ;;  %v4711_v43 = vpop.f32.mrb[96].mxu0  ;;  %v4839_v44 = vpop.f32.mrb[96].mxu1  ;;  %v3284_v3 = vmax.f32 %v2881_v45, %v3137_v46 }
 0x1d4   :  { %v4421_v40 = vpack.c.bf16 %v3563_v27, %v3562_v32  ;;  %2507 = vst [vmem:[#allocation2 + $0x310] sm:$0xff] %v4711_v43  ;;  %2635 = vst [vmem:[#allocation2 + $0x710] sm:$0xff] %v4839_v44  ;;  %v1770_v47 = vpop.f32.mrb[97].mxu0  ;;  %v2282_v48 = vpop.f32.mrb[97].mxu1 }
 0x1d5   :  { %4457 = vst [vmem:[%s5897_s4 + $0x50] sm:$0xff] %v4341_v34   ;;  %v2759_v49 = vld [vmem:[#allocation2 + $0x2f0] ss:$2 sm:$0xff]  ;;  %v3015_v50 = vld [vmem:[#allocation2 + $0x2f1] ss:$2 sm:$0xff]  ;;  %2505 = vst [vmem:[#allocation2 + $0x300] sm:$0xff] %v1770_v47 }
 0x1d6   :  { %4473 = vst [vmem:[%s5897_s4 + $0xd0] sm:$0xff] %v4421_v40   ;;  %2633 = vst [vmem:[#allocation2 + $0x700] sm:$0xff] %v2282_v48  ;;  %v4712_v38 = vpop.f32.mrb[98].mxu0  ;;  %v4840_v51 = vpop.f32.mrb[98].mxu1  ;;  %v3223_v53 = vmax.f32 %v2759_v49, %v3015_v50  ;;  %v2887_v54 = vld [vmem:[#allocation2 + $0x6f0] ss:$2 sm:$0xff] }
 0x1d7   :  { %v3143_v55 = vld [vmem:[#allocation2 + $0x6f1] ss:$2 sm:$0xff]  ;;  %2508 = vst [vmem:[#allocation2 + $0x318] sm:$0xff] %v4712_v38  ;;  %2636 = vst [vmem:[#allocation2 + $0x718] sm:$0xff] %v4840_v51  ;;  %v1773_v57 = vpop.f32.mrb[99].mxu0  ;;  %v2285_v58 = vpop.f32.mrb[99].mxu1 }
 0x1d8   :  { %v3287_v60 = vmax.f32 %v2887_v54, %v3143_v55  ;;  %v2757_v61 = vld [vmem:[#allocation2 + $0x2e0] ss:$2 sm:$0xff]  ;;  %v3013_v62 = vld [vmem:[#allocation2 + $0x2e1] ss:$2 sm:$0xff]  ;;  %2506 = vst [vmem:[#allocation2 + $0x308] sm:$0xff] %v1773_v57  ;;  %2634 = vst [vmem:[#allocation2 + $0x708] sm:$0xff] %v2285_v58  ;;  %v3327_v63 = vmax.f32 %v3221_v52, %v3223_v53 }
 0x1d9   :  { %v3222_v0 = vmax.f32 %v2757_v61, %v3013_v62  ;;  %v2885_v1 = vld [vmem:[#allocation2 + $0x6e0] ss:$2 sm:$0xff]  ;;  %v3141_v2 = vld [vmem:[#allocation2 + $0x6e1] ss:$2 sm:$0xff] }
 0x1da   :  { %v3359_v4 = vmax.f32 %v3285_v59, %v3287_v60  ;;  %v3286_v5 = vmax.f32 %v2885_v1, %v3141_v2  ;;  %v3398_v6 = vadd.f32 %v5769_v22, %v3327_v63 }
 0x1db   :  { %v3326_v7 = vmax.f32 %v3220_v56, %v3222_v0  ;;  %v4715_v10 = vpop.f32.mrb[100].mxu0  ;;  %v4843_v11 = vpop.f32.mrb[100].mxu1 }
 0x1dc   :  { %v3430_v8 = vadd.f32 %v5769_v22, %v3359_v4  ;;  %v3358_v9 = vmax.f32 %v3284_v3, %v3286_v5  ;;  %v3462_v12 = vmax.f32 %v3398_v6, 0.0  ;;  %2511 = vst [vmem:[#allocation2 + $0x330] sm:$0xff] %v4715_v10  ;;  %2639 = vst [vmem:[#allocation2 + $0x730] sm:$0xff] %v4843_v11  ;;  %v1786_v14 = vpop.f32.mrb[101].mxu0  ;;  %v2298_v15 = vpop.f32.mrb[101].mxu1 }
 0x1dd   :  { %v3397_v13 = vadd.f32 %v5769_v22, %v3326_v7  ;;  %2509 = vst [vmem:[#allocation2 + $0x320] sm:$0xff] %v1786_v14  ;;  %2637 = vst [vmem:[#allocation2 + $0x720] sm:$0xff] %v2298_v15  ;;  %v4716_v18 = vpop.f32.mrb[102].mxu0  ;;  %v4844_v21 = vpop.f32.mrb[102].mxu1 }
 0x1de   :  { %v3494_v16 = vmax.f32 %v3430_v8, 0.0  ;;  %v3429_v17 = vadd.f32 %v5769_v22, %v3358_v9  ;;  %v3533_v19 = vmul.f32 %v5775_v36, %v3462_v12  ;;  %2512 = vst [vmem:[#allocation2 + $0x338] sm:$0xff] %v4716_v18  ;;  %2640 = vst [vmem:[#allocation2 + $0x738] sm:$0xff] %v4844_v21  ;;  %v1789_v25 = vpop.f32.mrb[103].mxu0  ;;  %v2301_v27 = vpop.f32.mrb[103].mxu1 }
 0x1df   :  { %v3461_v20 = vmax.f32 %v3397_v13, 0.0  ;;  %2510 = vst [vmem:[#allocation2 + $0x328] sm:$0xff] %v1789_v25  ;;  %v2763_v29 = vld [vmem:[#allocation2 + $0x310] ss:$2 sm:$0xff]  ;;  %2638 = vst [vmem:[#allocation2 + $0x728] sm:$0xff] %v2301_v27 }
 0x1e0   :  { %v3565_v23 = vmul.f32 %v5775_v36, %v3494_v16  ;;  %v3493_v24 = vmax.f32 %v3429_v17, 0.0  ;;  %v3019_v31 = vld [vmem:[#allocation2 + $0x311] ss:$2 sm:$0xff]  ;;  %v2891_v32 = vld [vmem:[#allocation2 + $0x710] ss:$2 sm:$0xff] }
 0x1e1   :  { %v3532_v26 = vmul.f32 %v5775_v36, %v3461_v20  ;;  %v3147_v33 = vld [vmem:[#allocation2 + $0x711] ss:$2 sm:$0xff]  ;;  %v2761_v35 = vld [vmem:[#allocation2 + $0x300] ss:$2 sm:$0xff]  ;;  %v3017_v37 = vld [vmem:[#allocation2 + $0x301] ss:$2 sm:$0xff]  ;;  %v3225_v49 = vmax.f32 %v2763_v29, %v3019_v31 }
 0x1e2   :  { %v3564_v28 = vmul.f32 %v5775_v36, %v3493_v24  ;;  %v2889_v41 = vld [vmem:[#allocation2 + $0x700] ss:$2 sm:$0xff]  ;;  %v3145_v42 = vld [vmem:[#allocation2 + $0x701] ss:$2 sm:$0xff]  ;;  %v3289_v54 = vmax.f32 %v2891_v32, %v3147_v33  ;;  %v3224_v59 = vmax.f32 %v2761_v35, %v3017_v37 }
 0x1e3   :  { %v4346_v30 = vpack.c.bf16 %v3533_v19, %v3532_v26  ;;  %v4719_v39 = vpop.f32.mrb[104].mxu0  ;;  %v4847_v40 = vpop.f32.mrb[104].mxu1  ;;  %v3288_v63 = vmax.f32 %v2889_v41, %v3145_v42 }
 0x1e4   :  { %v4426_v34 = vpack.c.bf16 %v3565_v23, %v3564_v28  ;;  %2515 = vst [vmem:[#allocation2 + $0x350] sm:$0xff] %v4719_v39  ;;  %2643 = vst [vmem:[#allocation2 + $0x750] sm:$0xff] %v4847_v40  ;;  %v1802_v43 = vpop.f32.mrb[105].mxu0  ;;  %v2314_v44 = vpop.f32.mrb[105].mxu1 }
 0x1e5   :  { %4458 = vst [vmem:[%s5897_s4 + $0x58] sm:$0xff] %v4346_v30   ;;  %v2767_v45 = vld [vmem:[#allocation2 + $0x330] ss:$2 sm:$0xff]  ;;  %v3023_v46 = vld [vmem:[#allocation2 + $0x331] ss:$2 sm:$0xff]  ;;  %2513 = vst [vmem:[#allocation2 + $0x340] sm:$0xff] %v1802_v43 }
 0x1e6   :  { %4474 = vst [vmem:[%s5897_s4 + $0xd8] sm:$0xff] %v4426_v34   ;;  %2641 = vst [vmem:[#allocation2 + $0x740] sm:$0xff] %v2314_v44  ;;  %v4720_v47 = vpop.f32.mrb[106].mxu0  ;;  %v4848_v48 = vpop.f32.mrb[106].mxu1  ;;  %v3227_v50 = vmax.f32 %v2767_v45, %v3023_v46  ;;  %v2895_v38 = vld [vmem:[#allocation2 + $0x730] ss:$2 sm:$0xff] }
 0x1e7   :  { %v3151_v51 = vld [vmem:[#allocation2 + $0x731] ss:$2 sm:$0xff]  ;;  %2516 = vst [vmem:[#allocation2 + $0x358] sm:$0xff] %v4720_v47  ;;  %2644 = vst [vmem:[#allocation2 + $0x758] sm:$0xff] %v4848_v48  ;;  %v1805_v52 = vpop.f32.mrb[107].mxu0  ;;  %v2317_v53 = vpop.f32.mrb[107].mxu1 }
 0x1e8   :  { %v3291_v55 = vmax.f32 %v2895_v38, %v3151_v51  ;;  %v2765_v57 = vld [vmem:[#allocation2 + $0x320] ss:$2 sm:$0xff]  ;;  %v3021_v58 = vld [vmem:[#allocation2 + $0x321] ss:$2 sm:$0xff]  ;;  %2514 = vst [vmem:[#allocation2 + $0x348] sm:$0xff] %v1805_v52  ;;  %2642 = vst [vmem:[#allocation2 + $0x748] sm:$0xff] %v2317_v53  ;;  %v3329_v60 = vmax.f32 %v3225_v49, %v3227_v50 }
 0x1e9   :  { %v3226_v61 = vmax.f32 %v2765_v57, %v3021_v58  ;;  %v2893_v62 = vld [vmem:[#allocation2 + $0x720] ss:$2 sm:$0xff]  ;;  %v3149_v56 = vld [vmem:[#allocation2 + $0x721] ss:$2 sm:$0xff] }
 0x1ea   :  { %v3361_v0 = vmax.f32 %v3289_v54, %v3291_v55  ;;  %v3290_v1 = vmax.f32 %v2893_v62, %v3149_v56  ;;  %v3400_v2 = vadd.f32 %v5769_v22, %v3329_v60 }
 0x1eb   :  { %v3328_v3 = vmax.f32 %v3224_v59, %v3226_v61  ;;  %v4723_v6 = vpop.f32.mrb[108].mxu0  ;;  %v4851_v7 = vpop.f32.mrb[108].mxu1 }
 0x1ec   :  { %v3432_v4 = vadd.f32 %v5769_v22, %v3361_v0  ;;  %v3360_v5 = vmax.f32 %v3288_v63, %v3290_v1  ;;  %v3464_v8 = vmax.f32 %v3400_v2, 0.0  ;;  %2519 = vst [vmem:[#allocation2 + $0x370] sm:$0xff] %v4723_v6  ;;  %2647 = vst [vmem:[#allocation2 + $0x770] sm:$0xff] %v4851_v7  ;;  %v1818_v10 = vpop.f32.mrb[109].mxu0  ;;  %v2330_v11 = vpop.f32.mrb[109].mxu1 }
 0x1ed   :  { %v3399_v9 = vadd.f32 %v5769_v22, %v3328_v3  ;;  %2517 = vst [vmem:[#allocation2 + $0x360] sm:$0xff] %v1818_v10  ;;  %2645 = vst [vmem:[#allocation2 + $0x760] sm:$0xff] %v2330_v11  ;;  %v4724_v14 = vpop.f32.mrb[110].mxu0  ;;  %v4852_v17 = vpop.f32.mrb[110].mxu1 }
 0x1ee   :  { %v3496_v12 = vmax.f32 %v3432_v4, 0.0  ;;  %v3431_v13 = vadd.f32 %v5769_v22, %v3360_v5  ;;  %v3535_v15 = vmul.f32 %v5775_v36, %v3464_v8  ;;  %2520 = vst [vmem:[#allocation2 + $0x378] sm:$0xff] %v4724_v14  ;;  %2648 = vst [vmem:[#allocation2 + $0x778] sm:$0xff] %v4852_v17  ;;  %v1821_v20 = vpop.f32.mrb[111].mxu0  ;;  %v2333_v23 = vpop.f32.mrb[111].mxu1 }
 0x1ef   :  { %v3463_v16 = vmax.f32 %v3399_v9, 0.0  ;;  %2518 = vst [vmem:[#allocation2 + $0x368] sm:$0xff] %v1821_v20  ;;  %v2771_v25 = vld [vmem:[#allocation2 + $0x350] ss:$2 sm:$0xff]  ;;  %2646 = vst [vmem:[#allocation2 + $0x768] sm:$0xff] %v2333_v23 }
 0x1f0   :  { %v3567_v18 = vmul.f32 %v5775_v36, %v3496_v12  ;;  %v3495_v19 = vmax.f32 %v3431_v13, 0.0  ;;  %v3027_v27 = vld [vmem:[#allocation2 + $0x351] ss:$2 sm:$0xff]  ;;  %v2899_v28 = vld [vmem:[#allocation2 + $0x750] ss:$2 sm:$0xff] }
 0x1f1   :  { %v3534_v21 = vmul.f32 %v5775_v36, %v3463_v16  ;;  %v3155_v29 = vld [vmem:[#allocation2 + $0x751] ss:$2 sm:$0xff]  ;;  %v2769_v31 = vld [vmem:[#allocation2 + $0x340] ss:$2 sm:$0xff]  ;;  %v3025_v32 = vld [vmem:[#allocation2 + $0x341] ss:$2 sm:$0xff]  ;;  %v3229_v45 = vmax.f32 %v2771_v25, %v3027_v27 }
 0x1f2   :  { %v3566_v24 = vmul.f32 %v5775_v36, %v3495_v19  ;;  %v2897_v35 = vld [vmem:[#allocation2 + $0x740] ss:$2 sm:$0xff]  ;;  %v3153_v37 = vld [vmem:[#allocation2 + $0x741] ss:$2 sm:$0xff]  ;;  %v3293_v38 = vmax.f32 %v2899_v28, %v3155_v29  ;;  %v3228_v54 = vmax.f32 %v2769_v31, %v3025_v32 }
 0x1f3   :  { %v4351_v26 = vpack.c.bf16 %v3535_v15, %v3534_v21  ;;  %v4727_v33 = vpop.f32.mrb[112].mxu0  ;;  %v4855_v34 = vpop.f32.mrb[112].mxu1  ;;  %v3292_v60 = vmax.f32 %v2897_v35, %v3153_v37 }
 0x1f4   :  { %v4431_v30 = vpack.c.bf16 %v3567_v18, %v3566_v24  ;;  %2523 = vst [vmem:[#allocation2 + $0x390] sm:$0xff] %v4727_v33  ;;  %2651 = vst [vmem:[#allocation2 + $0x790] sm:$0xff] %v4855_v34  ;;  %v1834_v39 = vpop.f32.mrb[113].mxu0  ;;  %v2346_v40 = vpop.f32.mrb[113].mxu1 }
 0x1f5   :  { %4459 = vst [vmem:[%s5897_s4 + $0x60] sm:$0xff] %v4351_v26   ;;  %v2775_v41 = vld [vmem:[#allocation2 + $0x370] ss:$2 sm:$0xff]  ;;  %v3031_v42 = vld [vmem:[#allocation2 + $0x371] ss:$2 sm:$0xff]  ;;  %2521 = vst [vmem:[#allocation2 + $0x380] sm:$0xff] %v1834_v39 }
 0x1f6   :  { %4475 = vst [vmem:[%s5897_s4 + $0xe0] sm:$0xff] %v4431_v30   ;;  %2649 = vst [vmem:[#allocation2 + $0x780] sm:$0xff] %v2346_v40  ;;  %v4728_v43 = vpop.f32.mrb[114].mxu0  ;;  %v4856_v44 = vpop.f32.mrb[114].mxu1  ;;  %v3231_v46 = vmax.f32 %v2775_v41, %v3031_v42  ;;  %v2903_v47 = vld [vmem:[#allocation2 + $0x770] ss:$2 sm:$0xff] }
 0x1f7   :  { %v3159_v48 = vld [vmem:[#allocation2 + $0x771] ss:$2 sm:$0xff]  ;;  %2524 = vst [vmem:[#allocation2 + $0x398] sm:$0xff] %v4728_v43  ;;  %2652 = vst [vmem:[#allocation2 + $0x798] sm:$0xff] %v4856_v44  ;;  %v1837_v49 = vpop.f32.mrb[115].mxu0  ;;  %v2349_v50 = vpop.f32.mrb[115].mxu1 }
 0x1f8   :  { %v3295_v51 = vmax.f32 %v2903_v47, %v3159_v48  ;;  %v2773_v52 = vld [vmem:[#allocation2 + $0x360] ss:$2 sm:$0xff]  ;;  %v3029_v53 = vld [vmem:[#allocation2 + $0x361] ss:$2 sm:$0xff]  ;;  %2522 = vst [vmem:[#allocation2 + $0x388] sm:$0xff] %v1837_v49  ;;  %2650 = vst [vmem:[#allocation2 + $0x788] sm:$0xff] %v2349_v50  ;;  %v3331_v55 = vmax.f32 %v3229_v45, %v3231_v46 }
 0x1f9   :  { %v3230_v57 = vmax.f32 %v2773_v52, %v3029_v53  ;;  %v2901_v58 = vld [vmem:[#allocation2 + $0x760] ss:$2 sm:$0xff]  ;;  %v3157_v59 = vld [vmem:[#allocation2 + $0x761] ss:$2 sm:$0xff] }
 0x1fa   :  { %v3363_v61 = vmax.f32 %v3293_v38, %v3295_v51  ;;  %v3294_v62 = vmax.f32 %v2901_v58, %v3157_v59  ;;  %v3402_v56 = vadd.f32 %v5769_v22, %v3331_v55 }
 0x1fb   :  { %v3330_v63 = vmax.f32 %v3228_v54, %v3230_v57  ;;  %v4731_v2 = vpop.f32.mrb[116].mxu0  ;;  %v4859_v3 = vpop.f32.mrb[116].mxu1  ;;  %v5871_v57 = vld [vmem:[#allocation5] ss:$0 sm:$0xff] }
 0x1fc   :  { %v3434_v0 = vadd.f32 %v5769_v22, %v3363_v61  ;;  %v3362_v1 = vmax.f32 %v3292_v60, %v3294_v62  ;;  %v3466_v4 = vmax.f32 %v3402_v56, 0.0  ;;  %2527 = vst [vmem:[#allocation2 + $0x3b0] sm:$0xff] %v4731_v2  ;;  %2655 = vst [vmem:[#allocation2 + $0x7b0] sm:$0xff] %v4859_v3  ;;  %v1850_v6 = vpop.f32.mrb[117].mxu0  ;;  %v2362_v7 = vpop.f32.mrb[117].mxu1 }
 0x1fd   :  { %v3401_v5 = vadd.f32 %v5769_v22, %v3330_v63  ;;  %2525 = vst [vmem:[#allocation2 + $0x3a0] sm:$0xff] %v1850_v6  ;;  %2653 = vst [vmem:[#allocation2 + $0x7a0] sm:$0xff] %v2362_v7  ;;  %v4732_v10 = vpop.f32.mrb[118].mxu0  ;;  %v4860_v13 = vpop.f32.mrb[118].mxu1  ;;  %v5011_v6 = vld [vmem:[#allocation7] ss:$0 sm:$0xff] }
 0x1fe   :  { %v3498_v8 = vmax.f32 %v3434_v0, 0.0  ;;  %v3433_v9 = vadd.f32 %v5769_v22, %v3362_v1  ;;  %v3537_v11 = vmul.f32 %v5775_v36, %v3466_v4  ;;  %2528 = vst [vmem:[#allocation2 + $0x3b8] sm:$0xff] %v4732_v10  ;;  %2656 = vst [vmem:[#allocation2 + $0x7b8] sm:$0xff] %v4860_v13  ;;  %v1853_v16 = vpop.f32.mrb[119].mxu0  ;;  %v2365_v18 = vpop.f32.mrb[119].mxu1 }
 0x1ff   :  { %v3465_v12 = vmax.f32 %v3401_v5, 0.0  ;;  %2526 = vst [vmem:[#allocation2 + $0x3a8] sm:$0xff] %v1853_v16  ;;  %v2779_v22 = vld [vmem:[#allocation2 + $0x390] ss:$2 sm:$0xff]  ;;  %2654 = vst [vmem:[#allocation2 + $0x7a8] sm:$0xff] %v2365_v18 }
 0x200   :  { %v3569_v14 = vmul.f32 %v5775_v36, %v3498_v8  ;;  %v3497_v15 = vmax.f32 %v3433_v9, 0.0  ;;  %v3035_v21 = vld [vmem:[#allocation2 + $0x391] ss:$2 sm:$0xff]  ;;  %v2907_v23 = vld [vmem:[#allocation2 + $0x790] ss:$2 sm:$0xff] }
 0x201   :  { %v3536_v17 = vmul.f32 %v5775_v36, %v3465_v12  ;;  %v3163_v24 = vld [vmem:[#allocation2 + $0x791] ss:$2 sm:$0xff]  ;;  %v2777_v26 = vld [vmem:[#allocation2 + $0x380] ss:$2 sm:$0xff]  ;;  %v3033_v27 = vld [vmem:[#allocation2 + $0x381] ss:$2 sm:$0xff]  ;;  %v3233_v39 = vmax.f32 %v2779_v22, %v3035_v21 }
 0x202   :  { %v3568_v19 = vmul.f32 %v5775_v36, %v3497_v15  ;;  %v2905_v30 = vld [vmem:[#allocation2 + $0x780] ss:$2 sm:$0xff]  ;;  %v3161_v31 = vld [vmem:[#allocation2 + $0x781] ss:$2 sm:$0xff]  ;;  %v3297_v45 = vmax.f32 %v2907_v23, %v3163_v24  ;;  %v3232_v49 = vmax.f32 %v2777_v26, %v3033_v27 }
 0x203   :  { %v4356_v20 = vpack.c.bf16 %v3537_v11, %v3536_v17  ;;  %v4735_v28 = vpop.f32.mrb[120].mxu0  ;;  %v4863_v29 = vpop.f32.mrb[120].mxu1  ;;  %v3296_v53 = vmax.f32 %v2905_v30, %v3161_v31 }
 0x204   :  { %v4436_v25 = vpack.c.bf16 %v3569_v14, %v3568_v19  ;;  %2531 = vst [vmem:[#allocation2 + $0x3d0] sm:$0xff] %v4735_v28  ;;  %2659 = vst [vmem:[#allocation2 + $0x7d0] sm:$0xff] %v4863_v29  ;;  %v1866_v36 = vpop.f32.mrb[121].mxu0  ;;  %v2378_v32 = vpop.f32.mrb[121].mxu1 }
 0x205   :  { %4460 = vst [vmem:[%s5897_s4 + $0x68] sm:$0xff] %v4356_v20   ;;  %v2783_v33 = vld [vmem:[#allocation2 + $0x3b0] ss:$2 sm:$0xff]  ;;  %v3039_v34 = vld [vmem:[#allocation2 + $0x3b1] ss:$2 sm:$0xff]  ;;  %2529 = vst [vmem:[#allocation2 + $0x3c0] sm:$0xff] %v1866_v36 }
 0x206   :  { %4476 = vst [vmem:[%s5897_s4 + $0xe8] sm:$0xff] %v4436_v25   ;;  %2657 = vst [vmem:[#allocation2 + $0x7c0] sm:$0xff] %v2378_v32  ;;  %v4736_v35 = vpop.f32.mrb[122].mxu0  ;;  %v4864_v37 = vpop.f32.mrb[122].mxu1  ;;  %v3235_v40 = vmax.f32 %v2783_v33, %v3039_v34  ;;  %v2911_v41 = vld [vmem:[#allocation2 + $0x7b0] ss:$2 sm:$0xff] }
 0x207   :  { %v3167_v42 = vld [vmem:[#allocation2 + $0x7b1] ss:$2 sm:$0xff]  ;;  %2532 = vst [vmem:[#allocation2 + $0x3d8] sm:$0xff] %v4736_v35  ;;  %2660 = vst [vmem:[#allocation2 + $0x7d8] sm:$0xff] %v4864_v37  ;;  %v1869_v43 = vpop.f32.mrb[123].mxu0  ;;  %v2381_v44 = vpop.f32.mrb[123].mxu1 }
 0x208   :  { %v3299_v46 = vmax.f32 %v2911_v41, %v3167_v42  ;;  %v2781_v47 = vld [vmem:[#allocation2 + $0x3a0] ss:$2 sm:$0xff]  ;;  %v3037_v48 = vld [vmem:[#allocation2 + $0x3a1] ss:$2 sm:$0xff]  ;;  %2530 = vst [vmem:[#allocation2 + $0x3c8] sm:$0xff] %v1869_v43  ;;  %2658 = vst [vmem:[#allocation2 + $0x7c8] sm:$0xff] %v2381_v44  ;;  %v3333_v50 = vmax.f32 %v3233_v39, %v3235_v40 }
 0x209   :  { %v3234_v38 = vmax.f32 %v2781_v47, %v3037_v48  ;;  %v2909_v51 = vld [vmem:[#allocation2 + $0x7a0] ss:$2 sm:$0xff]  ;;  %v3165_v52 = vld [vmem:[#allocation2 + $0x7a1] ss:$2 sm:$0xff] }
 0x20a   :  { %v3365_v54 = vmax.f32 %v3297_v45, %v3299_v46  ;;  %v3298_v55 = vmax.f32 %v2909_v51, %v3165_v52  ;;  %v3404_v58 = vadd.f32 %v5871_v57, %v3333_v50 }
 0x20b   :  { %v3332_v59 = vmax.f32 %v3232_v49, %v3234_v38  ;;  %v4739_v62 = vpop.f32.mrb[124].mxu0  ;;  %v4867_v56 = vpop.f32.mrb[124].mxu1 }
 0x20c   :  { %v3436_v60 = vadd.f32 %v5871_v57, %v3365_v54  ;;  %v3364_v61 = vmax.f32 %v3296_v53, %v3298_v55  ;;  %v3468_v63 = vmax.f32 %v3404_v58, 0.0  ;;  %2535 = vst [vmem:[#allocation2 + $0x3f0] sm:$0xff] %v4739_v62  ;;  %2663 = vst [vmem:[#allocation2 + $0x7f0] sm:$0xff] %v4867_v56  ;;  %v1882_v1 = vpop.f32.mrb[125].mxu0  ;;  %v2394_v2 = vpop.f32.mrb[125].mxu1 }
 0x20d   :  { %v3403_v0 = vadd.f32 %v5871_v57, %v3332_v59  ;;  %2533 = vst [vmem:[#allocation2 + $0x3e0] sm:$0xff] %v1882_v1  ;;  %2661 = vst [vmem:[#allocation2 + $0x7e0] sm:$0xff] %v2394_v2  ;;  %v4740_v5 = vpop.f32.mrb[126].mxu0  ;;  %v4868_v9 = vpop.f32.mrb[126].mxu1 }
 0x20e   :  { %v3500_v3 = vmax.f32 %v3436_v60, 0.0  ;;  %v3435_v4 = vadd.f32 %v5871_v57, %v3364_v61  ;;  %v3539_v7 = vmul.f32 %v5011_v6, %v3468_v63  ;;  %2536 = vst [vmem:[#allocation2 + $0x3f8] sm:$0xff] %v4740_v5  ;;  %2664 = vst [vmem:[#allocation2 + $0x7f8] sm:$0xff] %v4868_v9  ;;  %v1885_v12 = vpop.f32.mrb[127].mxu0  ;;  %v2397_v14 = vpop.f32.mrb[127].mxu1 }
 0x20f   :  { %v3467_v8 = vmax.f32 %v3403_v0, 0.0  ;;  %2534 = vst [vmem:[#allocation2 + $0x3e8] sm:$0xff] %v1885_v12  ;;  %2662 = vst [vmem:[#allocation2 + $0x7e8] sm:$0xff] %v2397_v14  ;;  %v2787_v18 = vld [vmem:[#allocation2 + $0x3d0] ss:$2 sm:$0xff] }
 0x210   :  { %v3571_v10 = vmul.f32 %v5011_v6, %v3500_v3  ;;  %v3499_v11 = vmax.f32 %v3435_v4, 0.0  ;;  %v3043_v19 = vld [vmem:[#allocation2 + $0x3d1] ss:$2 sm:$0xff]  ;;  %v2915_v22 = vld [vmem:[#allocation2 + $0x7d0] ss:$2 sm:$0xff] }
 0x211   :  { %v3538_v13 = vmul.f32 %v5011_v6, %v3467_v8  ;;  %v3171_v20 = vld [vmem:[#allocation2 + $0x7d1] ss:$2 sm:$0xff]  ;;  %v2785_v21 = vld [vmem:[#allocation2 + $0x3c0] ss:$2 sm:$0xff]  ;;  %v3041_v23 = vld [vmem:[#allocation2 + $0x3c1] ss:$2 sm:$0xff]  ;;  %v3237_v27 = vmax.f32 %v2787_v18, %v3043_v19 }
 0x212   :  { %v3570_v15 = vmul.f32 %v5011_v6, %v3499_v11  ;;  %v2913_v24 = vld [vmem:[#allocation2 + $0x7c0] ss:$2 sm:$0xff]  ;;  %v3169_v28 = vld [vmem:[#allocation2 + $0x7c1] ss:$2 sm:$0xff]  ;;  %v3301_v36 = vmax.f32 %v2915_v22, %v3171_v20  ;;  %v3236_v35 = vmax.f32 %v2785_v21, %v3041_v23 }
 0x213   :  { %v4361_v16 = vpack.c.bf16 %v3539_v7, %v3538_v13  ;;  %v3300_v42 = vmax.f32 %v2913_v24, %v3169_v28 }
 0x214   :  { %v4441_v17 = vpack.c.bf16 %v3571_v10, %v3570_v15 }
 0x215   :  { %4461 = vst [vmem:[%s5897_s4 + $0x70] sm:$0xff] %v4361_v16   ;;  %v2791_v25 = vld [vmem:[#allocation2 + $0x3f0] ss:$2 sm:$0xff]  ;;  %v3047_v26 = vld [vmem:[#allocation2 + $0x3f1] ss:$2 sm:$0xff] }
 0x216   :  { %4477 = vst [vmem:[%s5897_s4 + $0xf0] sm:$0xff] %v4441_v17   ;;  %v3239_v29 = vmax.f32 %v2791_v25, %v3047_v26  ;;  %v2919_v30 = vld [vmem:[#allocation2 + $0x7f0] ss:$2 sm:$0xff]  ;;  %v3175_v31 = vld [vmem:[#allocation2 + $0x7f1] ss:$2 sm:$0xff] }
 0x217   :  { %v3303_v32 = vmax.f32 %v2919_v30, %v3175_v31  ;;  %v2789_v33 = vld [vmem:[#allocation2 + $0x3e0] ss:$2 sm:$0xff]  ;;  %v3045_v34 = vld [vmem:[#allocation2 + $0x3e1] ss:$2 sm:$0xff] }
 0x218   :  { %v3335_v37 = vmax.f32 %v3237_v27, %v3239_v29  ;;  %v3238_v39 = vmax.f32 %v2789_v33, %v3045_v34  ;;  %v2917_v40 = vld [vmem:[#allocation2 + $0x7e0] ss:$2 sm:$0xff]  ;;  %v3173_v41 = vld [vmem:[#allocation2 + $0x7e1] ss:$2 sm:$0xff] }
 0x219   :  { %v3367_v43 = vmax.f32 %v3301_v36, %v3303_v32  ;;  %v3302_v44 = vmax.f32 %v2917_v40, %v3173_v41 }
 0x21a   :  { %v3406_v45 = vadd.f32 %v5871_v57, %v3335_v37  ;;  %v3334_v46 = vmax.f32 %v3236_v35, %v3238_v39 }
 0x21b   :  { %v3438_v47 = vadd.f32 %v5871_v57, %v3367_v43  ;;  %v3366_v48 = vmax.f32 %v3300_v42, %v3302_v44 }
 0x21c   :  { %v3470_v49 = vmax.f32 %v3406_v45, 0.0  ;;  %v3405_v50 = vadd.f32 %v5871_v57, %v3334_v46 }
 0x21d   :  { %v3502_v38 = vmax.f32 %v3438_v47, 0.0  ;;  %v3437_v51 = vadd.f32 %v5871_v57, %v3366_v48 }
 0x21e   :  { %v3541_v52 = vmul.f32 %v5011_v6, %v3470_v49  ;;  %v3469_v53 = vmax.f32 %v3405_v50, 0.0 }
 0x21f   :  { %v3573_v54 = vmul.f32 %v5011_v6, %v3502_v38  ;;  %v3501_v55 = vmax.f32 %v3437_v51, 0.0 }
 0x220   :  { %v3540_v58 = vmul.f32 %v5011_v6, %v3469_v53 }
 0x221   :  { %v3572_v59 = vmul.f32 %v5011_v6, %v3501_v55 }
 0x222   :  { %v4366_v60 = vpack.c.bf16 %v3541_v52, %v3540_v58 }
 0x223   :  { %v4446_v61 = vpack.c.bf16 %v3573_v54, %v3572_v59 }
 0x224   :  { %4462 = vst [vmem:[%s5897_s4 + $0x78] sm:$0xff] %v4366_v60  }
 0x225   :  { %4478 = vst [vmem:[%s5897_s4 + $0xf8] sm:$0xff] %v4446_v61  }
 0x226   :  { %3898 = vsyncpa [#allocation4], 1 }
 0x227   :  { %3899 = vsyncpa [#allocation6], 1 }

// kernel: hat_cnn_forward.4
= control target key start
LH: loop header
LB: loop body
LE: loop exit
PB: predicated region body
PF: predicated region fallthrough
CT: control target
= control target key end

     0   :  { %9 = vsyncpa [#allocation4], 0  ;;  %s13559_s15 = smov [#allocation3]   ;;  %s17327_s0 = inlined_call_operand.vmem [shape: bf16[2,18,18,128], index: 0, kind: input, shape index: {}]   ;;  %s17328_s1 = inlined_call_operand.vmem [shape: bf16[9,128,128], index: 1, kind: input, shape index: {}]   ;;  %s17329_s2 = inlined_call_operand.hbm [shape: f32[1,128], index: 2, kind: input, shape index: {}]   ;;  %s17330_s3 = inlined_call_operand.vmem [shape: f32[1,128], index: 3, kind: input, shape index: {}]   ;;  %s17331_s4 = inlined_call_operand.vmem [shape: bf16[2,8,8,128], index: 4, kind: output, shape index: {}]  }
   0x1   :  { %s20_s16 = sshll.u32 %s13559_s15, 4  ;;  %s13535_s19 = scalar_lea.hbm %s17329_s2, 16  ;;  %s21_s16 = int_to_ptr.vmem [resolvable:$true] %s20_s16 }
   0x2   :  { %p13536_p0 = scmp.ne.s32.totalorder %s17329_s2, %s13535_s19  ;;  %p13539_p1 = scmp.lt.u32.totalorder %s13535_s19, %s17329_s2 }
   0x4   :  { %p13541_p2 = pnand %p13539_p1, %p13536_p0 }
   0x6   :  { %13544 = shalt.err (!%p13541_p2)
}
   0x7   :  { %s13545_s24 = scalar_lea.vmem %s21_s16, 16  ;;  %s13549_s25 = scalar_lea.vmem %s21_s16, 32 }
   0x8   :  { %p13546_p3 = scmp.ne.s32.totalorder %s21_s16, %s13545_s24  ;;  %p13550_p4 = scmp.lt.s32.totalorder %s21_s16, %s21_s16 }
   0x9   :  { %p13551_p5 = scmp.lt.s32.totalorder %s13549_s25, %s13545_s24 }
   0xb   :  { %p13552_p6 = por %p13551_p5, %p13550_p4 }
   0xd   :  { %p13553_p7 = pnand %p13552_p6, %p13546_p3 }
   0xf   :  { %13556 = shalt.err (!%p13553_p7)
}
  0x10   :  { %23 = dma.hbm_to_vmem [thread:$0]  %s17329_s2, 16, %s21_s16, [#allocation4]  }
  0x11   :  { %13557 = dma.done.wait [#allocation4], 16  }
  0x12   :  { %13558 = vsyncadd [#allocation4], 4294967280  ;;  %v13355_v0 = vld [vmem:[%s17328_s1] sm:$0xff]   ;;  %v13357_v2 = vld [vmem:[%s17328_s1 + $0x8] sm:$0xff]   ;;  %vm799_vm0 = vsmask.f32 3328 }
  0x13   :  { %v13356_v1 = vld [vmem:[%s17328_s1 + $0x100] sm:$0xff]   ;;  %11978 = vmatprep.subr.bf16.mxu1 %v13355_v0  ;;  %v13358_v3 = vld [vmem:[%s17328_s1 + $0x108] sm:$0xff]   ;;  %v13359_v4 = vld [vmem:[%s17328_s1 + $0x10] sm:$0xff]   ;;  %vm800_vm1 = vsmask.f32 7440  ;;  %vm2436_vm3 = vcmask 1042432  }
  0x14   :  { %12298 = vmatprep.subr.bf16.mxu0 %v13356_v1  ;;  %11979 = vmatpush3.bf16.msra.mxu1 %v13355_v0  ;;  %v13360_v5 = vld [vmem:[%s17328_s1 + $0x110] sm:$0xff]   ;;  %v13361_v6 = vld [vmem:[%s17328_s1 + $0x18] sm:$0xff]   ;;  %v13363_v8 = vld [vmem:[%s17328_s1 + $0x20] sm:$0xff]   ;;  %vm2437_vm4 = vcmask 1046532  }
  0x15   :  { %12299 = vmatpush3.bf16.msra.mxu0 %v13356_v1  ;;  %11980 = vmatprep.subr.bf16.mxu1 %v13357_v2  ;;  %v13362_v7 = vld [vmem:[%s17328_s1 + $0x118] sm:$0xff]   ;;  %v13364_v9 = vld [vmem:[%s17328_s1 + $0x120] sm:$0xff]   ;;  %v13365_v10 = vld [vmem:[%s17328_s1 + $0x28] sm:$0xff]  }
  0x16   :  { %12300 = vmatprep.subr.bf16.mxu0 %v13358_v3  ;;  %v13366_v11 = vld [vmem:[%s17328_s1 + $0x128] sm:$0xff]   ;;  %v13371_v12 = vld [vmem:[%s17327_s0] sm:$0xff]   ;;  %v10778_v14 = vld [vmem:[%s17327_s0 + $0x10] sm:$0xf] }
  0x17   :  { %v10777_v13 = vld [vmem:[%s17327_s0 + $0xc] sm:$0xf]  ;;  %v10779_v15 = vld [vmem:[%s17327_s0 + $0x14] sm:$0x1]  ;;  %11994 = vmatprep.mubr.bf16.mxu1 %v13371_v12  ;;  %v4246_v18 = vshll.u32 %v10778_v14, 16  ;;  %v4250_v19 = vshrl.u32 %v10778_v14, 16  ;;  %vm13668_vm2 = vmor %vm799_vm0, %vm800_vm1 }
  0x18   :  { %11981 = vmatpush3.bf16.msra.mxu1 %v13357_v2  ;;  %v4237_v16 = vshrl.u32 %v10777_v13, 16  ;;  %v4240_v17 = vshll.u32 %v10777_v13, 16  ;;  %v13367_v20 = vld [vmem:[%s17328_s1 + $0x30] sm:$0xff]   ;;  %v4256_v21 = vshll.u32 %v10779_v15, 16  ;;  %v10780_v28 = vld [vmem:[%s17327_s0 + $0x18] sm:$0xf]  ;;  %vm13948_vm5 = vmor %vm2436_vm3, %vm2437_vm4 }
  0x19   :  { %12301 = vmatpush3.bf16.msra.mxu0 %v13358_v3  ;;  %11982 = vmatprep.subr.bf16.mxu1 %v13359_v4  ;;  %v4248_v24 = vrot.slane %v4246_v18, 5  ;;  %v4252_v25 = vrot.slane %v4250_v19, 4  ;;  %v13368_v26 = vld [vmem:[%s17328_s1 + $0x130] sm:$0xff]   ;;  %v10781_v29 = vld [vmem:[%s17327_s0 + $0x1c] sm:$0xf]  ;;  %v4261_v34 = vshrl.u32 %v10780_v28, 16 }
  0x1a   :  { %12302 = vmatprep.subr.bf16.mxu0 %v13360_v5  ;;  %v4239_v22 = vrot.slane %v4237_v16, 4  ;;  %v4242_v23 = vrot.slane %v4240_v17, 5  ;;  %v4258_v27 = vrot.slane %v4256_v21, 5  ;;  %v13369_v30 = vld [vmem:[%s17328_s1 + $0x38] sm:$0xff]   ;;  %v10782_v33 = vld [vmem:[%s17327_s0 + $0x20] sm:$0x1] }
  0x1b   :  { %v4253_v32 = vor.u32 %v4252_v25, %v4248_v24  ;;  %v4264_v35 = vshll.u32 %v10780_v28, 16  ;;  %v13370_v36 = vld [vmem:[%s17328_s1 + $0x138] sm:$0xff]   ;;  %v4270_v38 = vshll.u32 %v10781_v29, 16  ;;  %v4274_v39 = vshrl.u32 %v10781_v29, 16  ;;  %v10783_v45 = vld [vmem:[%s17327_s0 + $0x24] sm:$0xf] }
  0x1c   :  { %11983 = vmatpush3.bf16.msra.mxu1 %v13359_v4  ;;  %v4243_v31 = vor.u32 %v4242_v23, %v4239_v22  ;;  %v4280_v40 = vshll.u32 %v10782_v33, 16  ;;  %v4263_v43 = vrot.slane %v4261_v34, 4  ;;  %v10784_v49 = vld [vmem:[%s17327_s0 + $0x28] sm:$0xf]  ;;  %v4285_v50 = vshrl.u32 %v10783_v45, 16  ;;  %v13373_v53 = vld [vmem:[%s17328_s1 + $0x40] sm:$0xff]  }
  0x1d   :  { %12303 = vmatpush3.bf16.msra.mxu0 %v13360_v5  ;;  %11984 = vmatprep.subr.bf16.mxu1 %v13361_v6  ;;  %v4254_v42 = vrot.slane %v4253_v32, 4  ;;  %v4266_v44 = vrot.slane %v4264_v35, 5  ;;  %v4272_v46 = vrot.slane %v4270_v38, 5  ;;  %v4276_v47 = vrot.slane %v4274_v39, 4  ;;  %v10785_v55 = vld [vmem:[%s17327_s0 + $0x2c] sm:$0x1] }
  0x1e   :  { %12304 = vmatprep.subr.bf16.mxu0 %v13362_v7  ;;  %v4244_v41 = vrot.slane %v4243_v31, 4  ;;  %v4282_v48 = vrot.slane %v4280_v40, 5  ;;  %v4288_v56 = vshll.u32 %v10783_v45, 16  ;;  %v4287_v59 = vrot.slane %v4285_v50, 4  ;;  %v10786_v61 = vld [vmem:[%s17327_s0 + $0x30] sm:$0xf] }
  0x1f   :  { %v4259_v52 = vsel %vm13668_vm2, %v4254_v42, %v4258_v27  ;;  %v4267_v54 = vor.u32 %v4266_v44, %v4263_v43  ;;  %v4277_v58 = vor.u32 %v4276_v47, %v4272_v46  ;;  %v4294_v60 = vshll.u32 %v10784_v49, 16  ;;  %v13372_v62 = vld [vmem:[%s17327_s0 + $0xc] sm:$0xff]   ;;  %v10787_v3 = vld [vmem:[%s17327_s0 + $0x34] sm:$0xf]  ;;  %v13376_v17 = vld [vmem:[%s17328_s1 + $0x140] sm:$0xff]  }
  0x20   :  { %11985 = vmatpush3.bf16.msra.mxu1 %v13361_v6  ;;  %v4249_v51 = vsel %vm13668_vm2, %v4244_v41, %v4248_v24  ;;  %v4290_v0 = vrot.slane %v4288_v56, 5  ;;  %v4298_v1 = vshrl.u32 %v10784_v49, 16  ;;  %v4304_v2 = vshll.u32 %v10785_v55, 16  ;;  %v10788_v6 = vld [vmem:[%s17327_s0 + $0x38] sm:$0x1]  ;;  %v13379_v33 = vld [vmem:[%s17328_s1 + $0x48] sm:$0xff]  }
  0x21   :  { %12305 = vmatpush3.bf16.msra.mxu0 %v13362_v7  ;;  %11986 = vmatprep.subr.bf16.mxu1 %v13363_v8  ;;  %v10889_v57 = vcombine.low %v4249_v51, %v4259_v52  ;;  %v4268_v63 = vrot.slane %v4267_v54, 4  ;;  %v4278_v4 = vrot.slane %v4277_v58, 4  ;;  %v4296_v5 = vrot.slane %v4294_v60, 5  ;;  %v13374_v19 = vld [vmem:[%s17327_s0 + $0x18] sm:$0xff]   ;;  %v10790_v27 = vld [vmem:[%s17327_s0 + $0x40] sm:$0xf] }
  0x22   :  { %12306 = vmatprep.subr.bf16.mxu0 %v13364_v9  ;;  %v4309_v7 = vshrl.u32 %v10786_v61, 16  ;;  %v4306_v12 = vrot.slane %v4304_v2, 5  ;;  %v4318_v16 = vshll.u32 %v10787_v3, 16  ;;  %v4322_v22 = vshrl.u32 %v10787_v3, 16  ;;  %v10791_v31 = vld [vmem:[%s17327_s0 + $0x44] sm:$0x1] }
  0x23   :  { %12314 = vmatprep.mubr.bf16.mxu0 %v10889_v57  ;;  %v4283_v13 = vsel %vm13668_vm2, %v4278_v4, %v4282_v48  ;;  %v4328_v25 = vshll.u32 %v10788_v6, 16  ;;  %v4342_v38 = vshll.u32 %v10790_v27, 16  ;;  %v13375_v40 = vld [vmem:[%s17327_s0 + $0x24] sm:$0xff]   ;;  %v4346_v43 = vshrl.u32 %v10790_v27, 16  ;;  %v10794_v56 = vld [vmem:[%s17327_s0 + $0x50] sm:$0x1] }
  0x24   :  { %11987 = vmatpush3.bf16.msra.mxu1 %v13363_v8  ;;  %v4312_v8 = vshll.u32 %v10786_v61, 16  ;;  %v4311_v14 = vrot.slane %v4309_v7, 4  ;;  %v4320_v24 = vrot.slane %v4318_v16, 5  ;;  %v10792_v49 = vld [vmem:[%s17327_s0 + $0x48] sm:$0xf]  ;;  %v4352_v52 = vshll.u32 %v10791_v31, 16 }
  0x25   :  { %12307 = vmatpush3.bf16.msra.mxu0 %v13364_v9  ;;  %11988 = vmatprep.subr.bf16.mxu1 %v13365_v10  ;;  %v4273_v9 = vsel %vm13668_vm2, %v4268_v63, %v4272_v46  ;;  %v4330_v35 = vrot.slane %v4328_v25, 5  ;;  %v13377_v46 = vld [vmem:[%s17327_s0 + $0x30] sm:$0xff]   ;;  %v4344_v48 = vrot.slane %v4342_v38, 5  ;;  %v4348_v51 = vrot.slane %v4346_v43, 4  ;;  %v13380_v60 = vld [vmem:[%s17328_s1 + $0x148] sm:$0xff]  }
  0x26   :  { %12308 = vmatprep.subr.bf16.mxu0 %v13366_v11  ;;  %v4314_v15 = vrot.slane %v4312_v8, 5  ;;  %v10890_v18 = vcombine.low %v4273_v9, %v4283_v13  ;;  %v4357_v54 = vshrl.u32 %v10792_v49, 16  ;;  %v4360_v57 = vshll.u32 %v10792_v49, 16 }
  0x27   :  { %v4354_v63 = vrot.slane %v4352_v52, 5  ;;  %v4376_v7 = vshll.u32 %v10794_v56, 16  ;;  %v10802_v52 = vld [vmem:[%s17327_s0 + $0x70] sm:$0xf] }
  0x28   :  { %11989 = vmatpush3.bf16.msra.mxu1 %v13365_v10  ;;  %v4291_v10 = vor.u32 %v4290_v0, %v4287_v59  ;;  %v4315_v23 = vor.u32 %v4314_v15, %v4311_v14  ;;  %v4359_v0 = vrot.slane %v4357_v54, 4  ;;  %v4362_v3 = vrot.slane %v4360_v57, 5  ;;  %v13378_v14 = vld [vmem:[%s17327_s0 + $0x3c] sm:$0xff]   ;;  %v10803_v57 = vld [vmem:[%s17327_s0 + $0x74] sm:$0x1] }
  0x29   :  { %12309 = vmatpush3.bf16.msra.mxu0 %v13366_v11  ;;  %11990 = vmatprep.subr.bf16.mxu1 %v13367_v20  ;;  %v4300_v11 = vrot.slane %v4298_v1, 4  ;;  %v4378_v16 = vrot.slane %v4376_v7, 5 }
  0x2a   :  { %12310 = vmatprep.subr.bf16.mxu0 %v13368_v26  ;;  %v4316_v34 = vrot.slane %v4315_v23, 4  ;;  %v4363_v9 = vor.u32 %v4362_v3, %v4359_v0  ;;  %v13383_v23 = vld [vmem:[%s17328_s1 + $0x150] sm:$0xff]   ;;  %v4442_v3 = vshrl.u32 %v10802_v52, 16 }
  0x2b   :  { %v4301_v21 = vor.u32 %v4300_v11, %v4296_v5  ;;  %v10796_v11 = vld [vmem:[%s17327_s0 + $0x58] sm:$0xf] }
  0x2c   :  { %11991 = vmatpush3.bf16.msra.mxu1 %v13367_v20  ;;  %v4292_v20 = vrot.slane %v4291_v10, 4  ;;  %v4321_v45 = vsel %vm13668_vm2, %v4316_v34, %v4320_v24  ;;  %v10795_v10 = vld [vmem:[%s17327_s0 + $0x54] sm:$0xf] }
  0x2d   :  { %12311 = vmatpush3.bf16.msra.mxu0 %v13368_v26  ;;  %11992 = vmatprep.subr.bf16.mxu1 %v13369_v30  ;;  %v10789_v26 = vld [vmem:[%s17327_s0 + $0x3c] sm:$0xf]  ;;  %v4302_v29 = vrot.slane %v4301_v21, 4  ;;  %v4390_v21 = vshll.u32 %v10796_v11, 16 }
  0x2e   :  { %12312 = vmatprep.subr.bf16.mxu0 %v13370_v36  ;;  %v4297_v28 = vsel %vm13668_vm2, %v4292_v20, %v4296_v5  ;;  %v4333_v32 = vshrl.u32 %v10789_v26, 16  ;;  %v4384_v20 = vshll.u32 %v10795_v10, 16 }
  0x2f   :  { %v4307_v39 = vsel %vm13668_vm2, %v4302_v29, %v4306_v12  ;;  %v10797_v12 = vld [vmem:[%s17327_s0 + $0x5c] sm:$0x1] }
  0x30   :  { %11993 = vmatpush3.bf16.msra.mxu1 %v13369_v30  ;;  %v4324_v30 = vrot.slane %v4322_v22, 4  ;;  %v4335_v42 = vrot.slane %v4333_v32, 4  ;;  %v10891_v44 = vcombine.low %v4297_v28, %v4307_v39  ;;  %v10798_v22 = vld [vmem:[%s17327_s0 + $0x60] sm:$0xf]  ;;  %v4400_v27 = vshll.u32 %v10797_v12, 16 }
  0x31   :  { %12313 = vmatpush3.bf16.msra.mxu0 %v13370_v36  ;;  %12058 = vmatprep.subr.bf16.mxu1 %v13373_v53  ;;  %v4336_v36 = vshll.u32 %v10789_v26, 16  ;;  %v4394_v26 = vshrl.u32 %v10796_v11, 16  ;;  %v10799_v28 = vld [vmem:[%s17327_s0 + $0x64] sm:$0xf]  ;;  %v4386_v31 = vrot.slane %v4384_v20, 5  ;;  %v4392_v32 = vrot.slane %v4390_v21, 5 }
  0x32   :  { %12378 = vmatprep.subr.bf16.mxu0 %v13376_v17  ;;  %v4325_v41 = vor.u32 %v4324_v30, %v4320_v24  ;;  %v13381_v30 = vld [vmem:[%s17327_s0 + $0x48] sm:$0xff]   ;;  %v4405_v34 = vshrl.u32 %v10798_v22, 16  ;;  %v4402_v38 = vrot.slane %v4400_v27, 5  ;;  %v4408_v39 = vshll.u32 %v10798_v22, 16 }
  0x33   :  { %11995 = vmatmul.mubr.bf16.vlgmr.msra.gmra.mrb[0].mxu1 %v13372_v62  ;;  %v4338_v47 = vrot.slane %v4336_v36, 5  ;;  %v4349_v62 = vor.u32 %v4348_v51, %v4344_v48  ;;  %v4396_v36 = vrot.slane %v4394_v26, 4  ;;  %v4414_v43 = vshll.u32 %v10799_v28, 16  ;;  %v10801_v51 = vld [vmem:[%s17327_s0 + $0x6c] sm:$0xf] }
  0x34   :  { %12315 = vmatmul.mubr.bf16.vlgmr.msra.gmra.mrb[0].mxu0 %v10890_v18  ;;  %12059 = vmatpush3.bf16.msra.mxu1 %v13373_v53  ;;  %v4326_v50 = vrot.slane %v4325_v41, 4  ;;  %v10793_v53 = vld [vmem:[%s17327_s0 + $0x4c] sm:$0xf]  ;;  %v4444_v11 = vrot.slane %v4442_v3, 4  ;;  %v4448_v12 = vshll.u32 %v10803_v57, 16 }
  0x35   :  { %11998 = vmatprep.mubr.bf16.mxu1 %v13374_v19  ;;  %12379 = vmatpush3.bf16.msra.mxu0 %v13376_v17  ;;  %v4339_v55 = vor.u32 %v4338_v47, %v4335_v42  ;;  %v4366_v58 = vshll.u32 %v10793_v53, 16  ;;  %v4370_v59 = vshrl.u32 %v10793_v53, 16  ;;  %v4350_v5 = vrot.slane %v4349_v62, 4 }
  0x36   :  { %12060 = vmatprep.subr.bf16.mxu1 %v13379_v33  ;;  %12318 = vmatprep.mubr.bf16.mxu0 %v10891_v44  ;;  %v4331_v61 = vsel %vm13668_vm2, %v4326_v50, %v4330_v35  ;;  %v4381_v17 = vshrl.u32 %v10795_v10, 16  ;;  %v4364_v19 = vrot.slane %v4363_v9, 4  ;;  %v4407_v42 = vrot.slane %v4405_v34, 4 }
  0x37   :  { %v10892_v1 = vcombine.low %v4321_v45, %v4331_v61  ;;  %v4340_v2 = vrot.slane %v4339_v55, 4  ;;  %v4368_v4 = vrot.slane %v4366_v58, 5  ;;  %12380 = vmatprep.subr.bf16.mxu0 %v13380_v60  ;;  %v4372_v6 = vrot.slane %v4370_v59, 4  ;;  %v13387_v58 = vld [vmem:[%s17328_s1 + $0x158] sm:$0xff]  }
  0x38   :  { %12061 = vmatpush3.bf16.msra.mxu1 %v13379_v33  ;;  %v4355_v13 = vsel %vm13668_vm2, %v4350_v5, %v4354_v63  ;;  %v4383_v25 = vrot.slane %v4381_v17, 4  ;;  %v10800_v33 = vld [vmem:[%s17327_s0 + $0x68] sm:$0x1]  ;;  %v4397_v44 = vor.u32 %v4396_v36, %v4392_v32  ;;  %v4410_v45 = vrot.slane %v4408_v39, 5  ;;  %v13384_v5 = vld [vmem:[%s17327_s0 + $0x60] sm:$0xff]  }
  0x39   :  { %12381 = vmatpush3.bf16.msra.mxu0 %v13380_v60  ;;  %v4345_v8 = vsel %vm13668_vm2, %v4340_v2, %v4344_v48  ;;  %v4373_v15 = vor.u32 %v4372_v6, %v4368_v4  ;;  %v4369_v29 = vsel %vm13668_vm2, %v4364_v19, %v4368_v4  ;;  %v4424_v47 = vshll.u32 %v10800_v33, 16  ;;  %v13386_v48 = vld [vmem:[%s17328_s1 + $0x50] sm:$0xff]   ;;  %v10806_v17 = vld [vmem:[%s17327_s0 + $0x80] sm:$0x1]  ;;  %v10808_v36 = vld [vmem:[%s17327_s0 + $0x88] sm:$0xf] }
  0x3a   :  { %v10893_v18 = vcombine.low %v4345_v8, %v4355_v13  ;;  %12382 = vmatprep.subr.bf16.mxu0 %v13383_v23  ;;  %v4387_v41 = vor.u32 %v4386_v31, %v4383_v25  ;;  %v4416_v50 = vrot.slane %v4414_v43, 5  ;;  %v4398_v53 = vrot.slane %v4397_v44, 4  ;;  %12062 = vmatprep.subr.bf16.mxu1 %v13386_v48  ;;  %v13382_v60 = vld [vmem:[%s17327_s0 + $0x54] sm:$0xff]  }
  0x3b   :  { %11999 = vmatmul.mubr.bf16.gmra.mrb[4].mxu1 %v13375_v40  ;;  %v4374_v24 = vrot.slane %v4373_v15, 4  ;;  %v4411_v54 = vor.u32 %v4410_v45, %v4407_v42  ;;  %v4426_v56 = vrot.slane %v4424_v47, 5  ;;  %v4429_v61 = vshrl.u32 %v10801_v51, 16  ;;  %v10804_v13 = vld [vmem:[%s17327_s0 + $0x78] sm:$0xf] }
  0x3c   :  { %12319 = vmatmul.mubr.bf16.gmra.mrb[4].mxu0 %v10892_v1  ;;  %12002 = vmatprep.mubr.bf16.mxu1 %v13377_v46  ;;  %v4418_v46 = vshrl.u32 %v10799_v28, 16  ;;  %v4388_v49 = vrot.slane %v4387_v41, 4  ;;  %v4432_v62 = vshll.u32 %v10801_v51, 16  ;;  %v4438_v63 = vshll.u32 %v10802_v52, 16  ;;  %v13388_v42 = vld [vmem:[%s17327_s0 + $0x78] sm:$0xff]  }
  0x3d   :  { %12322 = vmatprep.mubr.bf16.mxu0 %v10893_v18  ;;  %v4379_v35 = vsel %vm13668_vm2, %v4374_v24, %v4378_v16  ;;  %12383 = vmatpush3.bf16.msra.mxu0 %v13383_v23  ;;  %v4403_v0 = vsel %vm13668_vm2, %v4398_v53, %v4402_v38  ;;  %v4412_v1 = vrot.slane %v4411_v54, 4  ;;  %v4431_v6 = vrot.slane %v4429_v61, 4  ;;  %v10805_v16 = vld [vmem:[%s17327_s0 + $0x7c] sm:$0xf]  ;;  %v10809_v38 = vld [vmem:[%s17327_s0 + $0x8c] sm:$0x1] }
  0x3e   :  { %v10894_v40 = vcombine.low %v4369_v29, %v4379_v35  ;;  %v4420_v55 = vrot.slane %v4418_v46, 4  ;;  %v4393_v59 = vsel %vm13668_vm2, %v4388_v49, %v4392_v32  ;;  %12063 = vmatpush3.bf16.msra.mxu1 %v13386_v48  ;;  %12384 = vmatprep.subr.bf16.mxu0 %v13387_v58  ;;  %v4434_v7 = vrot.slane %v4432_v62, 5  ;;  %v13385_v29 = vld [vmem:[%s17327_s0 + $0x6c] sm:$0xff]   ;;  %v10807_v35 = vld [vmem:[%s17327_s0 + $0x84] sm:$0xf]  ;;  %v13393_v48 = vld [vmem:[%s17328_s1 + $0x58] sm:$0xff]  }
  0x3f   :  { %v10895_v4 = vcombine.low %v4393_v59, %v4403_v0  ;;  %v4440_v8 = vrot.slane %v4438_v63, 5  ;;  %v4417_v9 = vsel %vm13668_vm2, %v4412_v1, %v4416_v50  ;;  %v4453_v18 = vshrl.u32 %v10804_v13, 16  ;;  %v10810_v53 = vld [vmem:[%s17327_s0 + $0x90] sm:$0xf]  ;;  %v13394_v54 = vld [vmem:[%s17328_s1 + $0x168] sm:$0xff]   ;;  %12064 = vmatprep.subr.bf16.mxu1 %v13393_v48 }
  0x40   :  { %v4421_v2 = vor.u32 %v4420_v55, %v4416_v50  ;;  %v4435_v15 = vor.u32 %v4434_v7, %v4431_v6  ;;  %v4456_v19 = vshll.u32 %v10804_v13, 16  ;;  %v4450_v22 = vrot.slane %v4448_v12, 5  ;;  %v10812_v59 = vld [vmem:[%s17327_s0 + $0x98] sm:$0x1]  ;;  %v13389_v6 = vld [vmem:[%s17327_s0 + $0x84] sm:$0xff]   ;;  %v13391_v13 = vld [vmem:[%s17327_s0 + $0x90] sm:$0xff]  }
  0x41   :  { %12385 = vmatpush3.bf16.msra.mxu0 %v13387_v58  ;;  %v4445_v21 = vor.u32 %v4444_v11, %v4440_v8  ;;  %v4462_v23 = vshll.u32 %v10805_v16, 16  ;;  %v4455_v26 = vrot.slane %v4453_v18, 4  ;;  %v4466_v31 = vshrl.u32 %v10805_v16, 16  ;;  %v10811_v58 = vld [vmem:[%s17327_s0 + $0x94] sm:$0xf] }
  0x42   :  { %v4422_v10 = vrot.slane %v4421_v2, 4  ;;  %v4436_v25 = vrot.slane %v4435_v15, 4  ;;  %v4458_v27 = vrot.slane %v4456_v19, 5  ;;  %v4472_v32 = vshll.u32 %v10806_v17, 16  ;;  %12065 = vmatpush3.bf16.msra.mxu1 %v13393_v48  ;;  %v10814_v18 = vld [vmem:[%s17327_s0 + $0xa0] sm:$0xf] }
  0x43   :  { %12003 = vmatmul.mubr.bf16.gmra.mrb[8].mxu1 %v13378_v14  ;;  %v13390_v14 = vld [vmem:[%s17328_s1 + $0x160] sm:$0xff]   ;;  %v4446_v28 = vrot.slane %v4445_v21, 4  ;;  %v4477_v43 = vshrl.u32 %v10807_v35, 16  ;;  %v4480_v46 = vshll.u32 %v10807_v35, 16  ;;  %v4486_v47 = vshll.u32 %v10808_v36, 16 }
  0x44   :  { %12323 = vmatmul.mubr.bf16.gmra.mrb[8].mxu0 %v10894_v40  ;;  %12006 = vmatprep.mubr.bf16.mxu1 %v13381_v30  ;;  %v4427_v20 = vsel %vm13668_vm2, %v4422_v10, %v4426_v56  ;;  %v4464_v30 = vrot.slane %v4462_v23, 5  ;;  %v4441_v33 = vsel %vm13668_vm2, %v4436_v25, %v4440_v8  ;;  %v4459_v34 = vor.u32 %v4458_v27, %v4455_v26 }
  0x45   :  { %12326 = vmatprep.mubr.bf16.mxu0 %v10895_v4  ;;  %12386 = vmatprep.subr.bf16.mxu0 %v13390_v14  ;;  %v10896_v24 = vcombine.low %v4417_v9, %v4427_v20  ;;  %v4451_v39 = vsel %vm13668_vm2, %v4446_v28, %v4450_v22  ;;  %v4468_v40 = vrot.slane %v4466_v31, 4  ;;  %v4474_v41 = vrot.slane %v4472_v32, 5  ;;  %v10815_v22 = vld [vmem:[%s17327_s0 + $0xa4] sm:$0x1] }
  0x46   :  { %12387 = vmatpush3.bf16.msra.mxu0 %v13390_v14  ;;  %v10897_v44 = vcombine.low %v4441_v33, %v4451_v39  ;;  %v4460_v45 = vrot.slane %v4459_v34, 4  ;;  %v4479_v50 = vrot.slane %v4477_v43, 4  ;;  %v4490_v51 = vshrl.u32 %v10808_v36, 16  ;;  %v10813_v14 = vld [vmem:[%s17327_s0 + $0x9c] sm:$0xf]  ;;  %v13397_v33 = vld [vmem:[%s17328_s1 + $0x170] sm:$0xff]  }
  0x47   :  { %v4469_v49 = vor.u32 %v4468_v40, %v4464_v30  ;;  %v4496_v52 = vshll.u32 %v10809_v38, 16  ;;  %v4482_v56 = vrot.slane %v4480_v46, 5  ;;  %v4488_v57 = vrot.slane %v4486_v47, 5  ;;  %12388 = vmatprep.subr.bf16.mxu0 %v13394_v54  ;;  %v10816_v38 = vld [vmem:[%s17327_s0 + $0xa8] sm:$0xf]  ;;  %v13398_v39 = vld [vmem:[%s17328_s1 + $0x178] sm:$0xff]  }
  0x48   :  { %v4465_v55 = vsel %vm13668_vm2, %v4460_v45, %v4464_v30  ;;  %v4492_v61 = vrot.slane %v4490_v51, 4  ;;  %v4501_v63 = vshrl.u32 %v10810_v53, 16  ;;  %v4504_v1 = vshll.u32 %v10810_v53, 16  ;;  %v10818_v43 = vld [vmem:[%s17327_s0 + $0xb0] sm:$0x1] }
  0x49   :  { %v4498_v62 = vrot.slane %v4496_v52, 5  ;;  %v4483_v0 = vor.u32 %v4482_v56, %v4479_v50  ;;  %v4510_v2 = vshll.u32 %v10811_v58, 16  ;;  %v4514_v3 = vshrl.u32 %v10811_v58, 16 }
  0x4a   :  { %v4503_v7 = vrot.slane %v4501_v63, 4  ;;  %v4520_v8 = vshll.u32 %v10812_v59, 16  ;;  %12389 = vmatpush3.bf16.msra.mxu0 %v13394_v54  ;;  %v4506_v11 = vrot.slane %v4504_v1, 5  ;;  %v4525_v19 = vshrl.u32 %v10813_v14, 16  ;;  %v10820_v63 = vld [vmem:[%s17327_s0 + $0xb8] sm:$0xf] }
  0x4b   :  { %12007 = vmatmul.mubr.bf16.gmra.mrb[12].mxu1 %v13382_v60  ;;  %v4470_v60 = vrot.slane %v4469_v49, 4  ;;  %v4484_v10 = vrot.slane %v4483_v0, 4  ;;  %v4512_v12 = vrot.slane %v4510_v2, 5  ;;  %v4516_v16 = vrot.slane %v4514_v3, 4  ;;  %v13392_v49 = vld [vmem:[%s17327_s0 + $0x9c] sm:$0xff]   ;;  %12390 = vmatprep.subr.bf16.mxu0 %v13397_v33 }
  0x4c   :  { %12010 = vmatprep.mubr.bf16.mxu1 %v13384_v5  ;;  %12327 = vmatmul.mubr.bf16.gmra.mrb[12].mxu0 %v10896_v24  ;;  %v4493_v5 = vor.u32 %v4492_v61, %v4488_v57  ;;  %v4522_v17 = vrot.slane %v4520_v8, 5  ;;  %v4507_v21 = vor.u32 %v4506_v11, %v4503_v7  ;;  %v4528_v23 = vshll.u32 %v10813_v14, 16  ;;  %v10821_v0 = vld [vmem:[%s17327_s0 + $0xbc] sm:$0x1]  ;;  %v10822_v14 = vld [vmem:[%s17327_s0 + $0xc0] sm:$0xf] }
  0x4d   :  { %12330 = vmatprep.mubr.bf16.mxu0 %v10897_v44  ;;  %v4475_v4 = vsel %vm13668_vm2, %v4470_v60, %v4474_v41  ;;  %v4489_v20 = vsel %vm13668_vm2, %v4484_v10, %v4488_v57  ;;  %v4534_v24 = vshll.u32 %v10814_v18, 16  ;;  %v4517_v26 = vor.u32 %v4516_v16, %v4512_v12 }
  0x4e   :  { %v10898_v9 = vcombine.low %v4465_v55, %v4475_v4  ;;  %v4494_v15 = vrot.slane %v4493_v5, 4  ;;  %v4527_v27 = vrot.slane %v4525_v19, 4  ;;  %v4538_v28 = vshrl.u32 %v10814_v18, 16  ;;  %v13395_v55 = vld [vmem:[%s17327_s0 + $0xa8] sm:$0xff]   ;;  %12391 = vmatpush3.bf16.msra.mxu0 %v13397_v33  ;;  %v10823_v18 = vld [vmem:[%s17327_s0 + $0xc4] sm:$0xf] }
  0x4f   :  { %v4508_v30 = vrot.slane %v4507_v21, 4  ;;  %v4530_v31 = vrot.slane %v4528_v23, 5  ;;  %v4536_v32 = vrot.slane %v4534_v24, 5  ;;  %v4518_v34 = vrot.slane %v4517_v26, 4  ;;  %12392 = vmatprep.subr.bf16.mxu0 %v13398_v39  ;;  %v10824_v19 = vld [vmem:[%s17327_s0 + $0xc8] sm:$0x1] }
  0x50   :  { %v4499_v25 = vsel %vm13668_vm2, %v4494_v15, %v4498_v62  ;;  %v4540_v35 = vrot.slane %v4538_v28, 4  ;;  %v4544_v36 = vshll.u32 %v10815_v22, 16  ;;  %v4549_v44 = vshrl.u32 %v10816_v38, 16  ;;  %v10819_v62 = vld [vmem:[%s17327_s0 + $0xb4] sm:$0xf] }
  0x51   :  { %v4513_v40 = vsel %vm13668_vm2, %v4508_v30, %v4512_v12  ;;  %v4531_v41 = vor.u32 %v4530_v31, %v4527_v27  ;;  %v4552_v45 = vshll.u32 %v10816_v38, 16  ;;  %v4523_v46 = vsel %vm13668_vm2, %v4518_v34, %v4522_v17  ;;  %v13396_v23 = vld [vmem:[%s17327_s0 + $0xb4] sm:$0xff]  }
  0x52   :  { %v4541_v47 = vor.u32 %v4540_v35, %v4536_v32  ;;  %v4546_v48 = vrot.slane %v4544_v36, 5  ;;  %v10900_v51 = vcombine.low %v4513_v40, %v4523_v46  ;;  %v4551_v53 = vrot.slane %v4549_v44, 4  ;;  %12393 = vmatpush3.bf16.msra.mxu0 %v13398_v39  ;;  %v13944_v39 = vld [vmem:[%s17328_s1 + $0x180] sm:$0xff]   ;;  %v10929_v46 = vld [vmem:[%s17327_s0 + $0xc] sm:$0xe] }
  0x53   :  { %12011 = vmatmul.mubr.bf16.gmra.mrb[16].mxu1 %v13385_v29  ;;  %v10899_v29 = vcombine.low %v4489_v20, %v4499_v25  ;;  %v4532_v52 = vrot.slane %v4531_v41, 4  ;;  %v4554_v54 = vrot.slane %v4552_v45, 5  ;;  %v4568_v59 = vshll.u32 %v10818_v43, 16  ;;  %12458 = vmatprep.subr.bf16.mxu0 %v13944_v39 }
  0x54   :  { %12014 = vmatprep.mubr.bf16.mxu1 %v13388_v42  ;;  %12331 = vmatmul.mubr.bf16.gmra.mrb[16].mxu0 %v10898_v9  ;;  %v10817_v42 = vld [vmem:[%s17327_s0 + $0xac] sm:$0xf]  ;;  %v4542_v56 = vrot.slane %v4541_v47, 4  ;;  %v4573_v4 = vshrl.u32 %v10819_v62, 16  ;;  %v4576_v7 = vshll.u32 %v10819_v62, 16  ;;  %v4582_v8 = vshll.u32 %v10820_v63, 16 }
  0x55   :  { %12334 = vmatprep.mubr.bf16.mxu0 %v10899_v29  ;;  %v4558_v50 = vshll.u32 %v10817_v42, 16  ;;  %v4562_v58 = vshrl.u32 %v10817_v42, 16  ;;  %v4537_v60 = vsel %vm13668_vm2, %v4532_v52, %v4536_v32  ;;  %v4555_v61 = vor.u32 %v4554_v54, %v4551_v53  ;;  %v13401_v9 = vld [vmem:[%s17328_s1 + $0x60] sm:$0xff]   ;;  %v13399_v29 = vld [vmem:[%s17327_s0 + $0xd8] sm:$0xff]   ;;  %v10930_v47 = vld [vmem:[%s17327_s0 + $0x10] sm:$0xf] }
  0x56   :  { %v4547_v1 = vsel %vm13668_vm2, %v4542_v56, %v4546_v48  ;;  %v4570_v3 = vrot.slane %v4568_v59, 5  ;;  %v4575_v11 = vrot.slane %v4573_v4, 4  ;;  %v4586_v12 = vshrl.u32 %v10820_v63, 16  ;;  %12066 = vmatprep.subr.bf16.mxu1 %v13401_v9  ;;  %v10931_v48 = vld [vmem:[%s17327_s0 + $0x14] sm:$0x1]  ;;  %v13400_v59 = vld [vmem:[%s17327_s0 + $0xe4] sm:$0xff]  }
  0x57   :  { %v4560_v57 = vrot.slane %v4558_v50, 5  ;;  %v4564_v2 = vrot.slane %v4562_v58, 4  ;;  %v10901_v5 = vcombine.low %v4537_v60, %v4547_v1  ;;  %v4578_v16 = vrot.slane %v4576_v7, 5  ;;  %12067 = vmatpush3.bf16.msra.mxu1 %v13401_v9  ;;  %v10932_v60 = vld [vmem:[%s17327_s0 + $0x18] sm:$0xe]  ;;  %v13402_v1 = vld [vmem:[%s17327_s0 + $0xf0] sm:$0xff]  }
  0x58   :  { %v4584_v17 = vrot.slane %v4582_v8, 5  ;;  %v4588_v21 = vrot.slane %v4586_v12, 4  ;;  %v4597_v24 = vshrl.u32 %v10822_v14, 16  ;;  %v4600_v26 = vshll.u32 %v10822_v14, 16  ;;  %v10934_v63 = vld [vmem:[%s17327_s0 + $0x20] sm:$0x1] }
  0x59   :  { %v4565_v10 = vor.u32 %v4564_v2, %v4560_v57  ;;  %v4579_v25 = vor.u32 %v4578_v16, %v4575_v11  ;;  %v4606_v27 = vshll.u32 %v10823_v18, 16  ;;  %v4610_v28 = vshrl.u32 %v10823_v18, 16  ;;  %v10937_v11 = vld [vmem:[%s17327_s0 + $0x2c] sm:$0x1]  ;;  %v10938_v16 = vld [vmem:[%s17327_s0 + $0x30] sm:$0xe] }
  0x5a   :  { %v4589_v31 = vor.u32 %v4588_v21, %v4584_v17  ;;  %v4599_v32 = vrot.slane %v4597_v24, 4  ;;  %v4616_v33 = vshll.u32 %v10824_v19, 16  ;;  %v4602_v36 = vrot.slane %v4600_v26, 5  ;;  %v13407_v12 = vld [vmem:[%s17328_s1 + $0x68] sm:$0xff]   ;;  %v10940_v21 = vld [vmem:[%s17327_s0 + $0x38] sm:$0x1] }
  0x5b   :  { %12015 = vmatmul.mubr.bf16.gmra.mrb[20].mxu1 %v13389_v6  ;;  %v4556_v6 = vrot.slane %v4555_v61, 4  ;;  %v4566_v20 = vrot.slane %v4565_v10, 4  ;;  %v4580_v35 = vrot.slane %v4579_v25, 4  ;;  %v4608_v38 = vrot.slane %v4606_v27, 5  ;;  %v10933_v61 = vld [vmem:[%s17327_s0 + $0x1c] sm:$0xf]  ;;  %12068 = vmatprep.subr.bf16.mxu1 %v13407_v12 }
  0x5c   :  { %12018 = vmatprep.mubr.bf16.mxu1 %v13391_v13  ;;  %12335 = vmatmul.mubr.bf16.gmra.mrb[20].mxu0 %v10900_v51  ;;  %v4592_v13 = vshll.u32 %v10821_v0, 16  ;;  %v4590_v40 = vrot.slane %v4589_v31, 4  ;;  %v4612_v41 = vrot.slane %v4610_v28, 4  ;;  %v4618_v42 = vrot.slane %v4616_v33, 5  ;;  %v10936_v10 = vld [vmem:[%s17327_s0 + $0x28] sm:$0xf] }
  0x5d   :  { %12338 = vmatprep.mubr.bf16.mxu0 %v10901_v5  ;;  %v4561_v15 = vsel %vm13668_vm2, %v4556_v6, %v4560_v57  ;;  %v4571_v30 = vsel %vm13668_vm2, %v4566_v20, %v4570_v3  ;;  %v4585_v44 = vsel %vm13668_vm2, %v4580_v35, %v4584_v17  ;;  %v4603_v45 = vor.u32 %v4602_v36, %v4599_v32  ;;  %v10935_v6 = vld [vmem:[%s17327_s0 + $0x24] sm:$0xe]  ;;  %v10939_v17 = vld [vmem:[%s17327_s0 + $0x34] sm:$0xf]  ;;  %v13403_v27 = vld [vmem:[%s17327_s0 + $0xfc] sm:$0xff]  }
  0x5e   :  { %v4594_v22 = vrot.slane %v4592_v13, 5  ;;  %v10902_v34 = vcombine.low %v4561_v15, %v4571_v30  ;;  %v4613_v50 = vor.u32 %v4612_v41, %v4608_v38  ;;  %v11025_v51 = vrot.slane %v10929_v46, 9  ;;  %12069 = vmatpush3.bf16.msra.mxu1 %v13407_v12  ;;  %v10941_v28 = vld [vmem:[%s17327_s0 + $0x3c] sm:$0xe]  ;;  %v13405_v32 = vld [vmem:[%s17327_s0 + $0x108] sm:$0xff]  }
  0x5f   :  { %v5872_v52 = vrot.slane %v10930_v47, 5  ;;  %v4604_v54 = vrot.slane %v4603_v45, 4  ;;  %v5879_v0 = vrot.slane %v10933_v61, 5  ;;  %v11026_v4 = vrot.slane %v10932_v60, 9  ;;  %v10943_v33 = vld [vmem:[%s17327_s0 + $0x44] sm:$0x1] }
  0x60   :  { %v4614_v56 = vrot.slane %v4613_v50, 4  ;;  %v5882_v5 = vrot.slane %v10934_v63, 5  ;;  %v11027_v13 = vrot.slane %v10935_v6, 9  ;;  %v5886_v14 = vrot.slane %v10936_v10, 5  ;;  %v10945_v41 = vld [vmem:[%s17327_s0 + $0x4c] sm:$0xf] }
  0x61   :  { %v5873_v57 = vsel %vm13948_vm5, %v11025_v51, %v5872_v52  ;;  %v5874_v58 = vrot.slane %v5872_v52, 4  ;;  %v4609_v62 = vsel %vm13668_vm2, %v4604_v54, %v4608_v38  ;;  %v5881_v9 = vrot.slane %v5879_v0, 4  ;;  %v13406_v54 = vld [vmem:[%s17327_s0 + $0x114] sm:$0xff]   ;;  %v10951_v60 = vld [vmem:[%s17327_s0 + $0x64] sm:$0xf] }
  0x62   :  { %v4619_v2 = vsel %vm13668_vm2, %v4614_v56, %v4618_v42  ;;  %v5889_v15 = vrot.slane %v10937_v11, 5  ;;  %v5880_v18 = vsel %vm13948_vm5, %v11026_v4, %v5879_v0  ;;  %v5888_v20 = vrot.slane %v5886_v14, 4  ;;  %v10947_v56 = vld [vmem:[%s17327_s0 + $0x54] sm:$0xe]  ;;  %v13408_v63 = vld [vmem:[%s17327_s0 + $0x120] sm:$0xff]  }
  0x63   :  { %12019 = vmatmul.mubr.bf16.gmra.mrb[24].mxu1 %v13392_v49  ;;  %v4595_v49 = vsel %vm13668_vm2, %v4590_v40, %v4594_v22  ;;  %v10904_v7 = vcombine.low %v4609_v62, %v4619_v2  ;;  %v5883_v19 = vsel %vm13948_vm5, %v5881_v9, %v5882_v5  ;;  %v11028_v22 = vrot.slane %v10938_v16, 9  ;;  %v10944_v40 = vld [vmem:[%s17327_s0 + $0x48] sm:$0xe]  ;;  %v10952_v62 = vld [vmem:[%s17327_s0 + $0x68] sm:$0x1]  ;;  %v13409_v16 = vld [vmem:[%s17327_s0 + $0x12c] sm:$0xff]  }
  0x64   :  { %12022 = vmatprep.mubr.bf16.mxu1 %v13395_v55  ;;  %12339 = vmatmul.mubr.bf16.gmra.mrb[24].mxu0 %v10902_v34  ;;  %v10903_v53 = vcombine.low %v4585_v44, %v4595_v49  ;;  %v5875_v55 = vrot.slane %v10931_v48, 5  ;;  %v5893_v24 = vrot.slane %v10939_v17, 5  ;;  %v5896_v25 = vrot.slane %v10940_v21, 5  ;;  %v10946_v44 = vld [vmem:[%s17327_s0 + $0x50] sm:$0x1]  ;;  %v13411_v21 = vld [vmem:[%s17327_s0 + $0x138] sm:$0xff]  }
  0x65   :  { %v5890_v26 = vsel %vm13948_vm5, %v5888_v20, %v5889_v15  ;;  %v11074_v30 = vcombine.low %v5880_v18, %v5883_v19  ;;  %v11029_v34 = vrot.slane %v10941_v28, 9  ;;  %v5903_v38 = vrot.slane %v10943_v33, 5  ;;  %v10948_v49 = vld [vmem:[%s17327_s0 + $0x58] sm:$0xf]  ;;  %v10954_v4 = vld [vmem:[%s17327_s0 + $0x70] sm:$0xf] }
  0x66   :  { %12342 = vmatprep.mubr.bf16.mxu0 %v10903_v53  ;;  %v5876_v3 = vsel %vm13948_vm5, %v5874_v58, %v5875_v55  ;;  %v5895_v31 = vrot.slane %v5893_v24, 4  ;;  %v5907_v45 = vrot.slane %v10945_v41, 5  ;;  %v5894_v46 = vsel %vm13948_vm5, %v11028_v22, %v5893_v24  ;;  %v10953_v9 = vld [vmem:[%s17327_s0 + $0x6c] sm:$0xe]  ;;  %v10955_v12 = vld [vmem:[%s17327_s0 + $0x74] sm:$0x1] }
  0x67   :  { %v11073_v8 = vcombine.low %v5873_v57, %v5876_v3  ;;  %v11030_v48 = vrot.slane %v10944_v40, 9  ;;  %v5910_v52 = vrot.slane %v10946_v44, 5  ;;  %v5914_v53 = vrot.slane %v10948_v49, 5  ;;  %v13410_v57 = vld [vmem:[%s17328_s1 + $0x188] sm:$0xff]   ;;  %v10957_v15 = vld [vmem:[%s17327_s0 + $0x7c] sm:$0xf] }
  0x68   :  { %v5897_v47 = vsel %vm13948_vm5, %v5895_v31, %v5896_v25  ;;  %v5909_v55 = vrot.slane %v5907_v45, 4  ;;  %v11031_v0 = vrot.slane %v10947_v56, 9  ;;  %v5921_v3 = vrot.slane %v10951_v60, 5  ;;  %v10956_v18 = vld [vmem:[%s17327_s0 + $0x78] sm:$0xe]  ;;  %v13414_v56 = vld [vmem:[%s17327_s0 + $0x150] sm:$0xff]  }
  0x69   :  { %v11076_v58 = vcombine.low %v5894_v46, %v5897_v47  ;;  %v5924_v6 = vrot.slane %v10952_v62, 5  ;;  %v5935_v19 = vrot.slane %v10957_v15, 5  ;;  %v10958_v22 = vld [vmem:[%s17327_s0 + $0x80] sm:$0x1]  ;;  %v11033_v25 = vrot.slane %v10953_v9, 9  ;;  %v13416_v46 = vld [vmem:[%s17328_s1 + $0x190] sm:$0xff]  }
  0x6a   :  { %v5915_v10 = vsel %vm13948_vm5, %v11031_v0, %v5914_v53  ;;  %v5923_v17 = vrot.slane %v5921_v3, 4  ;;  %v10961_v28 = vld [vmem:[%s17327_s0 + $0x8c] sm:$0x1]  ;;  %v11034_v31 = vrot.slane %v10956_v18, 9  ;;  %v5938_v33 = vrot.slane %v10958_v22, 5  ;;  %v13419_v62 = vld [vmem:[%s17328_s1 + $0x78] sm:$0xff]  }
  0x6b   :  { %12023 = vmatmul.mubr.bf16.gmra.mrb[28].mxu1 %v13396_v23  ;;  %v5887_v23 = vsel %vm13948_vm5, %v11027_v13, %v5886_v14  ;;  %v5928_v13 = vrot.slane %v10954_v4, 5  ;;  %v13413_v14 = vld [vmem:[%s17328_s1 + $0x70] sm:$0xff]   ;;  %v10964_v40 = vld [vmem:[%s17327_s0 + $0x98] sm:$0x1]  ;;  %v5945_v44 = vrot.slane %v10961_v28, 5  ;;  %v13415_v18 = vld [vmem:[%s17327_s0 + $0x15c] sm:$0xff]  }
  0x6c   :  { %12026 = vmatprep.mubr.bf16.mxu1 %v13399_v29  ;;  %12343 = vmatmul.mubr.bf16.gmra.mrb[28].mxu0 %v10904_v7  ;;  %v10942_v29 = vld [vmem:[%s17327_s0 + $0x40] sm:$0xf]  ;;  %v11075_v35 = vcombine.low %v5887_v23, %v5890_v26  ;;  %v5908_v7 = vsel %vm13948_vm5, %v11030_v48, %v5907_v45  ;;  %v10959_v23 = vld [vmem:[%s17327_s0 + $0x84] sm:$0xe]  ;;  %v5931_v26 = vrot.slane %v10955_v12, 5  ;;  %v5925_v41 = vsel %vm13948_vm5, %v5923_v17, %v5924_v6 }
  0x6d   :  { %12394 = vmatprep.mubr.bf16.mxu0 %v11073_v8  ;;  %v5900_v36 = vrot.slane %v10942_v29, 5  ;;  %v5911_v8 = vsel %vm13948_vm5, %v5909_v55, %v5910_v52  ;;  %12070 = vmatprep.subr.bf16.mxu1 %v13413_v14  ;;  %v5930_v29 = vrot.slane %v5928_v13, 4  ;;  %v5929_v47 = vsel %vm13948_vm5, %v11033_v25, %v5928_v13  ;;  %v10965_v49 = vld [vmem:[%s17327_s0 + $0x9c] sm:$0xe]  ;;  %v10969_v0 = vld [vmem:[%s17327_s0 + $0xac] sm:$0xf] }
  0x6e   :  { %v11078_v20 = vcombine.low %v5908_v7, %v5911_v8  ;;  %12071 = vmatpush3.bf16.msra.mxu1 %v13413_v14  ;;  %v5952_v52 = vrot.slane %v10964_v40, 5  ;;  %v5936_v4 = vsel %vm13948_vm5, %v11034_v31, %v5935_v19  ;;  %v10971_v7 = vld [vmem:[%s17327_s0 + $0xb4] sm:$0xe]  ;;  %v10973_v12 = vld [vmem:[%s17327_s0 + $0xbc] sm:$0x1] }
  0x6f   :  { %v5902_v42 = vrot.slane %v5900_v36, 4  ;;  %v5901_v50 = vsel %vm13948_vm5, %v11029_v34, %v5900_v36  ;;  %v11035_v34 = vrot.slane %v10959_v23, 9  ;;  %v5932_v48 = vsel %vm13948_vm5, %v5930_v29, %v5931_v26  ;;  %12072 = vmatprep.subr.bf16.mxu1 %v13419_v62  ;;  %v10974_v23 = vld [vmem:[%s17327_s0 + $0xc0] sm:$0xe]  ;;  %v13417_v26 = vld [vmem:[%s17327_s0 + $0x168] sm:$0xff]  }
  0x70   :  { %v11039_v13 = vrot.slane %v10971_v7, 9  ;;  %v5973_v17 = vrot.slane %v10973_v12, 5  ;;  %v10976_v29 = vld [vmem:[%s17327_s0 + $0xc8] sm:$0x1] }
  0x71   :  { %v5904_v51 = vsel %vm13948_vm5, %v5902_v42, %v5903_v38  ;;  %v10962_v38 = vld [vmem:[%s17327_s0 + $0x90] sm:$0xe] }
  0x72   :  { %v11077_v61 = vcombine.low %v5901_v50, %v5904_v51  ;;  %v13412_v50 = vld [vmem:[%s17327_s0 + $0x144] sm:$0xff]   ;;  %v11036_v51 = vrot.slane %v10962_v38, 9  ;;  %12073 = vmatpush3.bf16.msra.mxu1 %v13419_v62 }
  0x73   :  { %12027 = vmatmul.mubr.bf16.gmra.mrb[32].mxu1 %v13400_v59  ;;  %v10950_v59 = vld [vmem:[%s17327_s0 + $0x60] sm:$0xe] }
  0x74   :  { %12030 = vmatprep.mubr.bf16.mxu1 %v13402_v1  ;;  %12395 = vmatmul.mubr.bf16.vlgmr.msra.gmra.mrb[0].mxu0 %v11074_v30  ;;  %v5916_v1 = vrot.slane %v5914_v53, 4  ;;  %v11032_v5 = vrot.slane %v10950_v59, 9  ;;  %v10966_v53 = vld [vmem:[%s17327_s0 + $0xa0] sm:$0xf]  ;;  %v11037_v59 = vrot.slane %v10965_v49, 9 }
  0x75   :  { %12398 = vmatprep.mubr.bf16.mxu0 %v11075_v35  ;;  %12459 = vmatpush3.bf16.msra.mxu0 %v13944_v39  ;;  %v10949_v39 = vld [vmem:[%s17327_s0 + $0x5c] sm:$0x1]  ;;  %v10963_v35 = vld [vmem:[%s17327_s0 + $0x94] sm:$0xf] }
  0x76   :  { %12460 = vmatprep.subr.bf16.mxu0 %v13410_v57  ;;  %v5917_v2 = vrot.slane %v10949_v39, 5  ;;  %v5922_v36 = vsel %vm13948_vm5, %v11032_v5, %v5921_v3  ;;  %v5949_v45 = vrot.slane %v10963_v35, 5  ;;  %v5963_v3 = vrot.slane %v10969_v0, 5  ;;  %v14235_v35 = vld [vmem:[%s17328_s1 + $0x80] sm:$0xff]  }
  0x77   :  { %v11080_v55 = vcombine.low %v5922_v36, %v5925_v41  ;;  %12138 = vmatprep.subr.bf16.mxu1 %v14235_v35 }
  0x78   :  { %v5918_v11 = vsel %vm13948_vm5, %v5916_v1, %v5917_v2  ;;  %v5951_v39 = vrot.slane %v5949_v45, 4  ;;  %v10970_v1 = vld [vmem:[%s17327_s0 + $0xb0] sm:$0x1]  ;;  %v14188_v14 = vsel %vm13948_vm5, %v11036_v51, %v5949_v45  ;;  %v705_v45 = vld [vmem:[%s17327_s0 + $0x8] sm:$0x1] }
  0x79   :  { %12461 = vmatpush3.bf16.msra.mxu0 %v13410_v57  ;;  %v11079_v24 = vcombine.low %v5915_v10, %v5918_v11  ;;  %v5956_v57 = vrot.slane %v10966_v53, 5  ;;  %v5966_v6 = vrot.slane %v10970_v1, 5  ;;  %v5965_v10 = vrot.slane %v5963_v3, 4  ;;  %v10972_v11 = vld [vmem:[%s17327_s0 + $0xb8] sm:$0xf] }
  0x7a   :  { %12462 = vmatprep.subr.bf16.mxu0 %v13416_v46  ;;  %v14192_v15 = vsel %vm13948_vm5, %v5951_v39, %v5952_v52  ;;  %v10978_v51 = vld [vmem:[%s17327_s0 + $0xe8] sm:$0xf] }
  0x7b   :  { %12031 = vmatmul.mubr.bf16.gmra.mrb[36].mxu1 %v13403_v27  ;;  %v10960_v27 = vld [vmem:[%s17327_s0 + $0x88] sm:$0xf]  ;;  %v14211_v22 = vsel %vm13948_vm5, %v5965_v10, %v5966_v6  ;;  %v11084_v36 = vcombine.low %v14188_v14, %v14192_v15 }
  0x7c   :  { %12034 = vmatprep.mubr.bf16.mxu1 %v13405_v32  ;;  %12399 = vmatmul.mubr.bf16.gmra.mrb[4].mxu0 %v11076_v58  ;;  %v5942_v30 = vrot.slane %v10960_v27, 5  ;;  %v5937_v32 = vrot.slane %v5935_v19, 4  ;;  %v11081_v58 = vcombine.low %v5929_v47, %v5932_v48  ;;  %v14199_v19 = vsel %vm13948_vm5, %v11037_v59, %v5956_v57 }
  0x7d   :  { %12402 = vmatprep.mubr.bf16.mxu0 %v11077_v61  ;;  %12463 = vmatpush3.bf16.msra.mxu0 %v13416_v46  ;;  %v5958_v61 = vrot.slane %v5956_v57, 4  ;;  %v5984_v59 = vrot.slane %v10978_v51, 5 }
  0x7e   :  { %v5944_v42 = vrot.slane %v5942_v30, 4  ;;  %v5939_v5 = vsel %vm13948_vm5, %v5937_v32, %v5938_v33  ;;  %v5943_v8 = vsel %vm13948_vm5, %v11035_v34, %v5942_v30  ;;  %v11040_v30 = vrot.slane %v10974_v23, 9  ;;  %v13422_v34 = vld [vmem:[%s17328_s1 + $0x198] sm:$0xff]  }
  0x7f   :  { %v11082_v25 = vcombine.low %v5936_v4, %v5939_v5  ;;  %v5980_v33 = vrot.slane %v10976_v29, 5  ;;  %12464 = vmatprep.subr.bf16.mxu0 %v13422_v34  ;;  %v5986_v6 = vrot.slane %v5984_v59, 4 }
  0x80   :  { %v5946_v9 = vsel %vm13948_vm5, %v5944_v42, %v5945_v44  ;;  %v703_v42 = vld [vmem:[%s17327_s0] sm:$0xf]  ;;  %v704_v44 = vld [vmem:[%s17327_s0 + $0x4] sm:$0xf] }
  0x81   :  { %v11083_v31 = vcombine.low %v5943_v8, %v5946_v9  ;;  %v803_v49 = vshrl.u32 %v703_v42, 16  ;;  %v806_v52 = vshll.u32 %v703_v42, 16  ;;  %v812_v53 = vshll.u32 %v704_v44, 16  ;;  %12465 = vmatpush3.bf16.msra.mxu0 %v13422_v34  ;;  %v708_v8 = vld [vmem:[%s17327_s0 + $0x14] sm:$0x1]  ;;  %v13426_v9 = vld [vmem:[%s17328_s1 + $0x1a8] sm:$0xff]  }
  0x83   :  { %12035 = vmatmul.mubr.bf16.gmra.mrb[40].mxu1 %v13406_v54  ;;  %v10967_v54 = vld [vmem:[%s17327_s0 + $0xa4] sm:$0x1]  ;;  %v805_v57 = vrot.slane %v803_v49, 4  ;;  %v814_v0 = vrot.slane %v812_v53, 5  ;;  %v710_v53 = vld [vmem:[%s17327_s0 + $0x1c] sm:$0xf] }
  0x84   :  { %12038 = vmatprep.mubr.bf16.mxu1 %v13408_v63  ;;  %12403 = vmatmul.mubr.bf16.gmra.mrb[8].mxu0 %v11078_v20  ;;  %v5959_v60 = vrot.slane %v10967_v54, 5  ;;  %v10968_v63 = vld [vmem:[%s17327_s0 + $0xa8] sm:$0xe]  ;;  %v816_v54 = vshrl.u32 %v704_v44, 16 }
  0x85   :  { %12406 = vmatprep.mubr.bf16.mxu0 %v11079_v24  ;;  %v11038_v2 = vrot.slane %v10968_v63, 9  ;;  %v10975_v24 = vld [vmem:[%s17327_s0 + $0xc4] sm:$0xf]  ;;  %v808_v63 = vrot.slane %v806_v52, 5  ;;  %v709_v52 = vld [vmem:[%s17327_s0 + $0x18] sm:$0xf] }
  0x86   :  { %v14203_v20 = vsel %vm13948_vm5, %v5958_v61, %v5959_v60  ;;  %v5977_v32 = vrot.slane %v10975_v24, 5  ;;  %v706_v60 = vld [vmem:[%s17327_s0 + $0xc] sm:$0xf]  ;;  %v13424_v61 = vld [vmem:[%s17328_s1 + $0x1a0] sm:$0xff]   ;;  %v818_v1 = vrot.slane %v816_v54, 4  ;;  %v846_v24 = vshll.u32 %v708_v8, 16 }
  0x87   :  { %v11085_v38 = vcombine.low %v14199_v19, %v14203_v20  ;;  %12466 = vmatprep.subr.bf16.mxu0 %v13424_v61  ;;  %v809_v10 = vor.u32 %v808_v63, %v805_v57  ;;  %v827_v12 = vshrl.u32 %v706_v60, 16  ;;  %v10983_v19 = vld [vmem:[%s17327_s0 + $0xfc] sm:$0xe]  ;;  %v10984_v20 = vld [vmem:[%s17327_s0 + $0x100] sm:$0xf]  ;;  %v860_v63 = vshll.u32 %v710_v53, 16 }
  0x88   :  { %v14260_v47 = vsel %vm13948_vm5, %v11040_v30, %v5977_v32  ;;  %v5979_v48 = vrot.slane %v5977_v32, 4  ;;  %12467 = vmatpush3.bf16.msra.mxu0 %v13424_v61  ;;  %v13428_v32 = vld [vmem:[%s17328_s1 + $0x1b0] sm:$0xff]   ;;  %v848_v44 = vrot.slane %v846_v24, 5 }
  0x89   :  { %v829_v30 = vrot.slane %v827_v12, 4  ;;  %12468 = vmatprep.subr.bf16.mxu0 %v13426_v9  ;;  %v13421_v8 = vld [vmem:[%s17327_s0 + $0x18c] sm:$0xff]   ;;  %v862_v12 = vrot.slane %v860_v63, 5  ;;  %v10989_v63 = vld [vmem:[%s17327_s0 + $0x114] sm:$0xe] }
  0x8a   :  { %v14274_v39 = vsel %vm13948_vm5, %v5979_v48, %v5980_v33 }
  0x8b   :  { %12039 = vmatmul.mubr.bf16.gmra.mrb[44].mxu1 %v13409_v16  ;;  %v5970_v16 = vrot.slane %v10972_v11, 5  ;;  %v11088_v62 = vcombine.low %v14260_v47, %v14274_v39  ;;  %v819_v11 = vor.u32 %v818_v1, %v814_v0  ;;  %v10985_v1 = vld [vmem:[%s17327_s0 + $0x104] sm:$0x1] }
  0x8c   :  { %12042 = vmatprep.mubr.bf16.mxu1 %v13411_v21  ;;  %12407 = vmatmul.mubr.bf16.gmra.mrb[12].mxu0 %v11080_v55  ;;  %v14207_v21 = vsel %vm13948_vm5, %v11038_v2, %v5963_v3  ;;  %v822_v55 = vshll.u32 %v705_v45, 16  ;;  %v707_v2 = vld [vmem:[%s17327_s0 + $0x10] sm:$0xf]  ;;  %v13418_v3 = vld [vmem:[%s17327_s0 + $0x174] sm:$0xff]  }
  0x8d   :  { %12410 = vmatprep.mubr.bf16.mxu0 %v11081_v58  ;;  %v14224_v27 = vsel %vm13948_vm5, %v11039_v13, %v5970_v16  ;;  %v5972_v28 = vrot.slane %v5970_v16, 4  ;;  %v11086_v40 = vcombine.low %v14207_v21, %v14211_v22  ;;  %v830_v13 = vshll.u32 %v706_v60, 16  ;;  %v13420_v16 = vld [vmem:[%s17327_s0 + $0x180] sm:$0xff]   ;;  %v10982_v45 = vld [vmem:[%s17327_s0 + $0xf8] sm:$0x1]  ;;  %12469 = vmatpush3.bf16.msra.mxu0 %v13426_v9 }
  0x8e   :  { %v824_v4 = vrot.slane %v822_v55, 5  ;;  %v840_v23 = vshrl.u32 %v707_v2, 16  ;;  %v5994_v54 = vrot.slane %v10982_v45, 5  ;;  %v711_v55 = vld [vmem:[%s17327_s0 + $0x20] sm:$0x1]  ;;  %12470 = vmatprep.subr.bf16.mxu0 %v13428_v32 }
  0x8f   :  { %v14245_v41 = vsel %vm13948_vm5, %v5972_v28, %v5973_v17  ;;  %v820_v28 = vrot.slane %v819_v11, 4  ;;  %v832_v33 = vrot.slane %v830_v13, 5  ;;  %v713_v13 = vld [vmem:[%s17327_s0 + $0x28] sm:$0xf] }
  0x90   :  { %v11087_v46 = vcombine.low %v14224_v27, %v14245_v41  ;;  %v842_v42 = vrot.slane %v840_v23, 4  ;;  %v10988_v27 = vld [vmem:[%s17327_s0 + $0x110] sm:$0x1] }
  0x91   :  { %v825_v49 = vsel %vm13668_vm2, %v820_v28, %v824_v4  ;;  %v833_v15 = vor.u32 %v832_v33, %v829_v30  ;;  %12471 = vmatpush3.bf16.msra.mxu0 %v13428_v32  ;;  %v11043_v28 = vrot.slane %v10983_v19, 9  ;;  %v5998_v30 = vrot.slane %v10984_v20, 5 }
  0x93   :  { %12043 = vmatmul.mubr.bf16.gmra.mrb[48].mxu1 %v13412_v50  ;;  %v10977_v50 = vld [vmem:[%s17327_s0 + $0xe4] sm:$0xe]  ;;  %v834_v60 = vrot.slane %v833_v15, 4  ;;  %v14394_v32 = vsel %vm13948_vm5, %v11043_v28, %v5998_v30 }
  0x94   :  { %12046 = vmatprep.mubr.bf16.mxu1 %v13414_v56  ;;  %12411 = vmatmul.mubr.bf16.gmra.mrb[16].mxu0 %v11082_v25  ;;  %v10979_v56 = vld [vmem:[%s17327_s0 + $0xec] sm:$0x1]  ;;  %v11041_v58 = vrot.slane %v10977_v50, 9  ;;  %v10980_v25 = vld [vmem:[%s17327_s0 + $0xf0] sm:$0xe] }
  0x95   :  { %12414 = vmatprep.mubr.bf16.mxu0 %v11083_v31  ;;  %v5987_v7 = vrot.slane %v10979_v56, 5  ;;  %v10981_v31 = vld [vmem:[%s17327_s0 + $0xf4] sm:$0xf]  ;;  %v11042_v50 = vrot.slane %v10980_v25, 9  ;;  %v714_v25 = vld [vmem:[%s17327_s0 + $0x2c] sm:$0x1] }
  0x96   :  { %v14292_v5 = vsel %vm13948_vm5, %v11041_v58, %v5984_v59  ;;  %v5991_v51 = vrot.slane %v10981_v31, 5  ;;  %v851_v58 = vshrl.u32 %v709_v52, 16  ;;  %v854_v59 = vshll.u32 %v709_v52, 16 }
  0x97   :  { %v14305_v17 = vsel %vm13948_vm5, %v5986_v6, %v5987_v7  ;;  %v870_v6 = vshll.u32 %v711_v55, 16  ;;  %v712_v7 = vld [vmem:[%s17327_s0 + $0x24] sm:$0xf]  ;;  %v6001_v31 = vrot.slane %v10985_v1, 5 }
  0x98   :  { %v11089_v29 = vcombine.low %v14292_v5, %v14305_v17  ;;  %v14342_v56 = vsel %vm13948_vm5, %v11042_v50, %v5991_v51  ;;  %v5993_v57 = vrot.slane %v5991_v51, 4  ;;  %v856_v4 = vrot.slane %v854_v59, 5  ;;  %v716_v59 = vld [vmem:[%s17327_s0 + $0x34] sm:$0xf] }
  0x99   :  { %v872_v24 = vrot.slane %v870_v6, 5  ;;  %v875_v33 = vshrl.u32 %v712_v7, 16  ;;  %v878_v45 = vshll.u32 %v712_v7, 16  ;;  %v888_v51 = vshrl.u32 %v713_v13, 16  ;;  %v10990_v6 = vld [vmem:[%s17327_s0 + $0x118] sm:$0xf] }
  0x9a   :  { %v13425_v7 = vld [vmem:[%s17328_s1 + $0x88] sm:$0xff]  }
  0x9b   :  { %12047 = vmatmul.mubr.bf16.gmra.mrb[52].mxu1 %v13415_v18  ;;  %v836_v18 = vshll.u32 %v707_v2, 16  ;;  %v14358_v2 = vsel %vm13948_vm5, %v5993_v57, %v5994_v54  ;;  %v877_v50 = vrot.slane %v875_v33, 4  ;;  %v6012_v33 = vrot.slane %v10990_v6, 5  ;;  %v10995_v6 = vld [vmem:[%s17327_s0 + $0x12c] sm:$0xe] }
  0x9c   :  { %12050 = vmatprep.mubr.bf16.mxu1 %v13417_v26  ;;  %v810_v26 = vrot.slane %v809_v10, 4  ;;  %12415 = vmatmul.mubr.bf16.gmra.mrb[20].mxu0 %v11084_v36  ;;  %v11090_v11 = vcombine.low %v14342_v56, %v14358_v2 }
  0x9d   :  { %v838_v34 = vrot.slane %v836_v18, 5  ;;  %12418 = vmatprep.mubr.bf16.mxu0 %v11085_v38  ;;  %v13430_v38 = vld [vmem:[%s17328_s1 + $0x1b8] sm:$0xff]  }
  0x9e   :  { %v815_v48 = vsel %vm13668_vm2, %v810_v26, %v814_v0  ;;  %v864_v0 = vshrl.u32 %v710_v53, 16  ;;  %v10986_v26 = vld [vmem:[%s17327_s0 + $0x108] sm:$0xe]  ;;  %12472 = vmatprep.subr.bf16.mxu0 %v13430_v38  ;;  %v894_v53 = vshll.u32 %v714_v25, 16 }
  0x9f   :  { %v10529_v14 = vcombine.low %v815_v48, %v825_v49  ;;  %v843_v36 = vor.u32 %v842_v42, %v838_v34  ;;  %v839_v9 = vsel %vm13668_vm2, %v834_v60, %v838_v34  ;;  %v10987_v34 = vld [vmem:[%s17327_s0 + $0x10c] sm:$0xf]  ;;  %v884_v48 = vshll.u32 %v713_v13, 16  ;;  %12473 = vmatpush3.bf16.msra.mxu0 %v13430_v38  ;;  %v10991_v13 = vld [vmem:[%s17327_s0 + $0x11c] sm:$0x1] }
  0xa0   :  { %v866_v23 = vrot.slane %v864_v0, 4  ;;  %v6000_v49 = vrot.slane %v5998_v30, 4  ;;  %v11044_v15 = vrot.slane %v10986_v26, 9  ;;  %v896_v38 = vrot.slane %v894_v53, 5  ;;  %v718_v26 = vld [vmem:[%s17327_s0 + $0x3c] sm:$0xf] }
  0xa1   :  { %v844_v61 = vrot.slane %v843_v36, 4  ;;  %v886_v52 = vrot.slane %v884_v48, 5  ;;  %v13436_v36 = vld [vmem:[%s17328_s1 + $0x1c0] sm:$0xff]   ;;  %v6008_v60 = vrot.slane %v10988_v27, 5 }
  0xa2   :  { %v14403_v41 = vsel %vm13948_vm5, %v6000_v49, %v6001_v31  ;;  %12538 = vmatprep.subr.bf16.mxu0 %v13436_v36  ;;  %v719_v30 = vld [vmem:[%s17327_s0 + $0x40] sm:$0xf]  ;;  %v10993_v27 = vld [vmem:[%s17327_s0 + $0x124] sm:$0xf]  ;;  %v10994_v36 = vld [vmem:[%s17327_s0 + $0x128] sm:$0x1] }
  0xa3   :  { %12051 = vmatmul.mubr.bf16.gmra.mrb[56].mxu1 %v13418_v3  ;;  %v853_v3 = vrot.slane %v851_v58, 4  ;;  %v849_v10 = vsel %vm13668_vm2, %v844_v61, %v848_v44  ;;  %v867_v44 = vor.u32 %v866_v23, %v862_v12  ;;  %v11091_v55 = vcombine.low %v14394_v32, %v14403_v41  ;;  %v717_v61 = vld [vmem:[%s17327_s0 + $0x38] sm:$0x1]  ;;  %v10996_v32 = vld [vmem:[%s17327_s0 + $0x130] sm:$0xf] }
  0xa4   :  { %12054 = vmatprep.mubr.bf16.mxu1 %v13420_v16  ;;  %v14375_v16 = vcombine.low %v839_v9, %v849_v10  ;;  %12419 = vmatmul.mubr.bf16.gmra.mrb[24].mxu0 %v11086_v40  ;;  %v880_v40 = vrot.slane %v878_v45, 5  ;;  %v6005_v58 = vrot.slane %v10987_v34, 5  ;;  %v908_v10 = vshll.u32 %v716_v59, 16  ;;  %v13427_v45 = vld [vmem:[%s17328_s1 + $0x90] sm:$0xff]  }
  0xa5   :  { %v857_v18 = vor.u32 %v856_v4, %v853_v3  ;;  %12422 = vmatprep.mubr.bf16.mxu0 %v11087_v46  ;;  %v868_v22 = vrot.slane %v867_v44, 4  ;;  %v890_v46 = vrot.slane %v888_v51, 4  ;;  %v918_v25 = vshll.u32 %v717_v61, 16  ;;  %v10992_v51 = vld [vmem:[%s17327_s0 + $0x120] sm:$0xe] }
  0xa6   :  { %v881_v57 = vor.u32 %v880_v40, %v877_v50  ;;  %v14426_v1 = vsel %vm13948_vm5, %v11044_v15, %v6005_v58  ;;  %v6007_v3 = vrot.slane %v6005_v58, 4  ;;  %v910_v28 = vrot.slane %v908_v10, 5 }
  0xa7   :  { %v858_v42 = vrot.slane %v857_v18, 4  ;;  %v873_v54 = vsel %vm13668_vm2, %v868_v22, %v872_v24  ;;  %v891_v20 = vor.u32 %v890_v46, %v886_v52  ;;  %v920_v17 = vrot.slane %v918_v25, 5 }
  0xa8   :  { %v882_v0 = vrot.slane %v881_v57, 4  ;;  %v14444_v23 = vsel %vm13948_vm5, %v6007_v3, %v6008_v60  ;;  %v6015_v34 = vrot.slane %v10991_v13, 5  ;;  %v923_v44 = vshrl.u32 %v718_v26, 16 }
  0xa9   :  { %v863_v21 = vsel %vm13668_vm2, %v858_v42, %v862_v12  ;;  %v912_v12 = vshrl.u32 %v716_v59, 16  ;;  %v11092_v39 = vcombine.low %v14426_v1, %v14444_v23  ;;  %v720_v42 = vld [vmem:[%s17327_s0 + $0x44] sm:$0x1]  ;;  %v932_v49 = vshll.u32 %v719_v30, 16  ;;  %v11000_v1 = vld [vmem:[%s17327_s0 + $0x140] sm:$0x1] }
  0xaa   :  { %v10531_v19 = vcombine.low %v863_v21, %v873_v54  ;;  %v887_v18 = vsel %vm13668_vm2, %v882_v0, %v886_v52  ;;  %v936_v50 = vshrl.u32 %v719_v30, 16  ;;  %v6014_v40 = vrot.slane %v6012_v33, 4  ;;  %v722_v0 = vld [vmem:[%s17327_s0 + $0x4c] sm:$0xf] }
  0xab   :  { %12055 = vmatmul.mubr.bf16.gmra.mrb[60].mxu1 %v13421_v8  ;;  %v892_v8 = vrot.slane %v891_v20, 4  ;;  %v914_v5 = vrot.slane %v912_v12, 4  ;;  %v925_v52 = vrot.slane %v923_v44, 4  ;;  %v934_v15 = vrot.slane %v932_v49, 5  ;;  %v13429_v20 = vld [vmem:[%s17328_s1 + $0x98] sm:$0xff]  }
  0xac   :  { %12074 = vmatprep.mubr.bf16.mxu1 %v10529_v14  ;;  %v715_v14 = vld [vmem:[%s17327_s0 + $0x30] sm:$0xf]  ;;  %12423 = vmatmul.mubr.bf16.gmra.mrb[28].mxu0 %v11088_v62  ;;  %v14484_v57 = vsel %vm13948_vm5, %v6014_v40, %v6015_v34  ;;  %v942_v58 = vshll.u32 %v720_v42, 16  ;;  %v11046_v59 = vrot.slane %v10992_v51, 9  ;;  %v6019_v2 = vrot.slane %v10993_v27, 5  ;;  %v13438_v51 = vld [vmem:[%s17328_s1 + $0xa8] sm:$0xff]  }
  0xad   :  { %v899_v4 = vshrl.u32 %v715_v14, 16  ;;  %v902_v9 = vshll.u32 %v715_v14, 16  ;;  %12426 = vmatprep.mubr.bf16.mxu0 %v11089_v29  ;;  %v897_v47 = vsel %vm13668_vm2, %v892_v8, %v896_v38  ;;  %v11045_v29 = vrot.slane %v10989_v63, 9  ;;  %v726_v44 = vld [vmem:[%s17327_s0 + $0x5c] sm:$0x1] }
  0xae   :  { %v10532_v31 = vcombine.low %v887_v18, %v897_v47  ;;  %v915_v48 = vor.u32 %v914_v5, %v910_v28  ;;  %v938_v14 = vrot.slane %v936_v50, 4  ;;  %v944_v56 = vrot.slane %v942_v58, 5  ;;  %v10997_v18 = vld [vmem:[%s17327_s0 + $0x134] sm:$0x1]  ;;  %v10998_v50 = vld [vmem:[%s17327_s0 + $0x138] sm:$0xe] }
  0xaf   :  { %v901_v24 = vrot.slane %v899_v4, 4  ;;  %v904_v62 = vrot.slane %v902_v9, 5  ;;  %v14472_v22 = vsel %vm13948_vm5, %v11045_v29, %v6012_v33  ;;  %v723_v4 = vld [vmem:[%s17327_s0 + $0x50] sm:$0x1]  ;;  %v14516_v41 = vsel %vm13948_vm5, %v11046_v59, %v6019_v2  ;;  %v725_v29 = vld [vmem:[%s17327_s0 + $0x58] sm:$0xf] }
  0xb0   :  { %v916_v46 = vrot.slane %v915_v48, 4  ;;  %v11093_v60 = vcombine.low %v14472_v22, %v14484_v57  ;;  %v939_v63 = vor.u32 %v938_v14, %v934_v15  ;;  %v956_v12 = vshll.u32 %v722_v0, 16  ;;  %v10999_v27 = vld [vmem:[%s17327_s0 + $0x13c] sm:$0xf]  ;;  %v727_v57 = vld [vmem:[%s17327_s0 + $0x60] sm:$0xf] }
  0xb1   :  { %v960_v13 = vshrl.u32 %v722_v0, 16  ;;  %v966_v34 = vshll.u32 %v723_v4, 16  ;;  %v11047_v42 = vrot.slane %v10995_v6, 9  ;;  %v6026_v48 = vrot.slane %v10996_v32, 5  ;;  %v729_v4 = vld [vmem:[%s17327_s0 + $0x68] sm:$0x1] }
  0xb2   :  { %v921_v38 = vsel %vm13668_vm2, %v916_v46, %v920_v17  ;;  %v940_v8 = vrot.slane %v939_v63, 4  ;;  %v958_v5 = vrot.slane %v956_v12, 5  ;;  %v995_v6 = vshrl.u32 %v727_v57, 16  ;;  %v11001_v32 = vld [vmem:[%s17327_s0 + $0x144] sm:$0xe] }
  0xb3   :  { %12075 = vmatmul.mubr.bf16.vlgmr.msra.gmra.mrb[0].mxu1 %v14375_v16  ;;  %v905_v16 = vor.u32 %v904_v62, %v901_v24  ;;  %v13432_v24 = vld [vmem:[%s17328_s1 + $0xa0] sm:$0xff]   ;;  %v962_v17 = vrot.slane %v960_v13, 4  ;;  %v968_v22 = vrot.slane %v966_v34, 5 }
  0xb4   :  { %12139 = vmatpush3.bf16.msra.mxu1 %v14235_v35  ;;  %12078 = vmatprep.mubr.bf16.mxu1 %v10531_v19  ;;  %v926_v35 = vshll.u32 %v718_v26, 16  ;;  %v721_v19 = vld [vmem:[%s17327_s0 + $0x48] sm:$0xf]  ;;  %v945_v26 = vsel %vm13668_vm2, %v940_v8, %v944_v56  ;;  %v997_v12 = vrot.slane %v995_v6, 4  ;;  %v13456_v6 = vld [vmem:[%s17328_s1 + $0xc0] sm:$0xff]  }
  0xb5   :  { %12140 = vmatprep.subr.bf16.mxu1 %v13425_v7  ;;  %v906_v21 = vrot.slane %v905_v16, 4  ;;  %12427 = vmatmul.mubr.bf16.gmra.mrb[32].mxu0 %v11090_v11  ;;  %v6022_v11 = vrot.slane %v10994_v36, 5  ;;  %v947_v9 = vshrl.u32 %v721_v19, 16  ;;  %v950_v10 = vshll.u32 %v721_v19, 16 }
  0xb6   :  { %v928_v53 = vrot.slane %v926_v35, 5  ;;  %12430 = vmatprep.mubr.bf16.mxu0 %v11091_v55  ;;  %v6021_v55 = vrot.slane %v6019_v2, 4  ;;  %v6029_v35 = vrot.slane %v10997_v18, 5  ;;  %v990_v19 = vshll.u32 %v726_v44, 16  ;;  %v11002_v18 = vld [vmem:[%s17327_s0 + $0x148] sm:$0xf] }
  0xb7   :  { %v911_v54 = vsel %vm13668_vm2, %v906_v21, %v910_v28  ;;  %v949_v47 = vrot.slane %v947_v9, 4  ;;  %v952_v62 = vrot.slane %v950_v10, 5  ;;  %v724_v28 = vld [vmem:[%s17327_s0 + $0x54] sm:$0xf]  ;;  %v6033_v2 = vrot.slane %v10999_v27, 5 }
  0xb8   :  { %12141 = vmatpush3.bf16.msra.mxu1 %v13425_v7  ;;  %v929_v61 = vor.u32 %v928_v53, %v925_v52  ;;  %v10533_v3 = vcombine.low %v911_v54, %v921_v38  ;;  %v971_v49 = vshrl.u32 %v724_v28, 16  ;;  %v974_v40 = vshll.u32 %v724_v28, 16  ;;  %v728_v38 = vld [vmem:[%s17327_s0 + $0x64] sm:$0xf]  ;;  %v11003_v28 = vld [vmem:[%s17327_s0 + $0x14c] sm:$0x1] }
  0xb9   :  { %12142 = vmatprep.subr.bf16.mxu1 %v13427_v45  ;;  %v953_v33 = vor.u32 %v952_v62, %v949_v47  ;;  %v980_v52 = vshll.u32 %v725_v29, 16  ;;  %v6027_v53 = vsel %vm13948_vm5, %v11047_v42, %v6026_v48  ;;  %v984_v54 = vshrl.u32 %v725_v29, 16  ;;  %v730_v29 = vld [vmem:[%s17327_s0 + $0x6c] sm:$0xf]  ;;  %v731_v44 = vld [vmem:[%s17327_s0 + $0x70] sm:$0xf] }
  0xba   :  { %v930_v7 = vrot.slane %v929_v61, 4  ;;  %v973_v14 = vrot.slane %v971_v49, 4  ;;  %v992_v56 = vrot.slane %v990_v19, 5  ;;  %v998_v9 = vshll.u32 %v727_v57, 16  ;;  %v733_v57 = vld [vmem:[%s17327_s0 + $0x78] sm:$0xf] }
  0xbb   :  { %12079 = vmatmul.mubr.bf16.gmra.mrb[4].mxu1 %v10532_v31  ;;  %v14533_v31 = vsel %vm13948_vm5, %v6021_v55, %v6022_v11  ;;  %v954_v21 = vrot.slane %v953_v33, 4  ;;  %v982_v36 = vrot.slane %v980_v52, 5  ;;  %v6036_v11 = vrot.slane %v11000_v1, 5  ;;  %v11004_v52 = vld [vmem:[%s17327_s0 + $0x150] sm:$0xe] }
  0xbc   :  { %12143 = vmatpush3.bf16.msra.mxu1 %v13427_v45  ;;  %12082 = vmatprep.mubr.bf16.mxu1 %v10533_v3  ;;  %v935_v25 = vsel %vm13668_vm2, %v930_v7, %v934_v15  ;;  %v11094_v16 = vcombine.low %v14516_v41, %v14533_v31  ;;  %v963_v45 = vor.u32 %v962_v17, %v958_v5  ;;  %v6028_v15 = vrot.slane %v6026_v48, 4 }
  0xbd   :  { %12144 = vmatprep.subr.bf16.mxu1 %v13429_v20  ;;  %v10534_v30 = vcombine.low %v935_v25, %v945_v26  ;;  %12431 = vmatmul.mubr.bf16.gmra.mrb[36].mxu0 %v11092_v39  ;;  %v959_v23 = vsel %vm13668_vm2, %v954_v21, %v958_v5  ;;  %v976_v39 = vrot.slane %v974_v40, 5  ;;  %v986_v3 = vrot.slane %v984_v54, 4  ;;  %v11006_v54 = vld [vmem:[%s17327_s0 + $0x158] sm:$0x1] }
  0xbe   :  { %12434 = vmatprep.mubr.bf16.mxu0 %v11093_v60  ;;  %v964_v46 = vrot.slane %v963_v45, 4  ;;  %v6030_v59 = vsel %vm13948_vm5, %v6028_v15, %v6029_v35  ;;  %v13444_v60 = vld [vmem:[%s17328_s1 + $0xb0] sm:$0xff]   ;;  %v1004_v10 = vshll.u32 %v728_v38, 16  ;;  %v6035_v55 = vrot.slane %v6033_v2, 4 }
  0xbf   :  { %v11095_v63 = vcombine.low %v6027_v53, %v6030_v59  ;;  %v977_v0 = vor.u32 %v976_v39, %v973_v14  ;;  %v987_v8 = vor.u32 %v986_v3, %v982_v36  ;;  %v1008_v13 = vshrl.u32 %v728_v38, 16  ;;  %v11005_v14 = vld [vmem:[%s17327_s0 + $0x154] sm:$0xf]  ;;  %v734_v38 = vld [vmem:[%s17327_s0 + $0x7c] sm:$0xf] }
  0xc0   :  { %12145 = vmatpush3.bf16.msra.mxu1 %v13429_v20  ;;  %v969_v58 = vsel %vm13668_vm2, %v964_v46, %v968_v22  ;;  %v11048_v20 = vrot.slane %v10998_v50, 9  ;;  %v1000_v47 = vrot.slane %v998_v9, 5  ;;  %v1006_v62 = vrot.slane %v1004_v10, 5  ;;  %v732_v50 = vld [vmem:[%s17327_s0 + $0x74] sm:$0x1] }
  0xc1   :  { %12146 = vmatprep.subr.bf16.mxu1 %v13432_v24  ;;  %v10535_v61 = vcombine.low %v959_v23, %v969_v58  ;;  %v978_v7 = vrot.slane %v977_v0, 4  ;;  %v988_v26 = vrot.slane %v987_v8, 4  ;;  %v1010_v31 = vrot.slane %v1008_v13, 4  ;;  %v735_v3 = vld [vmem:[%s17327_s0 + $0x80] sm:$0x1] }
  0xc2   :  { %v6034_v41 = vsel %vm13948_vm5, %v11048_v20, %v6033_v2  ;;  %v1014_v5 = vshll.u32 %v729_v4, 16  ;;  %v11049_v17 = vrot.slane %v11001_v32, 9  ;;  %v1001_v34 = vor.u32 %v1000_v47, %v997_v12  ;;  %v11007_v32 = vld [vmem:[%s17327_s0 + $0x15c] sm:$0xe] }
  0xc3   :  { %12083 = vmatmul.mubr.bf16.gmra.mrb[8].mxu1 %v10534_v30  ;;  %v983_v25 = vsel %vm13668_vm2, %v978_v7, %v982_v36  ;;  %v6037_v30 = vsel %vm13948_vm5, %v6035_v55, %v6036_v11  ;;  %v6040_v42 = vrot.slane %v11002_v18, 5  ;;  %v1011_v48 = vor.u32 %v1010_v31, %v1006_v62  ;;  %v11008_v18 = vld [vmem:[%s17327_s0 + $0x160] sm:$0xf] }
  0xc4   :  { %12147 = vmatpush3.bf16.msra.mxu1 %v13432_v24  ;;  %12086 = vmatprep.mubr.bf16.mxu1 %v10535_v61  ;;  %v13450_v24 = vld [vmem:[%s17328_s1 + $0xb8] sm:$0xff]   ;;  %v11096_v33 = vcombine.low %v6034_v41, %v6037_v30  ;;  %v1016_v35 = vrot.slane %v1014_v5, 5  ;;  %v6043_v49 = vrot.slane %v11003_v28, 5  ;;  %v1019_v40 = vshrl.u32 %v730_v29, 16 }
  0xc5   :  { %12148 = vmatprep.subr.bf16.mxu1 %v13438_v51  ;;  %12435 = vmatmul.mubr.bf16.gmra.mrb[40].mxu0 %v11094_v16  ;;  %v993_v16 = vsel %vm13668_vm2, %v988_v26, %v992_v56  ;;  %v6041_v21 = vsel %vm13948_vm5, %v11049_v17, %v6040_v42  ;;  %v6042_v22 = vrot.slane %v6040_v42, 4  ;;  %v1012_v27 = vrot.slane %v1011_v48, 4  ;;  %v736_v17 = vld [vmem:[%s17327_s0 + $0x84] sm:$0xf]  ;;  %v737_v42 = vld [vmem:[%s17327_s0 + $0x88] sm:$0xf] }
  0xc6   :  { %12438 = vmatprep.mubr.bf16.mxu0 %v11095_v63  ;;  %v10536_v45 = vcombine.low %v983_v25, %v993_v16  ;;  %v1022_v46 = vshll.u32 %v730_v29, 16  ;;  %v1028_v53 = vshll.u32 %v731_v44, 16  ;;  %v1032_v15 = vshrl.u32 %v731_v44, 16 }
  0xc7   :  { %v6044_v23 = vsel %vm13948_vm5, %v6042_v22, %v6043_v49  ;;  %v1021_v39 = vrot.slane %v1019_v40, 4  ;;  %v1038_v36 = vshll.u32 %v732_v50, 16  ;;  %v1017_v58 = vsel %vm13668_vm2, %v1012_v27, %v1016_v35  ;;  %v738_v49 = vld [vmem:[%s17327_s0 + $0x8c] sm:$0x1]  ;;  %v11010_v50 = vld [vmem:[%s17327_s0 + $0x168] sm:$0xe] }
  0xc8   :  { %12149 = vmatpush3.bf16.msra.mxu1 %v13438_v51  ;;  %v1002_v51 = vrot.slane %v1001_v34, 4  ;;  %v11097_v59 = vcombine.low %v6041_v21, %v6044_v23  ;;  %v1024_v19 = vrot.slane %v1022_v46, 5  ;;  %v1030_v20 = vrot.slane %v1028_v53, 5 }
  0xc9   :  { %12150 = vmatprep.subr.bf16.mxu1 %v13444_v60  ;;  %v1034_v61 = vrot.slane %v1032_v15, 4  ;;  %v1040_v63 = vrot.slane %v1038_v36, 5  ;;  %v11050_v0 = vrot.slane %v11004_v52, 9  ;;  %v6047_v2 = vrot.slane %v11005_v14, 5  ;;  %v11011_v52 = vld [vmem:[%s17327_s0 + $0x16c] sm:$0xf] }
  0xca   :  { %v1007_v1 = vsel %vm13668_vm2, %v1002_v51, %v1006_v62  ;;  %v1025_v56 = vor.u32 %v1024_v19, %v1021_v39  ;;  %v6050_v11 = vrot.slane %v11006_v54, 5  ;;  %v1043_v4 = vshrl.u32 %v733_v57, 16  ;;  %v11009_v62 = vld [vmem:[%s17327_s0 + $0x164] sm:$0x1]  ;;  %v11012_v36 = vld [vmem:[%s17327_s0 + $0x170] sm:$0x1] }
  0xcb   :  { %12087 = vmatmul.mubr.bf16.gmra.mrb[12].mxu1 %v10536_v45  ;;  %v1035_v7 = vor.u32 %v1034_v61, %v1030_v20  ;;  %v1046_v8 = vshll.u32 %v733_v57, 16  ;;  %v1052_v9 = vshll.u32 %v734_v38, 16  ;;  %v1056_v10 = vshrl.u32 %v734_v38, 16  ;;  %v739_v54 = vld [vmem:[%s17327_s0 + $0x90] sm:$0xf] }
  0xcc   :  { %12151 = vmatpush3.bf16.msra.mxu1 %v13444_v60  ;;  %v10537_v60 = vcombine.low %v1007_v1, %v1017_v58  ;;  %v1026_v41 = vrot.slane %v1025_v56, 4  ;;  %v6048_v55 = vsel %vm13948_vm5, %v11050_v0, %v6047_v2  ;;  %v6049_v12 = vrot.slane %v6047_v2, 4  ;;  %v741_v0 = vld [vmem:[%s17327_s0 + $0x98] sm:$0x1] }
  0xcd   :  { %12152 = vmatprep.subr.bf16.mxu1 %v13450_v24  ;;  %12439 = vmatmul.mubr.bf16.gmra.mrb[44].mxu0 %v11096_v33  ;;  %v1045_v13 = vrot.slane %v1043_v4, 4  ;;  %v1048_v25 = vrot.slane %v1046_v8, 5  ;;  %v1054_v26 = vrot.slane %v1052_v9, 5  ;;  %v1058_v47 = vrot.slane %v1056_v10, 4  ;;  %v11013_v4 = vld [vmem:[%s17327_s0 + $0x174] sm:$0xe] }
  0xce   :  { %12442 = vmatprep.mubr.bf16.mxu0 %v11097_v59  ;;  %12090 = vmatprep.mubr.bf16.mxu1 %v10537_v60  ;;  %v1031_v28 = vsel %vm13668_vm2, %v1026_v41, %v1030_v20  ;;  %v6051_v30 = vsel %vm13948_vm5, %v6049_v12, %v6050_v11  ;;  %v1062_v31 = vshll.u32 %v735_v3, 16  ;;  %v11051_v5 = vrot.slane %v11007_v32, 9  ;;  %v740_v20 = vld [vmem:[%s17327_s0 + $0x94] sm:$0xf]  ;;  %v11014_v10 = vld [vmem:[%s17327_s0 + $0x178] sm:$0xf] }
  0xcf   :  { %v11098_v16 = vcombine.low %v6048_v55, %v6051_v30  ;;  %v1049_v33 = vor.u32 %v1048_v25, %v1045_v13  ;;  %v1059_v34 = vor.u32 %v1058_v47, %v1054_v26  ;;  %v6054_v48 = vrot.slane %v11008_v18, 5  ;;  %v11015_v13 = vld [vmem:[%s17327_s0 + $0x17c] sm:$0x1] }
  0xd0   :  { %12153 = vmatpush3.bf16.msra.mxu1 %v13450_v24  ;;  %v1036_v24 = vrot.slane %v1035_v7, 4  ;;  %v1064_v45 = vrot.slane %v1062_v31, 5  ;;  %v6057_v35 = vrot.slane %v11009_v62, 5  ;;  %v1067_v22 = vshrl.u32 %v736_v17, 16  ;;  %v742_v47 = vld [vmem:[%s17327_s0 + $0x9c] sm:$0xf] }
  0xd1   :  { %12218 = vmatprep.subr.bf16.mxu1 %v13456_v6  ;;  %v1050_v51 = vrot.slane %v1049_v33, 4  ;;  %v1060_v21 = vrot.slane %v1059_v34, 4  ;;  %v1070_v40 = vshll.u32 %v736_v17, 16  ;;  %v6055_v27 = vsel %vm13948_vm5, %v11051_v5, %v6054_v48  ;;  %v743_v5 = vld [vmem:[%s17327_s0 + $0xa0] sm:$0xf] }
  0xd2   :  { %v1041_v29 = vsel %vm13668_vm2, %v1036_v24, %v1040_v63  ;;  %v6056_v46 = vrot.slane %v6054_v48, 4  ;;  %v1076_v53 = vshll.u32 %v737_v42, 16  ;;  %v1080_v15 = vshrl.u32 %v737_v42, 16  ;;  %v744_v34 = vld [vmem:[%s17327_s0 + $0xa4] sm:$0x1] }
  0xd3   :  { %v10538_v44 = vcombine.low %v1031_v28, %v1041_v29  ;;  %v1055_v14 = vsel %vm13668_vm2, %v1050_v51, %v1054_v26  ;;  %v1065_v1 = vsel %vm13668_vm2, %v1060_v21, %v1064_v45  ;;  %v1069_v23 = vrot.slane %v1067_v22, 4  ;;  %v11016_v42 = vld [vmem:[%s17327_s0 + $0x180] sm:$0xe] }
  0xd4   :  { %v1072_v39 = vrot.slane %v1070_v40, 5  ;;  %v10539_v57 = vcombine.low %v1055_v14, %v1065_v1  ;;  %v6058_v58 = vsel %vm13948_vm5, %v6056_v46, %v6057_v35  ;;  %v1078_v59 = vrot.slane %v1076_v53, 5  ;;  %v11018_v40 = vld [vmem:[%s17327_s0 + $0x188] sm:$0x1] }
  0xd5   :  { %12443 = vmatmul.mubr.bf16.gmra.mrb[48].mxu0 %v11098_v16  ;;  %12091 = vmatmul.mubr.bf16.gmra.mrb[16].mxu1 %v10538_v44  ;;  %v1082_v19 = vrot.slane %v1080_v15, 4  ;;  %v11099_v38 = vcombine.low %v6055_v27, %v6058_v58  ;;  %v1086_v61 = vshll.u32 %v738_v49, 16  ;;  %v11052_v63 = vrot.slane %v11010_v50, 9  ;;  %v11017_v49 = vld [vmem:[%s17327_s0 + $0x184] sm:$0xf] }
  0xd6   :  { %v1073_v60 = vor.u32 %v1072_v39, %v1069_v23  ;;  %12094 = vmatprep.mubr.bf16.mxu1 %v10539_v57  ;;  %v6061_v56 = vrot.slane %v11011_v52, 5  ;;  %v6064_v2 = vrot.slane %v11012_v36, 5  ;;  %v1091_v11 = vshrl.u32 %v739_v54, 16  ;;  %v745_v39 = vld [vmem:[%s17327_s0 + $0xa8] sm:$0xf] }
  0xd7   :  { %v1083_v3 = vor.u32 %v1082_v19, %v1078_v59  ;;  %12446 = vmatprep.mubr.bf16.mxu0 %v11099_v38  ;;  %v1088_v7 = vrot.slane %v1086_v61, 5  ;;  %v1094_v8 = vshll.u32 %v739_v54, 16  ;;  %v1100_v9 = vshll.u32 %v740_v20, 16  ;;  %v747_v61 = vld [vmem:[%s17327_s0 + $0xb0] sm:$0x1] }
  0xd8   :  { %v1074_v6 = vrot.slane %v1073_v60, 4  ;;  %v6062_v41 = vsel %vm13948_vm5, %v11052_v63, %v6061_v56  ;;  %v6063_v55 = vrot.slane %v6061_v56, 4  ;;  %v1093_v12 = vrot.slane %v1091_v11, 4 }
  0xd9   :  { %v1084_v32 = vrot.slane %v1083_v3, 4  ;;  %v1096_v24 = vrot.slane %v1094_v8, 5  ;;  %v1102_v25 = vrot.slane %v1100_v9, 5  ;;  %v1104_v26 = vshrl.u32 %v740_v20, 16  ;;  %v11020_v8 = vld [vmem:[%s17327_s0 + $0x190] sm:$0xf] }
  0xda   :  { %v1079_v18 = vsel %vm13668_vm2, %v1074_v6, %v1078_v59  ;;  %v6065_v28 = vsel %vm13948_vm5, %v6063_v55, %v6064_v2  ;;  %v1110_v30 = vshll.u32 %v741_v0, 16  ;;  %v11053_v31 = vrot.slane %v11013_v4, 9  ;;  %v746_v59 = vld [vmem:[%s17327_s0 + $0xac] sm:$0xf]  ;;  %v11021_v9 = vld [vmem:[%s17327_s0 + $0x194] sm:$0x1] }
  0xdb   :  { %v1089_v62 = vsel %vm13668_vm2, %v1084_v32, %v1088_v7  ;;  %v11100_v29 = vcombine.low %v6062_v41, %v6065_v28  ;;  %v1097_v16 = vor.u32 %v1096_v24, %v1093_v12  ;;  %v1106_v33 = vrot.slane %v1104_v26, 4  ;;  %v11019_v2 = vld [vmem:[%s17327_s0 + $0x18c] sm:$0xe] }
  0xdc   :  { %v10540_v17 = vcombine.low %v1079_v18, %v1089_v62  ;;  %v1112_v44 = vrot.slane %v1110_v30, 5  ;;  %v6068_v45 = vrot.slane %v11014_v10, 5  ;;  %v6071_v48 = vrot.slane %v11015_v13, 5  ;;  %v748_v10 = vld [vmem:[%s17327_s0 + $0xb4] sm:$0xf] }
  0xdd   :  { %v1115_v35 = vshrl.u32 %v742_v47, 16  ;;  %12447 = vmatmul.mubr.bf16.gmra.mrb[52].mxu0 %v11100_v29  ;;  %v1098_v50 = vrot.slane %v1097_v16, 4  ;;  %v1107_v51 = vor.u32 %v1106_v33, %v1102_v25  ;;  %v1118_v21 = vshll.u32 %v742_v47, 16  ;;  %v749_v13 = vld [vmem:[%s17327_s0 + $0xb8] sm:$0xf] }
  0xde   :  { %12095 = vmatmul.mubr.bf16.gmra.mrb[20].mxu1 %v10540_v17  ;;  %v1124_v22 = vshll.u32 %v743_v5, 16  ;;  %v6069_v52 = vsel %vm13948_vm5, %v11053_v31, %v6068_v45  ;;  %v6070_v27 = vrot.slane %v6068_v45, 4  ;;  %v1128_v53 = vshrl.u32 %v743_v5, 16  ;;  %v750_v16 = vld [vmem:[%s17327_s0 + $0xbc] sm:$0x1] }
  0xdf   :  { %v1117_v46 = vrot.slane %v1115_v35, 4  ;;  %v1103_v15 = vsel %vm13668_vm2, %v1098_v50, %v1102_v25  ;;  %v1108_v14 = vrot.slane %v1107_v51, 4  ;;  %v1120_v1 = vrot.slane %v1118_v21, 5  ;;  %v11022_v45 = vld [vmem:[%s17327_s0 + $0x198] sm:$0xe] }
  0xe0   :  { %v1126_v23 = vrot.slane %v1124_v22, 5  ;;  %v6072_v36 = vsel %vm13948_vm5, %v6070_v27, %v6071_v48  ;;  %v1130_v54 = vrot.slane %v1128_v53, 4  ;;  %v1134_v57 = vshll.u32 %v744_v34, 16  ;;  %v11023_v51 = vld [vmem:[%s17327_s0 + $0x19c] sm:$0xf] }
  0xe1   :  { %v11054_v58 = vrot.slane %v11016_v42, 9  ;;  %v1113_v19 = vsel %vm13668_vm2, %v1108_v14, %v1112_v44  ;;  %v11101_v20 = vcombine.low %v6069_v52, %v6072_v36  ;;  %v1121_v38 = vor.u32 %v1120_v1, %v1117_v46  ;;  %v11024_v21 = vld [vmem:[%s17327_s0 + $0x1a0] sm:$0x1] }
  0xe2   :  { %v6075_v60 = vrot.slane %v11017_v49, 5  ;;  %v10541_v63 = vcombine.low %v1103_v15, %v1113_v19  ;;  %v1131_v0 = vor.u32 %v1130_v54, %v1126_v23  ;;  %v1136_v3 = vrot.slane %v1134_v57, 5  ;;  %v751_v54 = vld [vmem:[%s17327_s0 + $0xd8] sm:$0xf] }
  0xe3   :  { %v6078_v56 = vrot.slane %v11018_v40, 5  ;;  %12450 = vmatprep.mubr.bf16.mxu0 %v11101_v20  ;;  %v1122_v11 = vrot.slane %v1121_v38, 4  ;;  %v1139_v7 = vshrl.u32 %v745_v39, 16  ;;  %v1142_v41 = vshll.u32 %v745_v39, 16  ;;  %v752_v20 = vld [vmem:[%s17327_s0 + $0xdc] sm:$0xf] }
  0xe4   :  { %v6076_v4 = vsel %vm13948_vm5, %v11054_v58, %v6075_v60  ;;  %v6077_v6 = vrot.slane %v6075_v60, 4  ;;  %12098 = vmatprep.mubr.bf16.mxu1 %v10541_v63  ;;  %v1132_v32 = vrot.slane %v1131_v0, 4  ;;  %v1148_v55 = vshll.u32 %v746_v59, 16  ;;  %v753_v0 = vld [vmem:[%s17327_s0 + $0xe0] sm:$0x1] }
  0xe5   :  { %v1152_v12 = vshrl.u32 %v746_v59, 16  ;;  %v1127_v18 = vsel %vm13668_vm2, %v1122_v11, %v1126_v23  ;;  %v1141_v25 = vrot.slane %v1139_v7, 4  ;;  %v1158_v26 = vshll.u32 %v747_v61, 16 }
  0xe6   :  { %v6079_v24 = vsel %vm13948_vm5, %v6077_v6, %v6078_v56  ;;  %v1137_v47 = vsel %vm13668_vm2, %v1132_v32, %v1136_v3  ;;  %v1144_v28 = vrot.slane %v1142_v41, 5  ;;  %v1150_v30 = vrot.slane %v1148_v55, 5 }
  0xe7   :  { %v11102_v62 = vcombine.low %v6076_v4, %v6079_v24  ;;  %v10542_v31 = vcombine.low %v1127_v18, %v1137_v47  ;;  %v1154_v5 = vrot.slane %v1152_v12, 4  ;;  %v1160_v17 = vrot.slane %v1158_v26, 5  ;;  %v756_v18 = vld [vmem:[%s17327_s0 + $0xec] sm:$0x1] }
  0xe8   :  { %v11055_v29 = vrot.slane %v11019_v2, 9  ;;  %v1145_v33 = vor.u32 %v1144_v28, %v1141_v25  ;;  %v6082_v34 = vrot.slane %v11020_v8, 5  ;;  %v6085_v42 = vrot.slane %v11021_v9, 5  ;;  %v13431_v9 = vld [vmem:[%s17327_s0 + $0x18] sm:$0xff]  }
  0xe9   :  { %12451 = vmatmul.mubr.bf16.gmra.mrb[56].mxu0 %v11102_v62  ;;  %v1163_v44 = vshrl.u32 %v748_v10, 16  ;;  %12099 = vmatmul.mubr.bf16.gmra.mrb[24].mxu1 %v10542_v31  ;;  %v1155_v48 = vor.u32 %v1154_v5, %v1150_v30  ;;  %v1166_v35 = vshll.u32 %v748_v10, 16  ;;  %v1172_v49 = vshll.u32 %v749_v13, 16  ;;  %v754_v10 = vld [vmem:[%s17327_s0 + $0xe4] sm:$0xf] }
  0xea   :  { %v1176_v50 = vshrl.u32 %v749_v13, 16  ;;  %v1146_v22 = vrot.slane %v1145_v33, 4  ;;  %v6083_v40 = vsel %vm13948_vm5, %v11055_v29, %v6082_v34  ;;  %v6084_v52 = vrot.slane %v6082_v34, 4  ;;  %v755_v13 = vld [vmem:[%s17327_s0 + $0xe8] sm:$0xf] }
  0xeb   :  { %v1165_v27 = vrot.slane %v1163_v44, 4  ;;  %v1156_v46 = vrot.slane %v1155_v48, 4  ;;  %v1168_v53 = vrot.slane %v1166_v35, 5  ;;  %v1174_v15 = vrot.slane %v1172_v49, 5  ;;  %v757_v5 = vld [vmem:[%s17327_s0 + $0xf0] sm:$0xf] }
  0xec   :  { %v1178_v14 = vrot.slane %v1176_v50, 4  ;;  %v1151_v1 = vsel %vm13668_vm2, %v1146_v22, %v1150_v30  ;;  %v6086_v23 = vsel %vm13948_vm5, %v6084_v52, %v6085_v42  ;;  %v1182_v39 = vshll.u32 %v750_v16, 16  ;;  %v758_v34 = vld [vmem:[%s17327_s0 + $0xf4] sm:$0xf]  ;;  %v759_v35 = vld [vmem:[%s17327_s0 + $0xf8] sm:$0x1] }
  0xed   :  { %v11056_v36 = vrot.slane %v11022_v45, 9  ;;  %v1161_v57 = vsel %vm13668_vm2, %v1156_v46, %v1160_v17  ;;  %v11103_v58 = vcombine.low %v6083_v40, %v6086_v23  ;;  %v1169_v59 = vor.u32 %v1168_v53, %v1165_v27  ;;  %v760_v23 = vld [vmem:[%s17327_s0 + $0xfc] sm:$0xf] }
  0xee   :  { %v1179_v19 = vor.u32 %v1178_v14, %v1174_v15  ;;  %v10543_v38 = vcombine.low %v1151_v1, %v1161_v57  ;;  %v1184_v60 = vrot.slane %v1182_v39, 5  ;;  %v6089_v61 = vrot.slane %v11023_v51, 5  ;;  %v13433_v14 = vld [vmem:[%s17327_s0 + $0x24] sm:$0xff]  }
  0xef   :  { %v6092_v63 = vrot.slane %v11024_v21, 5  ;;  %12454 = vmatprep.mubr.bf16.mxu0 %v11103_v58  ;;  %v1170_v3 = vrot.slane %v1169_v59, 4  ;;  %v1187_v2 = vshrl.u32 %v751_v54, 16  ;;  %v1190_v11 = vshll.u32 %v751_v54, 16  ;;  %v13434_v58 = vld [vmem:[%s17327_s0 + $0x30] sm:$0xff]  }
  0xf0   :  { %v1180_v56 = vrot.slane %v1179_v19, 4  ;;  %12102 = vmatprep.mubr.bf16.mxu1 %v10543_v38  ;;  %v6090_v4 = vsel %vm13948_vm5, %v11056_v36, %v6089_v61  ;;  %v6091_v6 = vrot.slane %v6089_v61, 4  ;;  %v1196_v7 = vshll.u32 %v752_v20, 16  ;;  %v761_v59 = vld [vmem:[%s17327_s0 + $0x100] sm:$0xf] }
  0xf1   :  { %v1200_v8 = vshrl.u32 %v752_v20, 16  ;;  %v1175_v32 = vsel %vm13668_vm2, %v1170_v3, %v1174_v15  ;;  %v1189_v55 = vrot.slane %v1187_v2, 4  ;;  %v1192_v12 = vrot.slane %v1190_v11, 5  ;;  %v762_v61 = vld [vmem:[%s17327_s0 + $0x104] sm:$0x1]  ;;  %v13442_v2 = vld [vmem:[%s17328_s1 + $0x1c8] sm:$0xff]  }
  0xf2   :  { %v1185_v41 = vsel %vm13668_vm2, %v1180_v56, %v1184_v60  ;;  %v6093_v25 = vsel %vm13948_vm5, %v6091_v6, %v6092_v63  ;;  %v1198_v26 = vrot.slane %v1196_v7, 5  ;;  %v1206_v30 = vshll.u32 %v753_v0, 16 }
  0xf3   :  { %v10544_v24 = vcombine.low %v1175_v32, %v1185_v41  ;;  %v1202_v47 = vrot.slane %v1200_v8, 4  ;;  %v11104_v62 = vcombine.low %v6090_v4, %v6093_v25  ;;  %v1193_v28 = vor.u32 %v1192_v12, %v1189_v55  ;;  %v763_v8 = vld [vmem:[%s17327_s0 + $0x108] sm:$0xf]  ;;  %v764_v55 = vld [vmem:[%s17327_s0 + $0x10c] sm:$0xf]  ;;  %v13523_v25 = vld [vmem:[%s17328_s1 + $0x1c0] sm:$0xff]  }
  0xf4   :  { %v1211_v31 = vshrl.u32 %v754_v10, 16  ;;  %v1214_v29 = vshll.u32 %v754_v10, 16  ;;  %v1220_v16 = vshll.u32 %v755_v13, 16  ;;  %v1224_v33 = vshrl.u32 %v755_v13, 16 }
  0xf5   :  { %12103 = vmatmul.mubr.bf16.gmra.mrb[28].mxu1 %v10544_v24  ;;  %v1203_v17 = vor.u32 %v1202_v47, %v1198_v26  ;;  %12455 = vmatmul.mubr.bf16.gmra.mrb[60].mxu0 %v11104_v62  ;;  %v1194_v42 = vrot.slane %v1193_v28, 4  ;;  %v1208_v44 = vrot.slane %v1206_v30, 5  ;;  %v1230_v48 = vshll.u32 %v756_v18, 16  ;;  %v766_v47 = vld [vmem:[%s17327_s0 + $0x114] sm:$0xf] }
  0xf6   :  { %v1213_v45 = vrot.slane %v1211_v31, 4  ;;  %12474 = vmatprep.mubr.bf16.mxu0 %v13431_v9  ;;  %v1216_v50 = vrot.slane %v1214_v29, 5  ;;  %v1222_v51 = vrot.slane %v1220_v16, 5  ;;  %v1226_v21 = vrot.slane %v1224_v33, 4 }
  0xf7   :  { %v1204_v49 = vrot.slane %v1203_v17, 4  ;;  %v1199_v22 = vsel %vm13668_vm2, %v1194_v42, %v1198_v26  ;;  %v1232_v40 = vrot.slane %v1230_v48, 5  ;;  %v1235_v52 = vshrl.u32 %v757_v5, 16  ;;  %v765_v26 = vld [vmem:[%s17327_s0 + $0x110] sm:$0x1] }
  0xf8   :  { %v1238_v27 = vshll.u32 %v757_v5, 16  ;;  %v1217_v53 = vor.u32 %v1216_v50, %v1213_v45  ;;  %v1227_v15 = vor.u32 %v1226_v21, %v1222_v51  ;;  %v1244_v1 = vshll.u32 %v758_v34, 16  ;;  %v767_v5 = vld [vmem:[%s17327_s0 + $0x118] sm:$0xf]  ;;  %v13448_v17 = vld [vmem:[%s17328_s1 + $0x1d0] sm:$0xff]  }
  0xf9   :  { %v1209_v46 = vsel %vm13668_vm2, %v1204_v49, %v1208_v44  ;;  %v1237_v36 = vrot.slane %v1235_v52, 4  ;;  %v1248_v57 = vshrl.u32 %v758_v34, 16  ;;  %v1254_v60 = vshll.u32 %v759_v35, 16  ;;  %v13435_v44 = vld [vmem:[%s17327_s0 + $0x3c] sm:$0xff]  }
  0xfa   :  { %v10545_v39 = vcombine.low %v1199_v22, %v1209_v46  ;;  %v1240_v54 = vrot.slane %v1238_v27, 5  ;;  %v1218_v19 = vrot.slane %v1217_v53, 4  ;;  %v1228_v20 = vrot.slane %v1227_v15, 4  ;;  %v13437_v22 = vld [vmem:[%s17327_s0 + $0x48] sm:$0xff]   ;;  %v769_v15 = vld [vmem:[%s17327_s0 + $0x120] sm:$0xf] }
  0xfb   :  { %v1246_v38 = vrot.slane %v1244_v1, 5  ;;  %v1250_v0 = vrot.slane %v1248_v57, 4  ;;  %v1259_v3 = vshrl.u32 %v760_v23, 16  ;;  %v1262_v56 = vshll.u32 %v760_v23, 16 }
  0xfc   :  { %12106 = vmatprep.mubr.bf16.mxu1 %v10545_v39  ;;  %v1241_v63 = vor.u32 %v1240_v54, %v1237_v36  ;;  %v1223_v11 = vsel %vm13668_vm2, %v1218_v19, %v1222_v51  ;;  %v1233_v4 = vsel %vm13668_vm2, %v1228_v20, %v1232_v40  ;;  %v1256_v6 = vrot.slane %v1254_v60, 5  ;;  %v768_v40 = vld [vmem:[%s17327_s0 + $0x11c] sm:$0x1] }
  0xfd   :  { %v1268_v7 = vshll.u32 %v761_v59, 16  ;;  %v10546_v9 = vcombine.low %v1223_v11, %v1233_v4  ;;  %12475 = vmatmul.mubr.bf16.vlgmr.msra.gmra.mrb[0].mxu0 %v13433_v14  ;;  %v1251_v32 = vor.u32 %v1250_v0, %v1246_v38  ;;  %v1261_v41 = vrot.slane %v1259_v3, 4  ;;  %v13454_v14 = vld [vmem:[%s17328_s1 + $0x1d8] sm:$0xff]   ;;  %v771_v4 = vld [vmem:[%s17327_s0 + $0x128] sm:$0x1] }
  0xfe   :  { %v1242_v10 = vrot.slane %v1241_v63, 4  ;;  %12478 = vmatprep.mubr.bf16.mxu0 %v13434_v58  ;;  %v1264_v12 = vrot.slane %v1262_v56, 5  ;;  %v1272_v18 = vshrl.u32 %v761_v59, 16  ;;  %v1278_v24 = vshll.u32 %v762_v61, 16  ;;  %12539 = vmatpush3.bf16.msra.mxu0 %v13523_v25  ;;  %v770_v61 = vld [vmem:[%s17327_s0 + $0x124] sm:$0xf] }
  0xff   :  { %v1270_v13 = vrot.slane %v1268_v7, 5  ;;  %12107 = vmatmul.mubr.bf16.gmra.mrb[32].mxu1 %v10546_v9  ;;  %v1252_v28 = vrot.slane %v1251_v32, 4  ;;  %v1283_v30 = vshrl.u32 %v763_v8, 16  ;;  %v1286_v31 = vshll.u32 %v763_v8, 16  ;;  %12540 = vmatprep.subr.bf16.mxu0 %v13442_v2  ;;  %v13460_v63 = vld [vmem:[%s17328_s1 + $0x1e0] sm:$0xff]   ;;  %v13439_v11 = vld [vmem:[%s17327_s0 + $0x54] sm:$0xff]  }
 0x100   :  { %v1247_v62 = vsel %vm13668_vm2, %v1242_v10, %v1246_v38  ;;  %v1265_v29 = vor.u32 %v1264_v12, %v1261_v41  ;;  %v1274_v16 = vrot.slane %v1272_v18, 4  ;;  %v1280_v33 = vrot.slane %v1278_v24, 5  ;;  %v13440_v32 = vld [vmem:[%s17327_s0 + $0x60] sm:$0xff]   ;;  %v773_v41 = vld [vmem:[%s17327_s0 + $0x130] sm:$0xf]  ;;  %v13466_v24 = vld [vmem:[%s17328_s1 + $0x1e8] sm:$0xff]  }
 0x101   :  { %v1292_v34 = vshll.u32 %v764_v55, 16  ;;  %v1257_v42 = vsel %vm13668_vm2, %v1252_v28, %v1256_v6  ;;  %v1285_v45 = vrot.slane %v1283_v30, 4  ;;  %v1288_v48 = vrot.slane %v1286_v31, 5  ;;  %v772_v6 = vld [vmem:[%s17327_s0 + $0x12c] sm:$0xf] }
 0x102   :  { %v1296_v35 = vshrl.u32 %v764_v55, 16  ;;  %v10547_v49 = vcombine.low %v1247_v62, %v1257_v42  ;;  %v1266_v50 = vrot.slane %v1265_v29, 4  ;;  %v1275_v51 = vor.u32 %v1274_v16, %v1270_v13  ;;  %12541 = vmatpush3.bf16.msra.mxu0 %v13442_v2  ;;  %v775_v42 = vld [vmem:[%s17327_s0 + $0x138] sm:$0xf] }
 0x103   :  { %v1294_v21 = vrot.slane %v1292_v34, 5  ;;  %v1289_v52 = vor.u32 %v1288_v48, %v1285_v45  ;;  %v1302_v46 = vshll.u32 %v765_v26, 16  ;;  %v1307_v53 = vshrl.u32 %v766_v47, 16  ;;  %12542 = vmatprep.subr.bf16.mxu0 %v13448_v17 }
 0x104   :  { %v1298_v27 = vrot.slane %v1296_v35, 4  ;;  %12110 = vmatprep.mubr.bf16.mxu1 %v10547_v49  ;;  %v1271_v1 = vsel %vm13668_vm2, %v1266_v50, %v1270_v13  ;;  %v1276_v23 = vrot.slane %v1275_v51, 4  ;;  %v1310_v39 = vshll.u32 %v766_v47, 16  ;;  %v776_v49 = vld [vmem:[%s17327_s0 + $0x13c] sm:$0xf] }
 0x105   :  { %v1316_v36 = vshll.u32 %v767_v5, 16  ;;  %12479 = vmatmul.mubr.bf16.gmra.mrb[4].mxu0 %v13435_v44  ;;  %v1290_v54 = vrot.slane %v1289_v52, 4  ;;  %v1304_v58 = vrot.slane %v1302_v46, 5  ;;  %v1309_v59 = vrot.slane %v1307_v53, 4  ;;  %v13441_v53 = vld [vmem:[%s17327_s0 + $0x6c] sm:$0xff]  }
 0x106   :  { %v1299_v57 = vor.u32 %v1298_v27, %v1294_v21  ;;  %v1281_v19 = vsel %vm13668_vm2, %v1276_v23, %v1280_v33  ;;  %12482 = vmatprep.mubr.bf16.mxu0 %v13437_v22  ;;  %v1312_v20 = vrot.slane %v1310_v39, 5  ;;  %v1320_v60 = vshrl.u32 %v767_v5, 16  ;;  %12543 = vmatpush3.bf16.msra.mxu0 %v13448_v17  ;;  %v774_v17 = vld [vmem:[%s17327_s0 + $0x134] sm:$0x1] }
 0x107   :  { %v1318_v38 = vrot.slane %v1316_v36, 5  ;;  %v10548_v0 = vcombine.low %v1271_v1, %v1281_v19  ;;  %v1295_v3 = vsel %vm13668_vm2, %v1290_v54, %v1294_v21  ;;  %v1326_v2 = vshll.u32 %v768_v40, 16  ;;  %12544 = vmatprep.subr.bf16.mxu0 %v13454_v14  ;;  %v13443_v54 = vld [vmem:[%s17327_s0 + $0x78] sm:$0xff]  }
 0x108   :  { %v1300_v56 = vrot.slane %v1299_v57, 4  ;;  %v1313_v7 = vor.u32 %v1312_v20, %v1309_v59  ;;  %v1322_v8 = vrot.slane %v1320_v60, 4  ;;  %v1331_v9 = vshrl.u32 %v769_v15, 16  ;;  %v778_v57 = vld [vmem:[%s17327_s0 + $0x144] sm:$0xf]  ;;  %v13478_v60 = vld [vmem:[%s17328_s1 + $0x1f8] sm:$0xff]  }
 0x109   :  { %v1334_v10 = vshll.u32 %v769_v15, 16  ;;  %12111 = vmatmul.mubr.bf16.gmra.mrb[36].mxu1 %v10548_v0  ;;  %v1328_v12 = vrot.slane %v1326_v2, 5  ;;  %v1340_v13 = vshll.u32 %v770_v61, 16  ;;  %v1344_v18 = vshrl.u32 %v770_v61, 16  ;;  %v777_v15 = vld [vmem:[%s17327_s0 + $0x140] sm:$0x1] }
 0x10a   :  { %v1305_v55 = vsel %vm13668_vm2, %v1300_v56, %v1304_v58  ;;  %v1314_v26 = vrot.slane %v1313_v7, 4  ;;  %v1323_v47 = vor.u32 %v1322_v8, %v1318_v38  ;;  %v1333_v62 = vrot.slane %v1331_v9, 4  ;;  %12545 = vmatpush3.bf16.msra.mxu0 %v13454_v14  ;;  %v13472_v14 = vld [vmem:[%s17328_s1 + $0x1f0] sm:$0xff]   ;;  %v780_v9 = vld [vmem:[%s17327_s0 + $0x14c] sm:$0x1] }
 0x10b   :  { %v10549_v25 = vcombine.low %v1295_v3, %v1305_v55  ;;  %v1336_v28 = vrot.slane %v1334_v10, 5  ;;  %v1342_v30 = vrot.slane %v1340_v13, 5  ;;  %v1346_v31 = vrot.slane %v1344_v18, 4  ;;  %12546 = vmatprep.subr.bf16.mxu0 %v13460_v63  ;;  %v781_v13 = vld [vmem:[%s17327_s0 + $0x150] sm:$0xf] }
 0x10c   :  { %v1350_v5 = vshll.u32 %v771_v4, 16  ;;  %v1319_v29 = vsel %vm13668_vm2, %v1314_v26, %v1318_v38  ;;  %v1324_v16 = vrot.slane %v1323_v47, 4  ;;  %v1355_v33 = vshrl.u32 %v772_v6, 16  ;;  %v779_v38 = vld [vmem:[%s17327_s0 + $0x148] sm:$0xf] }
 0x10d   :  { %12114 = vmatprep.mubr.bf16.mxu1 %v10549_v25  ;;  %v1358_v34 = vshll.u32 %v772_v6, 16  ;;  %12483 = vmatmul.mubr.bf16.gmra.mrb[8].mxu0 %v13439_v11  ;;  %v1337_v44 = vor.u32 %v1336_v28, %v1333_v62  ;;  %v1347_v45 = vor.u32 %v1346_v31, %v1342_v30  ;;  %v1364_v35 = vshll.u32 %v773_v41, 16  ;;  %v782_v47 = vld [vmem:[%s17327_s0 + $0x154] sm:$0xf]  ;;  %v13480_v62 = vld [vmem:[%s17328_s1 + $0x200] sm:$0xff]  }
 0x10e   :  { %v1352_v48 = vrot.slane %v1350_v5, 5  ;;  %v1329_v50 = vsel %vm13668_vm2, %v1324_v16, %v1328_v12  ;;  %12486 = vmatprep.mubr.bf16.mxu0 %v13440_v32  ;;  %v1357_v51 = vrot.slane %v1355_v33, 4  ;;  %v1368_v22 = vshrl.u32 %v773_v41, 16  ;;  %12547 = vmatpush3.bf16.msra.mxu0 %v13460_v63 }
 0x10f   :  { %v1360_v21 = vrot.slane %v1358_v34, 5  ;;  %v10550_v40 = vcombine.low %v1319_v29, %v1329_v50  ;;  %v1338_v52 = vrot.slane %v1337_v44, 4  ;;  %v1348_v27 = vrot.slane %v1347_v45, 4  ;;  %12548 = vmatprep.subr.bf16.mxu0 %v13466_v24  ;;  %v783_v34 = vld [vmem:[%s17327_s0 + $0x158] sm:$0x1] }
 0x110   :  { %v1366_v46 = vrot.slane %v1364_v35, 5  ;;  %v1370_v23 = vrot.slane %v1368_v22, 4  ;;  %v1374_v39 = vshll.u32 %v774_v17, 16  ;;  %v1379_v36 = vshrl.u32 %v775_v42, 16  ;;  %v13445_v17 = vld [vmem:[%s17327_s0 + $0x84] sm:$0xff]  }
 0x111   :  { %v1361_v1 = vor.u32 %v1360_v21, %v1357_v51  ;;  %12115 = vmatmul.mubr.bf16.gmra.mrb[40].mxu1 %v10550_v40  ;;  %v1343_v58 = vsel %vm13668_vm2, %v1338_v52, %v1342_v30  ;;  %v1353_v59 = vsel %vm13668_vm2, %v1348_v27, %v1352_v48  ;;  %v1382_v19 = vshll.u32 %v775_v42, 16  ;;  %v785_v50 = vld [vmem:[%s17327_s0 + $0x160] sm:$0xf]  ;;  %v13446_v52 = vld [vmem:[%s17327_s0 + $0x90] sm:$0xff]  }
 0x112   :  { %v1388_v20 = vshll.u32 %v776_v49, 16  ;;  %v10551_v61 = vcombine.low %v1343_v58, %v1353_v59  ;;  %v1371_v0 = vor.u32 %v1370_v23, %v1366_v46  ;;  %v1376_v3 = vrot.slane %v1374_v39, 5  ;;  %12549 = vmatpush3.bf16.msra.mxu0 %v13466_v24  ;;  %v786_v58 = vld [vmem:[%s17327_s0 + $0x164] sm:$0x1] }
 0x113   :  { %v1362_v63 = vrot.slane %v1361_v1, 4  ;;  %v1381_v56 = vrot.slane %v1379_v36, 4  ;;  %v1384_v2 = vrot.slane %v1382_v19, 5  ;;  %v1392_v4 = vshrl.u32 %v776_v49, 16  ;;  %12550 = vmatprep.subr.bf16.mxu0 %v13472_v14  ;;  %v784_v49 = vld [vmem:[%s17327_s0 + $0x15c] sm:$0xf] }
 0x114   :  { %v1390_v11 = vrot.slane %v1388_v20, 5  ;;  %12118 = vmatprep.mubr.bf16.mxu1 %v10551_v61  ;;  %v1372_v7 = vrot.slane %v1371_v0, 4  ;;  %v1398_v8 = vshll.u32 %v777_v15, 16  ;;  %v1403_v10 = vshrl.u32 %v778_v57, 16  ;;  %v787_v61 = vld [vmem:[%s17327_s0 + $0x168] sm:$0xf] }
 0x115   :  { %v1367_v6 = vsel %vm13668_vm2, %v1362_v63, %v1366_v46  ;;  %12487 = vmatmul.mubr.bf16.gmra.mrb[12].mxu0 %v13441_v53  ;;  %v1385_v32 = vor.u32 %v1384_v2, %v1381_v56  ;;  %v1394_v41 = vrot.slane %v1392_v4, 4  ;;  %v1406_v55 = vshll.u32 %v778_v57, 16  ;;  %v788_v2 = vld [vmem:[%s17327_s0 + $0x16c] sm:$0xf] }
 0x116   :  { %v1412_v12 = vshll.u32 %v779_v38, 16  ;;  %v1377_v18 = vsel %vm13668_vm2, %v1372_v7, %v1376_v3  ;;  %v1400_v24 = vrot.slane %v1398_v8, 5  ;;  %12490 = vmatprep.mubr.bf16.mxu0 %v13443_v54  ;;  %v1405_v25 = vrot.slane %v1403_v10, 4  ;;  %12551 = vmatpush3.bf16.msra.mxu0 %v13472_v14  ;;  %v13447_v10 = vld [vmem:[%s17327_s0 + $0x9c] sm:$0xff]  }
 0x117   :  { %v1416_v26 = vshrl.u32 %v779_v38, 16  ;;  %v10552_v28 = vcombine.low %v1367_v6, %v1377_v18  ;;  %v1386_v30 = vrot.slane %v1385_v32, 4  ;;  %v1395_v31 = vor.u32 %v1394_v41, %v1390_v11  ;;  %12552 = vmatprep.subr.bf16.mxu0 %v13478_v60  ;;  %v789_v32 = vld [vmem:[%s17327_s0 + $0x170] sm:$0x1] }
 0x118   :  { %v1408_v5 = vrot.slane %v1406_v55, 5  ;;  %v1414_v29 = vrot.slane %v1412_v12, 5  ;;  %v1422_v33 = vshll.u32 %v780_v9, 16  ;;  %v1427_v42 = vshrl.u32 %v781_v13, 16 }
 0x119   :  { %v1418_v16 = vrot.slane %v1416_v26, 4  ;;  %12119 = vmatmul.mubr.bf16.gmra.mrb[44].mxu1 %v10552_v28  ;;  %v1391_v44 = vsel %vm13668_vm2, %v1386_v30, %v1390_v11  ;;  %v1396_v45 = vrot.slane %v1395_v31, 4  ;;  %v1430_v35 = vshll.u32 %v781_v13, 16  ;;  %v790_v26 = vld [vmem:[%s17327_s0 + $0x174] sm:$0xf] }
 0x11a   :  { %v1409_v48 = vor.u32 %v1408_v5, %v1405_v25  ;;  %v1424_v21 = vrot.slane %v1422_v33, 5  ;;  %v1429_v22 = vrot.slane %v1427_v42, 4  ;;  %v1436_v40 = vshll.u32 %v782_v47, 16  ;;  %12553 = vmatpush3.bf16.msra.mxu0 %v13478_v60  ;;  %v13449_v25 = vld [vmem:[%s17327_s0 + $0xa8] sm:$0xff]   ;;  %v791_v31 = vld [vmem:[%s17327_s0 + $0x178] sm:$0xf] }
 0x11b   :  { %v1419_v51 = vor.u32 %v1418_v16, %v1414_v29  ;;  %v1401_v27 = vsel %vm13668_vm2, %v1396_v45, %v1400_v24  ;;  %v1432_v53 = vrot.slane %v1430_v35, 5  ;;  %v1440_v15 = vshrl.u32 %v782_v47, 16  ;;  %12618 = vmatprep.subr.bf16.mxu0 %v13480_v62  ;;  %v792_v33 = vld [vmem:[%s17327_s0 + $0x17c] sm:$0x1] }
 0x11c   :  { %v1410_v46 = vrot.slane %v1409_v48, 4  ;;  %v10553_v14 = vcombine.low %v1391_v44, %v1401_v27  ;;  %v1438_v23 = vrot.slane %v1436_v40, 5  ;;  %v1446_v39 = vshll.u32 %v783_v34, 16 }
 0x11d   :  { %v1420_v1 = vrot.slane %v1419_v51, 4  ;;  %12491 = vmatmul.mubr.bf16.gmra.mrb[16].mxu0 %v13445_v17  ;;  %v1433_v54 = vor.u32 %v1432_v53, %v1429_v22  ;;  %v1442_v57 = vrot.slane %v1440_v15, 4  ;;  %v1451_v59 = vshrl.u32 %v784_v49, 16 }
 0x11e   :  { %v1415_v36 = vsel %vm13668_vm2, %v1410_v46, %v1414_v29  ;;  %12122 = vmatprep.mubr.bf16.mxu1 %v10553_v14  ;;  %v1448_v20 = vrot.slane %v1446_v39, 5  ;;  %12494 = vmatprep.mubr.bf16.mxu0 %v13446_v52  ;;  %v1454_v38 = vshll.u32 %v784_v49, 16  ;;  %v1460_v60 = vshll.u32 %v785_v50, 16  ;;  %v793_v52 = vld [vmem:[%s17327_s0 + $0x180] sm:$0xf]  ;;  %v13451_v14 = vld [vmem:[%s17327_s0 + $0xb4] sm:$0xff]  }
 0x11f   :  { %v1425_v19 = vsel %vm13668_vm2, %v1420_v1, %v1424_v21  ;;  %v1434_v0 = vrot.slane %v1433_v54, 4  ;;  %v1443_v3 = vor.u32 %v1442_v57, %v1438_v23  ;;  %v1453_v56 = vrot.slane %v1451_v59, 4  ;;  %v794_v1 = vld [vmem:[%s17327_s0 + $0x184] sm:$0xf]  ;;  %v795_v57 = vld [vmem:[%s17327_s0 + $0x188] sm:$0x1] }
 0x120   :  { %v10554_v63 = vcombine.low %v1415_v36, %v1425_v19  ;;  %v1456_v11 = vrot.slane %v1454_v38, 5  ;;  %v1462_v4 = vrot.slane %v1460_v60, 5  ;;  %v1464_v6 = vshrl.u32 %v785_v50, 16  ;;  %v13452_v38 = vld [vmem:[%s17327_s0 + $0xc0] sm:$0xff]  }
 0x121   :  { %v1470_v7 = vshll.u32 %v786_v58, 16  ;;  %v1439_v8 = vsel %vm13668_vm2, %v1434_v0, %v1438_v23  ;;  %v1444_v9 = vrot.slane %v1443_v3, 4  ;;  %v1475_v41 = vshrl.u32 %v787_v61, 16  ;;  %v796_v3 = vld [vmem:[%s17327_s0 + $0x18c] sm:$0xf] }
 0x122   :  { %12123 = vmatmul.mubr.bf16.gmra.mrb[48].mxu1 %v10554_v63  ;;  %v1478_v55 = vshll.u32 %v787_v61, 16  ;;  %v1457_v12 = vor.u32 %v1456_v11, %v1453_v56  ;;  %v1466_v13 = vrot.slane %v1464_v6, 4  ;;  %v1484_v24 = vshll.u32 %v788_v2, 16  ;;  %v797_v6 = vld [vmem:[%s17327_s0 + $0x190] sm:$0xf] }
 0x123   :  { %v1472_v18 = vrot.slane %v1470_v7, 5  ;;  %v1449_v47 = vsel %vm13668_vm2, %v1444_v9, %v1448_v20  ;;  %v1477_v62 = vrot.slane %v1475_v41, 4  ;;  %v1488_v30 = vshrl.u32 %v788_v2, 16  ;;  %v2244_v41 = vld [vmem:[%s17327_s0] sm:$0xe] }
 0x124   :  { %v1480_v28 = vrot.slane %v1478_v55, 5  ;;  %v10555_v5 = vcombine.low %v1439_v8, %v1449_v47  ;;  %v1458_v17 = vrot.slane %v1457_v12, 4  ;;  %v1467_v29 = vor.u32 %v1466_v13, %v1462_v4 }
 0x125   :  { %v1486_v16 = vrot.slane %v1484_v24, 5  ;;  %12495 = vmatmul.mubr.bf16.gmra.mrb[20].mxu0 %v13447_v10  ;;  %v1490_v42 = vrot.slane %v1488_v30, 4  ;;  %v1494_v44 = vshll.u32 %v789_v32, 16  ;;  %v1499_v45 = vshrl.u32 %v790_v26, 16  ;;  %v798_v32 = vld [vmem:[%s17327_s0 + $0x194] sm:$0x1] }
 0x126   :  { %v1481_v34 = vor.u32 %v1480_v28, %v1477_v62  ;;  %12126 = vmatprep.mubr.bf16.mxu1 %v10555_v5  ;;  %v1463_v48 = vsel %vm13668_vm2, %v1458_v17, %v1462_v4  ;;  %v1468_v35 = vrot.slane %v1467_v29, 4  ;;  %12498 = vmatprep.mubr.bf16.mxu0 %v13449_v25  ;;  %v1502_v49 = vshll.u32 %v790_v26, 16  ;;  %v2245_v24 = vld [vmem:[%s17327_s0 + $0x4] sm:$0xf]  ;;  %v2246_v17 = vld [vmem:[%s17327_s0 + $0x8] sm:$0x1] }
 0x127   :  { %v1508_v50 = vshll.u32 %v791_v31, 16  ;;  %v1491_v21 = vor.u32 %v1490_v42, %v1486_v16  ;;  %v1496_v22 = vrot.slane %v1494_v44, 5  ;;  %v1501_v40 = vrot.slane %v1499_v45, 4  ;;  %v13453_v42 = vld [vmem:[%s17327_s0 + $0xcc] sm:$0xff]  }
 0x128   :  { %v1482_v51 = vrot.slane %v1481_v34, 4  ;;  %v1473_v27 = vsel %vm13668_vm2, %v1468_v35, %v1472_v18  ;;  %v1504_v46 = vrot.slane %v1502_v49, 5  ;;  %v1512_v15 = vshrl.u32 %v791_v31, 16  ;;  %v2247_v44 = vld [vmem:[%s17327_s0 + $0xc] sm:$0xe] }
 0x129   :  { %v1510_v53 = vrot.slane %v1508_v50, 5  ;;  %v10556_v23 = vcombine.low %v1463_v48, %v1473_v27  ;;  %v1492_v36 = vrot.slane %v1491_v21, 4  ;;  %v1518_v54 = vshll.u32 %v792_v33, 16  ;;  %v2248_v45 = vld [vmem:[%s17327_s0 + $0x10] sm:$0xf] }
 0x12a   :  { %v1487_v39 = vsel %vm13668_vm2, %v1482_v51, %v1486_v16  ;;  %v1505_v58 = vor.u32 %v1504_v46, %v1501_v40  ;;  %v1514_v59 = vrot.slane %v1512_v15, 4  ;;  %v1523_v19 = vshrl.u32 %v793_v52, 16  ;;  %v13455_v51 = vld [vmem:[%s17327_s0 + $0xf0] sm:$0xff]  }
 0x12b   :  { %v1526_v20 = vshll.u32 %v793_v52, 16  ;;  %12127 = vmatmul.mubr.bf16.gmra.mrb[52].mxu1 %v10556_v23  ;;  %v1497_v60 = vsel %vm13668_vm2, %v1492_v36, %v1496_v22  ;;  %v1520_v61 = vrot.slane %v1518_v54, 5  ;;  %v1532_v63 = vshll.u32 %v794_v1, 16  ;;  %v2249_v21 = vld [vmem:[%s17327_s0 + $0x14] sm:$0x1] }
 0x12c   :  { %v1536_v0 = vshrl.u32 %v794_v1, 16  ;;  %v10557_v56 = vcombine.low %v1487_v39, %v1497_v60  ;;  %v1506_v2 = vrot.slane %v1505_v58, 4  ;;  %v1515_v11 = vor.u32 %v1514_v59, %v1510_v53  ;;  %v2251_v1 = vld [vmem:[%s17327_s0 + $0x1c] sm:$0xf]  ;;  %v2250_v54 = vld [vmem:[%s17327_s0 + $0x18] sm:$0xe] }
 0x12d   :  { %v1525_v4 = vrot.slane %v1523_v19, 4  ;;  %12499 = vmatmul.mubr.bf16.gmra.mrb[24].mxu0 %v13451_v14  ;;  %v1528_v7 = vrot.slane %v1526_v20, 5  ;;  %v1534_v8 = vrot.slane %v1532_v63, 5  ;;  %v1542_v10 = vshll.u32 %v795_v57, 16  ;;  %v2252_v57 = vld [vmem:[%s17327_s0 + $0x20] sm:$0x1] }
 0x12e   :  { %v1538_v9 = vrot.slane %v1536_v0, 4  ;;  %12130 = vmatprep.mubr.bf16.mxu1 %v10557_v56  ;;  %v1511_v55 = vsel %vm13668_vm2, %v1506_v2, %v1510_v53  ;;  %v1516_v12 = vrot.slane %v1515_v11, 4  ;;  %12502 = vmatprep.mubr.bf16.mxu0 %v13452_v38  ;;  %v1547_v13 = vshrl.u32 %v796_v3, 16  ;;  %v2253_v56 = vld [vmem:[%s17327_s0 + $0x24] sm:$0xe] }
 0x12f   :  { %v1550_v18 = vshll.u32 %v796_v3, 16  ;;  %v1529_v25 = vor.u32 %v1528_v7, %v1525_v4  ;;  %v1544_v47 = vrot.slane %v1542_v10, 5  ;;  %v1556_v62 = vshll.u32 %v797_v6, 16  ;;  %v2254_v2 = vld [vmem:[%s17327_s0 + $0x28] sm:$0xf] }
 0x130   :  { %v1539_v26 = vor.u32 %v1538_v9, %v1534_v8  ;;  %v1521_v28 = vsel %vm13668_vm2, %v1516_v12, %v1520_v61  ;;  %v1549_v30 = vrot.slane %v1547_v13, 4  ;;  %v1560_v5 = vshrl.u32 %v797_v6, 16  ;;  %v13457_v61 = vld [vmem:[%s17327_s0 + $0xfc] sm:$0xff]   ;;  %v2257_v9 = vld [vmem:[%s17327_s0 + $0x34] sm:$0xf] }
 0x131   :  { %v1552_v31 = vrot.slane %v1550_v18, 5  ;;  %v10558_v29 = vcombine.low %v1511_v55, %v1521_v28  ;;  %v1530_v16 = vrot.slane %v1529_v25, 4  ;;  %v1558_v34 = vrot.slane %v1556_v62, 5  ;;  %v2255_v10 = vld [vmem:[%s17327_s0 + $0x2c] sm:$0x1] }
 0x132   :  { %v1540_v33 = vrot.slane %v1539_v26, 4  ;;  %v1562_v35 = vrot.slane %v1560_v5, 4  ;;  %v1566_v49 = vshll.u32 %v798_v32, 16  ;;  %v10569_v50 = vrot.slane %v2244_v41, 9  ;;  %v2256_v32 = vld [vmem:[%s17327_s0 + $0x30] sm:$0xe] }
 0x133   :  { %v1553_v48 = vor.u32 %v1552_v31, %v1549_v30  ;;  %12131 = vmatmul.mubr.bf16.gmra.mrb[56].mxu1 %v10558_v29  ;;  %v1535_v22 = vsel %vm13668_vm2, %v1530_v16, %v1534_v8  ;;  %v2441_v52 = vrot.slane %v2245_v24, 5  ;;  %v2444_v27 = vrot.slane %v2246_v17, 5  ;;  %v13458_v8 = vld [vmem:[%s17327_s0 + $0x108] sm:$0xff]   ;;  %v2258_v13 = vld [vmem:[%s17327_s0 + $0x38] sm:$0x1] }
 0x134   :  { %v1545_v40 = vsel %vm13668_vm2, %v1540_v33, %v1544_v47  ;;  %v1563_v15 = vor.u32 %v1562_v35, %v1558_v34  ;;  %v1568_v14 = vrot.slane %v1566_v49, 5  ;;  %v2448_v36 = vrot.slane %v2248_v45, 5  ;;  %v15139_v25 = vld [vmem:[%s17327_s0 + $0x3c] sm:$0xe]  ;;  %v15144_v26 = vld [vmem:[%s17327_s0 + $0x40] sm:$0xf] }
 0x135   :  { %v10559_v46 = vcombine.low %v1535_v22, %v1545_v40  ;;  %v1554_v53 = vrot.slane %v1553_v48, 4  ;;  %12503 = vmatmul.mubr.bf16.gmra.mrb[28].mxu0 %v13453_v42  ;;  %v2442_v23 = vsel %vm13948_vm5, %v10569_v50, %v2441_v52  ;;  %v2443_v39 = vrot.slane %v2441_v52, 4  ;;  %v15153_v30 = vld [vmem:[%s17327_s0 + $0x44] sm:$0x1]  ;;  %v13459_v29 = vld [vmem:[%s17327_s0 + $0x114] sm:$0xff]   ;;  %v13462_v42 = vld [vmem:[%s17328_s1 + $0xc8] sm:$0xff]  }
 0x136   :  { %v1564_v59 = vrot.slane %v1563_v15, 4  ;;  %12506 = vmatprep.mubr.bf16.mxu0 %v13455_v51  ;;  %v10570_v19 = vrot.slane %v2247_v44, 9  ;;  %v2451_v20 = vrot.slane %v2249_v21, 5  ;;  %v2450_v60 = vrot.slane %v2448_v36, 4  ;;  %v15166_v44 = vld [vmem:[%s17327_s0 + $0x4c] sm:$0xf] }
 0x137   :  { %12134 = vmatprep.mubr.bf16.mxu1 %v10559_v46  ;;  %v1559_v58 = vsel %vm13668_vm2, %v1554_v53, %v1558_v34  ;;  %v2445_v38 = vsel %vm13948_vm5, %v2443_v39, %v2444_v27  ;;  %v2455_v63 = vrot.slane %v2251_v1, 5  ;;  %v10571_v4 = vrot.slane %v2250_v54, 9  ;;  %v13461_v35 = vld [vmem:[%s17327_s0 + $0x120] sm:$0xff]   ;;  %v2262_v50 = vld [vmem:[%s17327_s0 + $0x48] sm:$0xe]  ;;  %v13468_v1 = vld [vmem:[%s17328_s1 + $0xd0] sm:$0xff]  }
 0x138   :  { %v1569_v0 = vsel %vm13668_vm2, %v1564_v59, %v1568_v14  ;;  %v10617_v3 = vcombine.low %v2442_v23, %v2445_v38  ;;  %v2458_v7 = vrot.slane %v2252_v57, 5  ;;  %v2449_v41 = vsel %vm13948_vm5, %v10570_v19, %v2448_v36  ;;  %v2264_v21 = vld [vmem:[%s17327_s0 + $0x50] sm:$0x1]  ;;  %v15182_v40 = vld [vmem:[%s17327_s0 + $0x54] sm:$0xe]  ;;  %v13524_v23 = vld [vmem:[%s17328_s1 + $0xc0] sm:$0xff]  }
 0x139   :  { %v10560_v11 = vcombine.low %v1559_v58, %v1569_v0  ;;  %v2457_v6 = vrot.slane %v2455_v63, 4  ;;  %v2452_v55 = vsel %vm13948_vm5, %v2450_v60, %v2451_v20  ;;  %v2462_v12 = vrot.slane %v2254_v2, 5  ;;  %v15187_v52 = vld [vmem:[%s17327_s0 + $0x58] sm:$0xf]  ;;  %v15192_v27 = vld [vmem:[%s17327_s0 + $0x5c] sm:$0x1] }
 0x13a   :  { %v10572_v18 = vrot.slane %v2253_v56, 9  ;;  %v2469_v24 = vrot.slane %v2257_v9, 5  ;;  %v2456_v47 = vsel %vm13948_vm5, %v10571_v4, %v2455_v63  ;;  %v2465_v28 = vrot.slane %v2255_v10, 5  ;;  %v15208_v39 = vld [vmem:[%s17327_s0 + $0x60] sm:$0xe] }
 0x13b   :  { %12135 = vmatmul.mubr.bf16.gmra.mrb[60].mxu1 %v10560_v11  ;;  %v2459_v62 = vsel %vm13948_vm5, %v2457_v6, %v2458_v7  ;;  %v2476_v31 = vrot.slane %v15144_v26, 5  ;;  %v10618_v5 = vcombine.low %v2449_v41, %v2452_v55  ;;  %v2464_v17 = vrot.slane %v2462_v12, 4  ;;  %v15217_v59 = vld [vmem:[%s17327_s0 + $0x64] sm:$0xf]  ;;  %v15222_v19 = vld [vmem:[%s17327_s0 + $0x68] sm:$0x1] }
 0x13c   :  { %12154 = vmatprep.mubr.bf16.mxu1 %v10617_v3  ;;  %v10573_v16 = vrot.slane %v2256_v32, 9  ;;  %v2472_v33 = vrot.slane %v2258_v13, 5  ;;  %v10574_v34 = vrot.slane %v15139_v25, 9  ;;  %v10619_v45 = vcombine.low %v2456_v47, %v2459_v62  ;;  %v15237_v2 = vld [vmem:[%s17327_s0 + $0x70] sm:$0xf]  ;;  %v13474_v11 = vld [vmem:[%s17328_s1 + $0xd8] sm:$0xff]  }
 0x13d   :  { %12507 = vmatmul.mubr.bf16.gmra.mrb[32].mxu0 %v13457_v61  ;;  %v2471_v48 = vrot.slane %v2469_v24, 4  ;;  %v2479_v49 = vrot.slane %v15153_v30, 5  ;;  %v2478_v51 = vrot.slane %v2476_v31, 4  ;;  %v2483_v22 = vrot.slane %v15166_v44, 5  ;;  %v13463_v61 = vld [vmem:[%s17327_s0 + $0x12c] sm:$0xff]   ;;  %v13464_v6 = vld [vmem:[%s17327_s0 + $0x138] sm:$0xff]  }
 0x13e   :  { %12510 = vmatprep.mubr.bf16.mxu0 %v13458_v8  ;;  %v2463_v46 = vsel %vm13948_vm5, %v10572_v18, %v2462_v12  ;;  %v2466_v53 = vsel %vm13948_vm5, %v2464_v17, %v2465_v28  ;;  %v10575_v15 = vrot.slane %v2262_v50, 9  ;;  %v2490_v14 = vrot.slane %v15187_v52, 5  ;;  %v15248_v7 = vld [vmem:[%s17327_s0 + $0x6c] sm:$0xe]  ;;  %v15253_v8 = vld [vmem:[%s17327_s0 + $0x74] sm:$0x1] }
 0x13f   :  { %v2470_v36 = vsel %vm13948_vm5, %v10573_v16, %v2469_v24  ;;  %v2473_v54 = vsel %vm13948_vm5, %v2471_v48, %v2472_v33  ;;  %v2485_v57 = vrot.slane %v2483_v22, 4  ;;  %v2486_v58 = vrot.slane %v2264_v21, 5  ;;  %v15259_v32 = vld [vmem:[%s17327_s0 + $0x78] sm:$0xe]  ;;  %v15264_v41 = vld [vmem:[%s17327_s0 + $0x7c] sm:$0xf] }
 0x140   :  { %v10620_v20 = vcombine.low %v2463_v46, %v2466_v53  ;;  %v10576_v38 = vrot.slane %v15182_v40, 9  ;;  %v2497_v60 = vrot.slane %v15217_v59, 5  ;;  %v2492_v63 = vrot.slane %v2490_v14, 4  ;;  %v15273_v13 = vld [vmem:[%s17327_s0 + $0x80] sm:$0x1]  ;;  %v13465_v33 = vld [vmem:[%s17327_s0 + $0x144] sm:$0xff]  }
 0x141   :  { %v2493_v0 = vrot.slane %v15192_v27, 5  ;;  %v10577_v3 = vrot.slane %v15208_v39, 9  ;;  %v2500_v56 = vrot.slane %v15222_v19, 5  ;;  %v10621_v4 = vcombine.low %v2470_v36, %v2473_v54  ;;  %v13479_v18 = vld [vmem:[%s17328_s1 + $0xe0] sm:$0xff]   ;;  %v2278_v47 = vld [vmem:[%s17327_s0 + $0x88] sm:$0xf] }
 0x142   :  { %v2499_v9 = vrot.slane %v2497_v60, 4  ;;  %v2504_v10 = vrot.slane %v15237_v2, 5  ;;  %v2477_v55 = vsel %vm13948_vm5, %v10574_v34, %v2476_v31  ;;  %v2480_v12 = vsel %vm13948_vm5, %v2478_v51, %v2479_v49  ;;  %v2277_v26 = vld [vmem:[%s17327_s0 + $0x84] sm:$0xe]  ;;  %v2279_v31 = vld [vmem:[%s17327_s0 + $0x8c] sm:$0x1] }
 0x143   :  { %12155 = vmatmul.mubr.bf16.vlgmr.msra.gmra.mrb[0].mxu1 %v10618_v5  ;;  %v10578_v24 = vrot.slane %v15248_v7, 9  ;;  %v2511_v25 = vrot.slane %v15264_v41, 5  ;;  %v2484_v62 = vsel %vm13948_vm5, %v10575_v15, %v2483_v22  ;;  %v2487_v28 = vsel %vm13948_vm5, %v2485_v57, %v2486_v58  ;;  %v13481_v48 = vld [vmem:[%s17328_s1 + $0xe8] sm:$0xff]   ;;  %v13467_v49 = vld [vmem:[%s17327_s0 + $0x150] sm:$0xff]   ;;  %v2282_v21 = vld [vmem:[%s17327_s0 + $0x98] sm:$0x1] }
 0x144   :  { %12219 = vmatpush3.bf16.msra.mxu1 %v13524_v23  ;;  %12158 = vmatprep.mubr.bf16.mxu1 %v10619_v45  ;;  %v2507_v30 = vrot.slane %v15253_v8, 5  ;;  %v2518_v5 = vrot.slane %v2278_v47, 5  ;;  %v10622_v17 = vcombine.low %v2477_v55, %v2480_v12  ;;  %v10579_v16 = vrot.slane %v15259_v32, 9  ;;  %v2280_v50 = vld [vmem:[%s17327_s0 + $0x90] sm:$0xe] }
 0x145   :  { %12511 = vmatmul.mubr.bf16.gmra.mrb[36].mxu0 %v13459_v29  ;;  %12220 = vmatprep.subr.bf16.mxu1 %v13462_v42  ;;  %v2506_v29 = vrot.slane %v2504_v10, 4  ;;  %v2513_v34 = vrot.slane %v2511_v25, 4  ;;  %v10580_v44 = vrot.slane %v2277_v26, 9  ;;  %v2521_v45 = vrot.slane %v2279_v31, 5  ;;  %v2281_v51 = vld [vmem:[%s17327_s0 + $0x94] sm:$0xf] }
 0x146   :  { %12514 = vmatprep.mubr.bf16.mxu0 %v13461_v35  ;;  %v10623_v35 = vcombine.low %v2484_v62, %v2487_v28  ;;  %v2520_v22 = vrot.slane %v2518_v5, 4  ;;  %v2525_v40 = vrot.slane %v2281_v51, 5  ;;  %v2491_v27 = vsel %vm13948_vm5, %v10576_v38, %v2490_v14  ;;  %v2284_v52 = vld [vmem:[%s17327_s0 + $0xa0] sm:$0xf]  ;;  %v2285_v14 = vld [vmem:[%s17327_s0 + $0xa4] sm:$0x1] }
 0x147   :  { %v2494_v46 = vsel %vm13948_vm5, %v2492_v63, %v2493_v0  ;;  %v2498_v53 = vsel %vm13948_vm5, %v10577_v3, %v2497_v60  ;;  %v2501_v15 = vsel %vm13948_vm5, %v2499_v9, %v2500_v56  ;;  %v10581_v23 = vrot.slane %v2280_v50, 9  ;;  %v2286_v38 = vld [vmem:[%s17327_s0 + $0xa8] sm:$0xe]  ;;  %v13483_v60 = vld [vmem:[%s17328_s1 + $0xf0] sm:$0xff]   ;;  %v2287_v56 = vld [vmem:[%s17327_s0 + $0xac] sm:$0xf] }
 0x148   :  { %12221 = vmatpush3.bf16.msra.mxu1 %v13462_v42  ;;  %v2514_v42 = vrot.slane %v15273_v13, 5  ;;  %v2527_v39 = vrot.slane %v2525_v40, 4  ;;  %v2528_v36 = vrot.slane %v2282_v21, 5  ;;  %v2532_v54 = vrot.slane %v2284_v52, 5  ;;  %v2288_v2 = vld [vmem:[%s17327_s0 + $0xb0] sm:$0x1] }
 0x149   :  { %12222 = vmatprep.subr.bf16.mxu1 %v13468_v1  ;;  %v2535_v58 = vrot.slane %v2285_v14, 5  ;;  %v10624_v59 = vcombine.low %v2491_v27, %v2494_v46  ;;  %v10625_v19 = vcombine.low %v2498_v53, %v2501_v15  ;;  %v15349_v63 = vsel %vm13948_vm5, %v2506_v29, %v2507_v30  ;;  %v13485_v9 = vld [vmem:[%s17328_s1 + $0xf8] sm:$0xff]   ;;  %v2289_v12 = vld [vmem:[%s17327_s0 + $0xb4] sm:$0xe]  ;;  %v13470_v62 = vld [vmem:[%s17327_s0 + $0x168] sm:$0xff]  }
 0x14a   :  { %v15353_v0 = vsel %vm13948_vm5, %v10579_v16, %v2511_v25  ;;  %v15357_v3 = vsel %vm13948_vm5, %v10580_v44, %v2518_v5  ;;  %v10583_v7 = vrot.slane %v2286_v38, 9  ;;  %v2539_v8 = vrot.slane %v2287_v56, 5  ;;  %v2290_v13 = vld [vmem:[%s17327_s0 + $0xb8] sm:$0xf]  ;;  %v2294_v44 = vld [vmem:[%s17327_s0 + $0xe0] sm:$0x1] }
 0x14b   :  { %12159 = vmatmul.mubr.bf16.gmra.mrb[4].mxu1 %v10620_v20  ;;  %v2534_v20 = vrot.slane %v2532_v54, 4  ;;  %v15385_v32 = vsel %vm13948_vm5, %v2527_v39, %v2528_v36  ;;  %v2542_v25 = vrot.slane %v2288_v2, 5  ;;  %v10584_v26 = vrot.slane %v2289_v12, 9  ;;  %v2292_v29 = vld [vmem:[%s17327_s0 + $0xd8] sm:$0xe] }
 0x14c   :  { %12162 = vmatprep.mubr.bf16.mxu1 %v10621_v4  ;;  %12223 = vmatpush3.bf16.msra.mxu1 %v13468_v1  ;;  %v2283_v1 = vld [vmem:[%s17327_s0 + $0x9c] sm:$0xe]  ;;  %v15370_v4 = vsel %vm13948_vm5, %v2513_v34, %v2514_v42  ;;  %v2546_v47 = vrot.slane %v2290_v13, 5  ;;  %v15422_v34 = vsel %vm13948_vm5, %v10583_v7, %v2539_v8  ;;  %v2556_v50 = vrot.slane %v2294_v44, 5  ;;  %v11233_v51 = vld [vmem:[%s17327_s0 + $0x18] sm:$0xf] }
 0x14d   :  { %12515 = vmatmul.mubr.bf16.gmra.mrb[40].mxu0 %v13463_v61  ;;  %12224 = vmatprep.subr.bf16.mxu1 %v13474_v11  ;;  %v10582_v57 = vrot.slane %v2283_v1, 9  ;;  %v15345_v61 = vsel %vm13948_vm5, %v10578_v24, %v2504_v10  ;;  %v15381_v10 = vsel %vm13948_vm5, %v10581_v23, %v2525_v40  ;;  %v15393_v55 = vsel %vm13948_vm5, %v2534_v20, %v2535_v58  ;;  %v2293_v42 = vld [vmem:[%s17327_s0 + $0xdc] sm:$0xf]  ;;  %v11235_v40 = vld [vmem:[%s17327_s0 + $0x20] sm:$0x1] }
 0x14e   :  { %12518 = vmatprep.mubr.bf16.mxu0 %v13464_v6  ;;  %v15374_v6 = vsel %vm13948_vm5, %v2520_v22, %v2521_v45  ;;  %v2541_v24 = vrot.slane %v2539_v8, 4  ;;  %v10626_v30 = vcombine.low %v15345_v61, %v15349_v63  ;;  %v10627_v31 = vcombine.low %v15353_v0, %v15370_v4  ;;  %v11234_v21 = vld [vmem:[%s17327_s0 + $0x1c] sm:$0xf]  ;;  %v2295_v23 = vld [vmem:[%s17327_s0 + $0xe4] sm:$0xe] }
 0x14f   :  { %v15389_v41 = vsel %vm13948_vm5, %v10582_v57, %v2532_v54  ;;  %v10628_v5 = vcombine.low %v15357_v3, %v15374_v6  ;;  %v10629_v16 = vcombine.low %v15381_v10, %v15385_v32  ;;  %v10585_v45 = vrot.slane %v2292_v29, 9  ;;  %v2296_v57 = vld [vmem:[%s17327_s0 + $0xe8] sm:$0xf]  ;;  %v2297_v61 = vld [vmem:[%s17327_s0 + $0xec] sm:$0x1]  ;;  %v13525_v0 = vld [vmem:[%s17328_s1 + $0x100] sm:$0xff]  }
 0x150   :  { %12225 = vmatpush3.bf16.msra.mxu1 %v13474_v11  ;;  %v13469_v11 = vld [vmem:[%s17327_s0 + $0x15c] sm:$0xff]   ;;  %v7668_v27 = vshrl.u32 %v11233_v51, 16  ;;  %v7671_v46 = vshll.u32 %v11233_v51, 16  ;;  %v7677_v53 = vshll.u32 %v11234_v21, 16  ;;  %v7681_v52 = vshrl.u32 %v11234_v21, 16 }
 0x151   :  { %12226 = vmatprep.subr.bf16.mxu1 %v13479_v18  ;;  %v7687_v14 = vshll.u32 %v11235_v40, 16  ;;  %v10586_v58 = vrot.slane %v2295_v23, 9  ;;  %v2560_v63 = vrot.slane %v2296_v57, 5  ;;  %v2563_v4 = vrot.slane %v2297_v61, 5  ;;  %v11236_v13 = vld [vmem:[%s17327_s0 + $0x24] sm:$0xf] }
 0x152   :  { %v7670_v39 = vrot.slane %v7668_v27, 4  ;;  %v7673_v36 = vrot.slane %v7671_v46, 5  ;;  %v7679_v54 = vrot.slane %v7677_v53, 5  ;;  %v2300_v51 = vld [vmem:[%s17327_s0 + $0xf8] sm:$0x1] }
 0x153   :  { %12163 = vmatmul.mubr.bf16.gmra.mrb[8].mxu1 %v10622_v17  ;;  %v2548_v17 = vrot.slane %v2546_v47, 4  ;;  %v2562_v12 = vrot.slane %v2560_v63, 4  ;;  %v11239_v53 = vld [vmem:[%s17327_s0 + $0x30] sm:$0xf]  ;;  %v13476_v61 = vld [vmem:[%s17327_s0 + $0x198] sm:$0xff]  }
 0x154   :  { %12166 = vmatprep.mubr.bf16.mxu1 %v10623_v35  ;;  %12227 = vmatpush3.bf16.msra.mxu1 %v13479_v18  ;;  %v2291_v18 = vld [vmem:[%s17327_s0 + $0xbc] sm:$0x1]  ;;  %v15436_v35 = vsel %vm13948_vm5, %v10584_v26, %v2546_v47  ;;  %v7674_v2 = vor.u32 %v7673_v36, %v7670_v39  ;;  %v7692_v26 = vshrl.u32 %v11236_v13, 16  ;;  %v7695_v47 = vshll.u32 %v11236_v13, 16  ;;  %v11240_v39 = vld [vmem:[%s17327_s0 + $0x34] sm:$0xf] }
 0x155   :  { %12519 = vmatmul.mubr.bf16.gmra.mrb[44].mxu0 %v13465_v33  ;;  %12228 = vmatprep.subr.bf16.mxu1 %v13481_v48  ;;  %v2549_v28 = vrot.slane %v2291_v18, 5  ;;  %v10630_v33 = vcombine.low %v15389_v41, %v15393_v55  ;;  %v11237_v18 = vld [vmem:[%s17327_s0 + $0x28] sm:$0xf]  ;;  %v11241_v36 = vld [vmem:[%s17327_s0 + $0x38] sm:$0x1] }
 0x156   :  { %12522 = vmatprep.mubr.bf16.mxu0 %v13467_v49  ;;  %v2553_v49 = vrot.slane %v2293_v42, 5  ;;  %v7735_v6 = vshll.u32 %v11241_v36, 16 }
 0x157   :  { %v15446_v22 = vsel %vm13948_vm5, %v2548_v17, %v2549_v28  ;;  %v7705_v17 = vshrl.u32 %v11237_v18, 16 }
 0x158   :  { %12229 = vmatpush3.bf16.msra.mxu1 %v13481_v48  ;;  %v15432_v48 = vsel %vm13948_vm5, %v2541_v24, %v2542_v25  ;;  %v15453_v15 = vsel %vm13948_vm5, %v10585_v45, %v2553_v49  ;;  %v2555_v1 = vrot.slane %v2553_v49, 4  ;;  %v10632_v56 = vcombine.low %v15436_v35, %v15446_v22  ;;  %v11238_v25 = vld [vmem:[%s17327_s0 + $0x2c] sm:$0x1] }
 0x159   :  { %12230 = vmatprep.subr.bf16.mxu1 %v13483_v60  ;;  %v10631_v20 = vcombine.low %v15422_v34, %v15432_v48  ;;  %v7675_v24 = vrot.slane %v7674_v2, 4  ;;  %v7711_v29 = vshll.u32 %v11238_v25, 16  ;;  %v7694_v45 = vrot.slane %v7692_v26, 4  ;;  %v2308_v34 = vld [vmem:[%s17327_s0 + $0x118] sm:$0xf] }
 0x15a   :  { %v15471_v38 = vsel %vm13948_vm5, %v2555_v1, %v2556_v50  ;;  %v7697_v49 = vrot.slane %v7695_v47, 5  ;;  %v2299_v50 = vld [vmem:[%s17327_s0 + $0xf4] sm:$0xf]  ;;  %v7707_v27 = vrot.slane %v7705_v17, 4  ;;  %v11243_v47 = vld [vmem:[%s17327_s0 + $0x40] sm:$0xf] }
 0x15b   :  { %12167 = vmatmul.mubr.bf16.gmra.mrb[12].mxu1 %v10624_v59  ;;  %v13471_v59 = vld [vmem:[%s17327_s0 + $0x174] sm:$0xff]   ;;  %v10633_v7 = vcombine.low %v15453_v15, %v15471_v38  ;;  %v7680_v42 = vsel %vm13668_vm2, %v7675_v24, %v7679_v54  ;;  %v7713_v46 = vrot.slane %v7711_v29, 5  ;;  %v2567_v23 = vrot.slane %v2299_v50, 5  ;;  %v2303_v24 = vld [vmem:[%s17327_s0 + $0x104] sm:$0x1] }
 0x15c   :  { %12170 = vmatprep.mubr.bf16.mxu1 %v10625_v19  ;;  %12231 = vmatpush3.bf16.msra.mxu1 %v13483_v60  ;;  %v13473_v19 = vld [vmem:[%s17327_s0 + $0x180] sm:$0xff]   ;;  %v7683_v60 = vrot.slane %v7681_v52, 4  ;;  %v7698_v52 = vor.u32 %v7697_v49, %v7694_v45  ;;  %v7737_v29 = vrot.slane %v7735_v6, 5  ;;  %v2577_v50 = vrot.slane %v2303_v24, 5  ;;  %v2307_v6 = vld [vmem:[%s17327_s0 + $0x114] sm:$0xe] }
 0x15d   :  { %12523 = vmatmul.mubr.bf16.gmra.mrb[48].mxu0 %v13469_v11  ;;  %12232 = vmatprep.subr.bf16.mxu1 %v13485_v9  ;;  %v7689_v11 = vrot.slane %v7687_v14, 5  ;;  %v2569_v2 = vrot.slane %v2567_v23, 4  ;;  %v2312_v38 = vld [vmem:[%s17327_s0 + $0x128] sm:$0x1] }
 0x15e   :  { %12526 = vmatprep.mubr.bf16.mxu0 %v13470_v62  ;;  %v7684_v8 = vor.u32 %v7683_v60, %v7679_v54  ;;  %v7701_v62 = vshll.u32 %v11237_v18, 16  ;;  %v13475_v54 = vld [vmem:[%s17327_s0 + $0x18c] sm:$0xff]   ;;  %v2301_v60 = vld [vmem:[%s17327_s0 + $0xfc] sm:$0xe]  ;;  %v7729_v18 = vshrl.u32 %v11240_v39, 16 }
 0x160   :  { %12233 = vmatpush3.bf16.msra.mxu1 %v13485_v9  ;;  %v15485_v9 = vsel %vm13948_vm5, %v10586_v58, %v2560_v63  ;;  %v7685_v28 = vrot.slane %v7684_v8, 4  ;;  %v7703_v40 = vrot.slane %v7701_v62, 5  ;;  %v2570_v58 = vrot.slane %v2300_v51, 5 }
 0x161   :  { %12698 = vmatprep.subr.bf16.mxu1 %v13525_v0  ;;  %v7699_v63 = vrot.slane %v7698_v52, 4  ;;  %v7731_v62 = vrot.slane %v7729_v18, 4  ;;  %v2305_v52 = vld [vmem:[%s17327_s0 + $0x10c] sm:$0xf] }
 0x162   :  { %v7690_v21 = vsel %vm13668_vm2, %v7685_v28, %v7689_v11  ;;  %v7708_v57 = vor.u32 %v7707_v27, %v7703_v40  ;;  %v7725_v11 = vshll.u32 %v11240_v39, 16  ;;  %v15555_v26 = vsel %vm13948_vm5, %v2569_v2, %v2570_v58  ;;  %v11244_v28 = vld [vmem:[%s17327_s0 + $0x44] sm:$0x1] }
 0x163   :  { %12171 = vmatmul.mubr.bf16.gmra.mrb[16].mxu1 %v10626_v30  ;;  %v15498_v30 = vsel %vm13948_vm5, %v2562_v12, %v2563_v4  ;;  %v15518_v1 = vcombine.low %v7680_v42, %v7690_v21  ;;  %v2302_v4 = vld [vmem:[%s17327_s0 + $0x100] sm:$0xf]  ;;  %v7704_v25 = vsel %vm13668_vm2, %v7699_v63, %v7703_v40  ;;  %v2304_v21 = vld [vmem:[%s17327_s0 + $0x108] sm:$0xe]  ;;  %v2581_v55 = vrot.slane %v2305_v52, 5 }
 0x164   :  { %12174 = vmatprep.mubr.bf16.mxu1 %v10627_v31  ;;  %v2298_v31 = vld [vmem:[%s17327_s0 + $0xf0] sm:$0xe]  ;;  %v10634_v44 = vcombine.low %v15485_v9, %v15498_v30  ;;  %v7709_v8 = vrot.slane %v7708_v57, 4  ;;  %v7727_v3 = vrot.slane %v7725_v11, 5  ;;  %v2574_v42 = vrot.slane %v2302_v4, 5 }
 0x165   :  { %12527 = vmatmul.mubr.bf16.gmra.mrb[52].mxu0 %v13471_v59  ;;  %v10587_v14 = vrot.slane %v2298_v31, 9  ;;  %v7716_v59 = vshrl.u32 %v11239_v53, 16  ;;  %v10588_v31 = vrot.slane %v2301_v60, 9  ;;  %v2306_v57 = vld [vmem:[%s17327_s0 + $0x110] sm:$0x1]  ;;  %v7759_v60 = vshll.u32 %v11244_v28, 16 }
 0x166   :  { %12530 = vmatprep.mubr.bf16.mxu0 %v13473_v19  ;;  %v7719_v19 = vshll.u32 %v11239_v53, 16  ;;  %v7714_v10 = vsel %vm13668_vm2, %v7709_v8, %v7713_v46  ;;  %v7732_v49 = vor.u32 %v7731_v62, %v7727_v3  ;;  %v2576_v27 = vrot.slane %v2574_v42, 4  ;;  %v11246_v8 = vld [vmem:[%s17327_s0 + $0x4c] sm:$0xf] }
 0x167   :  { %v15537_v0 = vsel %vm13948_vm5, %v10587_v14, %v2567_v23  ;;  %v7718_v12 = vrot.slane %v7716_v59, 4  ;;  %v15570_v17 = vcombine.low %v7704_v25, %v7714_v10  ;;  %v15577_v40 = vsel %vm13948_vm5, %v10588_v31, %v2574_v42  ;;  %v13477_v14 = vld [vmem:[%s17327_s0 + $0x1a4] sm:$0xff]   ;;  %v11254_v9 = vld [vmem:[%s17327_s0 + $0x6c] sm:$0xf] }
 0x168   :  { %v7721_v13 = vrot.slane %v7719_v19, 5  ;;  %v10635_v32 = vcombine.low %v15537_v0, %v15555_v26  ;;  %v7749_v53 = vshll.u32 %v11243_v47, 16  ;;  %v7733_v39 = vrot.slane %v7732_v49, 4  ;;  %v11248_v49 = vld [vmem:[%s17327_s0 + $0x54] sm:$0xf] }
 0x169   :  { %v15592_v58 = vsel %vm13948_vm5, %v2576_v27, %v2577_v50  ;;  %v10589_v4 = vrot.slane %v2304_v21, 9  ;;  %v7761_v41 = vrot.slane %v7759_v60, 5  ;;  %v2584_v24 = vrot.slane %v2306_v57, 5  ;;  %v13482_v60 = vld [vmem:[%s17328_s1 + $0x208] sm:$0xff]  }
 0x16a   :  { %v7751_v19 = vrot.slane %v7749_v53, 5  ;;  %v7738_v63 = vsel %vm13668_vm2, %v7733_v39, %v7737_v29  ;;  %v10636_v2 = vcombine.low %v15577_v40, %v15592_v58  ;;  %v7777_v28 = vshrl.u32 %v11246_v8, 16  ;;  %v11250_v39 = vld [vmem:[%s17327_s0 + $0x5c] sm:$0x1] }
 0x16b   :  { %12175 = vmatmul.mubr.bf16.gmra.mrb[20].mxu1 %v10628_v5  ;;  %v11242_v5 = vld [vmem:[%s17327_s0 + $0x3c] sm:$0xf] }
 0x16c   :  { %12178 = vmatprep.mubr.bf16.mxu1 %v10629_v16  ;;  %v7722_v16 = vor.u32 %v7721_v13, %v7718_v12  ;;  %v7740_v51 = vshrl.u32 %v11242_v5, 16  ;;  %v7743_v46 = vshll.u32 %v11242_v5, 16  ;;  %v2583_v5 = vrot.slane %v2581_v55, 4 }
 0x16d   :  { %12531 = vmatmul.mubr.bf16.gmra.mrb[56].mxu0 %v13475_v54  ;;  %v7753_v54 = vshrl.u32 %v11243_v47, 16  ;;  %v7773_v47 = vshll.u32 %v11246_v8, 16  ;;  %v7779_v27 = vrot.slane %v7777_v28, 4 }
 0x16e   :  { %12534 = vmatprep.mubr.bf16.mxu0 %v13476_v61  ;;  %v7723_v45 = vrot.slane %v7722_v16, 4  ;;  %v7742_v36 = vrot.slane %v7740_v51, 4  ;;  %v7745_v59 = vrot.slane %v7743_v46, 5  ;;  %v11245_v61 = vld [vmem:[%s17327_s0 + $0x48] sm:$0xf]  ;;  %v15628_v31 = vsel %vm13948_vm5, %v2583_v5, %v2584_v24 }
 0x16f   :  { %v7755_v11 = vrot.slane %v7753_v54, 4  ;;  %v7764_v25 = vshrl.u32 %v11245_v61, 16  ;;  %v7775_v42 = vrot.slane %v7773_v47, 5  ;;  %v11249_v46 = vld [vmem:[%s17327_s0 + $0x58] sm:$0xf] }
 0x170   :  { %v7728_v23 = vsel %vm13668_vm2, %v7723_v45, %v7727_v3  ;;  %v7746_v13 = vor.u32 %v7745_v59, %v7742_v36  ;;  %v7767_v3 = vshll.u32 %v11245_v61, 16  ;;  %v2309_v45 = vld [vmem:[%s17327_s0 + $0x11c] sm:$0x1]  ;;  %v7788_v59 = vshrl.u32 %v11248_v49, 16 }
 0x171   :  { %v11347_v12 = vcombine.low %v7728_v23, %v7738_v63  ;;  %v7756_v18 = vor.u32 %v7755_v11, %v7751_v19  ;;  %v7766_v16 = vrot.slane %v7764_v25, 4  ;;  %v2588_v23 = vrot.slane %v2308_v34, 5  ;;  %v2311_v63 = vld [vmem:[%s17327_s0 + $0x124] sm:$0xf] }
 0x172   :  { %v7747_v48 = vrot.slane %v7746_v13, 4  ;;  %v7769_v62 = vrot.slane %v7767_v3, 5  ;;  %v7780_v54 = vor.u32 %v7779_v27, %v7775_v42  ;;  %v2591_v57 = vrot.slane %v2309_v45, 5  ;;  %v11252_v3 = vld [vmem:[%s17327_s0 + $0x64] sm:$0xf] }
 0x173   :  { %12179 = vmatmul.mubr.bf16.gmra.mrb[24].mxu1 %v10630_v33  ;;  %v11247_v33 = vld [vmem:[%s17327_s0 + $0x50] sm:$0x1]  ;;  %v7757_v10 = vrot.slane %v7756_v18, 4  ;;  %v2590_v22 = vrot.slane %v2588_v23, 4  ;;  %v7797_v61 = vshll.u32 %v11249_v46, 16  ;;  %v7790_v8 = vrot.slane %v7788_v59, 4 }
 0x174   :  { %12182 = vmatprep.mubr.bf16.mxu1 %v10631_v20  ;;  %v15622_v20 = vsel %vm13948_vm5, %v10589_v4, %v2581_v55  ;;  %v7752_v29 = vsel %vm13668_vm2, %v7747_v48, %v7751_v19  ;;  %v7770_v21 = vor.u32 %v7769_v62, %v7766_v16  ;;  %v2310_v19 = vld [vmem:[%s17327_s0 + $0x120] sm:$0xe]  ;;  %v7781_v4 = vrot.slane %v7780_v54, 4  ;;  %v2315_v27 = vld [vmem:[%s17327_s0 + $0x134] sm:$0x1] }
 0x175   :  { %12535 = vmatmul.mubr.bf16.gmra.mrb[60].mxu0 %v13477_v14  ;;  %v7762_v50 = vsel %vm13668_vm2, %v7757_v10, %v7761_v41  ;;  %v10637_v51 = vcombine.low %v15622_v20, %v15628_v31  ;;  %v10590_v14 = vrot.slane %v2307_v6, 9  ;;  %v7801_v15 = vshrl.u32 %v11249_v46, 16  ;;  %v13484_v6 = vld [vmem:[%s17328_s1 + $0x210] sm:$0xff]   ;;  %v11253_v10 = vld [vmem:[%s17327_s0 + $0x68] sm:$0x1]  ;;  %v13486_v46 = vld [vmem:[%s17328_s1 + $0x218] sm:$0xff]  }
 0x176   :  { %12554 = vmatprep.mubr.bf16.mxu0 %v15518_v1  ;;  %v7783_v1 = vshll.u32 %v11247_v33, 16  ;;  %v15643_v53 = vcombine.low %v7752_v29, %v7762_v50  ;;  %v7771_v36 = vrot.slane %v7770_v21, 4  ;;  %v15678_v13 = vsel %vm13948_vm5, %v2590_v22, %v2591_v57  ;;  %v11251_v33 = vld [vmem:[%s17327_s0 + $0x60] sm:$0xf] }
 0x177   :  { %v15662_v35 = vsel %vm13948_vm5, %v10590_v14, %v2588_v23  ;;  %v7799_v41 = vrot.slane %v7797_v61, 5  ;;  %v7807_v55 = vshll.u32 %v11250_v39, 16  ;;  %v7803_v24 = vrot.slane %v7801_v15, 4  ;;  %v13491_v15 = vld [vmem:[%s17328_s1 + $0x220] sm:$0xff]  }
 0x178   :  { %v7785_v52 = vrot.slane %v7783_v1, 5  ;;  %v7776_v11 = vsel %vm13668_vm2, %v7771_v36, %v7775_v42  ;;  %v10591_v25 = vrot.slane %v2310_v19, 9  ;;  %v2595_v47 = vrot.slane %v2311_v63, 5  ;;  %v2313_v42 = vld [vmem:[%s17327_s0 + $0x12c] sm:$0xe] }
 0x179   :  { %v7809_v5 = vrot.slane %v7807_v55, 5  ;;  %v7804_v16 = vor.u32 %v7803_v24, %v7799_v41  ;;  %v2598_v62 = vrot.slane %v2312_v38, 5  ;;  %v7812_v28 = vshrl.u32 %v11251_v33, 16  ;;  %v2314_v1 = vld [vmem:[%s17327_s0 + $0x130] sm:$0xf] }
 0x17a   :  { %v7786_v18 = vsel %vm13668_vm2, %v7781_v4, %v7785_v52  ;;  %v7815_v29 = vshll.u32 %v11251_v33, 16  ;;  %v2597_v50 = vrot.slane %v2595_v47, 4  ;;  %v7821_v21 = vshll.u32 %v11252_v3, 16  ;;  %v2317_v55 = vld [vmem:[%s17327_s0 + $0x13c] sm:$0xf] }
 0x17b   :  { %12183 = vmatmul.mubr.bf16.gmra.mrb[28].mxu1 %v10632_v56  ;;  %v7791_v56 = vshll.u32 %v11248_v49, 16  ;;  %v11349_v34 = vcombine.low %v7776_v11, %v7786_v18  ;;  %v15704_v49 = vsel %vm13948_vm5, %v10591_v25, %v2595_v47  ;;  %v7805_v52 = vrot.slane %v7804_v16, 4  ;;  %v11257_v47 = vld [vmem:[%s17327_s0 + $0x78] sm:$0xf] }
 0x17c   :  { %12186 = vmatprep.mubr.bf16.mxu1 %v10633_v7  ;;  %v13526_v7 = vld [vmem:[%s17328_s1 + $0x200] sm:$0xff]   ;;  %v7814_v14 = vrot.slane %v7812_v28, 4  ;;  %v7817_v23 = vrot.slane %v7815_v29, 5  ;;  %v7825_v39 = vshrl.u32 %v11252_v3, 16  ;;  %v15722_v54 = vsel %vm13948_vm5, %v2597_v50, %v2598_v62 }
 0x17d   :  { %12555 = vmatmul.mubr.bf16.vlgmr.msra.gmra.mrb[0].mxu0 %v15570_v17  ;;  %v7793_v17 = vrot.slane %v7791_v56, 5  ;;  %v7823_v57 = vrot.slane %v7821_v21, 5  ;;  %v7831_v59 = vshll.u32 %v11253_v10, 16  ;;  %v7810_v30 = vsel %vm13668_vm2, %v7805_v52, %v7809_v5  ;;  %v2318_v3 = vld [vmem:[%s17327_s0 + $0x140] sm:$0x1]  ;;  %v13496_v10 = vld [vmem:[%s17328_s1 + $0x228] sm:$0xff]  }
 0x17e   :  { %12558 = vmatprep.mubr.bf16.mxu0 %v11347_v12  ;;  %12619 = vmatpush3.bf16.msra.mxu0 %v13526_v7  ;;  %v10638_v12 = vcombine.low %v15662_v35, %v15678_v13  ;;  %v7818_v0 = vor.u32 %v7817_v23, %v7814_v14  ;;  %v7827_v26 = vrot.slane %v7825_v39, 4  ;;  %v10592_v22 = vrot.slane %v2313_v42, 9  ;;  %v11258_v42 = vld [vmem:[%s17327_s0 + $0x7c] sm:$0xf]  ;;  %v11259_v21 = vld [vmem:[%s17327_s0 + $0x80] sm:$0x1] }
 0x17f   :  { %12620 = vmatprep.subr.bf16.mxu0 %v13482_v60  ;;  %v7794_v48 = vor.u32 %v7793_v17, %v7790_v8  ;;  %v2602_v56 = vrot.slane %v2314_v1, 5  ;;  %v2605_v11 = vrot.slane %v2315_v27, 5  ;;  %v7836_v4 = vshrl.u32 %v11254_v9, 16  ;;  %v2316_v8 = vld [vmem:[%s17327_s0 + $0x138] sm:$0xe]  ;;  %v13501_v23 = vld [vmem:[%s17328_s1 + $0x230] sm:$0xff]  }
 0x180   :  { %v7819_v61 = vrot.slane %v7818_v0, 4  ;;  %v7828_v63 = vor.u32 %v7827_v26, %v7823_v57  ;;  %v7839_v17 = vshll.u32 %v11254_v9, 16  ;;  %v10593_v29 = vrot.slane %v2316_v8, 9  ;;  %v2320_v9 = vld [vmem:[%s17327_s0 + $0x148] sm:$0xf] }
 0x181   :  { %v7795_v45 = vrot.slane %v7794_v48, 4  ;;  %v15746_v38 = vsel %vm13948_vm5, %v10592_v22, %v2602_v56  ;;  %v2604_v7 = vrot.slane %v2602_v56, 4  ;;  %v7838_v24 = vrot.slane %v7836_v4, 4 }
 0x182   :  { %12621 = vmatpush3.bf16.msra.mxu0 %v13482_v60  ;;  %v7833_v60 = vrot.slane %v7831_v59, 5  ;;  %v7824_v33 = vsel %vm13668_vm2, %v7819_v61, %v7823_v57  ;;  %v7829_v18 = vrot.slane %v7828_v63, 4  ;;  %v2612_v50 = vrot.slane %v2318_v3, 5  ;;  %v11261_v63 = vld [vmem:[%s17327_s0 + $0x88] sm:$0xf] }
 0x183   :  { %12187 = vmatmul.mubr.bf16.gmra.mrb[32].mxu1 %v10634_v44  ;;  %12622 = vmatprep.subr.bf16.mxu0 %v13484_v6  ;;  %v7800_v36 = vsel %vm13668_vm2, %v7795_v45, %v7799_v41  ;;  %v10639_v44 = vcombine.low %v15704_v49, %v15722_v54  ;;  %v7860_v27 = vshrl.u32 %v11257_v47, 16  ;;  %v7869_v31 = vshll.u32 %v11258_v42, 16  ;;  %v2323_v3 = vld [vmem:[%s17327_s0 + $0x154] sm:$0xf]  ;;  %v2324_v49 = vld [vmem:[%s17327_s0 + $0x158] sm:$0x1] }
 0x184   :  { %12190 = vmatprep.mubr.bf16.mxu1 %v10635_v32  ;;  %v11255_v32 = vld [vmem:[%s17327_s0 + $0x70] sm:$0xf]  ;;  %v11350_v19 = vcombine.low %v7800_v36, %v7810_v30  ;;  %v7834_v16 = vsel %vm13668_vm2, %v7829_v18, %v7833_v60  ;;  %v7873_v59 = vshrl.u32 %v11258_v42, 16  ;;  %v11260_v60 = vld [vmem:[%s17327_s0 + $0x84] sm:$0xf] }
 0x185   :  { %12559 = vmatmul.mubr.bf16.gmra.mrb[4].mxu0 %v15643_v53  ;;  %v11256_v53 = vld [vmem:[%s17327_s0 + $0x74] sm:$0x1]  ;;  %v7845_v41 = vshll.u32 %v11255_v32, 16  ;;  %v7849_v25 = vshrl.u32 %v11255_v32, 16  ;;  %v11351_v1 = vcombine.low %v7824_v33, %v7834_v16  ;;  %v7862_v36 = vrot.slane %v7860_v27, 4 }
 0x186   :  { %12562 = vmatprep.mubr.bf16.mxu0 %v11349_v34  ;;  %12623 = vmatpush3.bf16.msra.mxu0 %v13484_v6  ;;  %v15758_v6 = vsel %vm13948_vm5, %v2604_v7, %v2605_v11  ;;  %v7841_v34 = vrot.slane %v7839_v17, 5  ;;  %v7855_v5 = vshll.u32 %v11256_v53, 16  ;;  %v7871_v26 = vrot.slane %v7869_v31, 5  ;;  %v11262_v7 = vld [vmem:[%s17327_s0 + $0x8c] sm:$0x1] }
 0x187   :  { %12624 = vmatprep.subr.bf16.mxu0 %v13486_v46  ;;  %v7847_v48 = vrot.slane %v7845_v41, 5  ;;  %v10640_v62 = vcombine.low %v15746_v38, %v15758_v6  ;;  %v7851_v28 = vrot.slane %v7849_v25, 4  ;;  %v7879_v32 = vshll.u32 %v11259_v21, 16  ;;  %v2322_v18 = vld [vmem:[%s17327_s0 + $0x150] sm:$0xe] }
 0x188   :  { %v7842_v40 = vor.u32 %v7841_v34, %v7838_v24  ;;  %v7857_v58 = vrot.slane %v7855_v5, 5  ;;  %v7875_v61 = vrot.slane %v7873_v59, 4  ;;  %v7884_v33 = vshrl.u32 %v11260_v60, 16  ;;  %v13506_v24 = vld [vmem:[%s17328_s1 + $0x238] sm:$0xff]  }
 0x189   :  { %v7852_v45 = vor.u32 %v7851_v28, %v7847_v48  ;;  %v7881_v4 = vrot.slane %v7879_v32, 5  ;;  %v7893_v25 = vshll.u32 %v11261_v63, 16  ;;  %v7903_v16 = vshll.u32 %v11262_v7, 16  ;;  %v11263_v28 = vld [vmem:[%s17327_s0 + $0x90] sm:$0xf] }
 0x18a   :  { %12625 = vmatpush3.bf16.msra.mxu0 %v13486_v46  ;;  %v7863_v46 = vshll.u32 %v11257_v47, 16  ;;  %v7843_v52 = vrot.slane %v7842_v40, 4  ;;  %v7876_v41 = vor.u32 %v7875_v61, %v7871_v26  ;;  %v7886_v5 = vrot.slane %v7884_v33, 4  ;;  %v2326_v32 = vld [vmem:[%s17327_s0 + $0x160] sm:$0xf] }
 0x18b   :  { %12191 = vmatmul.mubr.bf16.gmra.mrb[36].mxu1 %v10636_v2  ;;  %12626 = vmatprep.subr.bf16.mxu0 %v13491_v15  ;;  %v2609_v2 = vrot.slane %v2317_v55, 5  ;;  %v7853_v39 = vrot.slane %v7852_v45, 4  ;;  %v7897_v47 = vshrl.u32 %v11261_v63, 16  ;;  %v10595_v40 = vrot.slane %v2322_v18, 9  ;;  %v11267_v61 = vld [vmem:[%s17327_s0 + $0xa0] sm:$0xf] }
 0x18c   :  { %12194 = vmatprep.mubr.bf16.mxu1 %v10637_v51  ;;  %v2319_v51 = vld [vmem:[%s17327_s0 + $0x144] sm:$0xe]  ;;  %v7865_v57 = vrot.slane %v7863_v46, 5  ;;  %v7848_v30 = vsel %vm13668_vm2, %v7843_v52, %v7847_v48  ;;  %v7877_v48 = vrot.slane %v7876_v41, 4  ;;  %v2623_v21 = vrot.slane %v2323_v3, 5 }
 0x18d   :  { %12563 = vmatmul.mubr.bf16.gmra.mrb[8].mxu0 %v11350_v19  ;;  %v15784_v14 = vsel %vm13948_vm5, %v10593_v29, %v2609_v2  ;;  %v2611_v20 = vrot.slane %v2609_v2, 4  ;;  %v2321_v19 = vld [vmem:[%s17327_s0 + $0x14c] sm:$0x1]  ;;  %v7858_v22 = vsel %vm13668_vm2, %v7853_v39, %v7857_v58  ;;  %v10594_v8 = vrot.slane %v2319_v51, 9  ;;  %v11264_v58 = vld [vmem:[%s17327_s0 + $0x94] sm:$0xf] }
 0x18e   :  { %12566 = vmatprep.mubr.bf16.mxu0 %v11351_v1  ;;  %12627 = vmatpush3.bf16.msra.mxu0 %v13491_v15  ;;  %v7866_v53 = vor.u32 %v7865_v57, %v7862_v36  ;;  %v11352_v11 = vcombine.low %v7848_v30, %v7858_v22  ;;  %v2616_v15 = vrot.slane %v2320_v9, 5  ;;  %v2619_v55 = vrot.slane %v2321_v19, 5  ;;  %v11265_v52 = vld [vmem:[%s17327_s0 + $0x98] sm:$0x1]  ;;  %v2325_v57 = vld [vmem:[%s17327_s0 + $0x15c] sm:$0xe] }
 0x18f   :  { %12628 = vmatprep.subr.bf16.mxu0 %v13496_v10  ;;  %v15799_v0 = vsel %vm13948_vm5, %v2611_v20, %v2612_v50  ;;  %v7882_v29 = vsel %vm13668_vm2, %v7877_v48, %v7881_v4  ;;  %v7899_v1 = vrot.slane %v7897_v47, 4  ;;  %v7905_v50 = vrot.slane %v7903_v16, 5  ;;  %v11266_v22 = vld [vmem:[%s17327_s0 + $0x9c] sm:$0xf]  ;;  %v11268_v63 = vld [vmem:[%s17327_s0 + $0xa4] sm:$0x1] }
 0x190   :  { %v10641_v56 = vcombine.low %v15784_v14, %v15799_v0  ;;  %v7867_v17 = vrot.slane %v7866_v53, 4  ;;  %v15831_v35 = vsel %vm13948_vm5, %v10594_v8, %v2616_v15  ;;  %v2618_v13 = vrot.slane %v2616_v15, 4  ;;  %v2328_v7 = vld [vmem:[%s17327_s0 + $0x168] sm:$0xe]  ;;  %v2329_v18 = vld [vmem:[%s17327_s0 + $0x16c] sm:$0xf] }
 0x191   :  { %v2626_v46 = vrot.slane %v2324_v49, 5  ;;  %v7908_v20 = vshrl.u32 %v11263_v28, 16  ;;  %v7911_v31 = vshll.u32 %v11263_v28, 16  ;;  %v2625_v39 = vrot.slane %v2623_v21, 4  ;;  %v2330_v3 = vld [vmem:[%s17327_s0 + $0x170] sm:$0x1] }
 0x192   :  { %12629 = vmatpush3.bf16.msra.mxu0 %v13496_v10  ;;  %v7872_v34 = vsel %vm13668_vm2, %v7867_v17, %v7871_v26  ;;  %v15843_v54 = vsel %vm13948_vm5, %v2618_v13, %v2619_v55  ;;  %v7895_v10 = vrot.slane %v7893_v25, 5  ;;  %v7917_v36 = vshll.u32 %v11264_v58, 16  ;;  %v11269_v28 = vld [vmem:[%s17327_s0 + $0xa8] sm:$0xf] }
 0x193   :  { %12195 = vmatmul.mubr.bf16.gmra.mrb[40].mxu1 %v10638_v12  ;;  %12630 = vmatprep.subr.bf16.mxu0 %v13501_v23  ;;  %v7887_v12 = vshll.u32 %v11260_v60, 16  ;;  %v10642_v42 = vcombine.low %v15831_v35, %v15843_v54  ;;  %v11353_v2 = vcombine.low %v7872_v34, %v7882_v29  ;;  %v7910_v9 = vrot.slane %v7908_v20, 4  ;;  %v11271_v35 = vld [vmem:[%s17327_s0 + $0xb0] sm:$0x1] }
 0x194   :  { %12198 = vmatprep.mubr.bf16.mxu1 %v10639_v44  ;;  %v7900_v27 = vor.u32 %v7899_v1, %v7895_v10  ;;  %v7913_v30 = vrot.slane %v7911_v31, 5  ;;  %v7921_v26 = vshrl.u32 %v11264_v58, 16  ;;  %v2627_v60 = vsel %vm13948_vm5, %v2625_v39, %v2626_v46  ;;  %v2331_v39 = vld [vmem:[%s17327_s0 + $0x174] sm:$0xe] }
 0x195   :  { %12567 = vmatmul.mubr.bf16.gmra.mrb[12].mxu0 %v11352_v11  ;;  %v7889_v44 = vrot.slane %v7887_v12, 5  ;;  %v7919_v38 = vrot.slane %v7917_v36, 5  ;;  %v7927_v6 = vshll.u32 %v11265_v52, 16  ;;  %v10596_v8 = vrot.slane %v2325_v57, 9 }
 0x196   :  { %12631 = vmatpush3.bf16.msra.mxu0 %v13501_v23  ;;  %12570 = vmatprep.mubr.bf16.mxu0 %v11353_v2  ;;  %v2624_v23 = vsel %vm13948_vm5, %v10595_v40, %v2623_v21  ;;  %v7901_v59 = vrot.slane %v7900_v27, 4  ;;  %v7923_v53 = vrot.slane %v7921_v26, 4  ;;  %v2630_v15 = vrot.slane %v2326_v32, 5  ;;  %v11270_v2 = vld [vmem:[%s17327_s0 + $0xac] sm:$0xf] }
 0x197   :  { %12632 = vmatprep.subr.bf16.mxu0 %v13506_v24  ;;  %v7890_v45 = vor.u32 %v7889_v44, %v7886_v5  ;;  %v10643_v0 = vcombine.low %v2624_v23, %v2627_v60  ;;  %v7929_v4 = vrot.slane %v7927_v6, 5  ;;  %v7932_v33 = vshrl.u32 %v11266_v22, 16  ;;  %v11272_v6 = vld [vmem:[%s17327_s0 + $0xb4] sm:$0xf] }
 0x198   :  { %v7906_v14 = vsel %vm13668_vm2, %v7901_v59, %v7905_v50  ;;  %v7924_v41 = vor.u32 %v7923_v53, %v7919_v38  ;;  %v2632_v13 = vrot.slane %v2630_v15, 4  ;;  %v7935_v12 = vshll.u32 %v11266_v22, 16  ;;  %v11274_v53 = vld [vmem:[%s17327_s0 + $0xbc] sm:$0x1] }
 0x199   :  { %v7891_v51 = vrot.slane %v7890_v45, 4  ;;  %v7941_v25 = vshll.u32 %v11267_v61, 16  ;;  %v7934_v5 = vrot.slane %v7932_v33, 4  ;;  %v7945_v47 = vshrl.u32 %v11267_v61, 16 }
 0x19a   :  { %12633 = vmatpush3.bf16.msra.mxu0 %v13506_v24  ;;  %v2631_v24 = vsel %vm13948_vm5, %v10596_v8, %v2630_v15  ;;  %v7925_v48 = vrot.slane %v7924_v41, 4  ;;  %v7937_v44 = vrot.slane %v7935_v12, 5  ;;  %v7951_v16 = vshll.u32 %v11268_v63, 16  ;;  %v2334_v8 = vld [vmem:[%s17327_s0 + $0x180] sm:$0xe] }
 0x19b   :  { %12199 = vmatmul.mubr.bf16.gmra.mrb[44].mxu1 %v10640_v62  ;;  %v7896_v19 = vsel %vm13668_vm2, %v7891_v51, %v7895_v10  ;;  %v2327_v62 = vld [vmem:[%s17327_s0 + $0x164] sm:$0x1]  ;;  %v7943_v10 = vrot.slane %v7941_v25, 5  ;;  %v7947_v40 = vrot.slane %v7945_v47, 4  ;;  %v10597_v58 = vrot.slane %v2328_v7, 9 }
 0x19c   :  { %12202 = vmatprep.mubr.bf16.mxu1 %v10641_v56  ;;  %v7914_v56 = vor.u32 %v7913_v30, %v7910_v9  ;;  %v11354_v11 = vcombine.low %v7896_v19, %v7906_v14  ;;  %v2633_v55 = vrot.slane %v2327_v62, 5  ;;  %v7930_v29 = vsel %vm13668_vm2, %v7925_v48, %v7929_v4  ;;  %v2332_v30 = vld [vmem:[%s17327_s0 + $0x178] sm:$0xf]  ;;  %v2336_v12 = vld [vmem:[%s17327_s0 + $0x188] sm:$0x1] }
 0x19d   :  { %v7938_v50 = vor.u32 %v7937_v44, %v7934_v5  ;;  %v7953_v21 = vrot.slane %v7951_v16, 5  ;;  %v2637_v27 = vrot.slane %v2329_v18, 5  ;;  %v7948_v46 = vor.u32 %v7947_v40, %v7943_v10  ;;  %v11275_v25 = vld [vmem:[%s17327_s0 + $0xc0] sm:$0xf]  ;;  %v11276_v47 = vld [vmem:[%s17327_s0 + $0xc4] sm:$0xf] }
 0x19e   :  { %v7915_v17 = vrot.slane %v7914_v56, 4  ;;  %12571 = vmatmul.mubr.bf16.gmra.mrb[16].mxu0 %v11354_v11  ;;  %v2634_v49 = vsel %vm13948_vm5, %v2632_v13, %v2633_v55  ;;  %v2640_v52 = vrot.slane %v2330_v3, 5  ;;  %v7956_v54 = vshrl.u32 %v11269_v28, 16  ;;  %v11273_v56 = vld [vmem:[%s17327_s0 + $0xb8] sm:$0xf] }
 0x19f   :  { %v10644_v1 = vcombine.low %v2631_v24, %v2634_v49  ;;  %v7939_v20 = vrot.slane %v7938_v50, 4  ;;  %v2638_v31 = vsel %vm13948_vm5, %v10597_v58, %v2637_v27  ;;  %v2639_v51 = vrot.slane %v2637_v27, 4  ;;  %v2335_v55 = vld [vmem:[%s17327_s0 + $0x184] sm:$0xf] }
 0x1a0   :  { %v7920_v34 = vsel %vm13668_vm2, %v7915_v17, %v7919_v38  ;;  %v7965_v23 = vshll.u32 %v11270_v2, 16  ;;  %v7949_v36 = vrot.slane %v7948_v46, 4  ;;  %v7958_v57 = vrot.slane %v7956_v54, 4  ;;  %v2333_v38 = vld [vmem:[%s17327_s0 + $0x17c] sm:$0x1] }
 0x1a1   :  { %v11355_v45 = vcombine.low %v7920_v34, %v7930_v29  ;;  %v7969_v9 = vshrl.u32 %v11270_v2, 16  ;;  %v7944_v26 = vsel %vm13668_vm2, %v7939_v20, %v7943_v10  ;;  %v2641_v32 = vsel %vm13948_vm5, %v2639_v51, %v2640_v52  ;;  %v2337_v54 = vld [vmem:[%s17327_s0 + $0x18c] sm:$0xe] }
 0x1a2   :  { %v7967_v19 = vrot.slane %v7965_v23, 5  ;;  %v7975_v60 = vshll.u32 %v11271_v35, 16  ;;  %v7954_v62 = vsel %vm13668_vm2, %v7949_v36, %v7953_v21  ;;  %v10645_v22 = vcombine.low %v2638_v31, %v2641_v32  ;;  %v11277_v21 = vld [vmem:[%s17327_s0 + $0xc8] sm:$0x1] }
 0x1a3   :  { %12203 = vmatmul.mubr.bf16.gmra.mrb[48].mxu1 %v10642_v42  ;;  %v7959_v42 = vshll.u32 %v11269_v28, 16  ;;  %12574 = vmatprep.mubr.bf16.mxu0 %v11355_v45  ;;  %v11356_v61 = vcombine.low %v7944_v26, %v7954_v62  ;;  %v10598_v11 = vrot.slane %v2331_v39, 9  ;;  %v2644_v4 = vrot.slane %v2332_v30, 5  ;;  %v2339_v39 = vld [vmem:[%s17327_s0 + $0x194] sm:$0x1] }
 0x1a4   :  { %12206 = vmatprep.mubr.bf16.mxu1 %v10643_v0  ;;  %v7971_v0 = vrot.slane %v7969_v9, 4  ;;  %v7977_v63 = vrot.slane %v7975_v60, 5  ;;  %v2647_v17 = vrot.slane %v2333_v38, 5  ;;  %v7980_v41 = vshrl.u32 %v11272_v6, 16  ;;  %v11278_v60 = vld [vmem:[%s17327_s0 + $0xcc] sm:$0xf] }
 0x1a5   :  { %v7961_v59 = vrot.slane %v7959_v42, 5  ;;  %v2645_v33 = vsel %vm13948_vm5, %v10598_v11, %v2644_v4  ;;  %v2646_v18 = vrot.slane %v2644_v4, 4  ;;  %v7983_v24 = vshll.u32 %v11272_v6, 16  ;;  %v2338_v42 = vld [vmem:[%s17327_s0 + $0x190] sm:$0xf] }
 0x1a6   :  { %v7972_v7 = vor.u32 %v7971_v0, %v7967_v19  ;;  %12575 = vmatmul.mubr.bf16.gmra.mrb[20].mxu0 %v11356_v61  ;;  %v7989_v13 = vshll.u32 %v11273_v56, 16  ;;  %v7982_v48 = vrot.slane %v7980_v41, 4  ;;  %v7993_v5 = vshrl.u32 %v11273_v56, 16  ;;  %v11279_v38 = vld [vmem:[%s17327_s0 + $0xd0] sm:$0xf] }
 0x1a7   :  { %v7962_v14 = vor.u32 %v7961_v59, %v7958_v57  ;;  %v2648_v49 = vsel %vm13948_vm5, %v2646_v18, %v2647_v17  ;;  %v7985_v44 = vrot.slane %v7983_v24, 5  ;;  %v7999_v16 = vshll.u32 %v11274_v53, 16  ;;  %v11280_v0 = vld [vmem:[%s17327_s0 + $0xd4] sm:$0x1] }
 0x1a8   :  { %v7973_v34 = vrot.slane %v7972_v7, 4  ;;  %v7991_v10 = vrot.slane %v7989_v13, 5  ;;  %v10646_v29 = vcombine.low %v2645_v33, %v2648_v49  ;;  %v10599_v40 = vrot.slane %v2334_v8, 9  ;;  %v11281_v7 = vld [vmem:[%s17327_s0 + $0xf0] sm:$0xf] }
 0x1a9   :  { %v7963_v15 = vrot.slane %v7962_v14, 4  ;;  %v7986_v2 = vor.u32 %v7985_v44, %v7982_v48  ;;  %v8001_v45 = vrot.slane %v7999_v16, 5  ;;  %v2651_v50 = vrot.slane %v2335_v55, 5  ;;  %v11282_v18 = vld [vmem:[%s17327_s0 + $0xf4] sm:$0xf]  ;;  %v13487_v49 = vld [vmem:[%s17327_s0 + $0xc] sm:$0xff]  }
 0x1aa   :  { %v7978_v28 = vsel %vm13668_vm2, %v7973_v34, %v7977_v63  ;;  %v2654_v46 = vrot.slane %v2336_v12, 5  ;;  %v8004_v52 = vshrl.u32 %v11275_v25, 16  ;;  %v8007_v35 = vshll.u32 %v11275_v25, 16 }
 0x1ab   :  { %12207 = vmatmul.mubr.bf16.gmra.mrb[52].mxu1 %v10644_v1  ;;  %v7968_v3 = vsel %vm13668_vm2, %v7963_v15, %v7967_v19  ;;  %v7995_v1 = vrot.slane %v7993_v5, 4  ;;  %v7987_v20 = vrot.slane %v7986_v2, 4  ;;  %v2652_v31 = vsel %vm13948_vm5, %v10599_v40, %v2651_v50 }
 0x1ac   :  { %12210 = vmatprep.mubr.bf16.mxu1 %v10645_v22  ;;  %v11357_v58 = vcombine.low %v7968_v3, %v7978_v28  ;;  %v2653_v51 = vrot.slane %v2651_v50, 4  ;;  %v8013_v23 = vshll.u32 %v11276_v47, 16  ;;  %v8006_v57 = vrot.slane %v8004_v52, 4  ;;  %v11283_v3 = vld [vmem:[%s17327_s0 + $0xf8] sm:$0x1] }
 0x1ad   :  { %v7996_v27 = vor.u32 %v7995_v1, %v7991_v10  ;;  %v8009_v59 = vrot.slane %v8007_v35, 5  ;;  %v8017_v9 = vshrl.u32 %v11276_v47, 16  ;;  %v7992_v30 = vsel %vm13668_vm2, %v7987_v20, %v7991_v10  ;;  %v11286_v52 = vld [vmem:[%s17327_s0 + $0x104] sm:$0x1] }
 0x1ae   :  { %12578 = vmatprep.mubr.bf16.mxu0 %v11357_v58  ;;  %v2655_v26 = vsel %vm13948_vm5, %v2653_v51, %v2654_v46  ;;  %v8015_v32 = vrot.slane %v8013_v23, 5  ;;  %v8023_v19 = vshll.u32 %v11277_v21, 16  ;;  %v10600_v61 = vrot.slane %v2337_v54, 9 }
 0x1af   :  { %v7997_v36 = vrot.slane %v7996_v27, 4  ;;  %v10647_v62 = vcombine.low %v2652_v31, %v2655_v26  ;;  %v8010_v22 = vor.u32 %v8009_v59, %v8006_v57  ;;  %v8019_v14 = vrot.slane %v8017_v9, 4 }
 0x1b0   :  { %v8025_v53 = vrot.slane %v8023_v19, 5  ;;  %v2658_v63 = vrot.slane %v2338_v42, 5  ;;  %v2661_v8 = vrot.slane %v2339_v39, 5  ;;  %v8028_v15 = vshrl.u32 %v11278_v60, 16  ;;  %v13488_v19 = vld [vmem:[%s17327_s0 + $0x18] sm:$0xff]  }
 0x1b1   :  { %v8002_v6 = vsel %vm13668_vm2, %v7997_v36, %v8001_v45  ;;  %v8011_v11 = vrot.slane %v8010_v22, 4  ;;  %v8020_v4 = vor.u32 %v8019_v14, %v8015_v32  ;;  %v8031_v55 = vshll.u32 %v11278_v60, 16  ;;  %v11285_v45 = vld [vmem:[%s17327_s0 + $0x100] sm:$0xf] }
 0x1b2   :  { %v11358_v56 = vcombine.low %v7992_v30, %v8002_v6  ;;  %v2659_v17 = vsel %vm13948_vm5, %v10600_v61, %v2658_v63  ;;  %v2660_v41 = vrot.slane %v2658_v63, 4  ;;  %v8037_v33 = vshll.u32 %v11279_v38, 16  ;;  %v11287_v30 = vld [vmem:[%s17327_s0 + $0x108] sm:$0xf]  ;;  %v11288_v6 = vld [vmem:[%s17327_s0 + $0x10c] sm:$0xf] }
 0x1b3   :  { %12211 = vmatmul.mubr.bf16.gmra.mrb[56].mxu1 %v10646_v29  ;;  %v8016_v24 = vsel %vm13668_vm2, %v8011_v11, %v8015_v32  ;;  %v8021_v13 = vrot.slane %v8020_v4, 4  ;;  %v8030_v12 = vrot.slane %v8028_v15, 4  ;;  %v8041_v25 = vshrl.u32 %v11279_v38, 16  ;;  %v11284_v29 = vld [vmem:[%s17327_s0 + $0xfc] sm:$0xf] }
 0x1b4   :  { %12214 = vmatprep.mubr.bf16.mxu1 %v10647_v62  ;;  %12579 = vmatmul.mubr.bf16.gmra.mrb[24].mxu0 %v11358_v56  ;;  %v2662_v34 = vsel %vm13948_vm5, %v2660_v41, %v2661_v8  ;;  %v8033_v48 = vrot.slane %v8031_v55, 5  ;;  %v8039_v5 = vrot.slane %v8037_v33, 5  ;;  %v8047_v47 = vshll.u32 %v11280_v0, 16  ;;  %v13489_v56 = vld [vmem:[%s17327_s0 + $0x24] sm:$0xff]   ;;  %v11290_v41 = vld [vmem:[%s17327_s0 + $0x114] sm:$0xf] }
 0x1b5   :  { %v8026_v44 = vsel %vm13668_vm2, %v8021_v13, %v8025_v53  ;;  %v10648_v10 = vcombine.low %v2659_v17, %v2662_v34  ;;  %v8043_v16 = vrot.slane %v8041_v25, 4  ;;  %v8052_v28 = vshrl.u32 %v11281_v7, 16  ;;  %v11289_v53 = vld [vmem:[%s17327_s0 + $0x110] sm:$0x1]  ;;  %v13527_v25 = vld [vmem:[%s17328_s1 + $0x100] sm:$0xff]  }
 0x1b6   :  { %v11359_v1 = vcombine.low %v8016_v24, %v8026_v44  ;;  %v8034_v40 = vor.u32 %v8033_v48, %v8030_v12  ;;  %v8049_v58 = vrot.slane %v8047_v47, 5  ;;  %v8055_v2 = vshll.u32 %v11281_v7, 16  ;;  %v11291_v48 = vld [vmem:[%s17327_s0 + $0x118] sm:$0xf]  ;;  %v13490_v44 = vld [vmem:[%s17327_s0 + $0x30] sm:$0xff]  }
 0x1b7   :  { %v8044_v50 = vor.u32 %v8043_v16, %v8039_v5  ;;  %v8054_v21 = vrot.slane %v8052_v28, 4  ;;  %v8061_v27 = vshll.u32 %v11282_v18, 16  ;;  %v8065_v46 = vshrl.u32 %v11282_v18, 16  ;;  %v13528_v16 = vld [vmem:[%s17328_s1 + $0x108] sm:$0xff]  }
 0x1b8   :  { %12582 = vmatprep.mubr.bf16.mxu0 %v11359_v1  ;;  %v8035_v35 = vrot.slane %v8034_v40, 4  ;;  %v8057_v54 = vrot.slane %v8055_v2, 5  ;;  %v8071_v42 = vshll.u32 %v11283_v3, 16  ;;  %v8076_v20 = vshrl.u32 %v11284_v29, 16  ;;  %v11292_v40 = vld [vmem:[%s17327_s0 + $0x11c] sm:$0x1] }
 0x1b9   :  { %v8045_v31 = vrot.slane %v8044_v50, 4  ;;  %v8063_v51 = vrot.slane %v8061_v27, 5  ;;  %v8067_v23 = vrot.slane %v8065_v46, 4  ;;  %v8079_v39 = vshll.u32 %v11284_v29, 16  ;;  %v13492_v2 = vld [vmem:[%s17327_s0 + $0x3c] sm:$0xff]  }
 0x1ba   :  { %v8040_v36 = vsel %vm13668_vm2, %v8035_v35, %v8039_v5  ;;  %v8058_v57 = vor.u32 %v8057_v54, %v8054_v21  ;;  %v8073_v59 = vrot.slane %v8071_v42, 5  ;;  %v8078_v9 = vrot.slane %v8076_v20, 4  ;;  %v11293_v46 = vld [vmem:[%s17327_s0 + $0x120] sm:$0xf]  ;;  %v11294_v20 = vld [vmem:[%s17327_s0 + $0x124] sm:$0xf] }
 0x1bb   :  { %12215 = vmatmul.mubr.bf16.gmra.mrb[60].mxu1 %v10648_v10  ;;  %v8050_v26 = vsel %vm13668_vm2, %v8045_v31, %v8049_v58  ;;  %v8068_v32 = vor.u32 %v8067_v23, %v8063_v51  ;;  %v8081_v60 = vrot.slane %v8079_v39, 5  ;;  %v8085_v38 = vshll.u32 %v11285_v45, 16 }
 0x1bc   :  { %12234 = vmatprep.mubr.bf16.mxu1 %v13487_v49  ;;  %v11360_v62 = vcombine.low %v8040_v36, %v8050_v26  ;;  %v8059_v22 = vrot.slane %v8058_v57, 4  ;;  %v8089_v14 = vshrl.u32 %v11285_v45, 16  ;;  %v8095_v0 = vshll.u32 %v11286_v52, 16  ;;  %v13529_v36 = vld [vmem:[%s17328_s1 + $0x110] sm:$0xff]  }
 0x1bd   :  { %v8069_v61 = vrot.slane %v8068_v32, 4  ;;  %v8082_v63 = vor.u32 %v8081_v60, %v8078_v9  ;;  %v8087_v11 = vrot.slane %v8085_v38, 5  ;;  %v8100_v4 = vshrl.u32 %v11287_v30, 16  ;;  %v11296_v32 = vld [vmem:[%s17327_s0 + $0x12c] sm:$0xf] }
 0x1be   :  { %12583 = vmatmul.mubr.bf16.gmra.mrb[28].mxu0 %v11360_v62  ;;  %v8064_v8 = vsel %vm13668_vm2, %v8059_v22, %v8063_v51  ;;  %v8091_v15 = vrot.slane %v8089_v14, 4  ;;  %v8097_v7 = vrot.slane %v8095_v0, 5  ;;  %v8103_v17 = vshll.u32 %v11287_v30, 16  ;;  %v11295_v30 = vld [vmem:[%s17327_s0 + $0x128] sm:$0x1] }
 0x1bf   :  { %v8074_v55 = vsel %vm13668_vm2, %v8069_v61, %v8073_v59  ;;  %v8083_v33 = vrot.slane %v8082_v63, 4  ;;  %v8102_v18 = vrot.slane %v8100_v4, 4  ;;  %v8109_v24 = vshll.u32 %v11288_v6, 16  ;;  %v11297_v62 = vld [vmem:[%s17327_s0 + $0x130] sm:$0xf] }
 0x1c0   :  { %v11361_v13 = vcombine.low %v8064_v8, %v8074_v55  ;;  %v8092_v12 = vor.u32 %v8091_v15, %v8087_v11  ;;  %v8105_v3 = vrot.slane %v8103_v17, 5  ;;  %v8113_v34 = vshrl.u32 %v11288_v6, 16  ;;  %v11298_v4 = vld [vmem:[%s17327_s0 + $0x134] sm:$0x1]  ;;  %v13530_v8 = vld [vmem:[%s17328_s1 + $0x118] sm:$0xff]  }
 0x1c1   :  { %v8088_v5 = vsel %vm13668_vm2, %v8083_v33, %v8087_v11  ;;  %v8111_v47 = vrot.slane %v8109_v24, 5  ;;  %v8119_v49 = vshll.u32 %v11289_v53, 16  ;;  %v8124_v10 = vshrl.u32 %v11290_v41, 16 }
 0x1c2   :  { %12586 = vmatprep.mubr.bf16.mxu0 %v11361_v13  ;;  %v8093_v28 = vrot.slane %v8092_v12, 4  ;;  %v8106_v29 = vor.u32 %v8105_v3, %v8102_v18  ;;  %v8115_v1 = vrot.slane %v8113_v34, 4  ;;  %v8127_v58 = vshll.u32 %v11290_v41, 16  ;;  %v13493_v41 = vld [vmem:[%s17327_s0 + $0x48] sm:$0xff]   ;;  %v11299_v12 = vld [vmem:[%s17327_s0 + $0x138] sm:$0xf] }
 0x1c3   :  { %12235 = vmatmul.mubr.bf16.vlgmr.msra.gmra.mrb[0].mxu1 %v13488_v19  ;;  %v8121_v45 = vrot.slane %v8119_v49, 5  ;;  %v8126_v50 = vrot.slane %v8124_v10, 4  ;;  %v8133_v21 = vshll.u32 %v11291_v48, 16  ;;  %v8137_v27 = vshrl.u32 %v11291_v48, 16 }
 0x1c4   :  { %12706 = vmatpush3.bf16.msra.mxu1 %v13527_v25  ;;  %12238 = vmatprep.mubr.bf16.mxu1 %v13489_v56  ;;  %v8098_v52 = vsel %vm13668_vm2, %v8093_v28, %v8097_v7  ;;  %v8107_v35 = vrot.slane %v8106_v29, 4  ;;  %v8116_v54 = vor.u32 %v8115_v1, %v8111_v47  ;;  %v8129_v42 = vrot.slane %v8127_v58, 5  ;;  %v13531_v28 = vld [vmem:[%s17328_s1 + $0x120] sm:$0xff]  }
 0x1c5   :  { %12699 = vmatprep.subr.bf16.mxu1 %v13528_v16  ;;  %v11362_v31 = vcombine.low %v8088_v5, %v8098_v52  ;;  %v8135_v51 = vrot.slane %v8133_v21, 5  ;;  %v8139_v23 = vrot.slane %v8137_v27, 4  ;;  %v8143_v39 = vshll.u32 %v11292_v40, 16  ;;  %v13494_v5 = vld [vmem:[%s17327_s0 + $0x54] sm:$0xff]   ;;  %v11301_v21 = vld [vmem:[%s17327_s0 + $0x140] sm:$0x1] }
 0x1c6   :  { %v8112_v57 = vsel %vm13668_vm2, %v8107_v35, %v8111_v47  ;;  %v8117_v59 = vrot.slane %v8116_v54, 4  ;;  %v8130_v9 = vor.u32 %v8129_v42, %v8126_v50  ;;  %v8148_v26 = vshrl.u32 %v11293_v46, 16  ;;  %v11300_v47 = vld [vmem:[%s17327_s0 + $0x13c] sm:$0xf] }
 0x1c7   :  { %12587 = vmatmul.mubr.bf16.gmra.mrb[32].mxu0 %v11362_v31  ;;  %v8140_v19 = vor.u32 %v8139_v23, %v8135_v51  ;;  %v8145_v60 = vrot.slane %v8143_v39, 5  ;;  %v8151_v38 = vshll.u32 %v11293_v46, 16  ;;  %v8157_v6 = vshll.u32 %v11294_v20, 16  ;;  %v11302_v46 = vld [vmem:[%s17327_s0 + $0x144] sm:$0xf] }
 0x1c8   :  { %12707 = vmatpush3.bf16.msra.mxu1 %v13528_v16  ;;  %v8122_v22 = vsel %vm13668_vm2, %v8117_v59, %v8121_v45  ;;  %v8131_v14 = vrot.slane %v8130_v9, 4  ;;  %v8150_v0 = vrot.slane %v8148_v26, 4  ;;  %v8161_v56 = vshrl.u32 %v11294_v20, 16  ;;  %v11303_v20 = vld [vmem:[%s17327_s0 + $0x148] sm:$0xf] }
 0x1c9   :  { %12700 = vmatprep.subr.bf16.mxu1 %v13529_v36  ;;  %v11363_v53 = vcombine.low %v8112_v57, %v8122_v22  ;;  %v8141_v61 = vrot.slane %v8140_v19, 4  ;;  %v8153_v63 = vrot.slane %v8151_v38, 5  ;;  %v8159_v11 = vrot.slane %v8157_v6, 5  ;;  %v11304_v26 = vld [vmem:[%s17327_s0 + $0x14c] sm:$0x1] }
 0x1ca   :  { %v8136_v15 = vsel %vm13668_vm2, %v8131_v14, %v8135_v51  ;;  %v8163_v7 = vrot.slane %v8161_v56, 4  ;;  %v8167_v17 = vshll.u32 %v11295_v30, 16  ;;  %v8172_v55 = vshrl.u32 %v11296_v32, 16  ;;  %v13495_v30 = vld [vmem:[%s17327_s0 + $0x60] sm:$0xff]   ;;  %v11305_v22 = vld [vmem:[%s17327_s0 + $0x150] sm:$0xf] }
 0x1cb   :  { %12239 = vmatmul.mubr.bf16.gmra.mrb[4].mxu1 %v13490_v44  ;;  %12590 = vmatprep.mubr.bf16.mxu0 %v11363_v53  ;;  %v8146_v33 = vsel %vm13668_vm2, %v8141_v61, %v8145_v60  ;;  %v8154_v18 = vor.u32 %v8153_v63, %v8150_v0  ;;  %v8175_v24 = vshll.u32 %v11296_v32, 16  ;;  %v8181_v13 = vshll.u32 %v11297_v62, 16  ;;  %v11306_v61 = vld [vmem:[%s17327_s0 + $0x154] sm:$0xf] }
 0x1cc   :  { %12242 = vmatprep.mubr.bf16.mxu1 %v13492_v2  ;;  %12708 = vmatpush3.bf16.msra.mxu1 %v13529_v36  ;;  %v11364_v25 = vcombine.low %v8136_v15, %v8146_v33  ;;  %v8164_v3 = vor.u32 %v8163_v7, %v8159_v11  ;;  %v8169_v34 = vrot.slane %v8167_v17, 5  ;;  %v8174_v48 = vrot.slane %v8172_v55, 4  ;;  %v13532_v36 = vld [vmem:[%s17328_s1 + $0x128] sm:$0xff]   ;;  %v13533_v15 = vld [vmem:[%s17328_s1 + $0x130] sm:$0xff]   ;;  %v11307_v33 = vld [vmem:[%s17327_s0 + $0x158] sm:$0x1] }
 0x1cd   :  { %12701 = vmatprep.subr.bf16.mxu1 %v13530_v8  ;;  %v8155_v49 = vrot.slane %v8154_v18, 4  ;;  %v8177_v44 = vrot.slane %v8175_v24, 5  ;;  %v8183_v10 = vrot.slane %v8181_v13, 5  ;;  %v8185_v16 = vshrl.u32 %v11297_v62, 16  ;;  %v13497_v62 = vld [vmem:[%s17327_s0 + $0x6c] sm:$0xff]  }
 0x1ce   :  { %v8165_v29 = vrot.slane %v8164_v3, 4  ;;  %v8191_v1 = vshll.u32 %v11298_v4, 16  ;;  %v8196_v40 = vshrl.u32 %v11299_v12, 16  ;;  %v8199_v58 = vshll.u32 %v11299_v12, 16 }
 0x1cf   :  { %12591 = vmatmul.mubr.bf16.gmra.mrb[36].mxu0 %v11364_v25  ;;  %v8160_v2 = vsel %vm13668_vm2, %v8155_v49, %v8159_v11  ;;  %v8178_v45 = vor.u32 %v8177_v44, %v8174_v48  ;;  %v8187_v50 = vrot.slane %v8185_v16, 4  ;;  %v8205_v27 = vshll.u32 %v11300_v47, 16  ;;  %v11308_v25 = vld [vmem:[%s17327_s0 + $0x15c] sm:$0xf] }
 0x1d0   :  { %12709 = vmatpush3.bf16.msra.mxu1 %v13530_v8  ;;  %v8170_v52 = vsel %vm13668_vm2, %v8165_v29, %v8169_v34  ;;  %v8193_v35 = vrot.slane %v8191_v1, 5  ;;  %v8198_v54 = vrot.slane %v8196_v40, 4  ;;  %v8201_v42 = vrot.slane %v8199_v58, 5  ;;  %v11310_v58 = vld [vmem:[%s17327_s0 + $0x164] sm:$0x1] }
 0x1d1   :  { %12702 = vmatprep.subr.bf16.mxu1 %v13531_v28  ;;  %v11365_v31 = vcombine.low %v8160_v2, %v8170_v52  ;;  %v8179_v51 = vrot.slane %v8178_v45, 4  ;;  %v8188_v23 = vor.u32 %v8187_v50, %v8183_v10  ;;  %v8207_v39 = vrot.slane %v8205_v27, 5  ;;  %v13534_v2 = vld [vmem:[%s17328_s1 + $0x138] sm:$0xff]  }
 0x1d2   :  { %v8202_v57 = vor.u32 %v8201_v42, %v8198_v54  ;;  %v8209_v59 = vshrl.u32 %v11300_v47, 16  ;;  %v8215_v9 = vshll.u32 %v11301_v21, 16  ;;  %v8220_v32 = vshrl.u32 %v11302_v46, 16  ;;  %v11309_v47 = vld [vmem:[%s17327_s0 + $0x160] sm:$0xf] }
 0x1d3   :  { %12243 = vmatmul.mubr.bf16.gmra.mrb[8].mxu1 %v13493_v41  ;;  %12594 = vmatprep.mubr.bf16.mxu0 %v11365_v31  ;;  %v8184_v19 = vsel %vm13668_vm2, %v8179_v51, %v8183_v10  ;;  %v8189_v60 = vrot.slane %v8188_v23, 4  ;;  %v8223_v38 = vshll.u32 %v11302_v46, 16  ;;  %v8229_v6 = vshll.u32 %v11303_v20, 16  ;;  %v13498_v46 = vld [vmem:[%s17327_s0 + $0x78] sm:$0xff]   ;;  %v11311_v31 = vld [vmem:[%s17327_s0 + $0x168] sm:$0xf] }
 0x1d4   :  { %12246 = vmatprep.mubr.bf16.mxu1 %v13494_v5  ;;  %12710 = vmatpush3.bf16.msra.mxu1 %v13531_v28  ;;  %v8203_v14 = vrot.slane %v8202_v57, 4  ;;  %v8211_v0 = vrot.slane %v8209_v59, 4  ;;  %v8217_v56 = vrot.slane %v8215_v9, 5  ;;  %v8222_v53 = vrot.slane %v8220_v32, 4  ;;  %v11312_v57 = vld [vmem:[%s17327_s0 + $0x16c] sm:$0xf] }
 0x1d5   :  { %12703 = vmatprep.subr.bf16.mxu1 %v13532_v36  ;;  %v8194_v63 = vsel %vm13668_vm2, %v8189_v60, %v8193_v35  ;;  %v8225_v11 = vrot.slane %v8223_v38, 5  ;;  %v8231_v4 = vrot.slane %v8229_v6, 5  ;;  %v8233_v8 = vshrl.u32 %v11303_v20, 16  ;;  %v13499_v20 = vld [vmem:[%s17327_s0 + $0x84] sm:$0xff]   ;;  %v11313_v32 = vld [vmem:[%s17327_s0 + $0x170] sm:$0x1] }
 0x1d6   :  { %v11366_v7 = vcombine.low %v8184_v19, %v8194_v63  ;;  %v8208_v17 = vsel %vm13668_vm2, %v8203_v14, %v8207_v39  ;;  %v8212_v41 = vor.u32 %v8211_v0, %v8207_v39  ;;  %v8239_v55 = vshll.u32 %v11304_v26, 16 }
 0x1d7   :  { %v8226_v18 = vor.u32 %v8225_v11, %v8222_v53  ;;  %v8235_v24 = vrot.slane %v8233_v8, 4  ;;  %v8244_v13 = vshrl.u32 %v11305_v22, 16  ;;  %v8247_v12 = vshll.u32 %v11305_v22, 16  ;;  %v11315_v8 = vld [vmem:[%s17327_s0 + $0x178] sm:$0xf] }
 0x1d8   :  { %12711 = vmatpush3.bf16.msra.mxu1 %v13532_v36  ;;  %12595 = vmatmul.mubr.bf16.gmra.mrb[40].mxu0 %v11366_v7  ;;  %v8213_v3 = vrot.slane %v8212_v41, 4  ;;  %v8241_v34 = vrot.slane %v8239_v55, 5  ;;  %v8253_v48 = vshll.u32 %v11306_v61, 16  ;;  %v8257_v5 = vshrl.u32 %v11306_v61, 16  ;;  %v13502_v55 = vld [vmem:[%s17327_s0 + $0x9c] sm:$0xff]  }
 0x1d9   :  { %12704 = vmatprep.subr.bf16.mxu1 %v13533_v15  ;;  %v8227_v49 = vrot.slane %v8226_v18, 4  ;;  %v8236_v44 = vor.u32 %v8235_v24, %v8231_v4  ;;  %v8246_v10 = vrot.slane %v8244_v13, 4  ;;  %v8249_v16 = vrot.slane %v8247_v12, 5 }
 0x1da   :  { %v8218_v28 = vsel %vm13668_vm2, %v8213_v3, %v8217_v56  ;;  %v8255_v29 = vrot.slane %v8253_v48, 5  ;;  %v8259_v1 = vrot.slane %v8257_v5, 4  ;;  %v8263_v40 = vshll.u32 %v11307_v33, 16  ;;  %v11314_v56 = vld [vmem:[%s17327_s0 + $0x174] sm:$0xf] }
 0x1db   :  { %12247 = vmatmul.mubr.bf16.gmra.mrb[12].mxu1 %v13495_v30  ;;  %v11367_v45 = vcombine.low %v8208_v17, %v8218_v28  ;;  %v8232_v50 = vsel %vm13668_vm2, %v8227_v49, %v8231_v4  ;;  %v8237_v21 = vrot.slane %v8236_v44, 4  ;;  %v8250_v27 = vor.u32 %v8249_v16, %v8246_v10  ;;  %v13500_v4 = vld [vmem:[%s17327_s0 + $0x90] sm:$0xff]   ;;  %v11317_v5 = vld [vmem:[%s17327_s0 + $0x180] sm:$0xf]  ;;  %v11318_v16 = vld [vmem:[%s17327_s0 + $0x184] sm:$0xf] }
 0x1dc   :  { %12250 = vmatprep.mubr.bf16.mxu1 %v13497_v62  ;;  %12712 = vmatpush3.bf16.msra.mxu1 %v13533_v15  ;;  %v8260_v52 = vor.u32 %v8259_v1, %v8255_v29  ;;  %v8265_v35 = vrot.slane %v8263_v40, 5  ;;  %v8268_v54 = vshrl.u32 %v11308_v25, 16  ;;  %v8271_v42 = vshll.u32 %v11308_v25, 16 }
 0x1dd   :  { %12705 = vmatprep.subr.bf16.mxu1 %v13534_v2  ;;  %12598 = vmatprep.mubr.bf16.mxu0 %v11367_v45  ;;  %v8242_v51 = vsel %vm13668_vm2, %v8237_v21, %v8241_v34  ;;  %v8251_v23 = vrot.slane %v8250_v27, 4  ;;  %v8277_v39 = vshll.u32 %v11309_v47, 16  ;;  %v8281_v36 = vshrl.u32 %v11309_v47, 16  ;;  %v11316_v34 = vld [vmem:[%s17327_s0 + $0x17c] sm:$0x1] }
 0x1de   :  { %v11368_v59 = vcombine.low %v8232_v50, %v8242_v51  ;;  %v8261_v9 = vrot.slane %v8260_v52, 4  ;;  %v8270_v30 = vrot.slane %v8268_v54, 4  ;;  %v8273_v26 = vrot.slane %v8271_v42, 5  ;;  %v11319_v50 = vld [vmem:[%s17327_s0 + $0x188] sm:$0x1] }
 0x1df   :  { %v8256_v19 = vsel %vm13668_vm2, %v8251_v23, %v8255_v29  ;;  %v8279_v60 = vrot.slane %v8277_v39, 5  ;;  %v8283_v38 = vrot.slane %v8281_v36, 4  ;;  %v8287_v6 = vshll.u32 %v11310_v58, 16  ;;  %v11320_v54 = vld [vmem:[%s17327_s0 + $0x18c] sm:$0xf] }
 0x1e0   :  { %12713 = vmatpush3.bf16.msra.mxu1 %v13534_v2  ;;  %12599 = vmatmul.mubr.bf16.gmra.mrb[44].mxu0 %v11368_v59  ;;  %v8266_v62 = vsel %vm13668_vm2, %v8261_v9, %v8265_v35  ;;  %v8274_v22 = vor.u32 %v8273_v26, %v8270_v30  ;;  %v8292_v14 = vshrl.u32 %v11311_v31, 16  ;;  %v8295_v0 = vshll.u32 %v11311_v31, 16  ;;  %v11321_v42 = vld [vmem:[%s17327_s0 + $0x190] sm:$0xf]  ;;  %v13503_v39 = vld [vmem:[%s17327_s0 + $0xa8] sm:$0xff]   ;;  %v13504_v30 = vld [vmem:[%s17327_s0 + $0xb4] sm:$0xff]  }
 0x1e1   :  { %v11369_v53 = vcombine.low %v8256_v19, %v8266_v62  ;;  %v8284_v61 = vor.u32 %v8283_v38, %v8279_v60  ;;  %v8289_v63 = vrot.slane %v8287_v6, 5  ;;  %v8301_v11 = vshll.u32 %v11312_v57, 16 }
 0x1e2   :  { %v8275_v15 = vrot.slane %v8274_v22, 4  ;;  %v8294_v7 = vrot.slane %v8292_v14, 4  ;;  %v8297_v17 = vrot.slane %v8295_v0, 5  ;;  %v8305_v41 = vshrl.u32 %v11312_v57, 16  ;;  %v11322_v22 = vld [vmem:[%s17327_s0 + $0x194] sm:$0x1] }
 0x1e3   :  { %12251 = vmatmul.mubr.bf16.gmra.mrb[16].mxu1 %v13498_v46  ;;  %12602 = vmatprep.mubr.bf16.mxu0 %v11369_v53  ;;  %v8285_v33 = vrot.slane %v8284_v61, 4  ;;  %v8303_v18 = vrot.slane %v8301_v11, 5  ;;  %v8311_v24 = vshll.u32 %v11313_v32, 16  ;;  %v8316_v13 = vshrl.u32 %v11314_v56, 16  ;;  %v11323_v0 = vld [vmem:[%s17327_s0 + $0x198] sm:$0xf] }
 0x1e4   :  { %12254 = vmatprep.mubr.bf16.mxu1 %v13499_v20  ;;  %v8280_v12 = vsel %vm13668_vm2, %v8275_v15, %v8279_v60  ;;  %v8298_v25 = vor.u32 %v8297_v17, %v8294_v7  ;;  %v8307_v3 = vrot.slane %v8305_v41, 4  ;;  %v8319_v48 = vshll.u32 %v11314_v56, 16  ;;  %v11324_v11 = vld [vmem:[%s17327_s0 + $0x19c] sm:$0xf] }
 0x1e5   :  { %v8290_v47 = vsel %vm13668_vm2, %v8285_v33, %v8289_v63  ;;  %v8313_v49 = vrot.slane %v8311_v24, 5  ;;  %v8318_v44 = vrot.slane %v8316_v13, 4  ;;  %v8325_v10 = vshll.u32 %v11315_v8, 16 }
 0x1e6   :  { %v11370_v28 = vcombine.low %v8280_v12, %v8290_v47  ;;  %v8299_v29 = vrot.slane %v8298_v25, 4  ;;  %v8308_v1 = vor.u32 %v8307_v3, %v8303_v18  ;;  %v8321_v40 = vrot.slane %v8319_v48, 5  ;;  %v11325_v25 = vld [vmem:[%s17327_s0 + $0x1a0] sm:$0x1] }
 0x1e7   :  { %v8327_v58 = vrot.slane %v8325_v10, 5  ;;  %v8329_v2 = vshrl.u32 %v11315_v8, 16  ;;  %v8335_v45 = vshll.u32 %v11316_v34, 16  ;;  %v8340_v21 = vshrl.u32 %v11317_v5, 16  ;;  %v13505_v47 = vld [vmem:[%s17327_s0 + $0xc0] sm:$0xff]  }
 0x1e8   :  { %12603 = vmatmul.mubr.bf16.gmra.mrb[48].mxu0 %v11370_v28  ;;  %v8304_v27 = vsel %vm13668_vm2, %v8299_v29, %v8303_v18  ;;  %v8309_v46 = vrot.slane %v8308_v1, 4  ;;  %v8322_v52 = vor.u32 %v8321_v40, %v8318_v44  ;;  %v8343_v35 = vshll.u32 %v11317_v5, 16 }
 0x1e9   :  { %v8331_v20 = vrot.slane %v8329_v2, 4  ;;  %v8337_v31 = vrot.slane %v8335_v45, 5  ;;  %v8342_v51 = vrot.slane %v8340_v21, 4  ;;  %v8349_v23 = vshll.u32 %v11318_v16, 16  ;;  %v11327_v2 = vld [vmem:[%s17327_s0 + $0x1a8] sm:$0xf] }
 0x1ea   :  { %v8314_v36 = vsel %vm13668_vm2, %v8309_v46, %v8313_v49  ;;  %v8323_v57 = vrot.slane %v8322_v52, 4  ;;  %v8345_v59 = vrot.slane %v8343_v35, 5  ;;  %v8353_v9 = vshrl.u32 %v11318_v16, 16  ;;  %v11326_v49 = vld [vmem:[%s17327_s0 + $0x1a4] sm:$0xf] }
 0x1eb   :  { %12255 = vmatmul.mubr.bf16.gmra.mrb[20].mxu1 %v13500_v4  ;;  %v11371_v26 = vcombine.low %v8304_v27, %v8314_v36  ;;  %v8332_v32 = vor.u32 %v8331_v20, %v8327_v58  ;;  %v8351_v19 = vrot.slane %v8349_v23, 5  ;;  %v8359_v60 = vshll.u32 %v11319_v50, 16  ;;  %v13507_v45 = vld [vmem:[%s17327_s0 + $0xe4] sm:$0xff]   ;;  %v11328_v52 = vld [vmem:[%s17327_s0 + $0x1ac] sm:$0x1] }
 0x1ec   :  { %12258 = vmatprep.mubr.bf16.mxu1 %v13502_v55  ;;  %v8328_v38 = vsel %vm13668_vm2, %v8323_v57, %v8327_v58  ;;  %v8346_v6 = vor.u32 %v8345_v59, %v8342_v51  ;;  %v8355_v62 = vrot.slane %v8353_v9, 4  ;;  %v8364_v14 = vshrl.u32 %v11320_v54, 16  ;;  %v11386_v57 = vld [vmem:[%s17327_s0 + $0x1c] sm:$0xf] }
 0x1ed   :  { %12606 = vmatprep.mubr.bf16.mxu0 %v11371_v26  ;;  %v8333_v56 = vrot.slane %v8332_v32, 4  ;;  %v8361_v53 = vrot.slane %v8359_v60, 5  ;;  %v8367_v61 = vshll.u32 %v11320_v54, 16  ;;  %v8373_v63 = vshll.u32 %v11321_v42, 16  ;;  %v11387_v32 = vld [vmem:[%s17327_s0 + $0x20] sm:$0x1] }
 0x1ee   :  { %v8347_v4 = vrot.slane %v8346_v6, 4  ;;  %v8356_v8 = vor.u32 %v8355_v62, %v8351_v19  ;;  %v8366_v15 = vrot.slane %v8364_v14, 4  ;;  %v8377_v7 = vshrl.u32 %v11321_v42, 16  ;;  %v11389_v62 = vld [vmem:[%s17327_s0 + $0x28] sm:$0xf] }
 0x1ef   :  { %v8338_v17 = vsel %vm13668_vm2, %v8333_v56, %v8337_v31  ;;  %v8369_v41 = vrot.slane %v8367_v61, 5  ;;  %v8375_v55 = vrot.slane %v8373_v63, 5  ;;  %v8383_v33 = vshll.u32 %v11322_v22, 16  ;;  %v11385_v31 = vld [vmem:[%s17327_s0 + $0x18] sm:$0xe] }
 0x1f0   :  { %v11372_v18 = vcombine.low %v8328_v38, %v8338_v17  ;;  %v8352_v24 = vsel %vm13668_vm2, %v8347_v4, %v8351_v19  ;;  %v8357_v13 = vrot.slane %v8356_v8, 4  ;;  %v8379_v12 = vrot.slane %v8377_v7, 4  ;;  %v11388_v4 = vld [vmem:[%s17327_s0 + $0x24] sm:$0xe]  ;;  %v13509_v8 = vld [vmem:[%s17327_s0 + $0xfc] sm:$0xff]  }
 0x1f1   :  { %v8370_v3 = vor.u32 %v8369_v41, %v8366_v15  ;;  %v8385_v34 = vrot.slane %v8383_v33, 5  ;;  %v8388_v48 = vshrl.u32 %v11323_v0, 16  ;;  %v8391_v5 = vshll.u32 %v11323_v0, 16  ;;  %v11392_v15 = vld [vmem:[%s17327_s0 + $0x34] sm:$0xf] }
 0x1f2   :  { %12607 = vmatmul.mubr.bf16.gmra.mrb[52].mxu0 %v11372_v18  ;;  %v8362_v44 = vsel %vm13668_vm2, %v8357_v13, %v8361_v53  ;;  %v8380_v10 = vor.u32 %v8379_v12, %v8375_v55  ;;  %v8397_v16 = vshll.u32 %v11324_v11, 16  ;;  %v8401_v28 = vshrl.u32 %v11324_v11, 16  ;;  %v13508_v53 = vld [vmem:[%s17327_s0 + $0xf0] sm:$0xff]   ;;  %v11393_v12 = vld [vmem:[%s17327_s0 + $0x38] sm:$0x1] }
 0x1f3   :  { %12259 = vmatmul.mubr.bf16.gmra.mrb[24].mxu1 %v13503_v39  ;;  %v11373_v29 = vcombine.low %v8352_v24, %v8362_v44  ;;  %v8371_v1 = vrot.slane %v8370_v3, 4  ;;  %v8390_v40 = vrot.slane %v8388_v48, 4  ;;  %v8393_v58 = vrot.slane %v8391_v5, 5  ;;  %v11391_v33 = vld [vmem:[%s17327_s0 + $0x30] sm:$0xe] }
 0x1f4   :  { %12262 = vmatprep.mubr.bf16.mxu1 %v13504_v30  ;;  %v8381_v50 = vrot.slane %v8380_v10, 4  ;;  %v8399_v21 = vrot.slane %v8397_v16, 5  ;;  %v8403_v27 = vrot.slane %v8401_v28, 4  ;;  %v8407_v46 = vshll.u32 %v11325_v25, 16  ;;  %v16328_v5 = vld [vmem:[%s17327_s0 + $0x3c] sm:$0xe] }
 0x1f5   :  { %12610 = vmatprep.mubr.bf16.mxu0 %v11373_v29  ;;  %v8376_v35 = vsel %vm13668_vm2, %v8371_v1, %v8375_v55  ;;  %v8394_v54 = vor.u32 %v8393_v58, %v8390_v40  ;;  %v8412_v42 = vshrl.u32 %v11326_v49, 16  ;;  %v8415_v20 = vshll.u32 %v11326_v49, 16  ;;  %v11390_v55 = vld [vmem:[%s17327_s0 + $0x2c] sm:$0x1]  ;;  %v11396_v28 = vld [vmem:[%s17327_s0 + $0x44] sm:$0x1] }
 0x1f6   :  { %v8386_v51 = vsel %vm13668_vm2, %v8381_v50, %v8385_v34  ;;  %v8404_v23 = vor.u32 %v8403_v27, %v8399_v21  ;;  %v8409_v39 = vrot.slane %v8407_v46, 5  ;;  %v8421_v36 = vshll.u32 %v11327_v2, 16  ;;  %v16343_v29 = vld [vmem:[%s17327_s0 + $0x48] sm:$0xe]  ;;  %v16348_v1 = vld [vmem:[%s17327_s0 + $0x4c] sm:$0xf] }
 0x1f7   :  { %v11374_v59 = vcombine.low %v8376_v35, %v8386_v51  ;;  %v8395_v9 = vrot.slane %v8394_v54, 4  ;;  %v8414_v30 = vrot.slane %v8412_v42, 4  ;;  %v8417_v26 = vrot.slane %v8415_v20, 5  ;;  %v11399_v50 = vld [vmem:[%s17327_s0 + $0x50] sm:$0x1]  ;;  %v13510_v35 = vld [vmem:[%s17327_s0 + $0x108] sm:$0xff]  }
 0x1f8   :  { %v8405_v19 = vrot.slane %v8404_v23, 4  ;;  %v8423_v60 = vrot.slane %v8421_v36, 5  ;;  %v8425_v38 = vshrl.u32 %v11327_v2, 16  ;;  %v8431_v6 = vshll.u32 %v11328_v52, 16  ;;  %v11400_v54 = vld [vmem:[%s17327_s0 + $0x54] sm:$0xe] }
 0x1f9   :  { %v8400_v22 = vsel %vm13668_vm2, %v8395_v9, %v8399_v21  ;;  %v8418_v14 = vor.u32 %v8417_v26, %v8414_v30  ;;  %v11481_v0 = vrot.slane %v11385_v31, 9  ;;  %v9303_v56 = vrot.slane %v11386_v57, 5  ;;  %v16359_v21 = vld [vmem:[%s17327_s0 + $0x58] sm:$0xf]  ;;  %v16370_v42 = vld [vmem:[%s17327_s0 + $0x5c] sm:$0x1] }
 0x1fa   :  { %12611 = vmatmul.mubr.bf16.gmra.mrb[56].mxu0 %v11374_v59  ;;  %v8410_v61 = vsel %vm13668_vm2, %v8405_v19, %v8409_v39  ;;  %v8427_v63 = vrot.slane %v8425_v38, 4  ;;  %v9306_v11 = vrot.slane %v11387_v32, 5  ;;  %v8433_v24 = vrot.slane %v8431_v6, 5  ;;  %v16375_v20 = vld [vmem:[%s17327_s0 + $0x64] sm:$0xf]  ;;  %v13511_v39 = vld [vmem:[%s17327_s0 + $0x114] sm:$0xff]  }
 0x1fb   :  { %12263 = vmatmul.mubr.bf16.gmra.mrb[28].mxu1 %v13505_v47  ;;  %v11375_v7 = vcombine.low %v8400_v22, %v8410_v61  ;;  %v8419_v17 = vrot.slane %v8418_v14, 4  ;;  %v9305_v41 = vrot.slane %v9303_v56, 4  ;;  %v9310_v13 = vrot.slane %v11389_v62, 5  ;;  %v16333_v47 = vld [vmem:[%s17327_s0 + $0x40] sm:$0xf] }
 0x1fc   :  { %12266 = vmatprep.mubr.bf16.mxu1 %v13507_v45  ;;  %v8428_v18 = vor.u32 %v8427_v63, %v8423_v60  ;;  %v9304_v25 = vsel %vm13948_vm5, %v11481_v0, %v9303_v56  ;;  %v11482_v34 = vrot.slane %v11388_v4, 9  ;;  %v9317_v48 = vrot.slane %v11392_v15, 5  ;;  %v11403_v9 = vld [vmem:[%s17327_s0 + $0x60] sm:$0xe]  ;;  %v16393_v30 = vld [vmem:[%s17327_s0 + $0x68] sm:$0x1] }
 0x1fd   :  { %12614 = vmatprep.mubr.bf16.mxu0 %v11375_v7  ;;  %v9307_v3 = vsel %vm13948_vm5, %v9305_v41, %v9306_v11  ;;  %v8424_v49 = vsel %vm13668_vm2, %v8419_v17, %v8423_v60  ;;  %v9312_v10 = vrot.slane %v9310_v13, 4  ;;  %v9313_v16 = vrot.slane %v11390_v55, 5  ;;  %v11406_v60 = vld [vmem:[%s17327_s0 + $0x6c] sm:$0xe]  ;;  %v11407_v38 = vld [vmem:[%s17327_s0 + $0x70] sm:$0xf] }
 0x1fe   :  { %v8429_v44 = vrot.slane %v8428_v18, 4  ;;  %v11529_v58 = vcombine.low %v9304_v25, %v9307_v3  ;;  %v11483_v2 = vrot.slane %v11391_v33, 9  ;;  %v9324_v45 = vrot.slane %v16333_v47, 5  ;;  %v11408_v61 = vld [vmem:[%s17327_s0 + $0x74] sm:$0x1]  ;;  %v13512_v55 = vld [vmem:[%s17327_s0 + $0x120] sm:$0xff]  }
 0x1ff   :  { %v9319_v46 = vrot.slane %v9317_v48, 4  ;;  %v9320_v52 = vrot.slane %v11393_v12, 5  ;;  %v9311_v31 = vsel %vm13948_vm5, %v11482_v34, %v9310_v13  ;;  %v9314_v51 = vsel %vm13948_vm5, %v9312_v10, %v9313_v16  ;;  %v11410_v7 = vld [vmem:[%s17327_s0 + $0x7c] sm:$0xf]  ;;  %v11409_v41 = vld [vmem:[%s17327_s0 + $0x78] sm:$0xe] }
 0x200   :  { %v8434_v40 = vsel %vm13668_vm2, %v8429_v44, %v8433_v24  ;;  %v11484_v23 = vrot.slane %v16328_v5, 9  ;;  %v9331_v36 = vrot.slane %v16348_v1, 5  ;;  %v9327_v57 = vrot.slane %v11396_v28, 5  ;;  %v11411_v18 = vld [vmem:[%s17327_s0 + $0x80] sm:$0x1]  ;;  %v13513_v3 = vld [vmem:[%s17327_s0 + $0x12c] sm:$0xff]  }
 0x201   :  { %v11376_v27 = vcombine.low %v8424_v49, %v8434_v40  ;;  %v9338_v59 = vrot.slane %v16359_v21, 5  ;;  %v9318_v26 = vsel %vm13948_vm5, %v11483_v2, %v9317_v48  ;;  %v9326_v32 = vrot.slane %v9324_v45, 4  ;;  %v11412_v13 = vld [vmem:[%s17327_s0 + $0x84] sm:$0xe]  ;;  %v11413_v5 = vld [vmem:[%s17327_s0 + $0x88] sm:$0xf] }
 0x202   :  { %v11485_v19 = vrot.slane %v16343_v29, 9  ;;  %v11530_v6 = vcombine.low %v9311_v31, %v9314_v51  ;;  %v9321_v62 = vsel %vm13948_vm5, %v9319_v46, %v9320_v52  ;;  %v9334_v22 = vrot.slane %v11399_v50, 5  ;;  %v11414_v47 = vld [vmem:[%s17327_s0 + $0x8c] sm:$0x1]  ;;  %v11415_v1 = vld [vmem:[%s17327_s0 + $0x90] sm:$0xe] }
 0x203   :  { %12267 = vmatmul.mubr.bf16.gmra.mrb[32].mxu1 %v13508_v53  ;;  %12615 = vmatmul.mubr.bf16.gmra.mrb[60].mxu0 %v11376_v27  ;;  %v9345_v14 = vrot.slane %v16375_v20, 5  ;;  %v9333_v0 = vrot.slane %v9331_v36, 4  ;;  %v11486_v56 = vrot.slane %v11400_v54, 9  ;;  %v9341_v53 = vrot.slane %v16370_v42, 5  ;;  %v11416_v40 = vld [vmem:[%s17327_s0 + $0x94] sm:$0xf] }
 0x204   :  { %12270 = vmatprep.mubr.bf16.mxu1 %v13509_v8  ;;  %12634 = vmatprep.mubr.bf16.mxu0 %v11529_v58  ;;  %v9352_v63 = vrot.slane %v11407_v38, 5  ;;  %v9340_v11 = vrot.slane %v9338_v59, 4  ;;  %v11487_v4 = vrot.slane %v11403_v9, 9  ;;  %v9348_v8 = vrot.slane %v16393_v30, 5  ;;  %v11417_v21 = vld [vmem:[%s17327_s0 + $0x98] sm:$0x1] }
 0x205   :  { %v11488_v15 = vrot.slane %v11406_v60, 9  ;;  %v11531_v17 = vcombine.low %v9318_v26, %v9321_v62  ;;  %v9347_v33 = vrot.slane %v9345_v14, 4  ;;  %v9359_v24 = vrot.slane %v11410_v7, 5  ;;  %v11418_v54 = vld [vmem:[%s17327_s0 + $0x9c] sm:$0xe] }
 0x206   :  { %v9325_v12 = vsel %vm13948_vm5, %v11484_v23, %v9324_v45  ;;  %v9328_v25 = vsel %vm13948_vm5, %v9326_v32, %v9327_v57  ;;  %v9354_v34 = vrot.slane %v9352_v63, 4  ;;  %v9355_v48 = vrot.slane %v11408_v61, 5  ;;  %v11419_v23 = vld [vmem:[%s17327_s0 + $0xa0] sm:$0xf]  ;;  %v13514_v30 = vld [vmem:[%s17327_s0 + $0x138] sm:$0xff]  }
 0x207   :  { %v9332_v49 = vsel %vm13948_vm5, %v11485_v19, %v9331_v36  ;;  %v9335_v44 = vsel %vm13948_vm5, %v9333_v0, %v9334_v22  ;;  %v11489_v10 = vrot.slane %v11409_v41, 9  ;;  %v9366_v16 = vrot.slane %v11413_v5, 5  ;;  %v11421_v38 = vld [vmem:[%s17327_s0 + $0xa8] sm:$0xe]  ;;  %v11426_v41 = vld [vmem:[%s17327_s0 + $0xbc] sm:$0x1] }
 0x208   :  { %v9362_v28 = vrot.slane %v11411_v18, 5  ;;  %v11490_v29 = vrot.slane %v11412_v13, 9  ;;  %v11532_v58 = vcombine.low %v9325_v12, %v9328_v25  ;;  %v16452_v2 = vsel %vm13948_vm5, %v11486_v56, %v9338_v59  ;;  %v11428_v5 = vld [vmem:[%s17327_s0 + $0xc4] sm:$0xf] }
 0x209   :  { %v9361_v45 = vrot.slane %v9359_v24, 4  ;;  %v9369_v50 = vrot.slane %v11414_v47, 5  ;;  %v11533_v27 = vcombine.low %v9332_v49, %v9335_v44  ;;  %v16459_v46 = vsel %vm13948_vm5, %v9340_v11, %v9341_v53  ;;  %v11424_v11 = vld [vmem:[%s17327_s0 + $0xb4] sm:$0xe] }
 0x20a   :  { %v9368_v52 = vrot.slane %v9366_v16, 4  ;;  %v16466_v42 = vsel %vm13948_vm5, %v11487_v4, %v9345_v14  ;;  %v16470_v20 = vsel %vm13948_vm5, %v11488_v15, %v9352_v63  ;;  %v11491_v31 = vrot.slane %v11415_v1, 9  ;;  %v11423_v14 = vld [vmem:[%s17327_s0 + $0xb0] sm:$0x1]  ;;  %v13515_v4 = vld [vmem:[%s17327_s0 + $0x144] sm:$0xff]  }
 0x20b   :  { %12271 = vmatmul.mubr.bf16.gmra.mrb[36].mxu1 %v13510_v35  ;;  %12635 = vmatmul.mubr.bf16.vlgmr.msra.gmra.mrb[0].mxu0 %v11530_v6  ;;  %v9373_v35 = vrot.slane %v11416_v40, 5  ;;  %v9376_v51 = vrot.slane %v11417_v21, 5  ;;  %v16480_v36 = vsel %vm13948_vm5, %v9347_v33, %v9348_v8  ;;  %v16484_v57 = vsel %vm13948_vm5, %v9354_v34, %v9355_v48  ;;  %v11422_v6 = vld [vmem:[%s17327_s0 + $0xac] sm:$0xf]  ;;  %v11427_v48 = vld [vmem:[%s17327_s0 + $0xc0] sm:$0xe] }
 0x20c   :  { %12274 = vmatprep.mubr.bf16.mxu1 %v13511_v39  ;;  %12638 = vmatprep.mubr.bf16.mxu0 %v11531_v17  ;;  %v11420_v39 = vld [vmem:[%s17327_s0 + $0xa4] sm:$0x1]  ;;  %v11492_v59 = vrot.slane %v11418_v54, 9  ;;  %v9380_v9 = vrot.slane %v11419_v23, 5  ;;  %v16491_v26 = vsel %vm13948_vm5, %v11489_v10, %v9359_v24  ;;  %v16495_v32 = vsel %vm13948_vm5, %v9361_v45, %v9362_v28  ;;  %v11425_v17 = vld [vmem:[%s17327_s0 + $0xb8] sm:$0xf] }
 0x20d   :  { %v9375_v19 = vrot.slane %v9373_v35, 4  ;;  %v9383_v60 = vrot.slane %v11420_v39, 5  ;;  %v11534_v62 = vcombine.low %v16452_v2, %v16459_v46  ;;  %v11493_v0 = vrot.slane %v11421_v38, 9  ;;  %v11429_v10 = vld [vmem:[%s17327_s0 + $0xc8] sm:$0x1]  ;;  %v13516_v2 = vld [vmem:[%s17327_s0 + $0x150] sm:$0xff]  }
 0x20e   :  { %v9382_v22 = vrot.slane %v9380_v9, 4  ;;  %v11535_v56 = vcombine.low %v16466_v42, %v16480_v36  ;;  %v11536_v53 = vcombine.low %v16470_v20, %v16484_v57  ;;  %v9387_v61 = vrot.slane %v11422_v6, 5  ;;  %v11432_v46 = vld [vmem:[%s17327_s0 + $0xd4] sm:$0x1]  ;;  %v10825_v23 = vld [vmem:[%s17327_s0 + $0xe4] sm:$0xf] }
 0x20f   :  { %v9390_v63 = vrot.slane %v11423_v14, 5  ;;  %v11537_v8 = vcombine.low %v16491_v26, %v16495_v32  ;;  %v16522_v15 = vsel %vm13948_vm5, %v11490_v29, %v9366_v16  ;;  %v16526_v7 = vsel %vm13948_vm5, %v9368_v52, %v9369_v50  ;;  %v10826_v39 = vld [vmem:[%s17327_s0 + $0xe8] sm:$0xf]  ;;  %v11434_v14 = vld [vmem:[%s17327_s0 + $0xf4] sm:$0xf] }
 0x210   :  { %v16536_v33 = vsel %vm13948_vm5, %v11491_v31, %v9373_v35  ;;  %v16540_v18 = vsel %vm13948_vm5, %v9375_v19, %v9376_v51  ;;  %v9389_v24 = vrot.slane %v9387_v61, 4  ;;  %v9394_v13 = vrot.slane %v11425_v17, 5  ;;  %v13517_v35 = vld [vmem:[%s17327_s0 + $0x15c] sm:$0xff]   ;;  %v13519_v20 = vld [vmem:[%s17327_s0 + $0x174] sm:$0xff]  }
 0x211   :  { %v16544_v12 = vsel %vm13948_vm5, %v11492_v59, %v9380_v9  ;;  %v16548_v25 = vsel %vm13948_vm5, %v9382_v22, %v9383_v60  ;;  %v9397_v34 = vrot.slane %v11426_v41, 5  ;;  %v11495_v16 = vrot.slane %v11427_v48, 9  ;;  %v10827_v59 = vld [vmem:[%s17327_s0 + $0xec] sm:$0x1] }
 0x212   :  { %v16562_v47 = vsel %vm13948_vm5, %v9389_v24, %v9390_v63  ;;  %v9396_v44 = vrot.slane %v9394_v13, 4  ;;  %v11538_v28 = vcombine.low %v16522_v15, %v16526_v7  ;;  %v11539_v29 = vcombine.low %v16536_v33, %v16540_v18  ;;  %v10828_v24 = vld [vmem:[%s17327_s0 + $0xf0] sm:$0xf]  ;;  %v11442_v18 = vld [vmem:[%s17327_s0 + $0x114] sm:$0xe] }
 0x213   :  { %12275 = vmatmul.mubr.bf16.gmra.mrb[40].mxu1 %v13512_v55  ;;  %12639 = vmatmul.mubr.bf16.gmra.mrb[4].mxu0 %v11532_v58  ;;  %v11494_v55 = vrot.slane %v11424_v11, 9  ;;  %v9401_v1 = vrot.slane %v11428_v5, 5  ;;  %v9404_v40 = vrot.slane %v11429_v10, 5  ;;  %v11430_v58 = vld [vmem:[%s17327_s0 + $0xcc] sm:$0xe]  ;;  %v11540_v45 = vcombine.low %v16544_v12, %v16548_v25 }
 0x214   :  { %12278 = vmatprep.mubr.bf16.mxu1 %v13513_v3  ;;  %12642 = vmatprep.mubr.bf16.mxu0 %v11533_v27  ;;  %v16552_v3 = vsel %vm13948_vm5, %v11493_v0, %v9387_v61  ;;  %v16587_v21 = vsel %vm13948_vm5, %v9396_v44, %v9397_v34  ;;  %v11431_v27 = vld [vmem:[%s17327_s0 + $0xd0] sm:$0xf]  ;;  %v11496_v52 = vrot.slane %v11430_v58, 9  ;;  %v9411_v36 = vrot.slane %v11432_v46, 5  ;;  %v11435_v11 = vld [vmem:[%s17327_s0 + $0xf8] sm:$0x1] }
 0x215   :  { %v16566_v49 = vsel %vm13948_vm5, %v11494_v55, %v9394_v13  ;;  %v11541_v50 = vcombine.low %v16552_v3, %v16562_v47  ;;  %v16602_v42 = vsel %vm13948_vm5, %v11495_v16, %v9401_v1  ;;  %v9403_v31 = vrot.slane %v9401_v1, 4  ;;  %v10829_v44 = vld [vmem:[%s17327_s0 + $0xf4] sm:$0xf]  ;;  %v10830_v1 = vld [vmem:[%s17327_s0 + $0xf8] sm:$0x1] }
 0x216   :  { %v11542_v54 = vcombine.low %v16566_v49, %v16587_v21  ;;  %v9408_v51 = vrot.slane %v11431_v27, 5  ;;  %v4621_v9 = vshrl.u32 %v10825_v23, 16  ;;  %v4630_v19 = vshll.u32 %v10826_v39, 16  ;;  %v10836_v7 = vld [vmem:[%s17327_s0 + $0x110] sm:$0x1] }
 0x217   :  { %v16615_v60 = vsel %vm13948_vm5, %v9403_v31, %v9404_v40  ;;  %v4634_v22 = vshrl.u32 %v10826_v39, 16  ;;  %v4640_v41 = vshll.u32 %v10827_v59, 16  ;;  %v9415_v48 = vrot.slane %v11434_v14, 5  ;;  %v11437_v59 = vld [vmem:[%s17327_s0 + $0x100] sm:$0xf] }
 0x218   :  { %v16619_v38 = vsel %vm13948_vm5, %v11496_v52, %v9408_v51  ;;  %v9410_v6 = vrot.slane %v9408_v51, 4  ;;  %v11543_v0 = vcombine.low %v16602_v42, %v16615_v60  ;;  %v4632_v63 = vrot.slane %v4630_v19, 5  ;;  %v10840_v3 = vld [vmem:[%s17327_s0 + $0x120] sm:$0xf]  ;;  %v10845_v42 = vld [vmem:[%s17327_s0 + $0x134] sm:$0x1] }
 0x219   :  { %v4636_v17 = vrot.slane %v4634_v22, 4  ;;  %v9418_v5 = vrot.slane %v11435_v11, 5  ;;  %v4642_v16 = vrot.slane %v4640_v41, 5  ;;  %v4645_v40 = vshrl.u32 %v10828_v24, 16  ;;  %v11438_v22 = vld [vmem:[%s17327_s0 + $0x104] sm:$0x1] }
 0x21a   :  { %v4648_v58 = vshll.u32 %v10828_v24, 16  ;;  %v9417_v52 = vrot.slane %v9415_v48, 4  ;;  %v4654_v31 = vshll.u32 %v10829_v44, 16  ;;  %v10833_v11 = vld [vmem:[%s17327_s0 + $0x104] sm:$0x1] }
 0x21b   :  { %12279 = vmatmul.mubr.bf16.gmra.mrb[44].mxu1 %v13514_v30  ;;  %12643 = vmatmul.mubr.bf16.gmra.mrb[8].mxu0 %v11534_v62  ;;  %v4624_v30 = vshll.u32 %v10825_v23, 16  ;;  %v11433_v62 = vld [vmem:[%s17327_s0 + $0xf0] sm:$0xe]  ;;  %v4637_v10 = vor.u32 %v4636_v17, %v4632_v63  ;;  %v4647_v23 = vrot.slane %v4645_v40, 4 }
 0x21c   :  { %12282 = vmatprep.mubr.bf16.mxu1 %v13515_v4  ;;  %12646 = vmatprep.mubr.bf16.mxu0 %v11535_v56  ;;  %v4623_v56 = vrot.slane %v4621_v9, 4  ;;  %v16634_v4 = vsel %vm13948_vm5, %v9410_v6, %v9411_v36  ;;  %v11497_v55 = vrot.slane %v11433_v62, 9  ;;  %v4650_v39 = vrot.slane %v4648_v58, 5  ;;  %v10831_v62 = vld [vmem:[%s17327_s0 + $0xfc] sm:$0xf] }
 0x21d   :  { %v4626_v61 = vrot.slane %v4624_v30, 5  ;;  %v11544_v13 = vcombine.low %v16619_v38, %v16634_v4  ;;  %v4638_v51 = vrot.slane %v4637_v10, 4  ;;  %v4658_v36 = vshrl.u32 %v10829_v44, 16 }
 0x21e   :  { %v16652_v46 = vsel %vm13948_vm5, %v11497_v55, %v9415_v48  ;;  %v16667_v30 = vsel %vm13948_vm5, %v9417_v52, %v9418_v5  ;;  %v4656_v19 = vrot.slane %v4654_v31, 5  ;;  %v4664_v6 = vshll.u32 %v10830_v1, 16 }
 0x21f   :  { %v4627_v34 = vor.u32 %v4626_v61, %v4623_v56  ;;  %v4643_v57 = vsel %vm13668_vm2, %v4638_v51, %v4642_v16  ;;  %v4651_v14 = vor.u32 %v4650_v39, %v4647_v23  ;;  %v4660_v56 = vrot.slane %v4658_v36, 4  ;;  %v10832_v61 = vld [vmem:[%s17327_s0 + $0x100] sm:$0xf]  ;;  %v11440_v16 = vld [vmem:[%s17327_s0 + $0x10c] sm:$0xf] }
 0x220   :  { %v4666_v26 = vrot.slane %v4664_v6, 5  ;;  %v9425_v55 = vrot.slane %v11438_v22, 5  ;;  %v4669_v24 = vshrl.u32 %v10831_v62, 16  ;;  %v4672_v44 = vshll.u32 %v10831_v62, 16  ;;  %v10834_v23 = vld [vmem:[%s17327_s0 + $0x108] sm:$0xf] }
 0x221   :  { %v4628_v27 = vrot.slane %v4627_v34, 4  ;;  %v4652_v17 = vrot.slane %v4651_v14, 4  ;;  %v4661_v41 = vor.u32 %v4660_v56, %v4656_v19  ;;  %v11439_v34 = vld [vmem:[%s17327_s0 + $0x108] sm:$0xe]  ;;  %v4678_v10 = vshll.u32 %v10832_v61, 16  ;;  %v13520_v6 = vld [vmem:[%s17327_s0 + $0x180] sm:$0xff]  }
 0x222   :  { %v4671_v58 = vrot.slane %v4669_v24, 4  ;;  %v4674_v31 = vrot.slane %v4672_v44, 5  ;;  %v4688_v51 = vshll.u32 %v10833_v11, 16  ;;  %v13521_v14 = vld [vmem:[%s17327_s0 + $0x18c] sm:$0xff]   ;;  %v4712_v44 = vshll.u32 %v10836_v7, 16 }
 0x223   :  { %12283 = vmatmul.mubr.bf16.gmra.mrb[48].mxu1 %v13516_v2  ;;  %v13518_v2 = vld [vmem:[%s17327_s0 + $0x168] sm:$0xff]   ;;  %12647 = vmatmul.mubr.bf16.gmra.mrb[12].mxu0 %v11536_v53  ;;  %v4633_v9 = vsel %vm13668_vm2, %v4628_v27, %v4632_v63  ;;  %v11545_v53 = vcombine.low %v16652_v46, %v16667_v30  ;;  %v4657_v1 = vsel %vm13668_vm2, %v4652_v17, %v4656_v19  ;;  %v4662_v40 = vrot.slane %v4661_v41, 4  ;;  %v11446_v7 = vld [vmem:[%s17327_s0 + $0x124] sm:$0xf] }
 0x224   :  { %12286 = vmatprep.mubr.bf16.mxu1 %v13517_v35  ;;  %v11436_v35 = vld [vmem:[%s17327_s0 + $0xfc] sm:$0xe]  ;;  %12650 = vmatprep.mubr.bf16.mxu0 %v11537_v8  ;;  %v16688_v63 = vcombine.low %v4633_v9, %v4643_v57  ;;  %v9422_v8 = vrot.slane %v11437_v59, 5  ;;  %v4682_v27 = vshrl.u32 %v10832_v61, 16  ;;  %v11499_v9 = vrot.slane %v11439_v34, 9 }
 0x225   :  { %v11498_v32 = vrot.slane %v11436_v35, 9  ;;  %v4680_v35 = vrot.slane %v4678_v10, 5  ;;  %v4667_v39 = vsel %vm13668_vm2, %v4662_v40, %v4666_v26  ;;  %v10835_v19 = vld [vmem:[%s17327_s0 + $0x10c] sm:$0xf]  ;;  %v4675_v62 = vor.u32 %v4674_v31, %v4671_v58  ;;  %v11444_v10 = vld [vmem:[%s17327_s0 + $0x11c] sm:$0x1] }
 0x226   :  { %v9424_v5 = vrot.slane %v9422_v8, 4  ;;  %v4684_v59 = vrot.slane %v4682_v27, 4  ;;  %v16728_v22 = vcombine.low %v4657_v1, %v4667_v39  ;;  %v9429_v57 = vrot.slane %v11440_v16, 5  ;;  %v10837_v16 = vld [vmem:[%s17327_s0 + $0x114] sm:$0xf] }
 0x227   :  { %v16698_v48 = vsel %vm13948_vm5, %v11498_v32, %v9422_v8  ;;  %v4696_v61 = vshll.u32 %v10834_v23, 16  ;;  %v4676_v26 = vrot.slane %v4675_v62, 4  ;;  %v4702_v33 = vshll.u32 %v10835_v19, 16  ;;  %v10839_v39 = vld [vmem:[%s17327_s0 + $0x11c] sm:$0x1] }
 0x228   :  { %v16710_v52 = vsel %vm13948_vm5, %v9424_v5, %v9425_v55  ;;  %v4685_v56 = vor.u32 %v4684_v59, %v4680_v35  ;;  %v16741_v32 = vsel %vm13948_vm5, %v11499_v9, %v9429_v57  ;;  %v9431_v8 = vrot.slane %v9429_v57, 4  ;;  %v11443_v55 = vld [vmem:[%s17327_s0 + $0x118] sm:$0xf]  ;;  %v11445_v62 = vld [vmem:[%s17327_s0 + $0x120] sm:$0xe] }
 0x229   :  { %v11546_v36 = vcombine.low %v16698_v48, %v16710_v52  ;;  %v4698_v17 = vrot.slane %v4696_v61, 5  ;;  %v4706_v41 = vshrl.u32 %v10835_v19, 16  ;;  %v4681_v24 = vsel %vm13668_vm2, %v4676_v26, %v4680_v35  ;;  %v11447_v61 = vld [vmem:[%s17327_s0 + $0x128] sm:$0x1]  ;;  %v11454_v46 = vld [vmem:[%s17327_s0 + $0x144] sm:$0xe] }
 0x22a   :  { %v4704_v5 = vrot.slane %v4702_v33, 5  ;;  %v4714_v35 = vrot.slane %v4712_v44, 5  ;;  %v9439_v19 = vrot.slane %v11444_v10, 5  ;;  %v9446_v10 = vrot.slane %v11447_v61, 5 }
 0x22b   :  { %12287 = vmatmul.mubr.bf16.gmra.mrb[52].mxu1 %v13518_v2  ;;  %v11441_v2 = vld [vmem:[%s17327_s0 + $0x110] sm:$0x1]  ;;  %12651 = vmatmul.mubr.bf16.gmra.mrb[16].mxu0 %v11538_v28  ;;  %v4693_v28 = vshrl.u32 %v10834_v23, 16  ;;  %v4708_v27 = vrot.slane %v4706_v41, 4  ;;  %v9436_v23 = vrot.slane %v11443_v55, 5 }
 0x22c   :  { %12290 = vmatprep.mubr.bf16.mxu1 %v13519_v20  ;;  %v4690_v20 = vrot.slane %v4688_v51, 5  ;;  %12654 = vmatprep.mubr.bf16.mxu0 %v11539_v29  ;;  %v9432_v15 = vrot.slane %v11441_v2, 5  ;;  %v4686_v29 = vrot.slane %v4685_v56, 4  ;;  %v10838_v2 = vld [vmem:[%s17327_s0 + $0x118] sm:$0xf]  ;;  %v11500_v51 = vrot.slane %v11442_v18, 9 }
 0x22d   :  { %v4695_v11 = vrot.slane %v4693_v28, 4  ;;  %v4709_v9 = vor.u32 %v4708_v27, %v4704_v5  ;;  %v4720_v56 = vshll.u32 %v10837_v16, 16  ;;  %v4730_v28 = vshrl.u32 %v10838_v2, 16 }
 0x22e   :  { %v16753_v34 = vsel %vm13948_vm5, %v9431_v8, %v9432_v15  ;;  %v4691_v1 = vsel %vm13668_vm2, %v4686_v29, %v4690_v20  ;;  %v13522_v20 = vld [vmem:[%s17327_s0 + $0x198] sm:$0xff]   ;;  %v16784_v57 = vsel %vm13948_vm5, %v11500_v51, %v9436_v23  ;;  %v4726_v15 = vshll.u32 %v10838_v2, 16 }
 0x22f   :  { %v11547_v40 = vcombine.low %v16741_v32, %v16753_v34  ;;  %v4699_v58 = vor.u32 %v4698_v17, %v4695_v11  ;;  %v16768_v31 = vcombine.low %v4681_v24, %v4691_v1  ;;  %v4710_v25 = vrot.slane %v4709_v9, 4  ;;  %v10841_v17 = vld [vmem:[%s17327_s0 + $0x124] sm:$0xf]  ;;  %v10852_v32 = vld [vmem:[%s17327_s0 + $0x150] sm:$0xf] }
 0x230   :  { %v4722_v8 = vrot.slane %v4720_v56, 5  ;;  %v4728_v33 = vrot.slane %v4726_v15, 5  ;;  %v4736_v18 = vshll.u32 %v10839_v39, 16  ;;  %v4732_v29 = vrot.slane %v4730_v28, 4  ;;  %v11450_v56 = vld [vmem:[%s17327_s0 + $0x134] sm:$0x1] }
 0x231   :  { %v4700_v59 = vrot.slane %v4699_v58, 4  ;;  %v4715_v47 = vsel %vm13668_vm2, %v4710_v25, %v4714_v35  ;;  %v11501_v11 = vrot.slane %v11445_v62, 9  ;;  %v4741_v1 = vshrl.u32 %v10840_v3, 16  ;;  %v10843_v15 = vld [vmem:[%s17327_s0 + $0x12c] sm:$0xf] }
 0x232   :  { %v4738_v24 = vrot.slane %v4736_v18, 5  ;;  %v4733_v44 = vor.u32 %v4732_v29, %v4728_v33  ;;  %v4744_v58 = vshll.u32 %v10840_v3, 16  ;;  %v4750_v51 = vshll.u32 %v10841_v17, 16  ;;  %v11451_v18 = vld [vmem:[%s17327_s0 + $0x138] sm:$0xe] }
 0x233   :  { %12291 = vmatmul.mubr.bf16.gmra.mrb[56].mxu1 %v13520_v6  ;;  %v4717_v6 = vshrl.u32 %v10837_v16, 16  ;;  %12655 = vmatmul.mubr.bf16.gmra.mrb[20].mxu0 %v11540_v45  ;;  %v4705_v12 = vsel %vm13668_vm2, %v4700_v59, %v4704_v5  ;;  %v9443_v5 = vrot.slane %v11446_v7, 5  ;;  %v10842_v16 = vld [vmem:[%s17327_s0 + $0x128] sm:$0x1]  ;;  %v4743_v39 = vrot.slane %v4741_v1, 4 }
 0x234   :  { %12294 = vmatprep.mubr.bf16.mxu1 %v13521_v14  ;;  %v9438_v14 = vrot.slane %v9436_v23, 4  ;;  %12658 = vmatprep.mubr.bf16.mxu0 %v11541_v50  ;;  %v16811_v41 = vcombine.low %v4705_v12, %v4715_v47  ;;  %v11448_v23 = vld [vmem:[%s17327_s0 + $0x12c] sm:$0xe]  ;;  %v4746_v59 = vrot.slane %v4744_v58, 5  ;;  %v4754_v9 = vshrl.u32 %v10841_v17, 16 }
 0x235   :  { %v4719_v45 = vrot.slane %v4717_v6, 4  ;;  %v16819_v2 = vsel %vm13948_vm5, %v11501_v11, %v9443_v5  ;;  %v9445_v35 = vrot.slane %v9443_v5, 4  ;;  %v10844_v12 = vld [vmem:[%s17327_s0 + $0x130] sm:$0xf]  ;;  %v11502_v28 = vrot.slane %v11448_v23, 9 }
 0x236   :  { %v16799_v26 = vsel %vm13948_vm5, %v9438_v14, %v9439_v19  ;;  %v11449_v19 = vld [vmem:[%s17327_s0 + $0x130] sm:$0xf]  ;;  %v4760_v14 = vshll.u32 %v10842_v16, 16  ;;  %v4756_v7 = vrot.slane %v4754_v9, 4  ;;  %v4768_v29 = vshll.u32 %v10843_v15, 16 }
 0x237   :  { %v11548_v50 = vcombine.low %v16784_v57, %v16799_v26  ;;  %v4723_v55 = vor.u32 %v4722_v8, %v4719_v45  ;;  %v16834_v62 = vsel %vm13948_vm5, %v9445_v35, %v9446_v10  ;;  %v9450_v61 = vrot.slane %v11449_v19, 5  ;;  %v11452_v17 = vld [vmem:[%s17327_s0 + $0x13c] sm:$0xf] }
 0x238   :  { %v11549_v21 = vcombine.low %v16819_v2, %v16834_v62  ;;  %v4762_v45 = vrot.slane %v4760_v14, 5  ;;  %v9453_v8 = vrot.slane %v11450_v56, 5  ;;  %v4774_v11 = vshll.u32 %v10844_v12, 16  ;;  %v10848_v14 = vld [vmem:[%s17327_s0 + $0x140] sm:$0x1] }
 0x239   :  { %v4724_v27 = vrot.slane %v4723_v55, 4  ;;  %v16861_v3 = vsel %vm13948_vm5, %v11502_v28, %v9450_v61  ;;  %v9452_v47 = vrot.slane %v9450_v61, 4  ;;  %v4770_v16 = vrot.slane %v4768_v29, 5  ;;  %v10857_v2 = vld [vmem:[%s17327_s0 + $0x164] sm:$0x1] }
 0x23a   :  { %v4776_v1 = vrot.slane %v4774_v11, 5  ;;  %v4784_v58 = vshll.u32 %v10845_v42, 16  ;;  %v11503_v23 = vrot.slane %v11451_v18, 9  ;;  %v9457_v19 = vrot.slane %v11452_v17, 5 }
 0x23b   :  { %12295 = vmatmul.mubr.bf16.gmra.mrb[60].mxu1 %v13522_v20  ;;  %12659 = vmatmul.mubr.bf16.gmra.mrb[24].mxu0 %v11542_v54  ;;  %v4729_v6 = vsel %vm13668_vm2, %v4724_v27, %v4728_v33  ;;  %v4752_v20 = vrot.slane %v4750_v51, 5  ;;  %v4747_v54 = vor.u32 %v4746_v59, %v4743_v39  ;;  %v4765_v33 = vshrl.u32 %v10843_v15, 16 }
 0x23c   :  { %12346 = vmatprep.mubr.bf16.mxu1 %v16688_v63  ;;  %v4734_v63 = vrot.slane %v4733_v44, 4  ;;  %12662 = vmatprep.mubr.bf16.mxu0 %v11543_v0  ;;  %v4778_v44 = vshrl.u32 %v10844_v12, 16  ;;  %v16874_v10 = vsel %vm13948_vm5, %v9452_v47, %v9453_v8  ;;  %v4786_v9 = vrot.slane %v4784_v58, 5  ;;  %v11455_v12 = vld [vmem:[%s17327_s0 + $0x148] sm:$0xf] }
 0x23d   :  { %v4748_v60 = vrot.slane %v4747_v54, 4  ;;  %v4757_v0 = vor.u32 %v4756_v7, %v4752_v20  ;;  %v4767_v5 = vrot.slane %v4765_v33, 4  ;;  %v11550_v35 = vcombine.low %v16861_v3, %v16874_v10  ;;  %v10850_v47 = vld [vmem:[%s17327_s0 + $0x148] sm:$0xf] }
 0x23e   :  { %v4739_v49 = vsel %vm13668_vm2, %v4734_v63, %v4738_v24  ;;  %v4780_v51 = vrot.slane %v4778_v44, 4  ;;  %v10847_v63 = vld [vmem:[%s17327_s0 + $0x13c] sm:$0xf]  ;;  %v16899_v38 = vsel %vm13948_vm5, %v11503_v23, %v9457_v19  ;;  %v9459_v4 = vrot.slane %v9457_v19, 4 }
 0x23f   :  { %v10909_v25 = vcombine.low %v4729_v6, %v4739_v49  ;;  %v4753_v55 = vsel %vm13668_vm2, %v4748_v60, %v4752_v20  ;;  %v4758_v24 = vrot.slane %v4757_v0, 4  ;;  %v4771_v59 = vor.u32 %v4770_v16, %v4767_v5  ;;  %v11456_v60 = vld [vmem:[%s17327_s0 + $0x14c] sm:$0x1]  ;;  %v10849_v0 = vld [vmem:[%s17327_s0 + $0x144] sm:$0xf] }
 0x240   :  { %v4781_v6 = vor.u32 %v4780_v51, %v4776_v1  ;;  %v4802_v7 = vshrl.u32 %v10847_v63, 16  ;;  %v4808_v42 = vshll.u32 %v10848_v14, 16  ;;  %v11504_v17 = vrot.slane %v11454_v46, 9  ;;  %v11457_v16 = vld [vmem:[%s17327_s0 + $0x150] sm:$0xe] }
 0x241   :  { %v4763_v27 = vsel %vm13668_vm2, %v4758_v24, %v4762_v45  ;;  %v4772_v49 = vrot.slane %v4771_v59, 4  ;;  %v9467_v44 = vrot.slane %v11456_v60, 5  ;;  %v11458_v51 = vld [vmem:[%s17327_s0 + $0x154] sm:$0xf]  ;;  %v11505_v14 = vrot.slane %v11457_v16, 9 }
 0x242   :  { %v16889_v39 = vcombine.low %v4753_v55, %v4763_v27  ;;  %v4782_v30 = vrot.slane %v4781_v6, 4  ;;  %v4804_v18 = vrot.slane %v4802_v7, 4  ;;  %v4810_v11 = vrot.slane %v4808_v42, 5  ;;  %v11460_v42 = vld [vmem:[%s17327_s0 + $0x15c] sm:$0xe] }
 0x243   :  { %12347 = vmatmul.mubr.bf16.vlgmr.msra.gmra.mrb[32].mxu1 %v16728_v22  ;;  %v11453_v22 = vld [vmem:[%s17327_s0 + $0x140] sm:$0x1]  ;;  %12663 = vmatmul.mubr.bf16.gmra.mrb[28].mxu0 %v11544_v13  ;;  %v4798_v13 = vshll.u32 %v10847_v63, 16  ;;  %v4777_v45 = vsel %vm13668_vm2, %v4772_v49, %v4776_v1  ;;  %v9464_v55 = vrot.slane %v11455_v12, 5  ;;  %v4822_v27 = vshll.u32 %v10850_v47, 16 }
 0x244   :  { %12350 = vmatprep.mubr.bf16.mxu1 %v16768_v31  ;;  %v10846_v31 = vld [vmem:[%s17327_s0 + $0x138] sm:$0xf]  ;;  %12666 = vmatprep.mubr.bf16.mxu0 %v11545_v53  ;;  %v9460_v20 = vrot.slane %v11453_v22, 5  ;;  %v4813_v22 = vshrl.u32 %v10849_v0, 16  ;;  %v4840_v7 = vshll.u32 %v10852_v32, 16  ;;  %v11506_v16 = vrot.slane %v11460_v42, 9 }
 0x245   :  { %v4789_v56 = vshrl.u32 %v10846_v31, 16  ;;  %v4792_v15 = vshll.u32 %v10846_v31, 16  ;;  %v4800_v61 = vrot.slane %v4798_v13, 5  ;;  %v16938_v1 = vsel %vm13948_vm5, %v11504_v17, %v9464_v55  ;;  %v11459_v63 = vld [vmem:[%s17327_s0 + $0x158] sm:$0x1] }
 0x246   :  { %v16912_v28 = vsel %vm13948_vm5, %v9459_v4, %v9460_v20  ;;  %v9466_v58 = vrot.slane %v9464_v55, 4  ;;  %v4816_v31 = vshll.u32 %v10849_v0, 16  ;;  %v4815_v52 = vrot.slane %v4813_v22, 4  ;;  %v11462_v55 = vld [vmem:[%s17327_s0 + $0x164] sm:$0x1] }
 0x247   :  { %v4791_v53 = vrot.slane %v4789_v56, 4  ;;  %v4794_v54 = vrot.slane %v4792_v15, 5  ;;  %v11551_v8 = vcombine.low %v16899_v38, %v16912_v28  ;;  %v4805_v5 = vor.u32 %v4804_v18, %v4800_v61  ;;  %v10853_v56 = vld [vmem:[%s17327_s0 + $0x154] sm:$0xf]  ;;  %v11461_v18 = vld [vmem:[%s17327_s0 + $0x160] sm:$0xf] }
 0x248   :  { %v16953_v59 = vsel %vm13948_vm5, %v9466_v58, %v9467_v44  ;;  %v4824_v19 = vrot.slane %v4822_v27, 5  ;;  %v9471_v13 = vrot.slane %v11458_v51, 5  ;;  %v9478_v58 = vrot.slane %v11461_v18, 5  ;;  %v11463_v51 = vld [vmem:[%s17327_s0 + $0x168] sm:$0xe] }
 0x249   :  { %v4795_v33 = vor.u32 %v4794_v54, %v4791_v53  ;;  %v4806_v48 = vrot.slane %v4805_v5, 4  ;;  %v10854_v53 = vld [vmem:[%s17327_s0 + $0x158] sm:$0x1]  ;;  %v4837_v54 = vshrl.u32 %v10852_v32, 16  ;;  %v10856_v5 = vld [vmem:[%s17327_s0 + $0x160] sm:$0xf] }
 0x24a   :  { %v4856_v17 = vshll.u32 %v10854_v53, 16  ;;  %v4874_v32 = vshrl.u32 %v10856_v5, 16  ;;  %v10859_v53 = vld [vmem:[%s17327_s0 + $0x16c] sm:$0xf]  ;;  %v11466_v38 = vld [vmem:[%s17327_s0 + $0x174] sm:$0xe] }
 0x24b   :  { %12351 = vmatmul.mubr.bf16.gmra.mrb[36].mxu1 %v16811_v41  ;;  %v4787_v41 = vsel %vm13668_vm2, %v4782_v30, %v4786_v9  ;;  %v4796_v24 = vrot.slane %v4795_v33, 4  ;;  %12667 = vmatmul.mubr.bf16.gmra.mrb[32].mxu0 %v11546_v36  ;;  %v4826_v36 = vshrl.u32 %v10850_v47, 16  ;;  %v4818_v9 = vrot.slane %v4816_v31, 5 }
 0x24c   :  { %12354 = vmatprep.mubr.bf16.mxu1 %v10909_v25  ;;  %v10911_v29 = vcombine.low %v4777_v45, %v4787_v41  ;;  %v10851_v25 = vld [vmem:[%s17327_s0 + $0x14c] sm:$0x1]  ;;  %12670 = vmatprep.mubr.bf16.mxu0 %v11547_v40  ;;  %v4811_v34 = vsel %vm13668_vm2, %v4806_v48, %v4810_v11  ;;  %v11552_v40 = vcombine.low %v16938_v1, %v16953_v59  ;;  %v9474_v30 = vrot.slane %v11459_v63, 5 }
 0x24d   :  { %v4801_v23 = vsel %vm13668_vm2, %v4796_v24, %v4800_v61  ;;  %v4832_v6 = vshll.u32 %v10851_v25, 16  ;;  %v4828_v20 = vrot.slane %v4826_v36, 4  ;;  %v4819_v49 = vor.u32 %v4818_v9, %v4815_v52  ;;  %v10855_v25 = vld [vmem:[%s17327_s0 + $0x15c] sm:$0xf]  ;;  %v11464_v63 = vld [vmem:[%s17327_s0 + $0x16c] sm:$0xf] }
 0x24e   :  { %v10912_v15 = vcombine.low %v4801_v23, %v4811_v34  ;;  %v16971_v45 = vsel %vm13948_vm5, %v11505_v14, %v9471_v13  ;;  %v9473_v61 = vrot.slane %v9471_v13, 4  ;;  %v4839_v0 = vrot.slane %v4837_v54, 4  ;;  %v11465_v34 = vld [vmem:[%s17327_s0 + $0x170] sm:$0x1] }
 0x24f   :  { %v4834_v4 = vrot.slane %v4832_v6, 5  ;;  %v4829_v46 = vor.u32 %v4828_v20, %v4824_v19  ;;  %v4820_v12 = vrot.slane %v4819_v49, 4  ;;  %v4842_v41 = vrot.slane %v4840_v7, 5  ;;  %v10858_v49 = vld [vmem:[%s17327_s0 + $0x168] sm:$0xf] }
 0x250   :  { %v4850_v33 = vshrl.u32 %v10853_v56, 16  ;;  %v4858_v22 = vrot.slane %v4856_v17, 5  ;;  %v9481_v31 = vrot.slane %v11462_v55, 5  ;;  %v4861_v27 = vshrl.u32 %v10855_v25, 16 }
 0x251   :  { %v4830_v60 = vrot.slane %v4829_v46, 4  ;;  %v4825_v47 = vsel %vm13668_vm2, %v4820_v12, %v4824_v19  ;;  %v17012_v23 = vsel %vm13948_vm5, %v11506_v16, %v9478_v58  ;;  %v9480_v48 = vrot.slane %v9478_v58, 4  ;;  %v10862_v58 = vld [vmem:[%s17327_s0 + $0x178] sm:$0xf] }
 0x252   :  { %v4852_v24 = vrot.slane %v4850_v33, 4  ;;  %v4864_v52 = vshll.u32 %v10855_v25, 16  ;;  %v4870_v36 = vshll.u32 %v10856_v5, 16  ;;  %v4863_v6 = vrot.slane %v4861_v27, 4  ;;  %v10863_v27 = vld [vmem:[%s17327_s0 + $0x17c] sm:$0x1] }
 0x253   :  { %12355 = vmatmul.mubr.bf16.gmra.mrb[40].mxu1 %v16889_v39  ;;  %v4846_v39 = vshll.u32 %v10853_v56, 16  ;;  %12671 = vmatmul.mubr.bf16.gmra.mrb[36].mxu0 %v11548_v50  ;;  %v4835_v57 = vsel %vm13668_vm2, %v4830_v60, %v4834_v4  ;;  %v4843_v50 = vor.u32 %v4842_v41, %v4839_v0  ;;  %v17024_v20 = vsel %vm13948_vm5, %v9480_v48, %v9481_v31  ;;  %v10860_v60 = vld [vmem:[%s17327_s0 + $0x170] sm:$0x1] }
 0x254   :  { %12358 = vmatprep.mubr.bf16.mxu1 %v10911_v29  ;;  %v16986_v29 = vsel %vm13948_vm5, %v9473_v61, %v9474_v30  ;;  %12674 = vmatprep.mubr.bf16.mxu0 %v11549_v21  ;;  %v10913_v44 = vcombine.low %v4825_v47, %v4835_v57  ;;  %v4866_v14 = vrot.slane %v4864_v52, 5  ;;  %v4872_v56 = vrot.slane %v4870_v36, 5 }
 0x255   :  { %v4848_v11 = vrot.slane %v4846_v39, 5  ;;  %v11553_v26 = vcombine.low %v16971_v45, %v16986_v29  ;;  %v4844_v62 = vrot.slane %v4843_v50, 4  ;;  %v11554_v13 = vcombine.low %v17012_v23, %v17024_v20  ;;  %v11468_v50 = vld [vmem:[%s17327_s0 + $0x17c] sm:$0x1]  ;;  %v10864_v45 = vld [vmem:[%s17327_s0 + $0x180] sm:$0xf] }
 0x256   :  { %v4876_v46 = vrot.slane %v4874_v32, 4  ;;  %v11507_v30 = vrot.slane %v11463_v51, 9  ;;  %v4867_v7 = vor.u32 %v4866_v14, %v4863_v6  ;;  %v9485_v61 = vrot.slane %v11464_v63, 5  ;;  %v11469_v63 = vld [vmem:[%s17327_s0 + $0x180] sm:$0xe] }
 0x257   :  { %v4853_v21 = vor.u32 %v4852_v24, %v4848_v11  ;;  %v4849_v9 = vsel %vm13668_vm2, %v4844_v62, %v4848_v11  ;;  %v9488_v42 = vrot.slane %v11465_v34, 5  ;;  %v4885_v0 = vshrl.u32 %v10858_v49, 16  ;;  %v11467_v11 = vld [vmem:[%s17327_s0 + $0x178] sm:$0xf]  ;;  %v10861_v24 = vld [vmem:[%s17327_s0 + $0x174] sm:$0xf] }
 0x258   :  { %v4877_v39 = vor.u32 %v4876_v46, %v4872_v56  ;;  %v4888_v41 = vshll.u32 %v10858_v49, 16  ;;  %v4868_v33 = vrot.slane %v4867_v7, 4  ;;  %v17047_v3 = vsel %vm13948_vm5, %v11507_v30, %v9485_v61  ;;  %v11470_v34 = vld [vmem:[%s17327_s0 + $0x184] sm:$0xf] }
 0x259   :  { %v4854_v19 = vrot.slane %v4853_v21, 4  ;;  %v9487_v10 = vrot.slane %v9485_v61, 4  ;;  %v4898_v47 = vshrl.u32 %v10859_v53, 16  ;;  %v4904_v57 = vshll.u32 %v10860_v60, 16 }
 0x25a   :  { %v4878_v28 = vrot.slane %v4877_v39, 4  ;;  %v4890_v18 = vrot.slane %v4888_v41, 5  ;;  %v4873_v17 = vsel %vm13668_vm2, %v4868_v33, %v4872_v56  ;;  %v11508_v21 = vrot.slane %v11466_v38, 9  ;;  %v11471_v56 = vld [vmem:[%s17327_s0 + $0x188] sm:$0x1] }
 0x25b   :  { %12359 = vmatmul.mubr.bf16.gmra.mrb[44].mxu1 %v10912_v15  ;;  %v4880_v15 = vshll.u32 %v10857_v2, 16  ;;  %v4859_v4 = vsel %vm13668_vm2, %v4854_v19, %v4858_v22  ;;  %12675 = vmatmul.mubr.bf16.gmra.mrb[40].mxu0 %v11550_v35  ;;  %v4894_v35 = vshll.u32 %v10859_v53, 16  ;;  %v17059_v55 = vsel %vm13948_vm5, %v9487_v10, %v9488_v42 }
 0x25c   :  { %12362 = vmatprep.mubr.bf16.mxu1 %v10913_v44  ;;  %v10914_v54 = vcombine.low %v4849_v9, %v4859_v4  ;;  %12678 = vmatprep.mubr.bf16.mxu0 %v11551_v8  ;;  %v4887_v8 = vrot.slane %v4885_v0, 4  ;;  %v11555_v44 = vcombine.low %v17047_v3, %v17059_v55  ;;  %v4900_v16 = vrot.slane %v4898_v47, 4  ;;  %v10866_v0 = vld [vmem:[%s17327_s0 + $0x188] sm:$0x1] }
 0x25d   :  { %v4882_v12 = vrot.slane %v4880_v15, 5  ;;  %v4896_v25 = vrot.slane %v4894_v35, 5  ;;  %v4906_v62 = vrot.slane %v4904_v57, 5  ;;  %v9492_v31 = vrot.slane %v11467_v11, 5 }
 0x25e   :  { %v4891_v22 = vor.u32 %v4890_v18, %v4887_v8  ;;  %v9495_v52 = vrot.slane %v11468_v50, 5  ;;  %v4909_v36 = vshrl.u32 %v10861_v24, 16  ;;  %v4912_v6 = vshll.u32 %v10861_v24, 16  ;;  %v11472_v8 = vld [vmem:[%s17327_s0 + $0x18c] sm:$0xe] }
 0x25f   :  { %v4883_v5 = vsel %vm13668_vm2, %v4878_v28, %v4882_v12  ;;  %v4901_v48 = vor.u32 %v4900_v16, %v4896_v25  ;;  %v17085_v9 = vsel %vm13948_vm5, %v11508_v21, %v9492_v31  ;;  %v9494_v19 = vrot.slane %v9492_v31, 4  ;;  %v10867_v16 = vld [vmem:[%s17327_s0 + $0x18c] sm:$0xf] }
 0x260   :  { %v10915_v2 = vcombine.low %v4873_v17, %v4883_v5  ;;  %v4892_v51 = vrot.slane %v4891_v22, 4  ;;  %v4918_v32 = vshll.u32 %v10862_v58, 16  ;;  %v4922_v14 = vshrl.u32 %v10862_v58, 16  ;;  %v11474_v22 = vld [vmem:[%s17327_s0 + $0x194] sm:$0x1] }
 0x261   :  { %v4902_v59 = vrot.slane %v4901_v48, 4  ;;  %v17100_v15 = vsel %vm13948_vm5, %v9494_v19, %v9495_v52  ;;  %v4914_v49 = vrot.slane %v4912_v6, 5  ;;  %v4928_v46 = vshll.u32 %v10863_v27, 16  ;;  %v11475_v52 = vld [vmem:[%s17327_s0 + $0x198] sm:$0xe] }
 0x262   :  { %v4897_v1 = vsel %vm13668_vm2, %v4892_v51, %v4896_v25  ;;  %v4920_v4 = vrot.slane %v4918_v32, 5  ;;  %v4924_v30 = vrot.slane %v4922_v14, 4  ;;  %v11509_v53 = vrot.slane %v11469_v63, 9  ;;  %v11473_v25 = vld [vmem:[%s17327_s0 + $0x190] sm:$0xf] }
 0x263   :  { %12363 = vmatmul.mubr.bf16.gmra.mrb[48].mxu1 %v10914_v54  ;;  %12679 = vmatmul.mubr.bf16.gmra.mrb[44].mxu0 %v11552_v40  ;;  %v4911_v40 = vrot.slane %v4909_v36, 4  ;;  %v4907_v29 = vsel %vm13668_vm2, %v4902_v59, %v4906_v62  ;;  %v10865_v54 = vld [vmem:[%s17327_s0 + $0x184] sm:$0xf]  ;;  %v4930_v61 = vrot.slane %v4928_v46, 5  ;;  %v9499_v39 = vrot.slane %v11470_v34, 5 }
 0x264   :  { %12366 = vmatprep.mubr.bf16.mxu1 %v10915_v2  ;;  %12682 = vmatprep.mubr.bf16.mxu0 %v11553_v26  ;;  %v11556_v26 = vcombine.low %v17085_v9, %v17100_v15  ;;  %v10916_v7 = vcombine.low %v4897_v1, %v4907_v29  ;;  %v4925_v42 = vor.u32 %v4924_v30, %v4920_v4  ;;  %v9502_v60 = vrot.slane %v11471_v56, 5  ;;  %v10868_v2 = vld [vmem:[%s17327_s0 + $0x190] sm:$0xf]  ;;  %v10869_v51 = vld [vmem:[%s17327_s0 + $0x194] sm:$0x1] }
 0x265   :  { %v4915_v12 = vor.u32 %v4914_v49, %v4911_v40  ;;  %v4933_v41 = vshrl.u32 %v10864_v45, 16  ;;  %v4936_v33 = vshll.u32 %v10864_v45, 16  ;;  %v9500_v35 = vsel %vm13948_vm5, %v11509_v53, %v9499_v39  ;;  %v11476_v32 = vld [vmem:[%s17327_s0 + $0x19c] sm:$0xf]  ;;  %v11477_v14 = vld [vmem:[%s17327_s0 + $0x1a0] sm:$0x1] }
 0x266   :  { %v9501_v38 = vrot.slane %v9499_v39, 4  ;;  %v4942_v28 = vshll.u32 %v10865_v54, 16  ;;  %v4926_v18 = vrot.slane %v4925_v42, 4  ;;  %v4946_v17 = vshrl.u32 %v10865_v54, 16  ;;  %v10870_v45 = vld [vmem:[%s17327_s0 + $0x198] sm:$0xf] }
 0x267   :  { %v4916_v10 = vrot.slane %v4915_v12, 4  ;;  %v4935_v47 = vrot.slane %v4933_v41, 4  ;;  %v4938_v11 = vrot.slane %v4936_v33, 5  ;;  %v4952_v5 = vshll.u32 %v10866_v0, 16  ;;  %v10872_v41 = vld [vmem:[%s17327_s0 + $0x1a0] sm:$0x1] }
 0x268   :  { %v9503_v50 = vsel %vm13948_vm5, %v9501_v38, %v9502_v60  ;;  %v4944_v24 = vrot.slane %v4942_v28, 5  ;;  %v4931_v23 = vsel %vm13668_vm2, %v4926_v18, %v4930_v61  ;;  %v4948_v58 = vrot.slane %v4946_v17, 4 }
 0x269   :  { %v4921_v57 = vsel %vm13668_vm2, %v4916_v10, %v4920_v4  ;;  %v11557_v20 = vcombine.low %v9500_v35, %v9503_v50  ;;  %v4954_v21 = vrot.slane %v4952_v5, 5  ;;  %v11510_v31 = vrot.slane %v11472_v8, 9 }
 0x26a   :  { %v10917_v62 = vcombine.low %v4921_v57, %v4931_v23  ;;  %v9506_v27 = vrot.slane %v11473_v25, 5  ;;  %v4949_v55 = vor.u32 %v4948_v58, %v4944_v24  ;;  %v4957_v48 = vshrl.u32 %v10867_v16, 16 }
 0x26b   :  { %12367 = vmatmul.mubr.bf16.gmra.mrb[52].mxu1 %v10916_v7  ;;  %12683 = vmatmul.mubr.bf16.gmra.mrb[48].mxu0 %v11554_v13  ;;  %v4939_v13 = vor.u32 %v4938_v11, %v4935_v47  ;;  %v4960_v19 = vshll.u32 %v10867_v16, 16  ;;  %v4966_v6 = vshll.u32 %v10868_v2, 16  ;;  %v4970_v40 = vshrl.u32 %v10868_v2, 16  ;;  %v10871_v7 = vld [vmem:[%s17327_s0 + $0x19c] sm:$0xf] }
 0x26c   :  { %12686 = vmatprep.mubr.bf16.mxu0 %v11555_v44  ;;  %v9509_v44 = vrot.slane %v11474_v22, 5  ;;  %12370 = vmatprep.mubr.bf16.mxu1 %v10917_v62  ;;  %v9507_v36 = vsel %vm13948_vm5, %v11510_v31, %v9506_v27  ;;  %v9508_v63 = vrot.slane %v9506_v27, 4  ;;  %v4950_v1 = vrot.slane %v4949_v55, 4  ;;  %v11479_v11 = vld [vmem:[%s17327_s0 + $0x1a8] sm:$0xf] }
 0x26d   :  { %v4940_v3 = vrot.slane %v4939_v13, 4  ;;  %v4959_v59 = vrot.slane %v4957_v48, 4  ;;  %v4962_v49 = vrot.slane %v4960_v19, 5  ;;  %v4968_v4 = vrot.slane %v4966_v6, 5 }
 0x26e   :  { %v9510_v56 = vsel %vm13948_vm5, %v9508_v63, %v9509_v44  ;;  %v4976_v46 = vshll.u32 %v10869_v51, 16  ;;  %v4955_v29 = vsel %vm13668_vm2, %v4950_v1, %v4954_v21  ;;  %v4972_v53 = vrot.slane %v4970_v40, 4 }
 0x26f   :  { %v4945_v34 = vsel %vm13668_vm2, %v4940_v3, %v4944_v24  ;;  %v11558_v30 = vcombine.low %v9507_v36, %v9510_v56  ;;  %v11511_v54 = vrot.slane %v11475_v52, 9  ;;  %v4963_v61 = vor.u32 %v4962_v49, %v4959_v59  ;;  %v11480_v24 = vld [vmem:[%s17327_s0 + $0x1ac] sm:$0x1] }
 0x270   :  { %v10918_v12 = vcombine.low %v4945_v34, %v4955_v29  ;;  %v4978_v39 = vrot.slane %v4976_v46, 5  ;;  %v9513_v42 = vrot.slane %v11476_v32, 5  ;;  %v4973_v60 = vor.u32 %v4972_v53, %v4968_v4 }
 0x271   :  { %v9516_v0 = vrot.slane %v11477_v14, 5  ;;  %v4981_v33 = vshrl.u32 %v10870_v45, 16  ;;  %v4984_v10 = vshll.u32 %v10870_v45, 16  ;;  %v4964_v35 = vrot.slane %v4963_v61, 4 }
 0x272   :  { %v9514_v38 = vsel %vm13948_vm5, %v11511_v54, %v9513_v42  ;;  %v9515_v9 = vrot.slane %v9513_v42, 4  ;;  %v4990_v15 = vshll.u32 %v10871_v7, 16  ;;  %v4974_v28 = vrot.slane %v4973_v60, 4 }
 0x273   :  { %12687 = vmatmul.mubr.bf16.gmra.mrb[52].mxu0 %v11556_v26  ;;  %12371 = vmatmul.mubr.bf16.gmra.mrb[56].mxu1 %v10918_v12  ;;  %v11478_v26 = vld [vmem:[%s17327_s0 + $0x1a4] sm:$0xe]  ;;  %v4983_v8 = vrot.slane %v4981_v33, 4  ;;  %v4986_v18 = vrot.slane %v4984_v10, 5  ;;  %v4994_v47 = vshrl.u32 %v10871_v7, 16  ;;  %v4969_v17 = vsel %vm13668_vm2, %v4964_v35, %v4968_v4 }
 0x274   :  { %12690 = vmatprep.mubr.bf16.mxu0 %v11557_v20  ;;  %v9517_v25 = vsel %vm13948_vm5, %v9515_v9, %v9516_v0  ;;  %v4992_v57 = vrot.slane %v4990_v15, 5  ;;  %v5000_v50 = vshll.u32 %v10872_v41, 16  ;;  %v4979_v5 = vsel %vm13668_vm2, %v4974_v28, %v4978_v39 }
 0x275   :  { %v11559_v22 = vcombine.low %v9514_v38, %v9517_v25  ;;  %v4987_v16 = vor.u32 %v4986_v18, %v4983_v8  ;;  %v4996_v23 = vrot.slane %v4994_v47, 4  ;;  %v10919_v20 = vcombine.low %v4969_v17, %v4979_v5 }
 0x276   :  { %v11512_v13 = vrot.slane %v11478_v26, 9  ;;  %v9520_v58 = vrot.slane %v11479_v11, 5  ;;  %v5002_v21 = vrot.slane %v5000_v50, 5  ;;  %v9523_v31 = vrot.slane %v11480_v24, 5 }
 0x277   :  { %v4988_v2 = vrot.slane %v4987_v16, 4  ;;  %v4997_v62 = vor.u32 %v4996_v23, %v4992_v57  ;;  %12374 = vmatprep.mubr.bf16.mxu1 %v10919_v20 }
 0x278   :  { %v9522_v27 = vrot.slane %v9520_v58, 4  ;;  %v9521_v55 = vsel %vm13948_vm5, %v11512_v13, %v9520_v58 }
 0x279   :  { %v4993_v51 = vsel %vm13668_vm2, %v4988_v2, %v4992_v57  ;;  %v4998_v3 = vrot.slane %v4997_v62, 4 }
 0x27a   :  { %v9524_v44 = vsel %vm13948_vm5, %v9522_v27, %v9523_v31 }
 0x27b   :  { %12691 = vmatmul.mubr.bf16.gmra.mrb[56].mxu0 %v11558_v30  ;;  %v5003_v48 = vsel %vm13668_vm2, %v4998_v3, %v5002_v21  ;;  %v11560_v36 = vcombine.low %v9521_v55, %v9524_v44  ;;  %v17243_v44 = vld [vmem:[#allocation3] ss:$0 sm:$0xff] }
 0x27c   :  { %12694 = vmatprep.mubr.bf16.mxu0 %v11559_v22  ;;  %v10920_v52 = vcombine.low %v4993_v51, %v5003_v48 }
 0x27e   :  { %12375 = vmatmul.mubr.bf16.gmra.mrb[60].mxu1 %v10920_v52 }
 0x283   :  { %12695 = vmatmul.mubr.bf16.gmra.mrb[60].mxu0 %v11560_v36 }
 0x296   :  { %v12236_v63 = vpop.f32.mrb[0].mxu1 }
 0x297   :  { %v3693_v19 = vpop.f32.mrb[1].mxu1 }
 0x298   :  { %v12237_v6 = vpop.f32.mrb[2].mxu1 }
 0x299   :  { %v3696_v32 = vpop.f32.mrb[3].mxu1 }
 0x29e   :  { %v12240_v34 = vpop.f32.mrb[4].mxu1 }
 0x29f   :  { %v3709_v1 = vpop.f32.mrb[5].mxu1 }
 0x2a0   :  { %v12241_v59 = vpop.f32.mrb[6].mxu1 }
 0x2a1   :  { %v3712_v40 = vpop.f32.mrb[7].mxu1 }
 0x2a6   :  { %v12244_v14 = vpop.f32.mrb[8].mxu1 }
 0x2a7   :  { %v3725_v56 = vpop.f32.mrb[9].mxu1 }
 0x2a8   :  { %v12245_v49 = vpop.f32.mrb[10].mxu1 }
 0x2a9   :  { %v17201_v43 = vpop.f32.mrb[11].mxu1 }
 0x2ae   :  { %v17203_v4 = vpop.f32.mrb[12].mxu1 }
 0x2af   :  { %v17205_v37 = vpop.f32.mrb[13].mxu1 }
 0x2b0   :  { %v17207_v46 = vpop.f32.mrb[14].mxu1 }
 0x2b1   :  { %v17209_v45 = vpop.f32.mrb[15].mxu1 }
 0x2b6   :  { %v17211_v29 = vpop.f32.mrb[16].mxu1 }
 0x2b7   :  { %v17213_v30 = vpop.f32.mrb[17].mxu1 }
 0x2b8   :  { %v17215_v53 = vpop.f32.mrb[18].mxu1 }
 0x2b9   :  { %v17217_v54 = vpop.f32.mrb[19].mxu1 }
 0x2be   :  { %v17219_v7 = vpop.f32.mrb[20].mxu1 }
 0x2bf   :  { %v17221_v12 = vpop.f32.mrb[21].mxu1 }
 0x2c0   :  { %v17223_v61 = vpop.f32.mrb[22].mxu1 }
 0x2c1   :  { %v17225_v39 = vpop.f32.mrb[23].mxu1 }
 0x2c6   :  { %v17227_v42 = vpop.f32.mrb[24].mxu1 }
 0x2c7   :  { %v17229_v60 = vpop.f32.mrb[25].mxu1 }
 0x2c8   :  { %v17231_v0 = vpop.f32.mrb[26].mxu1 }
 0x2c9   :  { %v17233_v41 = vpop.f32.mrb[27].mxu1 }
 0x2ce   :  { %v17235_v33 = vpop.f32.mrb[28].mxu1 }
 0x2cf   :  { %v17237_v10 = vpop.f32.mrb[29].mxu1 }
 0x2d0   :  { %v17239_v35 = vpop.f32.mrb[30].mxu1 }
 0x2d1   :  { %v17241_v38 = vpop.f32.mrb[31].mxu1 }
 0x2de   :  { %v12636_v9 = vpop.f32.mrb[0].mxu0 }
 0x2df   :  { %v12716_v15 = vadd.f32 %v12636_v9, %v12236_v63  ;;  %v9752_v26 = vpop.f32.mrb[1].mxu0 }
 0x2e0   :  { %v12719_v28 = vadd.f32 %v9752_v26, %v3693_v19  ;;  %v12637_v8 = vpop.f32.mrb[2].mxu0 }
 0x2e1   :  { %10137 = vst [vmem:[#allocation2 + $0x10] sm:$0xff] %v12716_v15  ;;  %v12722_v18 = vadd.f32 %v12637_v8, %v12237_v6  ;;  %v9755_v47 = vpop.f32.mrb[3].mxu0 }
 0x2e2   :  { %10135 = vst [vmem:[#allocation2] sm:$0xff] %v12719_v28  ;;  %v12725_v11 = vadd.f32 %v9755_v47, %v3696_v32 }
 0x2e3   :  { %10138 = vst [vmem:[#allocation2 + $0x18] sm:$0xff] %v12722_v18 }
 0x2e4   :  { %10136 = vst [vmem:[#allocation2 + $0x8] sm:$0xff] %v12725_v11 }
 0x2e6   :  { %v12640_v17 = vpop.f32.mrb[4].mxu0 }
 0x2e7   :  { %v12728_v25 = vadd.f32 %v12640_v17, %v12240_v34  ;;  %v9768_v57 = vpop.f32.mrb[5].mxu0 }
 0x2e8   :  { %v12731_v50 = vadd.f32 %v9768_v57, %v3709_v1  ;;  %v12641_v24 = vpop.f32.mrb[6].mxu0 }
 0x2e9   :  { %10141 = vst [vmem:[#allocation2 + $0x30] sm:$0xff] %v12728_v25  ;;  %v12734_v5 = vadd.f32 %v12641_v24, %v12241_v59  ;;  %v9771_v22 = vpop.f32.mrb[7].mxu0 }
 0x2ea   :  { %v10201_v16 = vld [vmem:[#allocation2 + $0x10] ss:$2 sm:$0xff]  ;;  %v10265_v23 = vld [vmem:[#allocation2 + $0x11] ss:$2 sm:$0xff]  ;;  %10139 = vst [vmem:[#allocation2 + $0x20] sm:$0xff] %v12731_v50  ;;  %v12737_v20 = vadd.f32 %v9771_v22, %v3712_v40 }
 0x2eb   :  { %v10199_v13 = vld [vmem:[#allocation2] ss:$2 sm:$0xff]  ;;  %v10263_v58 = vld [vmem:[#allocation2 + $0x1] ss:$2 sm:$0xff]  ;;  %10142 = vst [vmem:[#allocation2 + $0x38] sm:$0xff] %v12734_v5  ;;  %v10327_v2 = vmax.f32 %v10201_v16, %v10265_v23 }
 0x2ec   :  { %v10326_v62 = vmax.f32 %v10199_v13, %v10263_v58  ;;  %10140 = vst [vmem:[#allocation2 + $0x28] sm:$0xff] %v12737_v20 }
 0x2ee   :  { %v12644_v21 = vpop.f32.mrb[8].mxu0  ;;  %v10358_v51 = vmax.f32 %v10326_v62, %v10327_v2 }
 0x2ef   :  { %v12740_v31 = vadd.f32 %v12644_v21, %v12244_v14  ;;  %v9784_v27 = vpop.f32.mrb[9].mxu0 }
 0x2f0   :  { %v12743_v3 = vadd.f32 %v9784_v27, %v3725_v56  ;;  %v12645_v55 = vpop.f32.mrb[10].mxu0  ;;  %v10381_v1 = vadd.f32 %v17243_v44, %v10358_v51 }
 0x2f1   :  { %10145 = vst [vmem:[#allocation2 + $0x50] sm:$0xff] %v12740_v31  ;;  %v12746_v48 = vadd.f32 %v12645_v55, %v12245_v49  ;;  %v9787_v52 = vpop.f32.mrb[11].mxu0 }
 0x2f2   :  { %v10205_v36 = vld [vmem:[#allocation2 + $0x30] ss:$2 sm:$0xff]  ;;  %v10269_v63 = vld [vmem:[#allocation2 + $0x31] ss:$2 sm:$0xff]  ;;  %10143 = vst [vmem:[#allocation2 + $0x40] sm:$0xff] %v12743_v3  ;;  %v12749_v19 = vadd.f32 %v9787_v52, %v17201_v43  ;;  %v10397_v49 = vmax.f32 %v10381_v1, 0.0 }
 0x2f3   :  { %v10329_v6 = vmax.f32 %v10205_v36, %v10269_v63  ;;  %v10203_v32 = vld [vmem:[#allocation2 + $0x20] ss:$2 sm:$0xff]  ;;  %v10267_v34 = vld [vmem:[#allocation2 + $0x21] ss:$2 sm:$0xff]  ;;  %10146 = vst [vmem:[#allocation2 + $0x58] sm:$0xff] %v12746_v48 }
 0x2f4   :  { %v10328_v59 = vmax.f32 %v10203_v32, %v10267_v34  ;;  %10144 = vst [vmem:[#allocation2 + $0x48] sm:$0xff] %v12749_v19  ;;  %v17253_v43 = vld [vmem:[%s17330_s3] ss:$0 sm:$0xff] }
 0x2f6   :  { %v10359_v40 = vmax.f32 %v10328_v59, %v10329_v6  ;;  %v12648_v14 = vpop.f32.mrb[12].mxu0 }
 0x2f7   :  { %v12752_v56 = vadd.f32 %v12648_v14, %v17203_v4  ;;  %v9800_v9 = vpop.f32.mrb[13].mxu0 }
 0x2f8   :  { %v10382_v15 = vadd.f32 %v17243_v44, %v10359_v40  ;;  %v12755_v26 = vadd.f32 %v9800_v9, %v17205_v37  ;;  %v12649_v28 = vpop.f32.mrb[14].mxu0  ;;  %v10420_v37 = vmul.f32 %v17253_v43, %v10397_v49 }
 0x2f9   :  { %10149 = vst [vmem:[#allocation2 + $0x70] sm:$0xff] %v12752_v56  ;;  %v12758_v8 = vadd.f32 %v12649_v28, %v17207_v46  ;;  %v9803_v18 = vpop.f32.mrb[15].mxu0 }
 0x2fa   :  { %v10398_v47 = vmax.f32 %v10382_v15, 0.0  ;;  %v10209_v11 = vld [vmem:[#allocation2 + $0x50] ss:$2 sm:$0xff]  ;;  %v10273_v17 = vld [vmem:[#allocation2 + $0x51] ss:$2 sm:$0xff]  ;;  %10147 = vst [vmem:[#allocation2 + $0x60] sm:$0xff] %v12755_v26  ;;  %v12761_v4 = vadd.f32 %v9803_v18, %v17209_v45 }
 0x2fb   :  { %v10207_v25 = vld [vmem:[#allocation2 + $0x40] ss:$2 sm:$0xff]  ;;  %v10271_v57 = vld [vmem:[#allocation2 + $0x41] ss:$2 sm:$0xff]  ;;  %10150 = vst [vmem:[#allocation2 + $0x78] sm:$0xff] %v12758_v8  ;;  %v10331_v24 = vmax.f32 %v10209_v11, %v10273_v17 }
 0x2fc   :  { %v10421_v50 = vmul.f32 %v17253_v43, %v10398_v47  ;;  %v10330_v5 = vmax.f32 %v10207_v25, %v10271_v57  ;;  %10148 = vst [vmem:[#allocation2 + $0x68] sm:$0xff] %v12761_v4 }
 0x2fe   :  { %v11574_v22 = vpack.c.bf16 %v10421_v50, %v10420_v37  ;;  %v12652_v16 = vpop.f32.mrb[16].mxu0  ;;  %v10360_v45 = vmax.f32 %v10330_v5, %v10331_v24 }
 0x2ff   :  { %v12764_v46 = vadd.f32 %v12652_v16, %v17211_v29  ;;  %v9816_v23 = vpop.f32.mrb[17].mxu0 }
 0x300   :  { %11575 = vst [vmem:[%s17331_s4] sm:$0xff] %v11574_v22   ;;  %v12767_v20 = vadd.f32 %v9816_v23, %v17213_v30  ;;  %v12653_v13 = vpop.f32.mrb[18].mxu0  ;;  %v10383_v3 = vadd.f32 %v17243_v44, %v10360_v45 }
 0x301   :  { %10153 = vst [vmem:[#allocation2 + $0x90] sm:$0xff] %v12764_v46  ;;  %v12770_v58 = vadd.f32 %v12653_v13, %v17215_v53  ;;  %v9819_v2 = vpop.f32.mrb[19].mxu0 }
 0x302   :  { %v10213_v62 = vld [vmem:[#allocation2 + $0x70] ss:$2 sm:$0xff]  ;;  %v10277_v21 = vld [vmem:[#allocation2 + $0x71] ss:$2 sm:$0xff]  ;;  %10151 = vst [vmem:[#allocation2 + $0x80] sm:$0xff] %v12767_v20  ;;  %v12773_v31 = vadd.f32 %v9819_v2, %v17217_v54  ;;  %v10399_v53 = vmax.f32 %v10383_v3, 0.0 }
 0x303   :  { %v10333_v27 = vmax.f32 %v10213_v62, %v10277_v21  ;;  %v10211_v29 = vld [vmem:[#allocation2 + $0x60] ss:$2 sm:$0xff]  ;;  %v10275_v51 = vld [vmem:[#allocation2 + $0x61] ss:$2 sm:$0xff]  ;;  %10154 = vst [vmem:[#allocation2 + $0x98] sm:$0xff] %v12770_v58 }
 0x304   :  { %v10332_v55 = vmax.f32 %v10211_v29, %v10275_v51  ;;  %10152 = vst [vmem:[#allocation2 + $0x88] sm:$0xff] %v12773_v31 }
 0x306   :  { %v10361_v48 = vmax.f32 %v10332_v55, %v10333_v27  ;;  %v12656_v30 = vpop.f32.mrb[20].mxu0 }
 0x307   :  { %v12776_v52 = vadd.f32 %v12656_v30, %v17219_v7  ;;  %v9832_v36 = vpop.f32.mrb[21].mxu0  ;;  %v10422_v7 = vmul.f32 %v17253_v43, %v10399_v53 }
 0x308   :  { %v10384_v63 = vadd.f32 %v17243_v44, %v10361_v48  ;;  %v12779_v19 = vadd.f32 %v9832_v36, %v17221_v12  ;;  %v12657_v6 = vpop.f32.mrb[22].mxu0 }
 0x309   :  { %10157 = vst [vmem:[#allocation2 + $0xb0] sm:$0xff] %v12776_v52  ;;  %v12782_v54 = vadd.f32 %v12657_v6, %v17223_v61  ;;  %v9835_v32 = vpop.f32.mrb[23].mxu0 }
 0x30a   :  { %v10400_v34 = vmax.f32 %v10384_v63, 0.0  ;;  %v10217_v1 = vld [vmem:[#allocation2 + $0x90] ss:$2 sm:$0xff]  ;;  %v10281_v59 = vld [vmem:[#allocation2 + $0x91] ss:$2 sm:$0xff]  ;;  %10155 = vst [vmem:[#allocation2 + $0xa0] sm:$0xff] %v12779_v19  ;;  %v12785_v40 = vadd.f32 %v9835_v32, %v17225_v39 }
 0x30b   :  { %v10215_v14 = vld [vmem:[#allocation2 + $0x80] ss:$2 sm:$0xff]  ;;  %v10279_v56 = vld [vmem:[#allocation2 + $0x81] ss:$2 sm:$0xff]  ;;  %10158 = vst [vmem:[#allocation2 + $0xb8] sm:$0xff] %v12782_v54  ;;  %v10335_v49 = vmax.f32 %v10217_v1, %v10281_v59 }
 0x30c   :  { %v10423_v9 = vmul.f32 %v17253_v43, %v10400_v34  ;;  %v10334_v12 = vmax.f32 %v10215_v14, %v10279_v56  ;;  %10156 = vst [vmem:[#allocation2 + $0xa8] sm:$0xff] %v12785_v40 }
 0x30e   :  { %v11579_v15 = vpack.c.bf16 %v10423_v9, %v10422_v7  ;;  %v12660_v26 = vpop.f32.mrb[24].mxu0  ;;  %v10362_v39 = vmax.f32 %v10334_v12, %v10335_v49 }
 0x30f   :  { %v12788_v61 = vadd.f32 %v12660_v26, %v17227_v42  ;;  %v9848_v28 = vpop.f32.mrb[25].mxu0 }
 0x310   :  { %11611 = vst [vmem:[%s17331_s4 + $0x8] sm:$0xff] %v11579_v15   ;;  %v12791_v8 = vadd.f32 %v9848_v28, %v17229_v60  ;;  %v12661_v18 = vpop.f32.mrb[26].mxu0  ;;  %v10385_v5 = vadd.f32 %v17243_v44, %v10362_v39 }
 0x311   :  { %10161 = vst [vmem:[#allocation2 + $0xd0] sm:$0xff] %v12788_v61  ;;  %v12794_v47 = vadd.f32 %v12661_v18, %v17231_v0  ;;  %v9851_v11 = vpop.f32.mrb[27].mxu0 }
 0x312   :  { %v10221_v17 = vld [vmem:[#allocation2 + $0xb0] ss:$2 sm:$0xff]  ;;  %v10285_v4 = vld [vmem:[#allocation2 + $0xb1] ss:$2 sm:$0xff]  ;;  %10159 = vst [vmem:[#allocation2 + $0xc0] sm:$0xff] %v12791_v8  ;;  %v12797_v25 = vadd.f32 %v9851_v11, %v17233_v41  ;;  %v10401_v20 = vmax.f32 %v10385_v5, 0.0 }
 0x313   :  { %v10337_v42 = vmax.f32 %v10221_v17, %v10285_v4  ;;  %v10219_v37 = vld [vmem:[#allocation2 + $0xa0] ss:$2 sm:$0xff]  ;;  %v10283_v50 = vld [vmem:[#allocation2 + $0xa1] ss:$2 sm:$0xff]  ;;  %10162 = vst [vmem:[#allocation2 + $0xd8] sm:$0xff] %v12794_v47 }
 0x314   :  { %v10336_v22 = vmax.f32 %v10219_v37, %v10283_v50  ;;  %10160 = vst [vmem:[#allocation2 + $0xc8] sm:$0xff] %v12797_v25  ;;  %v10424_v48 = vmul.f32 %v17253_v43, %v10401_v20 }
 0x316   :  { %v12348_v57 = vpop.f32.mrb[32].mxu1  ;;  %v10363_v46 = vmax.f32 %v10336_v22, %v10337_v42  ;;  %v12664_v0 = vpop.f32.mrb[28].mxu0 }
 0x317   :  { %v5359_v24 = vpop.f32.mrb[33].mxu1  ;;  %v12800_v23 = vadd.f32 %v12664_v0, %v17235_v33  ;;  %v9864_v45 = vpop.f32.mrb[29].mxu0 }
 0x318   :  { %v12349_v60 = vpop.f32.mrb[34].mxu1  ;;  %v10386_v41 = vadd.f32 %v17243_v44, %v10363_v46  ;;  %v12803_v13 = vadd.f32 %v9864_v45, %v17237_v10  ;;  %v12665_v58 = vpop.f32.mrb[30].mxu0 }
 0x319   :  { %v5362_v16 = vpop.f32.mrb[35].mxu1  ;;  %10165 = vst [vmem:[#allocation2 + $0xf0] sm:$0xff] %v12800_v23  ;;  %v12806_v2 = vadd.f32 %v12665_v58, %v17239_v35  ;;  %v9867_v62 = vpop.f32.mrb[31].mxu0 }
 0x31a   :  { %v10402_v21 = vmax.f32 %v10386_v41, 0.0  ;;  %v10225_v31 = vld [vmem:[#allocation2 + $0xd0] ss:$2 sm:$0xff]  ;;  %v10289_v27 = vld [vmem:[#allocation2 + $0xd1] ss:$2 sm:$0xff]  ;;  %10163 = vst [vmem:[#allocation2 + $0xe0] sm:$0xff] %v12803_v13  ;;  %v12809_v29 = vadd.f32 %v9867_v62, %v17241_v38 }
 0x31b   :  { %v10223_v3 = vld [vmem:[#allocation2 + $0xc0] ss:$2 sm:$0xff]  ;;  %v10287_v33 = vld [vmem:[#allocation2 + $0xc1] ss:$2 sm:$0xff]  ;;  %10166 = vst [vmem:[#allocation2 + $0xf8] sm:$0xff] %v12806_v2  ;;  %v10339_v30 = vmax.f32 %v10225_v31, %v10289_v27 }
 0x31c   :  { %v10425_v10 = vmul.f32 %v17253_v43, %v10402_v21  ;;  %v10338_v52 = vmax.f32 %v10223_v3, %v10287_v33  ;;  %10164 = vst [vmem:[#allocation2 + $0xe8] sm:$0xff] %v12809_v29 }
 0x31e   :  { %v12352_v51 = vpop.f32.mrb[36].mxu1  ;;  %v11584_v53 = vpack.c.bf16 %v10425_v10, %v10424_v48  ;;  %v12668_v63 = vpop.f32.mrb[32].mxu0  ;;  %v10364_v38 = vmax.f32 %v10338_v52, %v10339_v30 }
 0x31f   :  { %v5375_v55 = vpop.f32.mrb[37].mxu1  ;;  %v12812_v19 = vadd.f32 %v12668_v63, %v12348_v57  ;;  %v9880_v6 = vpop.f32.mrb[33].mxu0 }
 0x320   :  { %v12353_v35 = vpop.f32.mrb[38].mxu1  ;;  %11612 = vst [vmem:[%s17331_s4 + $0x10] sm:$0xff] %v11584_v53   ;;  %v12815_v54 = vadd.f32 %v9880_v6, %v5359_v24  ;;  %v12669_v32 = vpop.f32.mrb[34].mxu0  ;;  %v10387_v15 = vadd.f32 %v17243_v44, %v10364_v38 }
 0x321   :  { %v5378_v36 = vpop.f32.mrb[39].mxu1  ;;  %10169 = vst [vmem:[#allocation2 + $0x110] sm:$0xff] %v12812_v19  ;;  %v12818_v34 = vadd.f32 %v12669_v32, %v12349_v60  ;;  %v9883_v1 = vpop.f32.mrb[35].mxu0 }
 0x322   :  { %v10229_v59 = vld [vmem:[#allocation2 + $0xf0] ss:$2 sm:$0xff]  ;;  %v10293_v40 = vld [vmem:[#allocation2 + $0xf1] ss:$2 sm:$0xff]  ;;  %10167 = vst [vmem:[#allocation2 + $0x100] sm:$0xff] %v12815_v54  ;;  %v12821_v14 = vadd.f32 %v9883_v1, %v5362_v16  ;;  %v10403_v11 = vmax.f32 %v10387_v15, 0.0 }
 0x323   :  { %v10341_v7 = vmax.f32 %v10229_v59, %v10293_v40  ;;  %v10227_v9 = vld [vmem:[#allocation2 + $0xe0] ss:$2 sm:$0xff]  ;;  %v10291_v49 = vld [vmem:[#allocation2 + $0xe1] ss:$2 sm:$0xff]  ;;  %10170 = vst [vmem:[#allocation2 + $0x118] sm:$0xff] %v12818_v34 }
 0x324   :  { %v10340_v26 = vmax.f32 %v10227_v9, %v10291_v49  ;;  %10168 = vst [vmem:[#allocation2 + $0x108] sm:$0xff] %v12821_v14  ;;  %v10426_v0 = vmul.f32 %v17253_v43, %v10403_v11 }
 0x326   :  { %v12356_v56 = vpop.f32.mrb[40].mxu1  ;;  %v10365_v39 = vmax.f32 %v10340_v26, %v10341_v7  ;;  %v12672_v8 = vpop.f32.mrb[36].mxu0 }
 0x327   :  { %v5391_v12 = vpop.f32.mrb[41].mxu1  ;;  %v12824_v18 = vadd.f32 %v12672_v8, %v12352_v51  ;;  %v9896_v47 = vpop.f32.mrb[37].mxu0 }
 0x328   :  { %v12357_v61 = vpop.f32.mrb[42].mxu1  ;;  %v10388_v17 = vadd.f32 %v17243_v44, %v10365_v39  ;;  %v12827_v4 = vadd.f32 %v9896_v47, %v5375_v55  ;;  %v12673_v25 = vpop.f32.mrb[38].mxu0 }
 0x329   :  { %v5394_v28 = vpop.f32.mrb[43].mxu1  ;;  %10173 = vst [vmem:[#allocation2 + $0x130] sm:$0xff] %v12824_v18  ;;  %v12830_v57 = vadd.f32 %v12673_v25, %v12353_v35  ;;  %v9899_v42 = vpop.f32.mrb[39].mxu0 }
 0x32a   :  { %v10404_v37 = vmax.f32 %v10388_v17, 0.0  ;;  %v10233_v50 = vld [vmem:[#allocation2 + $0x110] ss:$2 sm:$0xff]  ;;  %v10297_v24 = vld [vmem:[#allocation2 + $0x111] ss:$2 sm:$0xff]  ;;  %10171 = vst [vmem:[#allocation2 + $0x120] sm:$0xff] %v12827_v4  ;;  %v12833_v5 = vadd.f32 %v9899_v42, %v5378_v36 }
 0x32b   :  { %v10231_v60 = vld [vmem:[#allocation2 + $0x100] ss:$2 sm:$0xff]  ;;  %v10295_v16 = vld [vmem:[#allocation2 + $0x101] ss:$2 sm:$0xff]  ;;  %10174 = vst [vmem:[#allocation2 + $0x138] sm:$0xff] %v12830_v57  ;;  %v10343_v45 = vmax.f32 %v10233_v50, %v10297_v24 }
 0x32c   :  { %v10427_v23 = vmul.f32 %v17253_v43, %v10404_v37  ;;  %v10342_v20 = vmax.f32 %v10231_v60, %v10295_v16  ;;  %10172 = vst [vmem:[#allocation2 + $0x128] sm:$0xff] %v12833_v5 }
 0x32e   :  { %v12360_v22 = vpop.f32.mrb[44].mxu1  ;;  %v11589_v58 = vpack.c.bf16 %v10427_v23, %v10426_v0  ;;  %v12676_v2 = vpop.f32.mrb[40].mxu0  ;;  %v10366_v31 = vmax.f32 %v10342_v20, %v10343_v45 }
 0x32f   :  { %v5407_v46 = vpop.f32.mrb[45].mxu1  ;;  %v12836_v62 = vadd.f32 %v12676_v2, %v12356_v56  ;;  %v9912_v21 = vpop.f32.mrb[41].mxu0 }
 0x330   :  { %v12361_v41 = vpop.f32.mrb[46].mxu1  ;;  %11613 = vst [vmem:[%s17331_s4 + $0x18] sm:$0xff] %v11589_v58   ;;  %v12839_v27 = vadd.f32 %v9912_v21, %v5391_v12  ;;  %v12677_v29 = vpop.f32.mrb[42].mxu0  ;;  %v10389_v53 = vadd.f32 %v17243_v44, %v10366_v31 }
 0x331   :  { %v5410_v13 = vpop.f32.mrb[47].mxu1  ;;  %10177 = vst [vmem:[#allocation2 + $0x150] sm:$0xff] %v12836_v62  ;;  %v12842_v51 = vadd.f32 %v12677_v29, %v12357_v61  ;;  %v9915_v3 = vpop.f32.mrb[43].mxu0 }
 0x332   :  { %v10237_v33 = vld [vmem:[#allocation2 + $0x130] ss:$2 sm:$0xff]  ;;  %v10301_v55 = vld [vmem:[#allocation2 + $0x131] ss:$2 sm:$0xff]  ;;  %10175 = vst [vmem:[#allocation2 + $0x140] sm:$0xff] %v12839_v27  ;;  %v12845_v48 = vadd.f32 %v9915_v3, %v5394_v28  ;;  %v10405_v1 = vmax.f32 %v10389_v53, 0.0 }
 0x333   :  { %v10345_v30 = vmax.f32 %v10237_v33, %v10301_v55  ;;  %v10235_v52 = vld [vmem:[#allocation2 + $0x120] ss:$2 sm:$0xff]  ;;  %v10299_v35 = vld [vmem:[#allocation2 + $0x121] ss:$2 sm:$0xff]  ;;  %10178 = vst [vmem:[#allocation2 + $0x158] sm:$0xff] %v12842_v51 }
 0x334   :  { %v10344_v63 = vmax.f32 %v10235_v52, %v10299_v35  ;;  %10176 = vst [vmem:[#allocation2 + $0x148] sm:$0xff] %v12845_v48  ;;  %v10428_v28 = vmul.f32 %v17253_v43, %v10405_v1 }
 0x336   :  { %v12364_v10 = vpop.f32.mrb[48].mxu1  ;;  %v10367_v38 = vmax.f32 %v10344_v63, %v10345_v30  ;;  %v12680_v54 = vpop.f32.mrb[44].mxu0 }
 0x337   :  { %v5423_v36 = vpop.f32.mrb[49].mxu1  ;;  %v12848_v32 = vadd.f32 %v12680_v54, %v12360_v22  ;;  %v9928_v34 = vpop.f32.mrb[45].mxu0 }
 0x338   :  { %v12365_v19 = vpop.f32.mrb[50].mxu1  ;;  %v10390_v59 = vadd.f32 %v17243_v44, %v10367_v38  ;;  %v12851_v40 = vadd.f32 %v9928_v34, %v5407_v46  ;;  %v12681_v14 = vpop.f32.mrb[46].mxu0 }
 0x339   :  { %v5426_v6 = vpop.f32.mrb[51].mxu1  ;;  %10181 = vst [vmem:[#allocation2 + $0x170] sm:$0xff] %v12848_v32  ;;  %v12854_v56 = vadd.f32 %v12681_v14, %v12361_v41  ;;  %v9931_v7 = vpop.f32.mrb[47].mxu0 }
 0x33a   :  { %v10406_v9 = vmax.f32 %v10390_v59, 0.0  ;;  %v10241_v49 = vld [vmem:[#allocation2 + $0x150] ss:$2 sm:$0xff]  ;;  %v10305_v12 = vld [vmem:[#allocation2 + $0x151] ss:$2 sm:$0xff]  ;;  %10179 = vst [vmem:[#allocation2 + $0x160] sm:$0xff] %v12851_v40  ;;  %v12857_v15 = vadd.f32 %v9931_v7, %v5410_v13 }
 0x33b   :  { %v10239_v26 = vld [vmem:[#allocation2 + $0x140] ss:$2 sm:$0xff]  ;;  %v10303_v61 = vld [vmem:[#allocation2 + $0x141] ss:$2 sm:$0xff]  ;;  %10182 = vst [vmem:[#allocation2 + $0x178] sm:$0xff] %v12854_v56  ;;  %v10347_v8 = vmax.f32 %v10241_v49, %v10305_v12 }
 0x33c   :  { %v10429_v39 = vmul.f32 %v17253_v43, %v10406_v9  ;;  %v10346_v18 = vmax.f32 %v10239_v26, %v10303_v61  ;;  %10180 = vst [vmem:[#allocation2 + $0x168] sm:$0xff] %v12857_v15 }
 0x33e   :  { %v12368_v47 = vpop.f32.mrb[52].mxu1  ;;  %v11594_v17 = vpack.c.bf16 %v10429_v39, %v10428_v28  ;;  %v12684_v4 = vpop.f32.mrb[48].mxu0  ;;  %v10368_v50 = vmax.f32 %v10346_v18, %v10347_v8 }
 0x33f   :  { %v5439_v11 = vpop.f32.mrb[53].mxu1  ;;  %v12860_v57 = vadd.f32 %v12684_v4, %v12364_v10  ;;  %v9944_v42 = vpop.f32.mrb[49].mxu0 }
 0x340   :  { %v12369_v25 = vpop.f32.mrb[54].mxu1  ;;  %11614 = vst [vmem:[%s17331_s4 + $0x20] sm:$0xff] %v11594_v17   ;;  %v12863_v24 = vadd.f32 %v9944_v42, %v5423_v36  ;;  %v12685_v5 = vpop.f32.mrb[50].mxu0  ;;  %v10391_v41 = vadd.f32 %v17243_v44, %v10368_v50 }
 0x341   :  { %v5442_v37 = vpop.f32.mrb[55].mxu1  ;;  %10185 = vst [vmem:[#allocation2 + $0x190] sm:$0xff] %v12860_v57  ;;  %v12866_v22 = vadd.f32 %v12685_v5, %v12365_v19  ;;  %v9947_v60 = vpop.f32.mrb[51].mxu0 }
 0x342   :  { %v10245_v16 = vld [vmem:[#allocation2 + $0x170] ss:$2 sm:$0xff]  ;;  %v10309_v46 = vld [vmem:[#allocation2 + $0x171] ss:$2 sm:$0xff]  ;;  %10183 = vst [vmem:[#allocation2 + $0x180] sm:$0xff] %v12863_v24  ;;  %v12869_v0 = vadd.f32 %v9947_v60, %v5426_v6  ;;  %v10407_v31 = vmax.f32 %v10391_v41, 0.0 }
 0x343   :  { %v10349_v23 = vmax.f32 %v10245_v16, %v10309_v46  ;;  %v10243_v45 = vld [vmem:[#allocation2 + $0x160] ss:$2 sm:$0xff]  ;;  %v10307_v20 = vld [vmem:[#allocation2 + $0x161] ss:$2 sm:$0xff]  ;;  %10186 = vst [vmem:[#allocation2 + $0x198] sm:$0xff] %v12866_v22 }
 0x344   :  { %v10348_v13 = vmax.f32 %v10243_v45, %v10307_v20  ;;  %10184 = vst [vmem:[#allocation2 + $0x188] sm:$0xff] %v12869_v0  ;;  %v10430_v6 = vmul.f32 %v17253_v43, %v10407_v31 }
 0x346   :  { %v10369_v58 = vmax.f32 %v10348_v13, %v10349_v23  ;;  %v12688_v2 = vpop.f32.mrb[52].mxu0  ;;  %v12372_v3 = vpop.f32.mrb[56].mxu1 }
 0x347   :  { %v12872_v62 = vadd.f32 %v12688_v2, %v12368_v47  ;;  %v9960_v21 = vpop.f32.mrb[53].mxu0  ;;  %v5455_v48 = vpop.f32.mrb[57].mxu1 }
 0x348   :  { %v10392_v27 = vadd.f32 %v17243_v44, %v10369_v58  ;;  %v12875_v29 = vadd.f32 %v9960_v21, %v5439_v11  ;;  %v12689_v51 = vpop.f32.mrb[54].mxu0  ;;  %v12373_v36 = vpop.f32.mrb[58].mxu1 }
 0x349   :  { %10189 = vst [vmem:[#allocation2 + $0x1b0] sm:$0xff] %v12872_v62  ;;  %v12878_v33 = vadd.f32 %v12689_v51, %v12369_v25  ;;  %v9963_v55 = vpop.f32.mrb[55].mxu0  ;;  %v5458_v19 = vpop.f32.mrb[59].mxu1 }
 0x34a   :  { %v10408_v10 = vmax.f32 %v10392_v27, 0.0  ;;  %v10249_v30 = vld [vmem:[#allocation2 + $0x190] ss:$2 sm:$0xff]  ;;  %v10313_v52 = vld [vmem:[#allocation2 + $0x191] ss:$2 sm:$0xff]  ;;  %10187 = vst [vmem:[#allocation2 + $0x1a0] sm:$0xff] %v12875_v29  ;;  %v12881_v35 = vadd.f32 %v9963_v55, %v5442_v37 }
 0x34b   :  { %v10247_v53 = vld [vmem:[#allocation2 + $0x180] ss:$2 sm:$0xff]  ;;  %v10311_v63 = vld [vmem:[#allocation2 + $0x181] ss:$2 sm:$0xff]  ;;  %10190 = vst [vmem:[#allocation2 + $0x1b8] sm:$0xff] %v12878_v33  ;;  %v10351_v54 = vmax.f32 %v10249_v30, %v10313_v52 }
 0x34c   :  { %v10431_v38 = vmul.f32 %v17253_v43, %v10408_v10  ;;  %v10350_v32 = vmax.f32 %v10247_v53, %v10311_v63  ;;  %10188 = vst [vmem:[#allocation2 + $0x1a8] sm:$0xff] %v12881_v35 }
 0x34e   :  { %v11599_v34 = vpack.c.bf16 %v10431_v38, %v10430_v6  ;;  %v12692_v1 = vpop.f32.mrb[56].mxu0  ;;  %v10370_v14 = vmax.f32 %v10350_v32, %v10351_v54 }
 0x34f   :  { %v12884_v59 = vadd.f32 %v12692_v1, %v12372_v3  ;;  %v9976_v40 = vpop.f32.mrb[57].mxu0 }
 0x350   :  { %11615 = vst [vmem:[%s17331_s4 + $0x28] sm:$0xff] %v11599_v34   ;;  %v12887_v56 = vadd.f32 %v9976_v40, %v5455_v48  ;;  %v12693_v7 = vpop.f32.mrb[58].mxu0  ;;  %v10393_v8 = vadd.f32 %v17243_v44, %v10370_v14 }
 0x351   :  { %10193 = vst [vmem:[#allocation2 + $0x1d0] sm:$0xff] %v12884_v59  ;;  %v12890_v9 = vadd.f32 %v12693_v7, %v12373_v36  ;;  %v9979_v49 = vpop.f32.mrb[59].mxu0  ;;  %v12376_v47 = vpop.f32.mrb[60].mxu1 }
 0x352   :  { %v10253_v12 = vld [vmem:[#allocation2 + $0x1b0] ss:$2 sm:$0xff]  ;;  %v10317_v15 = vld [vmem:[#allocation2 + $0x1b1] ss:$2 sm:$0xff]  ;;  %10191 = vst [vmem:[#allocation2 + $0x1c0] sm:$0xff] %v12887_v56  ;;  %v12893_v26 = vadd.f32 %v9979_v49, %v5458_v19  ;;  %v5471_v11 = vpop.f32.mrb[61].mxu1 }
 0x353   :  { %v10353_v61 = vmax.f32 %v10253_v12, %v10317_v15  ;;  %v10251_v28 = vld [vmem:[#allocation2 + $0x1a0] ss:$2 sm:$0xff]  ;;  %v10315_v39 = vld [vmem:[#allocation2 + $0x1a1] ss:$2 sm:$0xff]  ;;  %10194 = vst [vmem:[#allocation2 + $0x1d8] sm:$0xff] %v12890_v9  ;;  %v12377_v25 = vpop.f32.mrb[62].mxu1 }
 0x354   :  { %v10352_v18 = vmax.f32 %v10251_v28, %v10315_v39  ;;  %10192 = vst [vmem:[#allocation2 + $0x1c8] sm:$0xff] %v12893_v26  ;;  %v5474_v37 = vpop.f32.mrb[63].mxu1  ;;  %v10409_v50 = vmax.f32 %v10393_v8, 0.0 }
 0x356   :  { %v10371_v17 = vmax.f32 %v10352_v18, %v10353_v61  ;;  %v12696_v4 = vpop.f32.mrb[60].mxu0  ;;  %v10432_v13 = vmul.f32 %v17253_v43, %v10409_v50 }
 0x357   :  { %v12896_v57 = vadd.f32 %v12696_v4, %v12376_v47  ;;  %v9992_v42 = vpop.f32.mrb[61].mxu0 }
 0x358   :  { %v10394_v24 = vadd.f32 %v17243_v44, %v10371_v17  ;;  %v12899_v5 = vadd.f32 %v9992_v42, %v5471_v11  ;;  %v12697_v22 = vpop.f32.mrb[62].mxu0 }
 0x359   :  { %10197 = vst [vmem:[#allocation2 + $0x1f0] sm:$0xff] %v12896_v57  ;;  %v12902_v60 = vadd.f32 %v12697_v22, %v12377_v25  ;;  %v9995_v16 = vpop.f32.mrb[63].mxu0 }
 0x35a   :  { %v10410_v46 = vmax.f32 %v10394_v24, 0.0  ;;  %v10257_v0 = vld [vmem:[#allocation2 + $0x1d0] ss:$2 sm:$0xff]  ;;  %v10321_v23 = vld [vmem:[#allocation2 + $0x1d1] ss:$2 sm:$0xff]  ;;  %10195 = vst [vmem:[#allocation2 + $0x1e0] sm:$0xff] %v12899_v5  ;;  %v12905_v45 = vadd.f32 %v9995_v16, %v5474_v37 }
 0x35b   :  { %v10255_v20 = vld [vmem:[#allocation2 + $0x1c0] ss:$2 sm:$0xff]  ;;  %v10319_v41 = vld [vmem:[#allocation2 + $0x1c1] ss:$2 sm:$0xff]  ;;  %10198 = vst [vmem:[#allocation2 + $0x1f8] sm:$0xff] %v12902_v60  ;;  %v10355_v2 = vmax.f32 %v10257_v0, %v10321_v23 }
 0x35c   :  { %v10433_v58 = vmul.f32 %v17253_v43, %v10410_v46  ;;  %v10354_v62 = vmax.f32 %v10255_v20, %v10319_v41  ;;  %10196 = vst [vmem:[#allocation2 + $0x1e8] sm:$0xff] %v12905_v45 }
 0x35e   :  { %v11604_v21 = vpack.c.bf16 %v10433_v58, %v10432_v13  ;;  %v10372_v31 = vmax.f32 %v10354_v62, %v10355_v2 }
 0x360   :  { %11616 = vst [vmem:[%s17331_s4 + $0x30] sm:$0xff] %v11604_v21   ;;  %v10395_v55 = vadd.f32 %v17243_v44, %v10372_v31 }
 0x362   :  { %v10261_v27 = vld [vmem:[#allocation2 + $0x1f0] ss:$2 sm:$0xff]  ;;  %v10325_v29 = vld [vmem:[#allocation2 + $0x1f1] ss:$2 sm:$0xff]  ;;  %v10411_v30 = vmax.f32 %v10395_v55, 0.0 }
 0x363   :  { %v10357_v51 = vmax.f32 %v10261_v27, %v10325_v29  ;;  %v10259_v3 = vld [vmem:[#allocation2 + $0x1e0] ss:$2 sm:$0xff]  ;;  %v10323_v33 = vld [vmem:[#allocation2 + $0x1e1] ss:$2 sm:$0xff] }
 0x364   :  { %v10356_v48 = vmax.f32 %v10259_v3, %v10323_v33  ;;  %v10434_v36 = vmul.f32 %v17253_v43, %v10411_v30 }
 0x366   :  { %v10373_v10 = vmax.f32 %v10356_v48, %v10357_v51 }
 0x368   :  { %v10396_v52 = vadd.f32 %v17243_v44, %v10373_v10 }
 0x36a   :  { %v10412_v35 = vmax.f32 %v10396_v52, 0.0 }
 0x36c   :  { %v10435_v53 = vmul.f32 %v17253_v43, %v10412_v35 }
 0x36e   :  { %v11609_v63 = vpack.c.bf16 %v10435_v53, %v10434_v36 }
 0x370   :  { %11617 = vst [vmem:[%s17331_s4 + $0x38] sm:$0xff] %v11609_v63  }
 0x371   :  { %10472 = vsyncpa [#allocation4], 1 }

</bundles_post_ra>
